<compile_context>
chip_gen: v5e
topology: v5e:2x2
jax: 0.10.0
libtpu: 0.0.40
codegen_flags: <defaults>
</compile_context>

<pallas_src>
import jax
import jax.numpy as jnp
from jax.experimental import pallas as pl
from jax.experimental.pallas import tpu as pltpu

D_IN = 1600
D_HID = 1024
BN_EPS = 1e-5


def _round_up(x, m):
    return ((x + m - 1) // m) * m


def _vmem_limit_bytes():
    """Generation-aware scoped-VMEM limit (working set is ~20 MiB at tm=256)."""
    try:
        cap = int(pltpu.get_tpu_info().vmem_capacity_bytes)
    except Exception:
        cap = 64 << 20  # conservative: v7x per-TensorCore VMEM
    return int(min(40 << 20, cap // 2))


def hallucinator_kernel(x_ref, w1_ref, t1_ref, w2_ref, t2_ref, o_ref, h_ref):
    j = pl.program_id(1)

    # Layer 1 only on the first W2-column step of each batch tile; the bf16
    # activation tile is persisted in VMEM scratch and reused for every j.
    @pl.when(j == 0)
    def _():
        h = jnp.dot(x_ref[...].astype(jnp.bfloat16), w1_ref[...],
                    preferred_element_type=jnp.float32)
        h = jnp.maximum(h + t1_ref[...], 0.0)   # + (bias + BN shift), ReLU
        # Dropout2d: identity in eval mode.
        h_ref[...] = h.astype(jnp.bfloat16)

    # Layer 2 on the current output-column tile of W2 (BN scale pre-folded).
    y = jnp.dot(h_ref[...], w2_ref[...], preferred_element_type=jnp.float32)
    o_ref[...] = jnp.maximum(y + t2_ref[...], 0.0).astype(o_ref.dtype)


def hallucinator_forward(x, params, *, out_dtype=jnp.float32):
    """x: (B, 1600) float32 -> (B, 1600) out_dtype."""
    w1, t1, w2, t2 = params
    B = x.shape[0]
    assert x.shape[1] == D_IN

    # Batch tile: 256 rows fills the 256-wide MXU (v6e/v7x); clamp to a
    # multiple of 16 (bf16 sublane packing) for small B.  Pallas masks the
    # partial last batch block; no wrapper-side padding.
    tm = 256 if B >= 256 else 128
    tm = min(tm, _round_up(B, 16))
    grid_m = pl.cdiv(B, tm)

    # Output-column tile for the second matmul.  Single batch tile => the
    # kernel is weight-DMA bound, so split W2 into 256-wide column tiles to
    # pipeline its fetch behind compute; otherwise keep the full 1600 (no
    # masked-MXU waste, fewer grid steps).
    tn = 256 if grid_m == 1 else D_IN
    grid_n = pl.cdiv(D_IN, tn)

    itemsize = jnp.dtype(out_dtype).itemsize
    cost = pl.CostEstimate(
        flops=4 * B * D_IN * D_HID,        # two matmuls, 2 flops per MAC
        transcendentals=0,
        bytes_accessed=(B * D_IN * 4               # x (f32)
                        + B * D_IN * itemsize      # out
                        + w1.size * 2 + w2.size * 2
                        + (t1.size + t2.size) * 4),
    )

    out = pl.pallas_call(
        hallucinator_kernel,
        out_shape=jax.ShapeDtypeStruct((B, D_IN), out_dtype),
        grid_spec=pltpu.PrefetchScalarGridSpec(
            num_scalar_prefetch=0,
            grid=(grid_m, grid_n),
            in_specs=[
                pl.BlockSpec((tm, D_IN), lambda i, j: (i, 0)),    # x tile (f32)
                pl.BlockSpec((D_IN, D_HID), lambda i, j: (0, 0)), # W1 (bf16, full)
                pl.BlockSpec((1, D_HID), lambda i, j: (0, 0)),    # shift1 (f32)
                pl.BlockSpec((D_HID, tn), lambda i, j: (0, j)),   # W2 column tile (bf16)
                pl.BlockSpec((1, tn), lambda i, j: (0, j)),       # shift2 tile (f32)
            ],
            out_specs=pl.BlockSpec((tm, tn), lambda i, j: (i, j)),
            scratch_shapes=[pltpu.VMEM((tm, D_HID), jnp.bfloat16)],  # layer-1 activations
        ),
        compiler_params=pltpu.CompilerParams(
            dimension_semantics=("parallel", "arbitrary"),
            vmem_limit_bytes=_vmem_limit_bytes(),
        ),
        cost_estimate=cost,
    )(x, w1, t1, w2, t2)

    return out


def make_params(key):
    """Synthetic parameters matching the PyTorch module's init, BN-folded."""
    k = jax.random.split(key, 6)

    # Linear(1600, 1024): torch weight (1024, 1600) -> stored as (1600, 1024).
    lim1 = 1.0 / jnp.sqrt(jnp.float32(D_IN))
    w1 = jax.random.uniform(k[0], (D_IN, D_HID), jnp.float32, -lim1, lim1)
    b1 = jax.random.uniform(k[1], (D_HID,), jnp.float32, -lim1, lim1)
    # BatchNorm1d(1024): weight ~ U[0,1), bias=0, running_mean=0, running_var=1.
    g1 = jax.random.uniform(k[2], (D_HID,), jnp.float32)
    scale1 = g1 / jnp.sqrt(1.0 + BN_EPS)
    shift1 = b1 * scale1

    # Linear(1024, 1600)
    lim2 = 1.0 / jnp.sqrt(jnp.float32(D_HID))
    w2 = jax.random.uniform(k[3], (D_HID, D_IN), jnp.float32, -lim2, lim2)
    b2 = jax.random.uniform(k[4], (D_IN,), jnp.float32, -lim2, lim2)
    # BatchNorm1d(1600)
    g2 = jax.random.uniform(k[5], (D_IN,), jnp.float32)
    scale2 = g2 / jnp.sqrt(1.0 + BN_EPS)
    shift2 = b2 * scale2

    # Fold BN(eval) scale into the weights:  y = (x @ (W*scale)) + shift.
    # (For trained checkpoints: scale = gamma/sqrt(var+eps),
    #  shift = beta + (bias - running_mean)*scale.)
    w1f = (w1 * scale1[None, :]).astype(jnp.bfloat16)
    w2f = (w2 * scale2[None, :]).astype(jnp.bfloat16)

    return (w1f, shift1.reshape(1, D_HID), w2f, shift2.reshape(1, D_IN))


def reference_forward(x, params):
    """Plain-JAX reference using the same folded bf16 parameters."""
    w1, t1, w2, t2 = params
    h = jnp.dot(x.astype(jnp.bfloat16), w1, preferred_element_type=jnp.float32) + t1
    h = jnp.maximum(h, 0.0)
    y = jnp.dot(h.astype(jnp.bfloat16), w2, preferred_element_type=jnp.float32) + t2
    return jnp.maximum(y, 0.0)


if __name__ == "__main__":
    key = jax.random.PRNGKey(0)
    kx, kp = jax.random.split(key)

    B = 8  # small batch; feature dims (1600 -> 1024 -> 1600) are fixed by the module
    x = jax.random.normal(kx, (B, D_IN), jnp.float32)
    params = make_params(kp)

    out = hallucinator_forward(x, params)
    out = jax.block_until_ready(out)

    ref = reference_forward(x, params)
    assert out.shape == (B, D_IN)
    assert jnp.allclose(out, ref, atol=2e-3, rtol=2e-3), "mismatch vs JAX reference"

    print("KERNEL_OK")
</pallas_src>

<mosaic_0001>
module attributes {stable_mosaic.version = 11 : i64} {
  func.func @hallucinator_kernel(%arg0: i32, %arg1: i32, %arg2: memref<16x1600xf32, #tpu.memory_space<vmem>>, %arg3: memref<1600x1024xbf16, #tpu.memory_space<vmem>>, %arg4: memref<1x1024xf32, #tpu.memory_space<vmem>>, %arg5: memref<1024x256xbf16, #tpu.memory_space<vmem>>, %arg6: memref<1x256xf32, #tpu.memory_space<vmem>>, %arg7: memref<16x256xf32, #tpu.memory_space<vmem>>, %arg8: memref<16x1024xbf16, #tpu.memory_space<vmem>>) attributes {dimension_semantics = [#tpu.dimension_semantics<parallel>, #tpu.dimension_semantics<arbitrary>], iteration_bounds = array<i64: 1, 7>, scalar_prefetch = 0 : i64, scratch_operands = 1 : i64, tpu.core_type = #tpu.core_type<tc>, window_params = [{transform_indices = @transform_0, window_bounds = array<i64: 16, 1600>}, {pipeline_mode = #tpu.pipeline_mode<synchronous>, transform_indices = @transform_1, window_bounds = array<i64: 1600, 1024>}, {pipeline_mode = #tpu.pipeline_mode<synchronous>, transform_indices = @transform_2, window_bounds = array<i64: 1, 1024>}, {transform_indices = @transform_3, window_bounds = array<i64: 1024, 256>}, {transform_indices = @transform_4, window_bounds = array<i64: 1, 256>}, {transform_indices = @transform_5, window_bounds = array<i64: 16, 256>}]} {
    %c0_i32 = arith.constant 0 : i32
    %0 = arith.cmpi eq, %arg1, %c0_i32 : i32
    %1 = arith.extui %0 : i1 to i32
    %c0_i32_0 = arith.constant 0 : i32
    %2 = arith.cmpi ne, %1, %c0_i32_0 : i32
    scf.if %2 {
      %c0_9 = arith.constant 0 : index
      %c0_10 = arith.constant 0 : index
      %12 = vector.load %arg2[%c0_9, %c0_10] : memref<16x1600xf32, #tpu.memory_space<vmem>>, vector<16x1600xf32>
      %13 = arith.truncf %12 : vector<16x1600xf32> to vector<16x1600xbf16>
      %c0_11 = arith.constant 0 : index
      %c0_12 = arith.constant 0 : index
      %14 = vector.load %arg3[%c0_11, %c0_12] : memref<1600x1024xbf16, #tpu.memory_space<vmem>>, vector<1600x1024xbf16>
      %cst_13 = arith.constant dense<0.000000e+00> : vector<16x1024xf32>
      %15 = tpu.matmul %13, %14, %cst_13 {dimension_numbers = #tpu.dot_dimension_numbers<[1], [0], [0], [1], [0, 0, 1, 1], [], []>} : vector<16x1600xbf16>, vector<1600x1024xbf16>, vector<16x1024xf32> -> vector<16x1024xf32>
      %c0_14 = arith.constant 0 : index
      %c0_15 = arith.constant 0 : index
      %16 = vector.load %arg4[%c0_14, %c0_15] : memref<1x1024xf32, #tpu.memory_space<vmem>>, vector<1x1024xf32>
      %17 = vector.broadcast %16 : vector<1x1024xf32> to vector<16x1024xf32>
      %18 = arith.addf %15, %17 : vector<16x1024xf32>
      %cst_16 = arith.constant 0.000000e+00 : f32
      %19 = vector.broadcast %cst_16 : f32 to vector<16x1024xf32>
      %20 = arith.maximumf %18, %19 : vector<16x1024xf32>
      %21 = arith.truncf %20 : vector<16x1024xf32> to vector<16x1024xbf16>
      %c0_17 = arith.constant 0 : index
      %c0_18 = arith.constant 0 : index
      %22 = vector.load %arg8[%c0_17, %c0_18] : memref<16x1024xbf16, #tpu.memory_space<vmem>>, vector<16x1024xbf16>
      tpu.vector_store %arg8[%c0_17, %c0_18], %21 {strides = array<i32>} : memref<16x1024xbf16, #tpu.memory_space<vmem>>, vector<16x1024xbf16>,
    } else {
    }
    %c0 = arith.constant 0 : index
    %c0_1 = arith.constant 0 : index
    %3 = vector.load %arg8[%c0, %c0_1] : memref<16x1024xbf16, #tpu.memory_space<vmem>>, vector<16x1024xbf16>
    %c0_2 = arith.constant 0 : index
    %c0_3 = arith.constant 0 : index
    %4 = vector.load %arg5[%c0_2, %c0_3] : memref<1024x256xbf16, #tpu.memory_space<vmem>>, vector<1024x256xbf16>
    %cst = arith.constant dense<0.000000e+00> : vector<16x256xf32>
    %5 = tpu.matmul %3, %4, %cst {dimension_numbers = #tpu.dot_dimension_numbers<[1], [0], [0], [1], [0, 0, 1, 1], [], []>} : vector<16x1024xbf16>, vector<1024x256xbf16>, vector<16x256xf32> -> vector<16x256xf32>
    %c0_4 = arith.constant 0 : index
    %c0_5 = arith.constant 0 : index
    %6 = vector.load %arg6[%c0_4, %c0_5] : memref<1x256xf32, #tpu.memory_space<vmem>>, vector<1x256xf32>
    %7 = vector.broadcast %6 : vector<1x256xf32> to vector<16x256xf32>
    %8 = arith.addf %5, %7 : vector<16x256xf32>
    %cst_6 = arith.constant 0.000000e+00 : f32
    %9 = vector.broadcast %cst_6 : f32 to vector<16x256xf32>
    %10 = arith.maximumf %8, %9 : vector<16x256xf32>
    %c0_7 = arith.constant 0 : index
    %c0_8 = arith.constant 0 : index
    %11 = vector.load %arg7[%c0_7, %c0_8] : memref<16x256xf32, #tpu.memory_space<vmem>>, vector<16x256xf32>
    tpu.vector_store %arg7[%c0_7, %c0_8], %10 {strides = array<i32>} : memref<16x256xf32, #tpu.memory_space<vmem>>, vector<16x256xf32>,
    return
  }
  func.func @transform_0(%arg0: i32, %arg1: i32) -> (i32, i32) {
    %c0_i32 = arith.constant 0 : i32
    %c0_i32_0 = arith.constant 0 : i32
    return %arg0, %c0_i32 : i32, i32
  }
  func.func @transform_1(%arg0: i32, %arg1: i32) -> (i32, i32) {
    %c0_i32 = arith.constant 0 : i32
    %c0_i32_0 = arith.constant 0 : i32
    %c0_i32_1 = arith.constant 0 : i32
    return %c0_i32, %c0_i32_0 : i32, i32
  }
  func.func @transform_2(%arg0: i32, %arg1: i32) -> (i32, i32) {
    %c0_i32 = arith.constant 0 : i32
    %c0_i32_0 = arith.constant 0 : i32
    %c0_i32_1 = arith.constant 0 : i32
    return %c0_i32, %c0_i32_0 : i32, i32
  }
  func.func @transform_3(%arg0: i32, %arg1: i32) -> (i32, i32) {
    %c0_i32 = arith.constant 0 : i32
    %c0_i32_0 = arith.constant 0 : i32
    return %c0_i32, %arg1 : i32, i32
  }
  func.func @transform_4(%arg0: i32, %arg1: i32) -> (i32, i32) {
    %c0_i32 = arith.constant 0 : i32
    %c0_i32_0 = arith.constant 0 : i32
    return %c0_i32, %arg1 : i32, i32
  }
  func.func @transform_5(%arg0: i32, %arg1: i32) -> (i32, i32) {
    %c0_i32 = arith.constant 0 : i32
    return %arg0, %arg1 : i32, i32
  }
}

</mosaic_0001>

<bundles_post_ra>
// kernel: tpu_custom_call.1
= control target key start
LH: loop header
LB: loop body
LE: loop exit
PB: predicated region body
PF: predicated region fallthrough
CT: control target
= control target key end

     0   :  { %s21516_s0 = inlined_call_operand.vmem [shape: f32[8,1600], index: 0, kind: input, shape index: {}]   ;;  %s21517_s1 = inlined_call_operand.vmem [shape: bf16[1600,1024], index: 1, kind: input, shape index: {}]   ;;  %s21518_s2 = inlined_call_operand.vmem [shape: f32[1,1024], index: 2, kind: input, shape index: {}]   ;;  %s21519_s3 = inlined_call_operand.vmem [shape: bf16[1024,1600], index: 3, kind: input, shape index: {}]   ;;  %s21520_s4 = inlined_call_operand.vmem [shape: f32[1,1600], index: 4, kind: input, shape index: {}]   ;;  %s21521_s5 = inlined_call_operand.hbm [shape: f32[8,1600], index: 5, kind: output, shape index: {}]  }
   0x1   :  { %21531 = sst [smem:[#allocation11_spill]] %s21519_s3 }
   0x2   :  { %10 = vsyncpa [#allocation5], 0 }
   0x3   :  { %12 = vsyncpa [#allocation5 + $0x1], 0  ;;  %s14059_s18 = smov 0   ;;  %s14061_s19 = smov 0  }
   0x4   :  { %s14063_s20 = smov 0   ;;  %s14065_s21 = smov 0  }
   0x5   :  { %s14067_s22 = smov 0   ;;  %s14069_s23 = smov 0  }
   0x6 LB: > { %s9017_s24 = sadd.s32 4294967295, %s13990_s23   ;;  %s9018_s25 = sadd.s32 4294967294, %s13990_s23   ;;  %s13990_s23 = sphi %s14069_s23, %s18_s23   ;;  %s13986_s22 = sphi %s14067_s22, %s21560_s22   ;;  %s13982_s21 = sphi %s14065_s21, %s21559_s21   ;;  %s13978_s20 = sphi %s14063_s20, %s21558_s20   ;;  %s13974_s19 = sphi %s14061_s19, %s21557_s19   ;;  %s13970_s18 = sphi %s14059_s18, %s21556_s18  }
   0x7   : > { %s27_s26 = sadd.s32 1, %s13986_s22  ;;  %s105_s27 = sadd.s32 1, %s13978_s20 }
   0x8   : > { %p28_p0 = scmp.ge.s32.totalorder %s27_s26, 7  ;;  %p112_p1 = scmp.ne.s32.totalorder %s13978_s20, %s13974_s19 }
   0x9   : > { %p113_p2 = scmp.eq.s32.totalorder %s13990_s23, 0  ;;  %p170_p3 = scmp.eq.s32.totalorder %s9017_s24, 6 }
   0xa   : > { %s21562_s26 = smov (%p28_p0, %s27_s26), 0  ;;  %p175_p6 = scmp.ne.s32.totalorder %s13974_s19, %s13970_s18 }
   0xb   : > { %21532 = sst [smem:[#allocation7_spill]] %s21562_s26  ;;  %p114_p4 = por %p113_p2, %p112_p1 }
   0xc   : > { %p14098_p5 = por %p170_p3, %p112_p1  ;;  %s102_s29 = ssub.s32 %s13986_s22, %s21562_s26 }
   0xd   : > { %p103_p7 = scmp.eq.s32.totalorder %s102_s29, 0  ;;  %p176_p8 = scmp.eq.s32.totalorder %s9018_s25, 6 }
   0xe   : > { %p9021_p10 = scmp.ge.s32.totalorder %s13990_s23, 7 }
   0xf   : > { %s14107_s30 = scalar_select %p103_p7, %s13978_s20, %s105_s27  }
  0x10   : > { %p14109_p9 = por %p176_p8, %p175_p6  ;;  %214 = sbr.rel (%p9021_p10) target bundleno = 586 (0x24a), region = 28 }
  0x15   : > { %217 = sbr.rel (!%p114_p4) target bundleno = 586 (0x24a), region = 32  ;;  %s219_s7 = sand.u32 (%p114_p4), 1, %s13978_s20  }
  0x16   : > { %s9023_s8 = sshll.u32 (%p114_p4), %s13986_s22, 1  ;;  %s9022_s9 = sshll.u32 (%p114_p4), %s219_s7, 10 }
  0x17   : > { %s223_s10 = ssub.s32 (%p114_p4), 13, %s9023_s8  ;;  %s12805_s11 = sshll.u32 (%p114_p4), %s13986_s22, 3 }
  0x18   : > { %p224_p11 = scmp.lt.s32.totalorder (%p114_p4), %s223_s10, 2  ;;  %s21535_s3 = sld [smem:[#allocation11_spill]] (%p114_p4) }
  0x19   : > { %s14124_s17 = scalar_lea.vmem (%p114_p4), [#allocation3], %s9022_s9  }
  0x1a   : > { %s21564_s10 = smov (!%p224_p11, %s223_s10), 2 }
  0x1b   : > { %s9024_s15 = sshll.u32 %s21564_s10, 9  ;;  %s14122_s16 = sshll.u32 %s21564_s10, 2 }
  0x1c   : > { %p9028_p12 = scmp.eq.s32.totalorder %s9024_s15, 0 }
  0x1d   : > { %p234_p13 = scmp.lt.u32.totalorder (!%p9028_p12), %s14122_s16, 8 }
  0x1e   : > { %s14120_s14 = scalar_lea.vmem %s21535_s3, %s12805_s11   ;;  %233 = sbr.rel (%p9028_p12) target bundleno = 586 (0x24a), region = 36 }
  0x23   : > { %237 = sbr.rel (%p234_p13) target bundleno = 450 (0x1c2), region = 40  ;;  %s14128_s24 = sand.u32 (!%p234_p13), 7, %s14122_s16  }
  0x24   : > { %p508_p0 = scmp.eq.s32.totalorder (!%p234_p13), %s14128_s24, 0  ;;  %p9029_p1 = scmp.ne.s32.totalorder (!%p234_p13), %s14128_s24, 0 }
  0x28   : > { %511 = sbr.rel (%p9029_p1) target bundleno = 179 (0xb3), region = 55  ;;  %s14133_s25 = sshrl.u32 (!%p9029_p1), %s14122_s16, 3 }
  0x29   : > { %p9030_p2 = scmp.le.s32.totalorder (!%p9029_p1), %s14133_s25, 0 }
  0x2d   : > { %8950 = sbr.rel (%p9030_p2) target bundleno = 179 (0xb3), region = 146  ;;  %s21536_s27 = smov (!%p9030_p2), %s14124_s17 }
  0x2e   : > { %s21537_s29 = smov (!%p9030_p2), %s14120_s14  ;;  %s14142_s7 = smov (!%p9030_p2), 0  }
  0x2f   : > { %s14144_s8 = smov (!%p9030_p2), 0  }
  0x32 LB: >> { %v522_v0 = vld [vmem:[%s13998_s29] sm:$0xff]  ;;  %v524_v1 = vld [vmem:[%s13998_s29 + $0x34] sm:$0xff]  ;;  %v526_v2 = vld [vmem:[%s13998_s29 + $0x68] sm:$0xff]  ;;  %s778_s9 = sadd.s32 1, %s14002_s7  ;;  %s516_s8 = sadd.s32 1, %s14006_s8   ;;  %s14006_s8 = sphi %s14144_s8, %s516_s8   ;;  %s14002_s7 = sphi %s14142_s7, %s21540_s7   ;;  %s13998_s29 = sphi %s21537_s29, %s21539_s29   ;;  %s13994_s27 = sphi %s21536_s27, %s21538_s27  }
  0x33   : >> { %523 = vst [vmem:[%s13994_s27] sm:$0xff] %v522_v0  ;;  %v528_v3 = vld [vmem:[%s13998_s29 + $0x9c] sm:$0xff]  ;;  %p779_p3 = scmp.ge.s32.totalorder %s778_s9, %s14133_s25  ;;  %v530_v4 = vld [vmem:[%s13998_s29 + $0xd0] sm:$0xff]  ;;  %v532_v5 = vld [vmem:[%s13998_s29 + $0x104] sm:$0xff]  ;;  %p515_p4 = scmp.ge.s32.totalorder %s516_s8, %s14133_s25 }
  0x34   : >> { %525 = vst [vmem:[%s13994_s27 + $0x8] sm:$0xff] %v524_v1  ;;  %v534_v6 = vld [vmem:[%s13998_s29 + $0x138] sm:$0xff]  ;;  %v536_v7 = vld [vmem:[%s13998_s29 + $0x16c] sm:$0xff]  ;;  %v538_v8 = vld [vmem:[%s13998_s29 + $0x1a0] sm:$0xff] }
  0x35   : >> { %527 = vst [vmem:[%s13994_s27 + $0x10] sm:$0xff] %v526_v2  ;;  %s21566_s9 = smov (%p779_p3, %s778_s9), 0  ;;  %v540_v9 = vld [vmem:[%s13998_s29 + $0x1d4] sm:$0xff]  ;;  %v542_v10 = vld [vmem:[%s13998_s29 + $0x208] sm:$0xff]  ;;  %v544_v11 = vld [vmem:[%s13998_s29 + $0x23c] sm:$0xff] }
  0x36   : >> { %529 = vst [vmem:[%s13994_s27 + $0x18] sm:$0xff] %v528_v3  ;;  %s9031_s10 = sshll.u32 %s21566_s9, 3  ;;  %v546_v12 = vld [vmem:[%s13998_s29 + $0x270] sm:$0xff]  ;;  %v548_v13 = vld [vmem:[%s13998_s29 + $0x2a4] sm:$0xff]  ;;  %v550_v14 = vld [vmem:[%s13998_s29 + $0x2d8] sm:$0xff]  ;;  %s21540_s7 = smov %s21566_s9 }
  0x37   : >> { %531 = vst [vmem:[%s13994_s27 + $0x20] sm:$0xff] %v530_v4  ;;  %s14176_s11 = scalar_lea.vmem %s14120_s14, %s9031_s10   ;;  %s14179_s12 = scalar_lea.vmem %s14124_s17, %s9031_s10 [#allocation3]   ;;  %v552_v15 = vld [vmem:[%s13998_s29 + $0x30c] sm:$0xff]  ;;  %v554_v16 = vld [vmem:[%s13998_s29 + $0x340] sm:$0xff]  ;;  %v556_v17 = vld [vmem:[%s13998_s29 + $0x374] sm:$0xff] }
  0x38   : >> { %533 = vst [vmem:[%s13994_s27 + $0x28] sm:$0xff] %v532_v5  ;;  %v558_v18 = vld [vmem:[%s13998_s29 + $0x3a8] sm:$0xff]  ;;  %v560_v19 = vld [vmem:[%s13998_s29 + $0x3dc] sm:$0xff]  ;;  %v562_v20 = vld [vmem:[%s13998_s29 + $0x410] sm:$0xff] }
  0x39   : >> { %535 = vst [vmem:[%s13994_s27 + $0x30] sm:$0xff] %v534_v6  ;;  %v564_v21 = vld [vmem:[%s13998_s29 + $0x444] sm:$0xff]  ;;  %v566_v22 = vld [vmem:[%s13998_s29 + $0x478] sm:$0xff]  ;;  %v568_v23 = vld [vmem:[%s13998_s29 + $0x4ac] sm:$0xff] }
  0x3a   : >> { %537 = vst [vmem:[%s13994_s27 + $0x38] sm:$0xff] %v536_v7  ;;  %v570_v24 = vld [vmem:[%s13998_s29 + $0x4e0] sm:$0xff]  ;;  %v572_v25 = vld [vmem:[%s13998_s29 + $0x514] sm:$0xff]  ;;  %v574_v26 = vld [vmem:[%s13998_s29 + $0x548] sm:$0xff] }
  0x3b   : >> { %539 = vst [vmem:[%s13994_s27 + $0x40] sm:$0xff] %v538_v8  ;;  %v576_v27 = vld [vmem:[%s13998_s29 + $0x57c] sm:$0xff]  ;;  %v578_v28 = vld [vmem:[%s13998_s29 + $0x5b0] sm:$0xff]  ;;  %v580_v29 = vld [vmem:[%s13998_s29 + $0x5e4] sm:$0xff] }
  0x3c   : >> { %541 = vst [vmem:[%s13994_s27 + $0x48] sm:$0xff] %v540_v9  ;;  %v582_v30 = vld [vmem:[%s13998_s29 + $0x618] sm:$0xff]  ;;  %v584_v31 = vld [vmem:[%s13998_s29 + $0x64c] sm:$0xff]  ;;  %v586_v32 = vld [vmem:[%s13998_s29 + $0x680] sm:$0xff] }
  0x3d   : >> { %543 = vst [vmem:[%s13994_s27 + $0x50] sm:$0xff] %v542_v10  ;;  %v588_v33 = vld [vmem:[%s13998_s29 + $0x6b4] sm:$0xff]  ;;  %v590_v34 = vld [vmem:[%s13998_s29 + $0x6e8] sm:$0xff]  ;;  %v592_v35 = vld [vmem:[%s13998_s29 + $0x71c] sm:$0xff] }
  0x3e   : >> { %545 = vst [vmem:[%s13994_s27 + $0x58] sm:$0xff] %v544_v11  ;;  %v594_v36 = vld [vmem:[%s13998_s29 + $0x750] sm:$0xff]  ;;  %v596_v37 = vld [vmem:[%s13998_s29 + $0x784] sm:$0xff]  ;;  %v598_v38 = vld [vmem:[%s13998_s29 + $0x7b8] sm:$0xff] }
  0x3f   : >> { %547 = vst [vmem:[%s13994_s27 + $0x60] sm:$0xff] %v546_v12  ;;  %v600_v39 = vld [vmem:[%s13998_s29 + $0x7ec] sm:$0xff]  ;;  %v602_v40 = vld [vmem:[%s13998_s29 + $0x820] sm:$0xff]  ;;  %v604_v41 = vld [vmem:[%s13998_s29 + $0x854] sm:$0xff] }
  0x40   : >> { %549 = vst [vmem:[%s13994_s27 + $0x68] sm:$0xff] %v548_v13  ;;  %v606_v42 = vld [vmem:[%s13998_s29 + $0x888] sm:$0xff]  ;;  %v608_v43 = vld [vmem:[%s13998_s29 + $0x8bc] sm:$0xff]  ;;  %v610_v44 = vld [vmem:[%s13998_s29 + $0x8f0] sm:$0xff] }
  0x41   : >> { %551 = vst [vmem:[%s13994_s27 + $0x70] sm:$0xff] %v550_v14  ;;  %v612_v45 = vld [vmem:[%s13998_s29 + $0x924] sm:$0xff]  ;;  %v614_v46 = vld [vmem:[%s13998_s29 + $0x958] sm:$0xff]  ;;  %v616_v47 = vld [vmem:[%s13998_s29 + $0x98c] sm:$0xff] }
  0x42   : >> { %553 = vst [vmem:[%s13994_s27 + $0x78] sm:$0xff] %v552_v15  ;;  %v618_v48 = vld [vmem:[%s13998_s29 + $0x9c0] sm:$0xff]  ;;  %v620_v49 = vld [vmem:[%s13998_s29 + $0x9f4] sm:$0xff]  ;;  %v622_v50 = vld [vmem:[%s13998_s29 + $0xa28] sm:$0xff] }
  0x43   : >> { %555 = vst [vmem:[%s13994_s27 + $0x80] sm:$0xff] %v554_v16  ;;  %v624_v51 = vld [vmem:[%s13998_s29 + $0xa5c] sm:$0xff]  ;;  %v626_v52 = vld [vmem:[%s13998_s29 + $0xa90] sm:$0xff]  ;;  %v628_v53 = vld [vmem:[%s13998_s29 + $0xac4] sm:$0xff] }
  0x44   : >> { %557 = vst [vmem:[%s13994_s27 + $0x88] sm:$0xff] %v556_v17  ;;  %v630_v54 = vld [vmem:[%s13998_s29 + $0xaf8] sm:$0xff]  ;;  %v632_v55 = vld [vmem:[%s13998_s29 + $0xb2c] sm:$0xff]  ;;  %v634_v56 = vld [vmem:[%s13998_s29 + $0xb60] sm:$0xff] }
  0x45   : >> { %559 = vst [vmem:[%s13994_s27 + $0x90] sm:$0xff] %v558_v18  ;;  %v636_v57 = vld [vmem:[%s13998_s29 + $0xb94] sm:$0xff]  ;;  %v638_v58 = vld [vmem:[%s13998_s29 + $0xbc8] sm:$0xff]  ;;  %v640_v59 = vld [vmem:[%s13998_s29 + $0xbfc] sm:$0xff] }
  0x46   : >> { %561 = vst [vmem:[%s13994_s27 + $0x98] sm:$0xff] %v560_v19  ;;  %v642_v60 = vld [vmem:[%s13998_s29 + $0xc30] sm:$0xff]  ;;  %v644_v61 = vld [vmem:[%s13998_s29 + $0xc64] sm:$0xff]  ;;  %v646_v62 = vld [vmem:[%s13998_s29 + $0xc98] sm:$0xff] }
  0x47   : >> { %563 = vst [vmem:[%s13994_s27 + $0xa0] sm:$0xff] %v562_v20  ;;  %v648_v63 = vld [vmem:[%s13998_s29 + $0xccc] sm:$0xff]  ;;  %v650_v0 = vld [vmem:[%s13998_s29 + $0xd00] sm:$0xff]  ;;  %v652_v1 = vld [vmem:[%s13998_s29 + $0xd34] sm:$0xff] }
  0x48   : >> { %565 = vst [vmem:[%s13994_s27 + $0xa8] sm:$0xff] %v564_v21  ;;  %v654_v2 = vld [vmem:[%s13998_s29 + $0xd68] sm:$0xff]  ;;  %v656_v3 = vld [vmem:[%s13998_s29 + $0xd9c] sm:$0xff]  ;;  %v658_v4 = vld [vmem:[%s13998_s29 + $0xdd0] sm:$0xff] }
  0x49   : >> { %567 = vst [vmem:[%s13994_s27 + $0xb0] sm:$0xff] %v566_v22  ;;  %v660_v5 = vld [vmem:[%s13998_s29 + $0xe04] sm:$0xff]  ;;  %v662_v6 = vld [vmem:[%s13998_s29 + $0xe38] sm:$0xff]  ;;  %v664_v7 = vld [vmem:[%s13998_s29 + $0xe6c] sm:$0xff] }
  0x4a   : >> { %569 = vst [vmem:[%s13994_s27 + $0xb8] sm:$0xff] %v568_v23  ;;  %v666_v8 = vld [vmem:[%s13998_s29 + $0xea0] sm:$0xff]  ;;  %v668_v9 = vld [vmem:[%s13998_s29 + $0xed4] sm:$0xff]  ;;  %v670_v10 = vld [vmem:[%s13998_s29 + $0xf08] sm:$0xff] }
  0x4b   : >> { %571 = vst [vmem:[%s13994_s27 + $0xc0] sm:$0xff] %v570_v24  ;;  %v672_v11 = vld [vmem:[%s13998_s29 + $0xf3c] sm:$0xff]  ;;  %v674_v12 = vld [vmem:[%s13998_s29 + $0xf70] sm:$0xff]  ;;  %v676_v13 = vld [vmem:[%s13998_s29 + $0xfa4] sm:$0xff] }
  0x4c   : >> { %573 = vst [vmem:[%s13994_s27 + $0xc8] sm:$0xff] %v572_v25  ;;  %v678_v14 = vld [vmem:[%s13998_s29 + $0xfd8] sm:$0xff]  ;;  %v680_v15 = vld [vmem:[%s13998_s29 + $0x100c] sm:$0xff]  ;;  %v682_v16 = vld [vmem:[%s13998_s29 + $0x1040] sm:$0xff] }
  0x4d   : >> { %575 = vst [vmem:[%s13994_s27 + $0xd0] sm:$0xff] %v574_v26  ;;  %v684_v17 = vld [vmem:[%s13998_s29 + $0x1074] sm:$0xff]  ;;  %v686_v18 = vld [vmem:[%s13998_s29 + $0x10a8] sm:$0xff]  ;;  %v688_v19 = vld [vmem:[%s13998_s29 + $0x10dc] sm:$0xff] }
  0x4e   : >> { %577 = vst [vmem:[%s13994_s27 + $0xd8] sm:$0xff] %v576_v27  ;;  %v690_v20 = vld [vmem:[%s13998_s29 + $0x1110] sm:$0xff]  ;;  %v692_v21 = vld [vmem:[%s13998_s29 + $0x1144] sm:$0xff]  ;;  %v694_v22 = vld [vmem:[%s13998_s29 + $0x1178] sm:$0xff] }
  0x4f   : >> { %579 = vst [vmem:[%s13994_s27 + $0xe0] sm:$0xff] %v578_v28  ;;  %v696_v23 = vld [vmem:[%s13998_s29 + $0x11ac] sm:$0xff]  ;;  %v698_v24 = vld [vmem:[%s13998_s29 + $0x11e0] sm:$0xff]  ;;  %v700_v25 = vld [vmem:[%s13998_s29 + $0x1214] sm:$0xff] }
  0x50   : >> { %581 = vst [vmem:[%s13994_s27 + $0xe8] sm:$0xff] %v580_v29  ;;  %v702_v26 = vld [vmem:[%s13998_s29 + $0x1248] sm:$0xff]  ;;  %v704_v27 = vld [vmem:[%s13998_s29 + $0x127c] sm:$0xff]  ;;  %v706_v28 = vld [vmem:[%s13998_s29 + $0x12b0] sm:$0xff] }
  0x51   : >> { %583 = vst [vmem:[%s13994_s27 + $0xf0] sm:$0xff] %v582_v30  ;;  %v708_v29 = vld [vmem:[%s13998_s29 + $0x12e4] sm:$0xff]  ;;  %v710_v30 = vld [vmem:[%s13998_s29 + $0x1318] sm:$0xff] }
  0x52   : >> { %585 = vst [vmem:[%s13994_s27 + $0xf8] sm:$0xff] %v584_v31  ;;  %v712_v31 = vld [vmem:[%s13998_s29 + $0x134c] sm:$0xff] }
  0x53   : >> { %587 = vst [vmem:[%s13994_s27 + $0x100] sm:$0xff] %v586_v32  ;;  %v714_v32 = vld [vmem:[%s13998_s29 + $0x1380] sm:$0xff] }
  0x54   : >> { %589 = vst [vmem:[%s13994_s27 + $0x108] sm:$0xff] %v588_v33  ;;  %v716_v33 = vld [vmem:[%s13998_s29 + $0x13b4] sm:$0xff] }
  0x55   : >> { %591 = vst [vmem:[%s13994_s27 + $0x110] sm:$0xff] %v590_v34  ;;  %v718_v34 = vld [vmem:[%s13998_s29 + $0x13e8] sm:$0xff] }
  0x56   : >> { %593 = vst [vmem:[%s13994_s27 + $0x118] sm:$0xff] %v592_v35  ;;  %v720_v35 = vld [vmem:[%s13998_s29 + $0x141c] sm:$0xff] }
  0x57   : >> { %595 = vst [vmem:[%s13994_s27 + $0x120] sm:$0xff] %v594_v36  ;;  %v722_v36 = vld [vmem:[%s13998_s29 + $0x1450] sm:$0xff] }
  0x58   : >> { %597 = vst [vmem:[%s13994_s27 + $0x128] sm:$0xff] %v596_v37  ;;  %v724_v37 = vld [vmem:[%s13998_s29 + $0x1484] sm:$0xff] }
  0x59   : >> { %599 = vst [vmem:[%s13994_s27 + $0x130] sm:$0xff] %v598_v38  ;;  %v726_v38 = vld [vmem:[%s13998_s29 + $0x14b8] sm:$0xff] }
  0x5a   : >> { %601 = vst [vmem:[%s13994_s27 + $0x138] sm:$0xff] %v600_v39  ;;  %v728_v39 = vld [vmem:[%s13998_s29 + $0x14ec] sm:$0xff] }
  0x5b   : >> { %603 = vst [vmem:[%s13994_s27 + $0x140] sm:$0xff] %v602_v40  ;;  %v730_v40 = vld [vmem:[%s13998_s29 + $0x1520] sm:$0xff] }
  0x5c   : >> { %605 = vst [vmem:[%s13994_s27 + $0x148] sm:$0xff] %v604_v41  ;;  %v732_v41 = vld [vmem:[%s13998_s29 + $0x1554] sm:$0xff] }
  0x5d   : >> { %607 = vst [vmem:[%s13994_s27 + $0x150] sm:$0xff] %v606_v42  ;;  %v734_v42 = vld [vmem:[%s13998_s29 + $0x1588] sm:$0xff] }
  0x5e   : >> { %609 = vst [vmem:[%s13994_s27 + $0x158] sm:$0xff] %v608_v43  ;;  %v736_v43 = vld [vmem:[%s13998_s29 + $0x15bc] sm:$0xff] }
  0x5f   : >> { %611 = vst [vmem:[%s13994_s27 + $0x160] sm:$0xff] %v610_v44  ;;  %v738_v44 = vld [vmem:[%s13998_s29 + $0x15f0] sm:$0xff] }
  0x60   : >> { %613 = vst [vmem:[%s13994_s27 + $0x168] sm:$0xff] %v612_v45  ;;  %v740_v45 = vld [vmem:[%s13998_s29 + $0x1624] sm:$0xff] }
  0x61   : >> { %615 = vst [vmem:[%s13994_s27 + $0x170] sm:$0xff] %v614_v46  ;;  %v742_v46 = vld [vmem:[%s13998_s29 + $0x1658] sm:$0xff] }
  0x62   : >> { %617 = vst [vmem:[%s13994_s27 + $0x178] sm:$0xff] %v616_v47  ;;  %v744_v47 = vld [vmem:[%s13998_s29 + $0x168c] sm:$0xff] }
  0x63   : >> { %619 = vst [vmem:[%s13994_s27 + $0x180] sm:$0xff] %v618_v48  ;;  %v746_v48 = vld [vmem:[%s13998_s29 + $0x16c0] sm:$0xff] }
  0x64   : >> { %621 = vst [vmem:[%s13994_s27 + $0x188] sm:$0xff] %v620_v49  ;;  %v748_v49 = vld [vmem:[%s13998_s29 + $0x16f4] sm:$0xff] }
  0x65   : >> { %623 = vst [vmem:[%s13994_s27 + $0x190] sm:$0xff] %v622_v50  ;;  %v750_v50 = vld [vmem:[%s13998_s29 + $0x1728] sm:$0xff] }
  0x66   : >> { %625 = vst [vmem:[%s13994_s27 + $0x198] sm:$0xff] %v624_v51  ;;  %v752_v51 = vld [vmem:[%s13998_s29 + $0x175c] sm:$0xff] }
  0x67   : >> { %627 = vst [vmem:[%s13994_s27 + $0x1a0] sm:$0xff] %v626_v52  ;;  %v754_v52 = vld [vmem:[%s13998_s29 + $0x1790] sm:$0xff] }
  0x68   : >> { %629 = vst [vmem:[%s13994_s27 + $0x1a8] sm:$0xff] %v628_v53  ;;  %v756_v53 = vld [vmem:[%s13998_s29 + $0x17c4] sm:$0xff] }
  0x69   : >> { %631 = vst [vmem:[%s13994_s27 + $0x1b0] sm:$0xff] %v630_v54  ;;  %v758_v54 = vld [vmem:[%s13998_s29 + $0x17f8] sm:$0xff] }
  0x6a   : >> { %633 = vst [vmem:[%s13994_s27 + $0x1b8] sm:$0xff] %v632_v55  ;;  %v760_v55 = vld [vmem:[%s13998_s29 + $0x182c] sm:$0xff] }
  0x6b   : >> { %635 = vst [vmem:[%s13994_s27 + $0x1c0] sm:$0xff] %v634_v56  ;;  %v762_v56 = vld [vmem:[%s13998_s29 + $0x1860] sm:$0xff] }
  0x6c   : >> { %637 = vst [vmem:[%s13994_s27 + $0x1c8] sm:$0xff] %v636_v57  ;;  %v764_v57 = vld [vmem:[%s13998_s29 + $0x1894] sm:$0xff] }
  0x6d   : >> { %639 = vst [vmem:[%s13994_s27 + $0x1d0] sm:$0xff] %v638_v58  ;;  %v766_v58 = vld [vmem:[%s13998_s29 + $0x18c8] sm:$0xff] }
  0x6e   : >> { %641 = vst [vmem:[%s13994_s27 + $0x1d8] sm:$0xff] %v640_v59  ;;  %v768_v59 = vld [vmem:[%s13998_s29 + $0x18fc] sm:$0xff] }
  0x6f   : >> { %643 = vst [vmem:[%s13994_s27 + $0x1e0] sm:$0xff] %v642_v60  ;;  %v770_v60 = vld [vmem:[%s13998_s29 + $0x1930] sm:$0xff] }
  0x70   : >> { %645 = vst [vmem:[%s13994_s27 + $0x1e8] sm:$0xff] %v644_v61  ;;  %v772_v61 = vld [vmem:[%s13998_s29 + $0x1964] sm:$0xff] }
  0x71   : >> { %647 = vst [vmem:[%s13994_s27 + $0x1f0] sm:$0xff] %v646_v62  ;;  %v774_v62 = vld [vmem:[%s13998_s29 + $0x1998] sm:$0xff] }
  0x72   : >> { %649 = vst [vmem:[%s13994_s27 + $0x1f8] sm:$0xff] %v648_v63  ;;  %v776_v63 = vld [vmem:[%s13998_s29 + $0x19cc] sm:$0xff]  ;;  %s21539_s29 = smov %s14176_s11 }
  0x73   : >> { %651 = vst [vmem:[%s13994_s27 + $0x200] sm:$0xff] %v650_v0 }
  0x74   : >> { %653 = vst [vmem:[%s13994_s27 + $0x208] sm:$0xff] %v652_v1 }
  0x75   : >> { %655 = vst [vmem:[%s13994_s27 + $0x210] sm:$0xff] %v654_v2 }
  0x76   : >> { %657 = vst [vmem:[%s13994_s27 + $0x218] sm:$0xff] %v656_v3 }
  0x77   : >> { %659 = vst [vmem:[%s13994_s27 + $0x220] sm:$0xff] %v658_v4 }
  0x78   : >> { %661 = vst [vmem:[%s13994_s27 + $0x228] sm:$0xff] %v660_v5 }
  0x79   : >> { %663 = vst [vmem:[%s13994_s27 + $0x230] sm:$0xff] %v662_v6 }
  0x7a   : >> { %665 = vst [vmem:[%s13994_s27 + $0x238] sm:$0xff] %v664_v7 }
  0x7b   : >> { %667 = vst [vmem:[%s13994_s27 + $0x240] sm:$0xff] %v666_v8 }
  0x7c   : >> { %669 = vst [vmem:[%s13994_s27 + $0x248] sm:$0xff] %v668_v9 }
  0x7d   : >> { %671 = vst [vmem:[%s13994_s27 + $0x250] sm:$0xff] %v670_v10 }
  0x7e   : >> { %673 = vst [vmem:[%s13994_s27 + $0x258] sm:$0xff] %v672_v11 }
  0x7f   : >> { %675 = vst [vmem:[%s13994_s27 + $0x260] sm:$0xff] %v674_v12 }
  0x80   : >> { %677 = vst [vmem:[%s13994_s27 + $0x268] sm:$0xff] %v676_v13 }
  0x81   : >> { %679 = vst [vmem:[%s13994_s27 + $0x270] sm:$0xff] %v678_v14 }
  0x82   : >> { %681 = vst [vmem:[%s13994_s27 + $0x278] sm:$0xff] %v680_v15 }
  0x83   : >> { %683 = vst [vmem:[%s13994_s27 + $0x280] sm:$0xff] %v682_v16 }
  0x84   : >> { %685 = vst [vmem:[%s13994_s27 + $0x288] sm:$0xff] %v684_v17 }
  0x85   : >> { %687 = vst [vmem:[%s13994_s27 + $0x290] sm:$0xff] %v686_v18 }
  0x86   : >> { %689 = vst [vmem:[%s13994_s27 + $0x298] sm:$0xff] %v688_v19 }
  0x87   : >> { %691 = vst [vmem:[%s13994_s27 + $0x2a0] sm:$0xff] %v690_v20 }
  0x88   : >> { %693 = vst [vmem:[%s13994_s27 + $0x2a8] sm:$0xff] %v692_v21 }
  0x89   : >> { %695 = vst [vmem:[%s13994_s27 + $0x2b0] sm:$0xff] %v694_v22 }
  0x8a   : >> { %697 = vst [vmem:[%s13994_s27 + $0x2b8] sm:$0xff] %v696_v23 }
  0x8b   : >> { %699 = vst [vmem:[%s13994_s27 + $0x2c0] sm:$0xff] %v698_v24 }
  0x8c   : >> { %701 = vst [vmem:[%s13994_s27 + $0x2c8] sm:$0xff] %v700_v25 }
  0x8d   : >> { %703 = vst [vmem:[%s13994_s27 + $0x2d0] sm:$0xff] %v702_v26 }
  0x8e   : >> { %705 = vst [vmem:[%s13994_s27 + $0x2d8] sm:$0xff] %v704_v27 }
  0x8f   : >> { %707 = vst [vmem:[%s13994_s27 + $0x2e0] sm:$0xff] %v706_v28 }
  0x90   : >> { %709 = vst [vmem:[%s13994_s27 + $0x2e8] sm:$0xff] %v708_v29 }
  0x91   : >> { %711 = vst [vmem:[%s13994_s27 + $0x2f0] sm:$0xff] %v710_v30 }
  0x92   : >> { %713 = vst [vmem:[%s13994_s27 + $0x2f8] sm:$0xff] %v712_v31 }
  0x93   : >> { %715 = vst [vmem:[%s13994_s27 + $0x300] sm:$0xff] %v714_v32 }
  0x94   : >> { %717 = vst [vmem:[%s13994_s27 + $0x308] sm:$0xff] %v716_v33 }
  0x95   : >> { %719 = vst [vmem:[%s13994_s27 + $0x310] sm:$0xff] %v718_v34 }
  0x96   : >> { %721 = vst [vmem:[%s13994_s27 + $0x318] sm:$0xff] %v720_v35 }
  0x97   : >> { %723 = vst [vmem:[%s13994_s27 + $0x320] sm:$0xff] %v722_v36 }
  0x98   : >> { %725 = vst [vmem:[%s13994_s27 + $0x328] sm:$0xff] %v724_v37 }
  0x99   : >> { %727 = vst [vmem:[%s13994_s27 + $0x330] sm:$0xff] %v726_v38 }
  0x9a   : >> { %729 = vst [vmem:[%s13994_s27 + $0x338] sm:$0xff] %v728_v39 }
  0x9b   : >> { %731 = vst [vmem:[%s13994_s27 + $0x340] sm:$0xff] %v730_v40 }
  0x9c   : >> { %733 = vst [vmem:[%s13994_s27 + $0x348] sm:$0xff] %v732_v41 }
  0x9d   : >> { %735 = vst [vmem:[%s13994_s27 + $0x350] sm:$0xff] %v734_v42 }
  0x9e   : >> { %737 = vst [vmem:[%s13994_s27 + $0x358] sm:$0xff] %v736_v43 }
  0x9f   : >> { %739 = vst [vmem:[%s13994_s27 + $0x360] sm:$0xff] %v738_v44 }
  0xa0   : >> { %741 = vst [vmem:[%s13994_s27 + $0x368] sm:$0xff] %v740_v45 }
  0xa1   : >> { %743 = vst [vmem:[%s13994_s27 + $0x370] sm:$0xff] %v742_v46 }
  0xa2   : >> { %745 = vst [vmem:[%s13994_s27 + $0x378] sm:$0xff] %v744_v47 }
  0xa3   : >> { %747 = vst [vmem:[%s13994_s27 + $0x380] sm:$0xff] %v746_v48 }
  0xa4   : >> { %749 = vst [vmem:[%s13994_s27 + $0x388] sm:$0xff] %v748_v49 }
  0xa5   : >> { %751 = vst [vmem:[%s13994_s27 + $0x390] sm:$0xff] %v750_v50 }
  0xa6   : >> { %753 = vst [vmem:[%s13994_s27 + $0x398] sm:$0xff] %v752_v51 }
  0xa7   : >> { %755 = vst [vmem:[%s13994_s27 + $0x3a0] sm:$0xff] %v754_v52 }
  0xa8   : >> { %757 = vst [vmem:[%s13994_s27 + $0x3a8] sm:$0xff] %v756_v53 }
  0xa9   : >> { %759 = vst [vmem:[%s13994_s27 + $0x3b0] sm:$0xff] %v758_v54 }
  0xaa   : >> { %761 = vst [vmem:[%s13994_s27 + $0x3b8] sm:$0xff] %v760_v55 }
  0xab   : >> { %763 = vst [vmem:[%s13994_s27 + $0x3c0] sm:$0xff] %v762_v56 }
  0xac   : >> { %765 = vst [vmem:[%s13994_s27 + $0x3c8] sm:$0xff] %v764_v57 }
  0xad   : >> { %767 = vst [vmem:[%s13994_s27 + $0x3d0] sm:$0xff] %v766_v58 }
  0xae   : >> { %769 = vst [vmem:[%s13994_s27 + $0x3d8] sm:$0xff] %v768_v59  ;;  %518 = sbr.rel (!%p515_p4) target bundleno = 50 (0x32), region = 152 }
  0xaf   : >> { %771 = vst [vmem:[%s13994_s27 + $0x3e0] sm:$0xff] %v770_v60 }
  0xb0   : >> { %773 = vst [vmem:[%s13994_s27 + $0x3e8] sm:$0xff] %v772_v61 }
  0xb1   : >> { %775 = vst [vmem:[%s13994_s27 + $0x3f0] sm:$0xff] %v774_v62 }
  0xb2   : >> { %777 = vst [vmem:[%s13994_s27 + $0x3f8] sm:$0xff] %v776_v63  ;;  %s21538_s27 = smov %s14179_s12 }
  0xb3 PF: > { %787 = sbr.rel (%p508_p0) target bundleno = 450 (0x1c2), region = 66  ;;  %s789_s13 = ssub.s32 (!%p508_p0), %s14122_s16, %s14128_s24 }
  0xb4   : > { %s14440_s15 = sshrl.u32 (!%p508_p0), %s14122_s16, 3  ;;  %s14443_s10 = scalar_lea.vmem (!%p508_p0), %s14120_s14, %s789_s13 }
  0xb5   : > { %s14446_s11 = scalar_lea.vmem (!%p508_p0), %s14124_s17, %s789_s13 [#allocation3]  ;;  %p9033_p6 = scmp.le.s32.totalorder (!%p508_p0), %s14440_s15, 0 }
  0xb8   : > { %8964 = sbr.rel (%p9033_p6) target bundleno = 318 (0x13e), region = 157  ;;  %s21541_s25 = smov (!%p9033_p6), %s14124_s17 }
  0xb9   : > { %s21542_s27 = smov (!%p9033_p6), %s14120_s14  ;;  %s14455_s29 = smov (!%p9033_p6), 0  }
  0xba   : > { %s14457_s7 = smov (!%p9033_p6), 0  }
  0xbd LB: >> { %v803_v0 = vld [vmem:[%s14014_s27] sm:$0xff]  ;;  %v805_v1 = vld [vmem:[%s14014_s27 + $0x34] sm:$0xff]  ;;  %v807_v2 = vld [vmem:[%s14014_s27 + $0x68] sm:$0xff]  ;;  %s1059_s8 = sadd.s32 1, %s14018_s29  ;;  %s797_s7 = sadd.s32 1, %s14022_s7   ;;  %s14022_s7 = sphi %s14457_s7, %s797_s7   ;;  %s14018_s29 = sphi %s14455_s29, %s21545_s29   ;;  %s14014_s27 = sphi %s21542_s27, %s21544_s27   ;;  %s14010_s25 = sphi %s21541_s25, %s21543_s25  }
  0xbe   : >> { %804 = vst [vmem:[%s14010_s25] sm:$0xff] %v803_v0  ;;  %v809_v3 = vld [vmem:[%s14014_s27 + $0x9c] sm:$0xff]  ;;  %p1060_p7 = scmp.ge.s32.totalorder %s1059_s8, %s14440_s15  ;;  %v811_v4 = vld [vmem:[%s14014_s27 + $0xd0] sm:$0xff]  ;;  %v813_v5 = vld [vmem:[%s14014_s27 + $0x104] sm:$0xff]  ;;  %p796_p8 = scmp.ge.s32.totalorder %s797_s7, %s14440_s15 }
  0xbf   : >> { %806 = vst [vmem:[%s14010_s25 + $0x8] sm:$0xff] %v805_v1  ;;  %v815_v6 = vld [vmem:[%s14014_s27 + $0x138] sm:$0xff]  ;;  %v817_v7 = vld [vmem:[%s14014_s27 + $0x16c] sm:$0xff]  ;;  %v819_v8 = vld [vmem:[%s14014_s27 + $0x1a0] sm:$0xff] }
  0xc0   : >> { %808 = vst [vmem:[%s14010_s25 + $0x10] sm:$0xff] %v807_v2  ;;  %s21568_s8 = smov (%p1060_p7, %s1059_s8), 0  ;;  %v821_v9 = vld [vmem:[%s14014_s27 + $0x1d4] sm:$0xff]  ;;  %v823_v10 = vld [vmem:[%s14014_s27 + $0x208] sm:$0xff]  ;;  %v825_v11 = vld [vmem:[%s14014_s27 + $0x23c] sm:$0xff] }
  0xc1   : >> { %810 = vst [vmem:[%s14010_s25 + $0x18] sm:$0xff] %v809_v3  ;;  %s9034_s9 = sshll.u32 %s21568_s8, 3  ;;  %v827_v12 = vld [vmem:[%s14014_s27 + $0x270] sm:$0xff]  ;;  %v829_v13 = vld [vmem:[%s14014_s27 + $0x2a4] sm:$0xff]  ;;  %v831_v14 = vld [vmem:[%s14014_s27 + $0x2d8] sm:$0xff]  ;;  %s21545_s29 = smov %s21568_s8 }
  0xc2   : >> { %812 = vst [vmem:[%s14010_s25 + $0x20] sm:$0xff] %v811_v4  ;;  %s14489_s12 = scalar_lea.vmem %s14120_s14, %s9034_s9   ;;  %s14492_s13 = scalar_lea.vmem %s14124_s17, %s9034_s9 [#allocation3]   ;;  %v833_v15 = vld [vmem:[%s14014_s27 + $0x30c] sm:$0xff]  ;;  %v835_v16 = vld [vmem:[%s14014_s27 + $0x340] sm:$0xff]  ;;  %v837_v17 = vld [vmem:[%s14014_s27 + $0x374] sm:$0xff] }
  0xc3   : >> { %814 = vst [vmem:[%s14010_s25 + $0x28] sm:$0xff] %v813_v5  ;;  %v839_v18 = vld [vmem:[%s14014_s27 + $0x3a8] sm:$0xff]  ;;  %v841_v19 = vld [vmem:[%s14014_s27 + $0x3dc] sm:$0xff]  ;;  %v843_v20 = vld [vmem:[%s14014_s27 + $0x410] sm:$0xff] }
  0xc4   : >> { %816 = vst [vmem:[%s14010_s25 + $0x30] sm:$0xff] %v815_v6  ;;  %v845_v21 = vld [vmem:[%s14014_s27 + $0x444] sm:$0xff]  ;;  %v847_v22 = vld [vmem:[%s14014_s27 + $0x478] sm:$0xff]  ;;  %v849_v23 = vld [vmem:[%s14014_s27 + $0x4ac] sm:$0xff] }
  0xc5   : >> { %818 = vst [vmem:[%s14010_s25 + $0x38] sm:$0xff] %v817_v7  ;;  %v851_v24 = vld [vmem:[%s14014_s27 + $0x4e0] sm:$0xff]  ;;  %v853_v25 = vld [vmem:[%s14014_s27 + $0x514] sm:$0xff]  ;;  %v855_v26 = vld [vmem:[%s14014_s27 + $0x548] sm:$0xff] }
  0xc6   : >> { %820 = vst [vmem:[%s14010_s25 + $0x40] sm:$0xff] %v819_v8  ;;  %v857_v27 = vld [vmem:[%s14014_s27 + $0x57c] sm:$0xff]  ;;  %v859_v28 = vld [vmem:[%s14014_s27 + $0x5b0] sm:$0xff]  ;;  %v861_v29 = vld [vmem:[%s14014_s27 + $0x5e4] sm:$0xff] }
  0xc7   : >> { %822 = vst [vmem:[%s14010_s25 + $0x48] sm:$0xff] %v821_v9  ;;  %v863_v30 = vld [vmem:[%s14014_s27 + $0x618] sm:$0xff]  ;;  %v865_v31 = vld [vmem:[%s14014_s27 + $0x64c] sm:$0xff]  ;;  %v867_v32 = vld [vmem:[%s14014_s27 + $0x680] sm:$0xff] }
  0xc8   : >> { %824 = vst [vmem:[%s14010_s25 + $0x50] sm:$0xff] %v823_v10  ;;  %v869_v33 = vld [vmem:[%s14014_s27 + $0x6b4] sm:$0xff]  ;;  %v871_v34 = vld [vmem:[%s14014_s27 + $0x6e8] sm:$0xff]  ;;  %v873_v35 = vld [vmem:[%s14014_s27 + $0x71c] sm:$0xff] }
  0xc9   : >> { %826 = vst [vmem:[%s14010_s25 + $0x58] sm:$0xff] %v825_v11  ;;  %v875_v36 = vld [vmem:[%s14014_s27 + $0x750] sm:$0xff]  ;;  %v877_v37 = vld [vmem:[%s14014_s27 + $0x784] sm:$0xff]  ;;  %v879_v38 = vld [vmem:[%s14014_s27 + $0x7b8] sm:$0xff] }
  0xca   : >> { %828 = vst [vmem:[%s14010_s25 + $0x60] sm:$0xff] %v827_v12  ;;  %v881_v39 = vld [vmem:[%s14014_s27 + $0x7ec] sm:$0xff]  ;;  %v883_v40 = vld [vmem:[%s14014_s27 + $0x820] sm:$0xff]  ;;  %v885_v41 = vld [vmem:[%s14014_s27 + $0x854] sm:$0xff] }
  0xcb   : >> { %830 = vst [vmem:[%s14010_s25 + $0x68] sm:$0xff] %v829_v13  ;;  %v887_v42 = vld [vmem:[%s14014_s27 + $0x888] sm:$0xff]  ;;  %v889_v43 = vld [vmem:[%s14014_s27 + $0x8bc] sm:$0xff]  ;;  %v891_v44 = vld [vmem:[%s14014_s27 + $0x8f0] sm:$0xff] }
  0xcc   : >> { %832 = vst [vmem:[%s14010_s25 + $0x70] sm:$0xff] %v831_v14  ;;  %v893_v45 = vld [vmem:[%s14014_s27 + $0x924] sm:$0xff]  ;;  %v895_v46 = vld [vmem:[%s14014_s27 + $0x958] sm:$0xff]  ;;  %v897_v47 = vld [vmem:[%s14014_s27 + $0x98c] sm:$0xff] }
  0xcd   : >> { %834 = vst [vmem:[%s14010_s25 + $0x78] sm:$0xff] %v833_v15  ;;  %v899_v48 = vld [vmem:[%s14014_s27 + $0x9c0] sm:$0xff]  ;;  %v901_v49 = vld [vmem:[%s14014_s27 + $0x9f4] sm:$0xff]  ;;  %v903_v50 = vld [vmem:[%s14014_s27 + $0xa28] sm:$0xff] }
  0xce   : >> { %836 = vst [vmem:[%s14010_s25 + $0x80] sm:$0xff] %v835_v16  ;;  %v905_v51 = vld [vmem:[%s14014_s27 + $0xa5c] sm:$0xff]  ;;  %v907_v52 = vld [vmem:[%s14014_s27 + $0xa90] sm:$0xff]  ;;  %v909_v53 = vld [vmem:[%s14014_s27 + $0xac4] sm:$0xff] }
  0xcf   : >> { %838 = vst [vmem:[%s14010_s25 + $0x88] sm:$0xff] %v837_v17  ;;  %v911_v54 = vld [vmem:[%s14014_s27 + $0xaf8] sm:$0xff]  ;;  %v913_v55 = vld [vmem:[%s14014_s27 + $0xb2c] sm:$0xff]  ;;  %v915_v56 = vld [vmem:[%s14014_s27 + $0xb60] sm:$0xff] }
  0xd0   : >> { %840 = vst [vmem:[%s14010_s25 + $0x90] sm:$0xff] %v839_v18  ;;  %v917_v57 = vld [vmem:[%s14014_s27 + $0xb94] sm:$0xff]  ;;  %v919_v58 = vld [vmem:[%s14014_s27 + $0xbc8] sm:$0xff]  ;;  %v921_v59 = vld [vmem:[%s14014_s27 + $0xbfc] sm:$0xff] }
  0xd1   : >> { %842 = vst [vmem:[%s14010_s25 + $0x98] sm:$0xff] %v841_v19  ;;  %v923_v60 = vld [vmem:[%s14014_s27 + $0xc30] sm:$0xff]  ;;  %v925_v61 = vld [vmem:[%s14014_s27 + $0xc64] sm:$0xff]  ;;  %v927_v62 = vld [vmem:[%s14014_s27 + $0xc98] sm:$0xff] }
  0xd2   : >> { %844 = vst [vmem:[%s14010_s25 + $0xa0] sm:$0xff] %v843_v20  ;;  %v929_v63 = vld [vmem:[%s14014_s27 + $0xccc] sm:$0xff]  ;;  %v931_v0 = vld [vmem:[%s14014_s27 + $0xd00] sm:$0xff]  ;;  %v933_v1 = vld [vmem:[%s14014_s27 + $0xd34] sm:$0xff] }
  0xd3   : >> { %846 = vst [vmem:[%s14010_s25 + $0xa8] sm:$0xff] %v845_v21  ;;  %v935_v2 = vld [vmem:[%s14014_s27 + $0xd68] sm:$0xff]  ;;  %v937_v3 = vld [vmem:[%s14014_s27 + $0xd9c] sm:$0xff]  ;;  %v939_v4 = vld [vmem:[%s14014_s27 + $0xdd0] sm:$0xff] }
  0xd4   : >> { %848 = vst [vmem:[%s14010_s25 + $0xb0] sm:$0xff] %v847_v22  ;;  %v941_v5 = vld [vmem:[%s14014_s27 + $0xe04] sm:$0xff]  ;;  %v943_v6 = vld [vmem:[%s14014_s27 + $0xe38] sm:$0xff]  ;;  %v945_v7 = vld [vmem:[%s14014_s27 + $0xe6c] sm:$0xff] }
  0xd5   : >> { %850 = vst [vmem:[%s14010_s25 + $0xb8] sm:$0xff] %v849_v23  ;;  %v947_v8 = vld [vmem:[%s14014_s27 + $0xea0] sm:$0xff]  ;;  %v949_v9 = vld [vmem:[%s14014_s27 + $0xed4] sm:$0xff]  ;;  %v951_v10 = vld [vmem:[%s14014_s27 + $0xf08] sm:$0xff] }
  0xd6   : >> { %852 = vst [vmem:[%s14010_s25 + $0xc0] sm:$0xff] %v851_v24  ;;  %v953_v11 = vld [vmem:[%s14014_s27 + $0xf3c] sm:$0xff]  ;;  %v955_v12 = vld [vmem:[%s14014_s27 + $0xf70] sm:$0xff]  ;;  %v957_v13 = vld [vmem:[%s14014_s27 + $0xfa4] sm:$0xff] }
  0xd7   : >> { %854 = vst [vmem:[%s14010_s25 + $0xc8] sm:$0xff] %v853_v25  ;;  %v959_v14 = vld [vmem:[%s14014_s27 + $0xfd8] sm:$0xff]  ;;  %v961_v15 = vld [vmem:[%s14014_s27 + $0x100c] sm:$0xff]  ;;  %v963_v16 = vld [vmem:[%s14014_s27 + $0x1040] sm:$0xff] }
  0xd8   : >> { %856 = vst [vmem:[%s14010_s25 + $0xd0] sm:$0xff] %v855_v26  ;;  %v965_v17 = vld [vmem:[%s14014_s27 + $0x1074] sm:$0xff]  ;;  %v967_v18 = vld [vmem:[%s14014_s27 + $0x10a8] sm:$0xff]  ;;  %v969_v19 = vld [vmem:[%s14014_s27 + $0x10dc] sm:$0xff] }
  0xd9   : >> { %858 = vst [vmem:[%s14010_s25 + $0xd8] sm:$0xff] %v857_v27  ;;  %v971_v20 = vld [vmem:[%s14014_s27 + $0x1110] sm:$0xff]  ;;  %v973_v21 = vld [vmem:[%s14014_s27 + $0x1144] sm:$0xff]  ;;  %v975_v22 = vld [vmem:[%s14014_s27 + $0x1178] sm:$0xff] }
  0xda   : >> { %860 = vst [vmem:[%s14010_s25 + $0xe0] sm:$0xff] %v859_v28  ;;  %v977_v23 = vld [vmem:[%s14014_s27 + $0x11ac] sm:$0xff]  ;;  %v979_v24 = vld [vmem:[%s14014_s27 + $0x11e0] sm:$0xff]  ;;  %v981_v25 = vld [vmem:[%s14014_s27 + $0x1214] sm:$0xff] }
  0xdb   : >> { %862 = vst [vmem:[%s14010_s25 + $0xe8] sm:$0xff] %v861_v29  ;;  %v983_v26 = vld [vmem:[%s14014_s27 + $0x1248] sm:$0xff]  ;;  %v985_v27 = vld [vmem:[%s14014_s27 + $0x127c] sm:$0xff]  ;;  %v987_v28 = vld [vmem:[%s14014_s27 + $0x12b0] sm:$0xff] }
  0xdc   : >> { %864 = vst [vmem:[%s14010_s25 + $0xf0] sm:$0xff] %v863_v30  ;;  %v989_v29 = vld [vmem:[%s14014_s27 + $0x12e4] sm:$0xff]  ;;  %v991_v30 = vld [vmem:[%s14014_s27 + $0x1318] sm:$0xff] }
  0xdd   : >> { %866 = vst [vmem:[%s14010_s25 + $0xf8] sm:$0xff] %v865_v31  ;;  %v993_v31 = vld [vmem:[%s14014_s27 + $0x134c] sm:$0xff] }
  0xde   : >> { %868 = vst [vmem:[%s14010_s25 + $0x100] sm:$0xff] %v867_v32  ;;  %v995_v32 = vld [vmem:[%s14014_s27 + $0x1380] sm:$0xff] }
  0xdf   : >> { %870 = vst [vmem:[%s14010_s25 + $0x108] sm:$0xff] %v869_v33  ;;  %v997_v33 = vld [vmem:[%s14014_s27 + $0x13b4] sm:$0xff] }
  0xe0   : >> { %872 = vst [vmem:[%s14010_s25 + $0x110] sm:$0xff] %v871_v34  ;;  %v999_v34 = vld [vmem:[%s14014_s27 + $0x13e8] sm:$0xff] }
  0xe1   : >> { %874 = vst [vmem:[%s14010_s25 + $0x118] sm:$0xff] %v873_v35  ;;  %v1001_v35 = vld [vmem:[%s14014_s27 + $0x141c] sm:$0xff] }
  0xe2   : >> { %876 = vst [vmem:[%s14010_s25 + $0x120] sm:$0xff] %v875_v36  ;;  %v1003_v36 = vld [vmem:[%s14014_s27 + $0x1450] sm:$0xff] }
  0xe3   : >> { %878 = vst [vmem:[%s14010_s25 + $0x128] sm:$0xff] %v877_v37  ;;  %v1005_v37 = vld [vmem:[%s14014_s27 + $0x1484] sm:$0xff] }
  0xe4   : >> { %880 = vst [vmem:[%s14010_s25 + $0x130] sm:$0xff] %v879_v38  ;;  %v1007_v38 = vld [vmem:[%s14014_s27 + $0x14b8] sm:$0xff] }
  0xe5   : >> { %882 = vst [vmem:[%s14010_s25 + $0x138] sm:$0xff] %v881_v39  ;;  %v1009_v39 = vld [vmem:[%s14014_s27 + $0x14ec] sm:$0xff] }
  0xe6   : >> { %884 = vst [vmem:[%s14010_s25 + $0x140] sm:$0xff] %v883_v40  ;;  %v1011_v40 = vld [vmem:[%s14014_s27 + $0x1520] sm:$0xff] }
  0xe7   : >> { %886 = vst [vmem:[%s14010_s25 + $0x148] sm:$0xff] %v885_v41  ;;  %v1013_v41 = vld [vmem:[%s14014_s27 + $0x1554] sm:$0xff] }
  0xe8   : >> { %888 = vst [vmem:[%s14010_s25 + $0x150] sm:$0xff] %v887_v42  ;;  %v1015_v42 = vld [vmem:[%s14014_s27 + $0x1588] sm:$0xff] }
  0xe9   : >> { %890 = vst [vmem:[%s14010_s25 + $0x158] sm:$0xff] %v889_v43  ;;  %v1017_v43 = vld [vmem:[%s14014_s27 + $0x15bc] sm:$0xff] }
  0xea   : >> { %892 = vst [vmem:[%s14010_s25 + $0x160] sm:$0xff] %v891_v44  ;;  %v1019_v44 = vld [vmem:[%s14014_s27 + $0x15f0] sm:$0xff] }
  0xeb   : >> { %894 = vst [vmem:[%s14010_s25 + $0x168] sm:$0xff] %v893_v45  ;;  %v1021_v45 = vld [vmem:[%s14014_s27 + $0x1624] sm:$0xff] }
  0xec   : >> { %896 = vst [vmem:[%s14010_s25 + $0x170] sm:$0xff] %v895_v46  ;;  %v1023_v46 = vld [vmem:[%s14014_s27 + $0x1658] sm:$0xff] }
  0xed   : >> { %898 = vst [vmem:[%s14010_s25 + $0x178] sm:$0xff] %v897_v47  ;;  %v1025_v47 = vld [vmem:[%s14014_s27 + $0x168c] sm:$0xff] }
  0xee   : >> { %900 = vst [vmem:[%s14010_s25 + $0x180] sm:$0xff] %v899_v48  ;;  %v1027_v48 = vld [vmem:[%s14014_s27 + $0x16c0] sm:$0xff] }
  0xef   : >> { %902 = vst [vmem:[%s14010_s25 + $0x188] sm:$0xff] %v901_v49  ;;  %v1029_v49 = vld [vmem:[%s14014_s27 + $0x16f4] sm:$0xff] }
  0xf0   : >> { %904 = vst [vmem:[%s14010_s25 + $0x190] sm:$0xff] %v903_v50  ;;  %v1031_v50 = vld [vmem:[%s14014_s27 + $0x1728] sm:$0xff] }
  0xf1   : >> { %906 = vst [vmem:[%s14010_s25 + $0x198] sm:$0xff] %v905_v51  ;;  %v1033_v51 = vld [vmem:[%s14014_s27 + $0x175c] sm:$0xff] }
  0xf2   : >> { %908 = vst [vmem:[%s14010_s25 + $0x1a0] sm:$0xff] %v907_v52  ;;  %v1035_v52 = vld [vmem:[%s14014_s27 + $0x1790] sm:$0xff] }
  0xf3   : >> { %910 = vst [vmem:[%s14010_s25 + $0x1a8] sm:$0xff] %v909_v53  ;;  %v1037_v53 = vld [vmem:[%s14014_s27 + $0x17c4] sm:$0xff] }
  0xf4   : >> { %912 = vst [vmem:[%s14010_s25 + $0x1b0] sm:$0xff] %v911_v54  ;;  %v1039_v54 = vld [vmem:[%s14014_s27 + $0x17f8] sm:$0xff] }
  0xf5   : >> { %914 = vst [vmem:[%s14010_s25 + $0x1b8] sm:$0xff] %v913_v55  ;;  %v1041_v55 = vld [vmem:[%s14014_s27 + $0x182c] sm:$0xff] }
  0xf6   : >> { %916 = vst [vmem:[%s14010_s25 + $0x1c0] sm:$0xff] %v915_v56  ;;  %v1043_v56 = vld [vmem:[%s14014_s27 + $0x1860] sm:$0xff] }
  0xf7   : >> { %918 = vst [vmem:[%s14010_s25 + $0x1c8] sm:$0xff] %v917_v57  ;;  %v1045_v57 = vld [vmem:[%s14014_s27 + $0x1894] sm:$0xff] }
  0xf8   : >> { %920 = vst [vmem:[%s14010_s25 + $0x1d0] sm:$0xff] %v919_v58  ;;  %v1047_v58 = vld [vmem:[%s14014_s27 + $0x18c8] sm:$0xff] }
  0xf9   : >> { %922 = vst [vmem:[%s14010_s25 + $0x1d8] sm:$0xff] %v921_v59  ;;  %v1049_v59 = vld [vmem:[%s14014_s27 + $0x18fc] sm:$0xff] }
  0xfa   : >> { %924 = vst [vmem:[%s14010_s25 + $0x1e0] sm:$0xff] %v923_v60  ;;  %v1051_v60 = vld [vmem:[%s14014_s27 + $0x1930] sm:$0xff] }
  0xfb   : >> { %926 = vst [vmem:[%s14010_s25 + $0x1e8] sm:$0xff] %v925_v61  ;;  %v1053_v61 = vld [vmem:[%s14014_s27 + $0x1964] sm:$0xff] }
  0xfc   : >> { %928 = vst [vmem:[%s14010_s25 + $0x1f0] sm:$0xff] %v927_v62  ;;  %v1055_v62 = vld [vmem:[%s14014_s27 + $0x1998] sm:$0xff] }
  0xfd   : >> { %930 = vst [vmem:[%s14010_s25 + $0x1f8] sm:$0xff] %v929_v63  ;;  %v1057_v63 = vld [vmem:[%s14014_s27 + $0x19cc] sm:$0xff]  ;;  %s21544_s27 = smov %s14489_s12 }
  0xfe   : >> { %932 = vst [vmem:[%s14010_s25 + $0x200] sm:$0xff] %v931_v0 }
  0xff   : >> { %934 = vst [vmem:[%s14010_s25 + $0x208] sm:$0xff] %v933_v1 }
 0x100   : >> { %936 = vst [vmem:[%s14010_s25 + $0x210] sm:$0xff] %v935_v2 }
 0x101   : >> { %938 = vst [vmem:[%s14010_s25 + $0x218] sm:$0xff] %v937_v3 }
 0x102   : >> { %940 = vst [vmem:[%s14010_s25 + $0x220] sm:$0xff] %v939_v4 }
 0x103   : >> { %942 = vst [vmem:[%s14010_s25 + $0x228] sm:$0xff] %v941_v5 }
 0x104   : >> { %944 = vst [vmem:[%s14010_s25 + $0x230] sm:$0xff] %v943_v6 }
 0x105   : >> { %946 = vst [vmem:[%s14010_s25 + $0x238] sm:$0xff] %v945_v7 }
 0x106   : >> { %948 = vst [vmem:[%s14010_s25 + $0x240] sm:$0xff] %v947_v8 }
 0x107   : >> { %950 = vst [vmem:[%s14010_s25 + $0x248] sm:$0xff] %v949_v9 }
 0x108   : >> { %952 = vst [vmem:[%s14010_s25 + $0x250] sm:$0xff] %v951_v10 }
 0x109   : >> { %954 = vst [vmem:[%s14010_s25 + $0x258] sm:$0xff] %v953_v11 }
 0x10a   : >> { %956 = vst [vmem:[%s14010_s25 + $0x260] sm:$0xff] %v955_v12 }
 0x10b   : >> { %958 = vst [vmem:[%s14010_s25 + $0x268] sm:$0xff] %v957_v13 }
 0x10c   : >> { %960 = vst [vmem:[%s14010_s25 + $0x270] sm:$0xff] %v959_v14 }
 0x10d   : >> { %962 = vst [vmem:[%s14010_s25 + $0x278] sm:$0xff] %v961_v15 }
 0x10e   : >> { %964 = vst [vmem:[%s14010_s25 + $0x280] sm:$0xff] %v963_v16 }
 0x10f   : >> { %966 = vst [vmem:[%s14010_s25 + $0x288] sm:$0xff] %v965_v17 }
 0x110   : >> { %968 = vst [vmem:[%s14010_s25 + $0x290] sm:$0xff] %v967_v18 }
 0x111   : >> { %970 = vst [vmem:[%s14010_s25 + $0x298] sm:$0xff] %v969_v19 }
 0x112   : >> { %972 = vst [vmem:[%s14010_s25 + $0x2a0] sm:$0xff] %v971_v20 }
 0x113   : >> { %974 = vst [vmem:[%s14010_s25 + $0x2a8] sm:$0xff] %v973_v21 }
 0x114   : >> { %976 = vst [vmem:[%s14010_s25 + $0x2b0] sm:$0xff] %v975_v22 }
 0x115   : >> { %978 = vst [vmem:[%s14010_s25 + $0x2b8] sm:$0xff] %v977_v23 }
 0x116   : >> { %980 = vst [vmem:[%s14010_s25 + $0x2c0] sm:$0xff] %v979_v24 }
 0x117   : >> { %982 = vst [vmem:[%s14010_s25 + $0x2c8] sm:$0xff] %v981_v25 }
 0x118   : >> { %984 = vst [vmem:[%s14010_s25 + $0x2d0] sm:$0xff] %v983_v26 }
 0x119   : >> { %986 = vst [vmem:[%s14010_s25 + $0x2d8] sm:$0xff] %v985_v27 }
 0x11a   : >> { %988 = vst [vmem:[%s14010_s25 + $0x2e0] sm:$0xff] %v987_v28 }
 0x11b   : >> { %990 = vst [vmem:[%s14010_s25 + $0x2e8] sm:$0xff] %v989_v29 }
 0x11c   : >> { %992 = vst [vmem:[%s14010_s25 + $0x2f0] sm:$0xff] %v991_v30 }
 0x11d   : >> { %994 = vst [vmem:[%s14010_s25 + $0x2f8] sm:$0xff] %v993_v31 }
 0x11e   : >> { %996 = vst [vmem:[%s14010_s25 + $0x300] sm:$0xff] %v995_v32 }
 0x11f   : >> { %998 = vst [vmem:[%s14010_s25 + $0x308] sm:$0xff] %v997_v33 }
 0x120   : >> { %1000 = vst [vmem:[%s14010_s25 + $0x310] sm:$0xff] %v999_v34 }
 0x121   : >> { %1002 = vst [vmem:[%s14010_s25 + $0x318] sm:$0xff] %v1001_v35 }
 0x122   : >> { %1004 = vst [vmem:[%s14010_s25 + $0x320] sm:$0xff] %v1003_v36 }
 0x123   : >> { %1006 = vst [vmem:[%s14010_s25 + $0x328] sm:$0xff] %v1005_v37 }
 0x124   : >> { %1008 = vst [vmem:[%s14010_s25 + $0x330] sm:$0xff] %v1007_v38 }
 0x125   : >> { %1010 = vst [vmem:[%s14010_s25 + $0x338] sm:$0xff] %v1009_v39 }
 0x126   : >> { %1012 = vst [vmem:[%s14010_s25 + $0x340] sm:$0xff] %v1011_v40 }
 0x127   : >> { %1014 = vst [vmem:[%s14010_s25 + $0x348] sm:$0xff] %v1013_v41 }
 0x128   : >> { %1016 = vst [vmem:[%s14010_s25 + $0x350] sm:$0xff] %v1015_v42 }
 0x129   : >> { %1018 = vst [vmem:[%s14010_s25 + $0x358] sm:$0xff] %v1017_v43 }
 0x12a   : >> { %1020 = vst [vmem:[%s14010_s25 + $0x360] sm:$0xff] %v1019_v44 }
 0x12b   : >> { %1022 = vst [vmem:[%s14010_s25 + $0x368] sm:$0xff] %v1021_v45 }
 0x12c   : >> { %1024 = vst [vmem:[%s14010_s25 + $0x370] sm:$0xff] %v1023_v46 }
 0x12d   : >> { %1026 = vst [vmem:[%s14010_s25 + $0x378] sm:$0xff] %v1025_v47 }
 0x12e   : >> { %1028 = vst [vmem:[%s14010_s25 + $0x380] sm:$0xff] %v1027_v48 }
 0x12f   : >> { %1030 = vst [vmem:[%s14010_s25 + $0x388] sm:$0xff] %v1029_v49 }
 0x130   : >> { %1032 = vst [vmem:[%s14010_s25 + $0x390] sm:$0xff] %v1031_v50 }
 0x131   : >> { %1034 = vst [vmem:[%s14010_s25 + $0x398] sm:$0xff] %v1033_v51 }
 0x132   : >> { %1036 = vst [vmem:[%s14010_s25 + $0x3a0] sm:$0xff] %v1035_v52 }
 0x133   : >> { %1038 = vst [vmem:[%s14010_s25 + $0x3a8] sm:$0xff] %v1037_v53 }
 0x134   : >> { %1040 = vst [vmem:[%s14010_s25 + $0x3b0] sm:$0xff] %v1039_v54 }
 0x135   : >> { %1042 = vst [vmem:[%s14010_s25 + $0x3b8] sm:$0xff] %v1041_v55 }
 0x136   : >> { %1044 = vst [vmem:[%s14010_s25 + $0x3c0] sm:$0xff] %v1043_v56 }
 0x137   : >> { %1046 = vst [vmem:[%s14010_s25 + $0x3c8] sm:$0xff] %v1045_v57 }
 0x138   : >> { %1048 = vst [vmem:[%s14010_s25 + $0x3d0] sm:$0xff] %v1047_v58 }
 0x139   : >> { %1050 = vst [vmem:[%s14010_s25 + $0x3d8] sm:$0xff] %v1049_v59  ;;  %799 = sbr.rel (!%p796_p8) target bundleno = 189 (0xbd), region = 163 }
 0x13a   : >> { %1052 = vst [vmem:[%s14010_s25 + $0x3e0] sm:$0xff] %v1051_v60 }
 0x13b   : >> { %1054 = vst [vmem:[%s14010_s25 + $0x3e8] sm:$0xff] %v1053_v61 }
 0x13c   : >> { %1056 = vst [vmem:[%s14010_s25 + $0x3f0] sm:$0xff] %v1055_v62 }
 0x13d   : >> { %1058 = vst [vmem:[%s14010_s25 + $0x3f8] sm:$0xff] %v1057_v63  ;;  %s21543_s25 = smov %s14492_s13 }
 0x13e PF: > { %s14024_s9 = smov 1  }
 0x13f   : > { %s1066_s8 = sshll.u32 %s14024_s9, %s14128_s24 }
 0x140   : > { %s14749_s7 = sadd.s32 4294967295, %s1066_s8 }
 0x141   : > { %v1076_v0 = vld [vmem:[%s14443_s10] sm:%s14749_s7]  ;;  %v1078_v1 = vld [vmem:[%s14443_s10 + $0x34] sm:%s14749_s7] }
 0x142   : > { %1077 = vst [vmem:[%s14446_s11] sm:%s14749_s7] %v1076_v0  ;;  %v1080_v2 = vld [vmem:[%s14443_s10 + $0x68] sm:%s14749_s7] }
 0x143   : > { %1079 = vst [vmem:[%s14446_s11 + $0x8] sm:%s14749_s7] %v1078_v1  ;;  %v1082_v3 = vld [vmem:[%s14443_s10 + $0x9c] sm:%s14749_s7] }
 0x144   : > { %1081 = vst [vmem:[%s14446_s11 + $0x10] sm:%s14749_s7] %v1080_v2  ;;  %v1084_v4 = vld [vmem:[%s14443_s10 + $0xd0] sm:%s14749_s7] }
 0x145   : > { %1083 = vst [vmem:[%s14446_s11 + $0x18] sm:%s14749_s7] %v1082_v3  ;;  %v1086_v5 = vld [vmem:[%s14443_s10 + $0x104] sm:%s14749_s7] }
 0x146   : > { %1085 = vst [vmem:[%s14446_s11 + $0x20] sm:%s14749_s7] %v1084_v4  ;;  %v1088_v6 = vld [vmem:[%s14443_s10 + $0x138] sm:%s14749_s7] }
 0x147   : > { %1087 = vst [vmem:[%s14446_s11 + $0x28] sm:%s14749_s7] %v1086_v5  ;;  %v1090_v7 = vld [vmem:[%s14443_s10 + $0x16c] sm:%s14749_s7] }
 0x148   : > { %1089 = vst [vmem:[%s14446_s11 + $0x30] sm:%s14749_s7] %v1088_v6  ;;  %v1092_v8 = vld [vmem:[%s14443_s10 + $0x1a0] sm:%s14749_s7] }
 0x149   : > { %1091 = vst [vmem:[%s14446_s11 + $0x38] sm:%s14749_s7] %v1090_v7  ;;  %v1094_v9 = vld [vmem:[%s14443_s10 + $0x1d4] sm:%s14749_s7] }
 0x14a   : > { %1093 = vst [vmem:[%s14446_s11 + $0x40] sm:%s14749_s7] %v1092_v8  ;;  %v1096_v10 = vld [vmem:[%s14443_s10 + $0x208] sm:%s14749_s7] }
 0x14b   : > { %1095 = vst [vmem:[%s14446_s11 + $0x48] sm:%s14749_s7] %v1094_v9  ;;  %v1098_v11 = vld [vmem:[%s14443_s10 + $0x23c] sm:%s14749_s7] }
 0x14c   : > { %1097 = vst [vmem:[%s14446_s11 + $0x50] sm:%s14749_s7] %v1096_v10  ;;  %v1100_v12 = vld [vmem:[%s14443_s10 + $0x270] sm:%s14749_s7] }
 0x14d   : > { %1099 = vst [vmem:[%s14446_s11 + $0x58] sm:%s14749_s7] %v1098_v11  ;;  %v1102_v13 = vld [vmem:[%s14443_s10 + $0x2a4] sm:%s14749_s7] }
 0x14e   : > { %1101 = vst [vmem:[%s14446_s11 + $0x60] sm:%s14749_s7] %v1100_v12  ;;  %v1104_v14 = vld [vmem:[%s14443_s10 + $0x2d8] sm:%s14749_s7] }
 0x14f   : > { %1103 = vst [vmem:[%s14446_s11 + $0x68] sm:%s14749_s7] %v1102_v13  ;;  %v1106_v15 = vld [vmem:[%s14443_s10 + $0x30c] sm:%s14749_s7] }
 0x150   : > { %1105 = vst [vmem:[%s14446_s11 + $0x70] sm:%s14749_s7] %v1104_v14  ;;  %v1108_v16 = vld [vmem:[%s14443_s10 + $0x340] sm:%s14749_s7] }
 0x151   : > { %1107 = vst [vmem:[%s14446_s11 + $0x78] sm:%s14749_s7] %v1106_v15  ;;  %v1110_v17 = vld [vmem:[%s14443_s10 + $0x374] sm:%s14749_s7] }
 0x152   : > { %1109 = vst [vmem:[%s14446_s11 + $0x80] sm:%s14749_s7] %v1108_v16  ;;  %v1112_v18 = vld [vmem:[%s14443_s10 + $0x3a8] sm:%s14749_s7] }
 0x153   : > { %1111 = vst [vmem:[%s14446_s11 + $0x88] sm:%s14749_s7] %v1110_v17  ;;  %v1114_v19 = vld [vmem:[%s14443_s10 + $0x3dc] sm:%s14749_s7] }
 0x154   : > { %1113 = vst [vmem:[%s14446_s11 + $0x90] sm:%s14749_s7] %v1112_v18  ;;  %v1116_v20 = vld [vmem:[%s14443_s10 + $0x410] sm:%s14749_s7] }
 0x155   : > { %1115 = vst [vmem:[%s14446_s11 + $0x98] sm:%s14749_s7] %v1114_v19  ;;  %v1118_v21 = vld [vmem:[%s14443_s10 + $0x444] sm:%s14749_s7] }
 0x156   : > { %1117 = vst [vmem:[%s14446_s11 + $0xa0] sm:%s14749_s7] %v1116_v20  ;;  %v1120_v22 = vld [vmem:[%s14443_s10 + $0x478] sm:%s14749_s7] }
 0x157   : > { %1119 = vst [vmem:[%s14446_s11 + $0xa8] sm:%s14749_s7] %v1118_v21  ;;  %v1122_v23 = vld [vmem:[%s14443_s10 + $0x4ac] sm:%s14749_s7] }
 0x158   : > { %1121 = vst [vmem:[%s14446_s11 + $0xb0] sm:%s14749_s7] %v1120_v22  ;;  %v1124_v24 = vld [vmem:[%s14443_s10 + $0x4e0] sm:%s14749_s7] }
 0x159   : > { %1123 = vst [vmem:[%s14446_s11 + $0xb8] sm:%s14749_s7] %v1122_v23  ;;  %v1126_v25 = vld [vmem:[%s14443_s10 + $0x514] sm:%s14749_s7] }
 0x15a   : > { %1125 = vst [vmem:[%s14446_s11 + $0xc0] sm:%s14749_s7] %v1124_v24  ;;  %v1128_v26 = vld [vmem:[%s14443_s10 + $0x548] sm:%s14749_s7] }
 0x15b   : > { %1127 = vst [vmem:[%s14446_s11 + $0xc8] sm:%s14749_s7] %v1126_v25  ;;  %v1130_v27 = vld [vmem:[%s14443_s10 + $0x57c] sm:%s14749_s7] }
 0x15c   : > { %1129 = vst [vmem:[%s14446_s11 + $0xd0] sm:%s14749_s7] %v1128_v26  ;;  %v1132_v28 = vld [vmem:[%s14443_s10 + $0x5b0] sm:%s14749_s7] }
 0x15d   : > { %1131 = vst [vmem:[%s14446_s11 + $0xd8] sm:%s14749_s7] %v1130_v27  ;;  %v1134_v29 = vld [vmem:[%s14443_s10 + $0x5e4] sm:%s14749_s7] }
 0x15e   : > { %1133 = vst [vmem:[%s14446_s11 + $0xe0] sm:%s14749_s7] %v1132_v28  ;;  %v1136_v30 = vld [vmem:[%s14443_s10 + $0x618] sm:%s14749_s7] }
 0x15f   : > { %1135 = vst [vmem:[%s14446_s11 + $0xe8] sm:%s14749_s7] %v1134_v29  ;;  %v1138_v31 = vld [vmem:[%s14443_s10 + $0x64c] sm:%s14749_s7] }
 0x160   : > { %1137 = vst [vmem:[%s14446_s11 + $0xf0] sm:%s14749_s7] %v1136_v30  ;;  %v1140_v32 = vld [vmem:[%s14443_s10 + $0x680] sm:%s14749_s7] }
 0x161   : > { %1139 = vst [vmem:[%s14446_s11 + $0xf8] sm:%s14749_s7] %v1138_v31  ;;  %v1142_v33 = vld [vmem:[%s14443_s10 + $0x6b4] sm:%s14749_s7] }
 0x162   : > { %1141 = vst [vmem:[%s14446_s11 + $0x100] sm:%s14749_s7] %v1140_v32  ;;  %v1144_v34 = vld [vmem:[%s14443_s10 + $0x6e8] sm:%s14749_s7] }
 0x163   : > { %1143 = vst [vmem:[%s14446_s11 + $0x108] sm:%s14749_s7] %v1142_v33  ;;  %v1146_v35 = vld [vmem:[%s14443_s10 + $0x71c] sm:%s14749_s7] }
 0x164   : > { %1145 = vst [vmem:[%s14446_s11 + $0x110] sm:%s14749_s7] %v1144_v34  ;;  %v1148_v36 = vld [vmem:[%s14443_s10 + $0x750] sm:%s14749_s7] }
 0x165   : > { %1147 = vst [vmem:[%s14446_s11 + $0x118] sm:%s14749_s7] %v1146_v35  ;;  %v1150_v37 = vld [vmem:[%s14443_s10 + $0x784] sm:%s14749_s7] }
 0x166   : > { %1149 = vst [vmem:[%s14446_s11 + $0x120] sm:%s14749_s7] %v1148_v36  ;;  %v1152_v38 = vld [vmem:[%s14443_s10 + $0x7b8] sm:%s14749_s7] }
 0x167   : > { %1151 = vst [vmem:[%s14446_s11 + $0x128] sm:%s14749_s7] %v1150_v37  ;;  %v1154_v39 = vld [vmem:[%s14443_s10 + $0x7ec] sm:%s14749_s7] }
 0x168   : > { %1153 = vst [vmem:[%s14446_s11 + $0x130] sm:%s14749_s7] %v1152_v38  ;;  %v1156_v40 = vld [vmem:[%s14443_s10 + $0x820] sm:%s14749_s7] }
 0x169   : > { %1155 = vst [vmem:[%s14446_s11 + $0x138] sm:%s14749_s7] %v1154_v39  ;;  %v1158_v41 = vld [vmem:[%s14443_s10 + $0x854] sm:%s14749_s7] }
 0x16a   : > { %1157 = vst [vmem:[%s14446_s11 + $0x140] sm:%s14749_s7] %v1156_v40  ;;  %v1160_v42 = vld [vmem:[%s14443_s10 + $0x888] sm:%s14749_s7] }
 0x16b   : > { %1159 = vst [vmem:[%s14446_s11 + $0x148] sm:%s14749_s7] %v1158_v41  ;;  %v1162_v43 = vld [vmem:[%s14443_s10 + $0x8bc] sm:%s14749_s7] }
 0x16c   : > { %1161 = vst [vmem:[%s14446_s11 + $0x150] sm:%s14749_s7] %v1160_v42  ;;  %v1164_v44 = vld [vmem:[%s14443_s10 + $0x8f0] sm:%s14749_s7] }
 0x16d   : > { %1163 = vst [vmem:[%s14446_s11 + $0x158] sm:%s14749_s7] %v1162_v43  ;;  %v1166_v45 = vld [vmem:[%s14443_s10 + $0x924] sm:%s14749_s7] }
 0x16e   : > { %1165 = vst [vmem:[%s14446_s11 + $0x160] sm:%s14749_s7] %v1164_v44  ;;  %v1168_v46 = vld [vmem:[%s14443_s10 + $0x958] sm:%s14749_s7] }
 0x16f   : > { %1167 = vst [vmem:[%s14446_s11 + $0x168] sm:%s14749_s7] %v1166_v45  ;;  %v1170_v47 = vld [vmem:[%s14443_s10 + $0x98c] sm:%s14749_s7] }
 0x170   : > { %1169 = vst [vmem:[%s14446_s11 + $0x170] sm:%s14749_s7] %v1168_v46  ;;  %v1172_v48 = vld [vmem:[%s14443_s10 + $0x9c0] sm:%s14749_s7] }
 0x171   : > { %1171 = vst [vmem:[%s14446_s11 + $0x178] sm:%s14749_s7] %v1170_v47  ;;  %v1174_v49 = vld [vmem:[%s14443_s10 + $0x9f4] sm:%s14749_s7] }
 0x172   : > { %1173 = vst [vmem:[%s14446_s11 + $0x180] sm:%s14749_s7] %v1172_v48  ;;  %v1176_v50 = vld [vmem:[%s14443_s10 + $0xa28] sm:%s14749_s7] }
 0x173   : > { %1175 = vst [vmem:[%s14446_s11 + $0x188] sm:%s14749_s7] %v1174_v49  ;;  %v1178_v51 = vld [vmem:[%s14443_s10 + $0xa5c] sm:%s14749_s7] }
 0x174   : > { %1177 = vst [vmem:[%s14446_s11 + $0x190] sm:%s14749_s7] %v1176_v50  ;;  %v1180_v52 = vld [vmem:[%s14443_s10 + $0xa90] sm:%s14749_s7] }
 0x175   : > { %1179 = vst [vmem:[%s14446_s11 + $0x198] sm:%s14749_s7] %v1178_v51  ;;  %v1182_v53 = vld [vmem:[%s14443_s10 + $0xac4] sm:%s14749_s7] }
 0x176   : > { %1181 = vst [vmem:[%s14446_s11 + $0x1a0] sm:%s14749_s7] %v1180_v52  ;;  %v1184_v54 = vld [vmem:[%s14443_s10 + $0xaf8] sm:%s14749_s7] }
 0x177   : > { %1183 = vst [vmem:[%s14446_s11 + $0x1a8] sm:%s14749_s7] %v1182_v53  ;;  %v1186_v55 = vld [vmem:[%s14443_s10 + $0xb2c] sm:%s14749_s7] }
 0x178   : > { %1185 = vst [vmem:[%s14446_s11 + $0x1b0] sm:%s14749_s7] %v1184_v54  ;;  %v1188_v56 = vld [vmem:[%s14443_s10 + $0xb60] sm:%s14749_s7] }
 0x179   : > { %1187 = vst [vmem:[%s14446_s11 + $0x1b8] sm:%s14749_s7] %v1186_v55  ;;  %v1190_v57 = vld [vmem:[%s14443_s10 + $0xb94] sm:%s14749_s7] }
 0x17a   : > { %1189 = vst [vmem:[%s14446_s11 + $0x1c0] sm:%s14749_s7] %v1188_v56  ;;  %v1192_v58 = vld [vmem:[%s14443_s10 + $0xbc8] sm:%s14749_s7] }
 0x17b   : > { %1191 = vst [vmem:[%s14446_s11 + $0x1c8] sm:%s14749_s7] %v1190_v57  ;;  %v1194_v59 = vld [vmem:[%s14443_s10 + $0xbfc] sm:%s14749_s7] }
 0x17c   : > { %1193 = vst [vmem:[%s14446_s11 + $0x1d0] sm:%s14749_s7] %v1192_v58  ;;  %v1196_v60 = vld [vmem:[%s14443_s10 + $0xc30] sm:%s14749_s7] }
 0x17d   : > { %1195 = vst [vmem:[%s14446_s11 + $0x1d8] sm:%s14749_s7] %v1194_v59  ;;  %v1198_v61 = vld [vmem:[%s14443_s10 + $0xc64] sm:%s14749_s7] }
 0x17e   : > { %1197 = vst [vmem:[%s14446_s11 + $0x1e0] sm:%s14749_s7] %v1196_v60  ;;  %v1200_v62 = vld [vmem:[%s14443_s10 + $0xc98] sm:%s14749_s7] }
 0x17f   : > { %1199 = vst [vmem:[%s14446_s11 + $0x1e8] sm:%s14749_s7] %v1198_v61  ;;  %v1202_v63 = vld [vmem:[%s14443_s10 + $0xccc] sm:%s14749_s7] }
 0x180   : > { %1201 = vst [vmem:[%s14446_s11 + $0x1f0] sm:%s14749_s7] %v1200_v62  ;;  %v1204_v0 = vld [vmem:[%s14443_s10 + $0xd00] sm:%s14749_s7] }
 0x181   : > { %1203 = vst [vmem:[%s14446_s11 + $0x1f8] sm:%s14749_s7] %v1202_v63  ;;  %v1206_v1 = vld [vmem:[%s14443_s10 + $0xd34] sm:%s14749_s7] }
 0x182   : > { %1205 = vst [vmem:[%s14446_s11 + $0x200] sm:%s14749_s7] %v1204_v0  ;;  %v1208_v2 = vld [vmem:[%s14443_s10 + $0xd68] sm:%s14749_s7] }
 0x183   : > { %1207 = vst [vmem:[%s14446_s11 + $0x208] sm:%s14749_s7] %v1206_v1  ;;  %v1210_v3 = vld [vmem:[%s14443_s10 + $0xd9c] sm:%s14749_s7] }
 0x184   : > { %1209 = vst [vmem:[%s14446_s11 + $0x210] sm:%s14749_s7] %v1208_v2  ;;  %v1212_v4 = vld [vmem:[%s14443_s10 + $0xdd0] sm:%s14749_s7] }
 0x185   : > { %1211 = vst [vmem:[%s14446_s11 + $0x218] sm:%s14749_s7] %v1210_v3  ;;  %v1214_v5 = vld [vmem:[%s14443_s10 + $0xe04] sm:%s14749_s7] }
 0x186   : > { %1213 = vst [vmem:[%s14446_s11 + $0x220] sm:%s14749_s7] %v1212_v4  ;;  %v1216_v6 = vld [vmem:[%s14443_s10 + $0xe38] sm:%s14749_s7] }
 0x187   : > { %1215 = vst [vmem:[%s14446_s11 + $0x228] sm:%s14749_s7] %v1214_v5  ;;  %v1218_v7 = vld [vmem:[%s14443_s10 + $0xe6c] sm:%s14749_s7] }
 0x188   : > { %1217 = vst [vmem:[%s14446_s11 + $0x230] sm:%s14749_s7] %v1216_v6  ;;  %v1220_v8 = vld [vmem:[%s14443_s10 + $0xea0] sm:%s14749_s7] }
 0x189   : > { %1219 = vst [vmem:[%s14446_s11 + $0x238] sm:%s14749_s7] %v1218_v7  ;;  %v1222_v9 = vld [vmem:[%s14443_s10 + $0xed4] sm:%s14749_s7] }
 0x18a   : > { %1221 = vst [vmem:[%s14446_s11 + $0x240] sm:%s14749_s7] %v1220_v8  ;;  %v1224_v10 = vld [vmem:[%s14443_s10 + $0xf08] sm:%s14749_s7] }
 0x18b   : > { %1223 = vst [vmem:[%s14446_s11 + $0x248] sm:%s14749_s7] %v1222_v9  ;;  %v1226_v11 = vld [vmem:[%s14443_s10 + $0xf3c] sm:%s14749_s7] }
 0x18c   : > { %1225 = vst [vmem:[%s14446_s11 + $0x250] sm:%s14749_s7] %v1224_v10  ;;  %v1228_v12 = vld [vmem:[%s14443_s10 + $0xf70] sm:%s14749_s7] }
 0x18d   : > { %1227 = vst [vmem:[%s14446_s11 + $0x258] sm:%s14749_s7] %v1226_v11  ;;  %v1230_v13 = vld [vmem:[%s14443_s10 + $0xfa4] sm:%s14749_s7] }
 0x18e   : > { %1229 = vst [vmem:[%s14446_s11 + $0x260] sm:%s14749_s7] %v1228_v12  ;;  %v1232_v14 = vld [vmem:[%s14443_s10 + $0xfd8] sm:%s14749_s7] }
 0x18f   : > { %1231 = vst [vmem:[%s14446_s11 + $0x268] sm:%s14749_s7] %v1230_v13  ;;  %v1234_v15 = vld [vmem:[%s14443_s10 + $0x100c] sm:%s14749_s7] }
 0x190   : > { %1233 = vst [vmem:[%s14446_s11 + $0x270] sm:%s14749_s7] %v1232_v14  ;;  %v1236_v16 = vld [vmem:[%s14443_s10 + $0x1040] sm:%s14749_s7] }
 0x191   : > { %1235 = vst [vmem:[%s14446_s11 + $0x278] sm:%s14749_s7] %v1234_v15  ;;  %v1238_v17 = vld [vmem:[%s14443_s10 + $0x1074] sm:%s14749_s7] }
 0x192   : > { %1237 = vst [vmem:[%s14446_s11 + $0x280] sm:%s14749_s7] %v1236_v16  ;;  %v1240_v18 = vld [vmem:[%s14443_s10 + $0x10a8] sm:%s14749_s7] }
 0x193   : > { %1239 = vst [vmem:[%s14446_s11 + $0x288] sm:%s14749_s7] %v1238_v17  ;;  %v1242_v19 = vld [vmem:[%s14443_s10 + $0x10dc] sm:%s14749_s7] }
 0x194   : > { %1241 = vst [vmem:[%s14446_s11 + $0x290] sm:%s14749_s7] %v1240_v18  ;;  %v1244_v20 = vld [vmem:[%s14443_s10 + $0x1110] sm:%s14749_s7] }
 0x195   : > { %1243 = vst [vmem:[%s14446_s11 + $0x298] sm:%s14749_s7] %v1242_v19  ;;  %v1246_v21 = vld [vmem:[%s14443_s10 + $0x1144] sm:%s14749_s7] }
 0x196   : > { %1245 = vst [vmem:[%s14446_s11 + $0x2a0] sm:%s14749_s7] %v1244_v20  ;;  %v1248_v22 = vld [vmem:[%s14443_s10 + $0x1178] sm:%s14749_s7] }
 0x197   : > { %1247 = vst [vmem:[%s14446_s11 + $0x2a8] sm:%s14749_s7] %v1246_v21  ;;  %v1250_v23 = vld [vmem:[%s14443_s10 + $0x11ac] sm:%s14749_s7] }
 0x198   : > { %1249 = vst [vmem:[%s14446_s11 + $0x2b0] sm:%s14749_s7] %v1248_v22  ;;  %v1252_v24 = vld [vmem:[%s14443_s10 + $0x11e0] sm:%s14749_s7] }
 0x199   : > { %1251 = vst [vmem:[%s14446_s11 + $0x2b8] sm:%s14749_s7] %v1250_v23  ;;  %v1254_v25 = vld [vmem:[%s14443_s10 + $0x1214] sm:%s14749_s7] }
 0x19a   : > { %1253 = vst [vmem:[%s14446_s11 + $0x2c0] sm:%s14749_s7] %v1252_v24  ;;  %v1256_v26 = vld [vmem:[%s14443_s10 + $0x1248] sm:%s14749_s7] }
 0x19b   : > { %1255 = vst [vmem:[%s14446_s11 + $0x2c8] sm:%s14749_s7] %v1254_v25  ;;  %v1258_v27 = vld [vmem:[%s14443_s10 + $0x127c] sm:%s14749_s7] }
 0x19c   : > { %1257 = vst [vmem:[%s14446_s11 + $0x2d0] sm:%s14749_s7] %v1256_v26  ;;  %v1260_v28 = vld [vmem:[%s14443_s10 + $0x12b0] sm:%s14749_s7] }
 0x19d   : > { %1259 = vst [vmem:[%s14446_s11 + $0x2d8] sm:%s14749_s7] %v1258_v27  ;;  %v1262_v29 = vld [vmem:[%s14443_s10 + $0x12e4] sm:%s14749_s7] }
 0x19e   : > { %1261 = vst [vmem:[%s14446_s11 + $0x2e0] sm:%s14749_s7] %v1260_v28  ;;  %v1264_v30 = vld [vmem:[%s14443_s10 + $0x1318] sm:%s14749_s7] }
 0x19f   : > { %1263 = vst [vmem:[%s14446_s11 + $0x2e8] sm:%s14749_s7] %v1262_v29  ;;  %v1266_v31 = vld [vmem:[%s14443_s10 + $0x134c] sm:%s14749_s7] }
 0x1a0   : > { %1265 = vst [vmem:[%s14446_s11 + $0x2f0] sm:%s14749_s7] %v1264_v30  ;;  %v1268_v32 = vld [vmem:[%s14443_s10 + $0x1380] sm:%s14749_s7] }
 0x1a1   : > { %1267 = vst [vmem:[%s14446_s11 + $0x2f8] sm:%s14749_s7] %v1266_v31  ;;  %v1270_v33 = vld [vmem:[%s14443_s10 + $0x13b4] sm:%s14749_s7] }
 0x1a2   : > { %1269 = vst [vmem:[%s14446_s11 + $0x300] sm:%s14749_s7] %v1268_v32  ;;  %v1272_v34 = vld [vmem:[%s14443_s10 + $0x13e8] sm:%s14749_s7] }
 0x1a3   : > { %1271 = vst [vmem:[%s14446_s11 + $0x308] sm:%s14749_s7] %v1270_v33  ;;  %v1274_v35 = vld [vmem:[%s14443_s10 + $0x141c] sm:%s14749_s7] }
 0x1a4   : > { %1273 = vst [vmem:[%s14446_s11 + $0x310] sm:%s14749_s7] %v1272_v34  ;;  %v1276_v36 = vld [vmem:[%s14443_s10 + $0x1450] sm:%s14749_s7] }
 0x1a5   : > { %1275 = vst [vmem:[%s14446_s11 + $0x318] sm:%s14749_s7] %v1274_v35  ;;  %v1278_v37 = vld [vmem:[%s14443_s10 + $0x1484] sm:%s14749_s7] }
 0x1a6   : > { %1277 = vst [vmem:[%s14446_s11 + $0x320] sm:%s14749_s7] %v1276_v36  ;;  %v1280_v38 = vld [vmem:[%s14443_s10 + $0x14b8] sm:%s14749_s7] }
 0x1a7   : > { %1279 = vst [vmem:[%s14446_s11 + $0x328] sm:%s14749_s7] %v1278_v37  ;;  %v1282_v39 = vld [vmem:[%s14443_s10 + $0x14ec] sm:%s14749_s7] }
 0x1a8   : > { %1281 = vst [vmem:[%s14446_s11 + $0x330] sm:%s14749_s7] %v1280_v38  ;;  %v1284_v40 = vld [vmem:[%s14443_s10 + $0x1520] sm:%s14749_s7] }
 0x1a9   : > { %1283 = vst [vmem:[%s14446_s11 + $0x338] sm:%s14749_s7] %v1282_v39  ;;  %v1286_v41 = vld [vmem:[%s14443_s10 + $0x1554] sm:%s14749_s7] }
 0x1aa   : > { %1285 = vst [vmem:[%s14446_s11 + $0x340] sm:%s14749_s7] %v1284_v40  ;;  %v1288_v42 = vld [vmem:[%s14443_s10 + $0x1588] sm:%s14749_s7] }
 0x1ab   : > { %1287 = vst [vmem:[%s14446_s11 + $0x348] sm:%s14749_s7] %v1286_v41  ;;  %v1290_v43 = vld [vmem:[%s14443_s10 + $0x15bc] sm:%s14749_s7] }
 0x1ac   : > { %1289 = vst [vmem:[%s14446_s11 + $0x350] sm:%s14749_s7] %v1288_v42  ;;  %v1292_v44 = vld [vmem:[%s14443_s10 + $0x15f0] sm:%s14749_s7] }
 0x1ad   : > { %1291 = vst [vmem:[%s14446_s11 + $0x358] sm:%s14749_s7] %v1290_v43  ;;  %v1294_v45 = vld [vmem:[%s14443_s10 + $0x1624] sm:%s14749_s7] }
 0x1ae   : > { %1293 = vst [vmem:[%s14446_s11 + $0x360] sm:%s14749_s7] %v1292_v44  ;;  %v1296_v46 = vld [vmem:[%s14443_s10 + $0x1658] sm:%s14749_s7] }
 0x1af   : > { %1295 = vst [vmem:[%s14446_s11 + $0x368] sm:%s14749_s7] %v1294_v45  ;;  %v1298_v47 = vld [vmem:[%s14443_s10 + $0x168c] sm:%s14749_s7] }
 0x1b0   : > { %1297 = vst [vmem:[%s14446_s11 + $0x370] sm:%s14749_s7] %v1296_v46  ;;  %v1300_v48 = vld [vmem:[%s14443_s10 + $0x16c0] sm:%s14749_s7] }
 0x1b1   : > { %1299 = vst [vmem:[%s14446_s11 + $0x378] sm:%s14749_s7] %v1298_v47  ;;  %v1302_v49 = vld [vmem:[%s14443_s10 + $0x16f4] sm:%s14749_s7] }
 0x1b2   : > { %1301 = vst [vmem:[%s14446_s11 + $0x380] sm:%s14749_s7] %v1300_v48  ;;  %v1304_v50 = vld [vmem:[%s14443_s10 + $0x1728] sm:%s14749_s7] }
 0x1b3   : > { %1303 = vst [vmem:[%s14446_s11 + $0x388] sm:%s14749_s7] %v1302_v49  ;;  %v1306_v51 = vld [vmem:[%s14443_s10 + $0x175c] sm:%s14749_s7] }
 0x1b4   : > { %1305 = vst [vmem:[%s14446_s11 + $0x390] sm:%s14749_s7] %v1304_v50  ;;  %v1308_v52 = vld [vmem:[%s14443_s10 + $0x1790] sm:%s14749_s7] }
 0x1b5   : > { %1307 = vst [vmem:[%s14446_s11 + $0x398] sm:%s14749_s7] %v1306_v51  ;;  %v1310_v53 = vld [vmem:[%s14443_s10 + $0x17c4] sm:%s14749_s7] }
 0x1b6   : > { %1309 = vst [vmem:[%s14446_s11 + $0x3a0] sm:%s14749_s7] %v1308_v52  ;;  %v1312_v54 = vld [vmem:[%s14443_s10 + $0x17f8] sm:%s14749_s7] }
 0x1b7   : > { %1311 = vst [vmem:[%s14446_s11 + $0x3a8] sm:%s14749_s7] %v1310_v53  ;;  %v1314_v55 = vld [vmem:[%s14443_s10 + $0x182c] sm:%s14749_s7] }
 0x1b8   : > { %1313 = vst [vmem:[%s14446_s11 + $0x3b0] sm:%s14749_s7] %v1312_v54  ;;  %v1316_v56 = vld [vmem:[%s14443_s10 + $0x1860] sm:%s14749_s7] }
 0x1b9   : > { %1315 = vst [vmem:[%s14446_s11 + $0x3b8] sm:%s14749_s7] %v1314_v55  ;;  %v1318_v57 = vld [vmem:[%s14443_s10 + $0x1894] sm:%s14749_s7] }
 0x1ba   : > { %1317 = vst [vmem:[%s14446_s11 + $0x3c0] sm:%s14749_s7] %v1316_v56  ;;  %v1320_v58 = vld [vmem:[%s14443_s10 + $0x18c8] sm:%s14749_s7] }
 0x1bb   : > { %1319 = vst [vmem:[%s14446_s11 + $0x3c8] sm:%s14749_s7] %v1318_v57  ;;  %v1322_v59 = vld [vmem:[%s14443_s10 + $0x18fc] sm:%s14749_s7] }
 0x1bc   : > { %1321 = vst [vmem:[%s14446_s11 + $0x3d0] sm:%s14749_s7] %v1320_v58  ;;  %v1324_v60 = vld [vmem:[%s14443_s10 + $0x1930] sm:%s14749_s7] }
 0x1bd   : > { %1323 = vst [vmem:[%s14446_s11 + $0x3d8] sm:%s14749_s7] %v1322_v59  ;;  %v1326_v61 = vld [vmem:[%s14443_s10 + $0x1964] sm:%s14749_s7] }
 0x1be   : > { %1325 = vst [vmem:[%s14446_s11 + $0x3e0] sm:%s14749_s7] %v1324_v60  ;;  %v1328_v62 = vld [vmem:[%s14443_s10 + $0x1998] sm:%s14749_s7] }
 0x1bf   : > { %1327 = vst [vmem:[%s14446_s11 + $0x3e8] sm:%s14749_s7] %v1326_v61  ;;  %v1330_v63 = vld [vmem:[%s14443_s10 + $0x19cc] sm:%s14749_s7] }
 0x1c0   : > { %1329 = vst [vmem:[%s14446_s11 + $0x3f0] sm:%s14749_s7] %v1328_v62 }
 0x1c1   : > { %1331 = vst [vmem:[%s14446_s11 + $0x3f8] sm:%s14749_s7] %v1330_v63 }
 0x1c2 PF: > { %p9037_p10 = scmp.ge.u32.totalorder %s14122_s16, 8 }
 0x1c3   : > { %s14025_s24 = smov (!%p9037_p10), 1  }
 0x1c4   : > { %240 = sbr.rel (%p9037_p10) target bundleno = 586 (0x24a), region = 44  ;;  %s241_s15 = sshll.u32 (!%p9037_p10), %s14025_s24, %s14122_s16 }
 0x1c5   : > { %s15265_s10 = sadd.s32 (!%p9037_p10), 4294967295, %s241_s15 }
 0x1c9   : > { %v251_v0 = vld [vmem:[%s14120_s14] sm:%s15265_s10]  ;;  %v253_v1 = vld [vmem:[%s14120_s14 + $0x34] sm:%s15265_s10] }
 0x1ca   : > { %252 = vst [vmem:[%s14124_s17] sm:%s15265_s10] %v251_v0  ;;  %v255_v2 = vld [vmem:[%s14120_s14 + $0x68] sm:%s15265_s10] }
 0x1cb   : > { %254 = vst [vmem:[%s14124_s17 + $0x8] sm:%s15265_s10] %v253_v1  ;;  %v257_v3 = vld [vmem:[%s14120_s14 + $0x9c] sm:%s15265_s10] }
 0x1cc   : > { %256 = vst [vmem:[%s14124_s17 + $0x10] sm:%s15265_s10] %v255_v2  ;;  %v259_v4 = vld [vmem:[%s14120_s14 + $0xd0] sm:%s15265_s10] }
 0x1cd   : > { %258 = vst [vmem:[%s14124_s17 + $0x18] sm:%s15265_s10] %v257_v3  ;;  %v261_v5 = vld [vmem:[%s14120_s14 + $0x104] sm:%s15265_s10] }
 0x1ce   : > { %260 = vst [vmem:[%s14124_s17 + $0x20] sm:%s15265_s10] %v259_v4  ;;  %v263_v6 = vld [vmem:[%s14120_s14 + $0x138] sm:%s15265_s10] }
 0x1cf   : > { %262 = vst [vmem:[%s14124_s17 + $0x28] sm:%s15265_s10] %v261_v5  ;;  %v265_v7 = vld [vmem:[%s14120_s14 + $0x16c] sm:%s15265_s10] }
 0x1d0   : > { %264 = vst [vmem:[%s14124_s17 + $0x30] sm:%s15265_s10] %v263_v6  ;;  %v267_v8 = vld [vmem:[%s14120_s14 + $0x1a0] sm:%s15265_s10] }
 0x1d1   : > { %266 = vst [vmem:[%s14124_s17 + $0x38] sm:%s15265_s10] %v265_v7  ;;  %v269_v9 = vld [vmem:[%s14120_s14 + $0x1d4] sm:%s15265_s10] }
 0x1d2   : > { %268 = vst [vmem:[%s14124_s17 + $0x40] sm:%s15265_s10] %v267_v8  ;;  %v271_v10 = vld [vmem:[%s14120_s14 + $0x208] sm:%s15265_s10] }
 0x1d3   : > { %270 = vst [vmem:[%s14124_s17 + $0x48] sm:%s15265_s10] %v269_v9  ;;  %v273_v11 = vld [vmem:[%s14120_s14 + $0x23c] sm:%s15265_s10] }
 0x1d4   : > { %272 = vst [vmem:[%s14124_s17 + $0x50] sm:%s15265_s10] %v271_v10  ;;  %v275_v12 = vld [vmem:[%s14120_s14 + $0x270] sm:%s15265_s10] }
 0x1d5   : > { %274 = vst [vmem:[%s14124_s17 + $0x58] sm:%s15265_s10] %v273_v11  ;;  %v277_v13 = vld [vmem:[%s14120_s14 + $0x2a4] sm:%s15265_s10] }
 0x1d6   : > { %276 = vst [vmem:[%s14124_s17 + $0x60] sm:%s15265_s10] %v275_v12  ;;  %v279_v14 = vld [vmem:[%s14120_s14 + $0x2d8] sm:%s15265_s10] }
 0x1d7   : > { %278 = vst [vmem:[%s14124_s17 + $0x68] sm:%s15265_s10] %v277_v13  ;;  %v281_v15 = vld [vmem:[%s14120_s14 + $0x30c] sm:%s15265_s10] }
 0x1d8   : > { %280 = vst [vmem:[%s14124_s17 + $0x70] sm:%s15265_s10] %v279_v14  ;;  %v283_v16 = vld [vmem:[%s14120_s14 + $0x340] sm:%s15265_s10] }
 0x1d9   : > { %282 = vst [vmem:[%s14124_s17 + $0x78] sm:%s15265_s10] %v281_v15  ;;  %v285_v17 = vld [vmem:[%s14120_s14 + $0x374] sm:%s15265_s10] }
 0x1da   : > { %284 = vst [vmem:[%s14124_s17 + $0x80] sm:%s15265_s10] %v283_v16  ;;  %v287_v18 = vld [vmem:[%s14120_s14 + $0x3a8] sm:%s15265_s10] }
 0x1db   : > { %286 = vst [vmem:[%s14124_s17 + $0x88] sm:%s15265_s10] %v285_v17  ;;  %v289_v19 = vld [vmem:[%s14120_s14 + $0x3dc] sm:%s15265_s10] }
 0x1dc   : > { %288 = vst [vmem:[%s14124_s17 + $0x90] sm:%s15265_s10] %v287_v18  ;;  %v291_v20 = vld [vmem:[%s14120_s14 + $0x410] sm:%s15265_s10] }
 0x1dd   : > { %290 = vst [vmem:[%s14124_s17 + $0x98] sm:%s15265_s10] %v289_v19  ;;  %v293_v21 = vld [vmem:[%s14120_s14 + $0x444] sm:%s15265_s10] }
 0x1de   : > { %292 = vst [vmem:[%s14124_s17 + $0xa0] sm:%s15265_s10] %v291_v20  ;;  %v295_v22 = vld [vmem:[%s14120_s14 + $0x478] sm:%s15265_s10] }
 0x1df   : > { %294 = vst [vmem:[%s14124_s17 + $0xa8] sm:%s15265_s10] %v293_v21  ;;  %v297_v23 = vld [vmem:[%s14120_s14 + $0x4ac] sm:%s15265_s10] }
 0x1e0   : > { %296 = vst [vmem:[%s14124_s17 + $0xb0] sm:%s15265_s10] %v295_v22  ;;  %v299_v24 = vld [vmem:[%s14120_s14 + $0x4e0] sm:%s15265_s10] }
 0x1e1   : > { %298 = vst [vmem:[%s14124_s17 + $0xb8] sm:%s15265_s10] %v297_v23  ;;  %v301_v25 = vld [vmem:[%s14120_s14 + $0x514] sm:%s15265_s10] }
 0x1e2   : > { %300 = vst [vmem:[%s14124_s17 + $0xc0] sm:%s15265_s10] %v299_v24  ;;  %v303_v26 = vld [vmem:[%s14120_s14 + $0x548] sm:%s15265_s10] }
 0x1e3   : > { %302 = vst [vmem:[%s14124_s17 + $0xc8] sm:%s15265_s10] %v301_v25  ;;  %v305_v27 = vld [vmem:[%s14120_s14 + $0x57c] sm:%s15265_s10] }
 0x1e4   : > { %304 = vst [vmem:[%s14124_s17 + $0xd0] sm:%s15265_s10] %v303_v26  ;;  %v307_v28 = vld [vmem:[%s14120_s14 + $0x5b0] sm:%s15265_s10] }
 0x1e5   : > { %306 = vst [vmem:[%s14124_s17 + $0xd8] sm:%s15265_s10] %v305_v27  ;;  %v309_v29 = vld [vmem:[%s14120_s14 + $0x5e4] sm:%s15265_s10] }
 0x1e6   : > { %308 = vst [vmem:[%s14124_s17 + $0xe0] sm:%s15265_s10] %v307_v28  ;;  %v311_v30 = vld [vmem:[%s14120_s14 + $0x618] sm:%s15265_s10] }
 0x1e7   : > { %310 = vst [vmem:[%s14124_s17 + $0xe8] sm:%s15265_s10] %v309_v29  ;;  %v313_v31 = vld [vmem:[%s14120_s14 + $0x64c] sm:%s15265_s10] }
 0x1e8   : > { %312 = vst [vmem:[%s14124_s17 + $0xf0] sm:%s15265_s10] %v311_v30  ;;  %v315_v32 = vld [vmem:[%s14120_s14 + $0x680] sm:%s15265_s10] }
 0x1e9   : > { %314 = vst [vmem:[%s14124_s17 + $0xf8] sm:%s15265_s10] %v313_v31  ;;  %v317_v33 = vld [vmem:[%s14120_s14 + $0x6b4] sm:%s15265_s10] }
 0x1ea   : > { %316 = vst [vmem:[%s14124_s17 + $0x100] sm:%s15265_s10] %v315_v32  ;;  %v319_v34 = vld [vmem:[%s14120_s14 + $0x6e8] sm:%s15265_s10] }
 0x1eb   : > { %318 = vst [vmem:[%s14124_s17 + $0x108] sm:%s15265_s10] %v317_v33  ;;  %v321_v35 = vld [vmem:[%s14120_s14 + $0x71c] sm:%s15265_s10] }
 0x1ec   : > { %320 = vst [vmem:[%s14124_s17 + $0x110] sm:%s15265_s10] %v319_v34  ;;  %v323_v36 = vld [vmem:[%s14120_s14 + $0x750] sm:%s15265_s10] }
 0x1ed   : > { %322 = vst [vmem:[%s14124_s17 + $0x118] sm:%s15265_s10] %v321_v35  ;;  %v325_v37 = vld [vmem:[%s14120_s14 + $0x784] sm:%s15265_s10] }
 0x1ee   : > { %324 = vst [vmem:[%s14124_s17 + $0x120] sm:%s15265_s10] %v323_v36  ;;  %v327_v38 = vld [vmem:[%s14120_s14 + $0x7b8] sm:%s15265_s10] }
 0x1ef   : > { %326 = vst [vmem:[%s14124_s17 + $0x128] sm:%s15265_s10] %v325_v37  ;;  %v329_v39 = vld [vmem:[%s14120_s14 + $0x7ec] sm:%s15265_s10] }
 0x1f0   : > { %328 = vst [vmem:[%s14124_s17 + $0x130] sm:%s15265_s10] %v327_v38  ;;  %v331_v40 = vld [vmem:[%s14120_s14 + $0x820] sm:%s15265_s10] }
 0x1f1   : > { %330 = vst [vmem:[%s14124_s17 + $0x138] sm:%s15265_s10] %v329_v39  ;;  %v333_v41 = vld [vmem:[%s14120_s14 + $0x854] sm:%s15265_s10] }
 0x1f2   : > { %332 = vst [vmem:[%s14124_s17 + $0x140] sm:%s15265_s10] %v331_v40  ;;  %v335_v42 = vld [vmem:[%s14120_s14 + $0x888] sm:%s15265_s10] }
 0x1f3   : > { %334 = vst [vmem:[%s14124_s17 + $0x148] sm:%s15265_s10] %v333_v41  ;;  %v337_v43 = vld [vmem:[%s14120_s14 + $0x8bc] sm:%s15265_s10] }
 0x1f4   : > { %336 = vst [vmem:[%s14124_s17 + $0x150] sm:%s15265_s10] %v335_v42  ;;  %v339_v44 = vld [vmem:[%s14120_s14 + $0x8f0] sm:%s15265_s10] }
 0x1f5   : > { %338 = vst [vmem:[%s14124_s17 + $0x158] sm:%s15265_s10] %v337_v43  ;;  %v341_v45 = vld [vmem:[%s14120_s14 + $0x924] sm:%s15265_s10] }
 0x1f6   : > { %340 = vst [vmem:[%s14124_s17 + $0x160] sm:%s15265_s10] %v339_v44  ;;  %v343_v46 = vld [vmem:[%s14120_s14 + $0x958] sm:%s15265_s10] }
 0x1f7   : > { %342 = vst [vmem:[%s14124_s17 + $0x168] sm:%s15265_s10] %v341_v45  ;;  %v345_v47 = vld [vmem:[%s14120_s14 + $0x98c] sm:%s15265_s10] }
 0x1f8   : > { %344 = vst [vmem:[%s14124_s17 + $0x170] sm:%s15265_s10] %v343_v46  ;;  %v347_v48 = vld [vmem:[%s14120_s14 + $0x9c0] sm:%s15265_s10] }
 0x1f9   : > { %346 = vst [vmem:[%s14124_s17 + $0x178] sm:%s15265_s10] %v345_v47  ;;  %v349_v49 = vld [vmem:[%s14120_s14 + $0x9f4] sm:%s15265_s10] }
 0x1fa   : > { %348 = vst [vmem:[%s14124_s17 + $0x180] sm:%s15265_s10] %v347_v48  ;;  %v351_v50 = vld [vmem:[%s14120_s14 + $0xa28] sm:%s15265_s10] }
 0x1fb   : > { %350 = vst [vmem:[%s14124_s17 + $0x188] sm:%s15265_s10] %v349_v49  ;;  %v353_v51 = vld [vmem:[%s14120_s14 + $0xa5c] sm:%s15265_s10] }
 0x1fc   : > { %352 = vst [vmem:[%s14124_s17 + $0x190] sm:%s15265_s10] %v351_v50  ;;  %v355_v52 = vld [vmem:[%s14120_s14 + $0xa90] sm:%s15265_s10] }
 0x1fd   : > { %354 = vst [vmem:[%s14124_s17 + $0x198] sm:%s15265_s10] %v353_v51  ;;  %v357_v53 = vld [vmem:[%s14120_s14 + $0xac4] sm:%s15265_s10] }
 0x1fe   : > { %356 = vst [vmem:[%s14124_s17 + $0x1a0] sm:%s15265_s10] %v355_v52  ;;  %v359_v54 = vld [vmem:[%s14120_s14 + $0xaf8] sm:%s15265_s10] }
 0x1ff   : > { %358 = vst [vmem:[%s14124_s17 + $0x1a8] sm:%s15265_s10] %v357_v53  ;;  %v361_v55 = vld [vmem:[%s14120_s14 + $0xb2c] sm:%s15265_s10] }
 0x200   : > { %360 = vst [vmem:[%s14124_s17 + $0x1b0] sm:%s15265_s10] %v359_v54  ;;  %v363_v56 = vld [vmem:[%s14120_s14 + $0xb60] sm:%s15265_s10] }
 0x201   : > { %362 = vst [vmem:[%s14124_s17 + $0x1b8] sm:%s15265_s10] %v361_v55  ;;  %v365_v57 = vld [vmem:[%s14120_s14 + $0xb94] sm:%s15265_s10] }
 0x202   : > { %364 = vst [vmem:[%s14124_s17 + $0x1c0] sm:%s15265_s10] %v363_v56  ;;  %v367_v58 = vld [vmem:[%s14120_s14 + $0xbc8] sm:%s15265_s10] }
 0x203   : > { %366 = vst [vmem:[%s14124_s17 + $0x1c8] sm:%s15265_s10] %v365_v57  ;;  %v369_v59 = vld [vmem:[%s14120_s14 + $0xbfc] sm:%s15265_s10] }
 0x204   : > { %368 = vst [vmem:[%s14124_s17 + $0x1d0] sm:%s15265_s10] %v367_v58  ;;  %v371_v60 = vld [vmem:[%s14120_s14 + $0xc30] sm:%s15265_s10] }
 0x205   : > { %370 = vst [vmem:[%s14124_s17 + $0x1d8] sm:%s15265_s10] %v369_v59  ;;  %v373_v61 = vld [vmem:[%s14120_s14 + $0xc64] sm:%s15265_s10] }
 0x206   : > { %372 = vst [vmem:[%s14124_s17 + $0x1e0] sm:%s15265_s10] %v371_v60  ;;  %v375_v62 = vld [vmem:[%s14120_s14 + $0xc98] sm:%s15265_s10] }
 0x207   : > { %374 = vst [vmem:[%s14124_s17 + $0x1e8] sm:%s15265_s10] %v373_v61  ;;  %v377_v63 = vld [vmem:[%s14120_s14 + $0xccc] sm:%s15265_s10] }
 0x208   : > { %376 = vst [vmem:[%s14124_s17 + $0x1f0] sm:%s15265_s10] %v375_v62  ;;  %v379_v0 = vld [vmem:[%s14120_s14 + $0xd00] sm:%s15265_s10] }
 0x209   : > { %378 = vst [vmem:[%s14124_s17 + $0x1f8] sm:%s15265_s10] %v377_v63  ;;  %v381_v1 = vld [vmem:[%s14120_s14 + $0xd34] sm:%s15265_s10] }
 0x20a   : > { %380 = vst [vmem:[%s14124_s17 + $0x200] sm:%s15265_s10] %v379_v0  ;;  %v383_v2 = vld [vmem:[%s14120_s14 + $0xd68] sm:%s15265_s10] }
 0x20b   : > { %382 = vst [vmem:[%s14124_s17 + $0x208] sm:%s15265_s10] %v381_v1  ;;  %v385_v3 = vld [vmem:[%s14120_s14 + $0xd9c] sm:%s15265_s10] }
 0x20c   : > { %384 = vst [vmem:[%s14124_s17 + $0x210] sm:%s15265_s10] %v383_v2  ;;  %v387_v4 = vld [vmem:[%s14120_s14 + $0xdd0] sm:%s15265_s10] }
 0x20d   : > { %386 = vst [vmem:[%s14124_s17 + $0x218] sm:%s15265_s10] %v385_v3  ;;  %v389_v5 = vld [vmem:[%s14120_s14 + $0xe04] sm:%s15265_s10] }
 0x20e   : > { %388 = vst [vmem:[%s14124_s17 + $0x220] sm:%s15265_s10] %v387_v4  ;;  %v391_v6 = vld [vmem:[%s14120_s14 + $0xe38] sm:%s15265_s10] }
 0x20f   : > { %390 = vst [vmem:[%s14124_s17 + $0x228] sm:%s15265_s10] %v389_v5  ;;  %v393_v7 = vld [vmem:[%s14120_s14 + $0xe6c] sm:%s15265_s10] }
 0x210   : > { %392 = vst [vmem:[%s14124_s17 + $0x230] sm:%s15265_s10] %v391_v6  ;;  %v395_v8 = vld [vmem:[%s14120_s14 + $0xea0] sm:%s15265_s10] }
 0x211   : > { %394 = vst [vmem:[%s14124_s17 + $0x238] sm:%s15265_s10] %v393_v7  ;;  %v397_v9 = vld [vmem:[%s14120_s14 + $0xed4] sm:%s15265_s10] }
 0x212   : > { %396 = vst [vmem:[%s14124_s17 + $0x240] sm:%s15265_s10] %v395_v8  ;;  %v399_v10 = vld [vmem:[%s14120_s14 + $0xf08] sm:%s15265_s10] }
 0x213   : > { %398 = vst [vmem:[%s14124_s17 + $0x248] sm:%s15265_s10] %v397_v9  ;;  %v401_v11 = vld [vmem:[%s14120_s14 + $0xf3c] sm:%s15265_s10] }
 0x214   : > { %400 = vst [vmem:[%s14124_s17 + $0x250] sm:%s15265_s10] %v399_v10  ;;  %v403_v12 = vld [vmem:[%s14120_s14 + $0xf70] sm:%s15265_s10] }
 0x215   : > { %402 = vst [vmem:[%s14124_s17 + $0x258] sm:%s15265_s10] %v401_v11  ;;  %v405_v13 = vld [vmem:[%s14120_s14 + $0xfa4] sm:%s15265_s10] }
 0x216   : > { %404 = vst [vmem:[%s14124_s17 + $0x260] sm:%s15265_s10] %v403_v12  ;;  %v407_v14 = vld [vmem:[%s14120_s14 + $0xfd8] sm:%s15265_s10] }
 0x217   : > { %406 = vst [vmem:[%s14124_s17 + $0x268] sm:%s15265_s10] %v405_v13  ;;  %v409_v15 = vld [vmem:[%s14120_s14 + $0x100c] sm:%s15265_s10] }
 0x218   : > { %408 = vst [vmem:[%s14124_s17 + $0x270] sm:%s15265_s10] %v407_v14  ;;  %v411_v16 = vld [vmem:[%s14120_s14 + $0x1040] sm:%s15265_s10] }
 0x219   : > { %410 = vst [vmem:[%s14124_s17 + $0x278] sm:%s15265_s10] %v409_v15  ;;  %v413_v17 = vld [vmem:[%s14120_s14 + $0x1074] sm:%s15265_s10] }
 0x21a   : > { %412 = vst [vmem:[%s14124_s17 + $0x280] sm:%s15265_s10] %v411_v16  ;;  %v415_v18 = vld [vmem:[%s14120_s14 + $0x10a8] sm:%s15265_s10] }
 0x21b   : > { %414 = vst [vmem:[%s14124_s17 + $0x288] sm:%s15265_s10] %v413_v17  ;;  %v417_v19 = vld [vmem:[%s14120_s14 + $0x10dc] sm:%s15265_s10] }
 0x21c   : > { %416 = vst [vmem:[%s14124_s17 + $0x290] sm:%s15265_s10] %v415_v18  ;;  %v419_v20 = vld [vmem:[%s14120_s14 + $0x1110] sm:%s15265_s10] }
 0x21d   : > { %418 = vst [vmem:[%s14124_s17 + $0x298] sm:%s15265_s10] %v417_v19  ;;  %v421_v21 = vld [vmem:[%s14120_s14 + $0x1144] sm:%s15265_s10] }
 0x21e   : > { %420 = vst [vmem:[%s14124_s17 + $0x2a0] sm:%s15265_s10] %v419_v20  ;;  %v423_v22 = vld [vmem:[%s14120_s14 + $0x1178] sm:%s15265_s10] }
 0x21f   : > { %422 = vst [vmem:[%s14124_s17 + $0x2a8] sm:%s15265_s10] %v421_v21  ;;  %v425_v23 = vld [vmem:[%s14120_s14 + $0x11ac] sm:%s15265_s10] }
 0x220   : > { %424 = vst [vmem:[%s14124_s17 + $0x2b0] sm:%s15265_s10] %v423_v22  ;;  %v427_v24 = vld [vmem:[%s14120_s14 + $0x11e0] sm:%s15265_s10] }
 0x221   : > { %426 = vst [vmem:[%s14124_s17 + $0x2b8] sm:%s15265_s10] %v425_v23  ;;  %v429_v25 = vld [vmem:[%s14120_s14 + $0x1214] sm:%s15265_s10] }
 0x222   : > { %428 = vst [vmem:[%s14124_s17 + $0x2c0] sm:%s15265_s10] %v427_v24  ;;  %v431_v26 = vld [vmem:[%s14120_s14 + $0x1248] sm:%s15265_s10] }
 0x223   : > { %430 = vst [vmem:[%s14124_s17 + $0x2c8] sm:%s15265_s10] %v429_v25  ;;  %v433_v27 = vld [vmem:[%s14120_s14 + $0x127c] sm:%s15265_s10] }
 0x224   : > { %432 = vst [vmem:[%s14124_s17 + $0x2d0] sm:%s15265_s10] %v431_v26  ;;  %v435_v28 = vld [vmem:[%s14120_s14 + $0x12b0] sm:%s15265_s10] }
 0x225   : > { %434 = vst [vmem:[%s14124_s17 + $0x2d8] sm:%s15265_s10] %v433_v27  ;;  %v437_v29 = vld [vmem:[%s14120_s14 + $0x12e4] sm:%s15265_s10] }
 0x226   : > { %436 = vst [vmem:[%s14124_s17 + $0x2e0] sm:%s15265_s10] %v435_v28  ;;  %v439_v30 = vld [vmem:[%s14120_s14 + $0x1318] sm:%s15265_s10] }
 0x227   : > { %438 = vst [vmem:[%s14124_s17 + $0x2e8] sm:%s15265_s10] %v437_v29  ;;  %v441_v31 = vld [vmem:[%s14120_s14 + $0x134c] sm:%s15265_s10] }
 0x228   : > { %440 = vst [vmem:[%s14124_s17 + $0x2f0] sm:%s15265_s10] %v439_v30  ;;  %v443_v32 = vld [vmem:[%s14120_s14 + $0x1380] sm:%s15265_s10] }
 0x229   : > { %442 = vst [vmem:[%s14124_s17 + $0x2f8] sm:%s15265_s10] %v441_v31  ;;  %v445_v33 = vld [vmem:[%s14120_s14 + $0x13b4] sm:%s15265_s10] }
 0x22a   : > { %444 = vst [vmem:[%s14124_s17 + $0x300] sm:%s15265_s10] %v443_v32  ;;  %v447_v34 = vld [vmem:[%s14120_s14 + $0x13e8] sm:%s15265_s10] }
 0x22b   : > { %446 = vst [vmem:[%s14124_s17 + $0x308] sm:%s15265_s10] %v445_v33  ;;  %v449_v35 = vld [vmem:[%s14120_s14 + $0x141c] sm:%s15265_s10] }
 0x22c   : > { %448 = vst [vmem:[%s14124_s17 + $0x310] sm:%s15265_s10] %v447_v34  ;;  %v451_v36 = vld [vmem:[%s14120_s14 + $0x1450] sm:%s15265_s10] }
 0x22d   : > { %450 = vst [vmem:[%s14124_s17 + $0x318] sm:%s15265_s10] %v449_v35  ;;  %v453_v37 = vld [vmem:[%s14120_s14 + $0x1484] sm:%s15265_s10] }
 0x22e   : > { %452 = vst [vmem:[%s14124_s17 + $0x320] sm:%s15265_s10] %v451_v36  ;;  %v455_v38 = vld [vmem:[%s14120_s14 + $0x14b8] sm:%s15265_s10] }
 0x22f   : > { %454 = vst [vmem:[%s14124_s17 + $0x328] sm:%s15265_s10] %v453_v37  ;;  %v457_v39 = vld [vmem:[%s14120_s14 + $0x14ec] sm:%s15265_s10] }
 0x230   : > { %456 = vst [vmem:[%s14124_s17 + $0x330] sm:%s15265_s10] %v455_v38  ;;  %v459_v40 = vld [vmem:[%s14120_s14 + $0x1520] sm:%s15265_s10] }
 0x231   : > { %458 = vst [vmem:[%s14124_s17 + $0x338] sm:%s15265_s10] %v457_v39  ;;  %v461_v41 = vld [vmem:[%s14120_s14 + $0x1554] sm:%s15265_s10] }
 0x232   : > { %460 = vst [vmem:[%s14124_s17 + $0x340] sm:%s15265_s10] %v459_v40  ;;  %v463_v42 = vld [vmem:[%s14120_s14 + $0x1588] sm:%s15265_s10] }
 0x233   : > { %462 = vst [vmem:[%s14124_s17 + $0x348] sm:%s15265_s10] %v461_v41  ;;  %v465_v43 = vld [vmem:[%s14120_s14 + $0x15bc] sm:%s15265_s10] }
 0x234   : > { %464 = vst [vmem:[%s14124_s17 + $0x350] sm:%s15265_s10] %v463_v42  ;;  %v467_v44 = vld [vmem:[%s14120_s14 + $0x15f0] sm:%s15265_s10] }
 0x235   : > { %466 = vst [vmem:[%s14124_s17 + $0x358] sm:%s15265_s10] %v465_v43  ;;  %v469_v45 = vld [vmem:[%s14120_s14 + $0x1624] sm:%s15265_s10] }
 0x236   : > { %468 = vst [vmem:[%s14124_s17 + $0x360] sm:%s15265_s10] %v467_v44  ;;  %v471_v46 = vld [vmem:[%s14120_s14 + $0x1658] sm:%s15265_s10] }
 0x237   : > { %470 = vst [vmem:[%s14124_s17 + $0x368] sm:%s15265_s10] %v469_v45  ;;  %v473_v47 = vld [vmem:[%s14120_s14 + $0x168c] sm:%s15265_s10] }
 0x238   : > { %472 = vst [vmem:[%s14124_s17 + $0x370] sm:%s15265_s10] %v471_v46  ;;  %v475_v48 = vld [vmem:[%s14120_s14 + $0x16c0] sm:%s15265_s10] }
 0x239   : > { %474 = vst [vmem:[%s14124_s17 + $0x378] sm:%s15265_s10] %v473_v47  ;;  %v477_v49 = vld [vmem:[%s14120_s14 + $0x16f4] sm:%s15265_s10] }
 0x23a   : > { %476 = vst [vmem:[%s14124_s17 + $0x380] sm:%s15265_s10] %v475_v48  ;;  %v479_v50 = vld [vmem:[%s14120_s14 + $0x1728] sm:%s15265_s10] }
 0x23b   : > { %478 = vst [vmem:[%s14124_s17 + $0x388] sm:%s15265_s10] %v477_v49  ;;  %v481_v51 = vld [vmem:[%s14120_s14 + $0x175c] sm:%s15265_s10] }
 0x23c   : > { %480 = vst [vmem:[%s14124_s17 + $0x390] sm:%s15265_s10] %v479_v50  ;;  %v483_v52 = vld [vmem:[%s14120_s14 + $0x1790] sm:%s15265_s10] }
 0x23d   : > { %482 = vst [vmem:[%s14124_s17 + $0x398] sm:%s15265_s10] %v481_v51  ;;  %v485_v53 = vld [vmem:[%s14120_s14 + $0x17c4] sm:%s15265_s10] }
 0x23e   : > { %484 = vst [vmem:[%s14124_s17 + $0x3a0] sm:%s15265_s10] %v483_v52  ;;  %v487_v54 = vld [vmem:[%s14120_s14 + $0x17f8] sm:%s15265_s10] }
 0x23f   : > { %486 = vst [vmem:[%s14124_s17 + $0x3a8] sm:%s15265_s10] %v485_v53  ;;  %v489_v55 = vld [vmem:[%s14120_s14 + $0x182c] sm:%s15265_s10] }
 0x240   : > { %488 = vst [vmem:[%s14124_s17 + $0x3b0] sm:%s15265_s10] %v487_v54  ;;  %v491_v56 = vld [vmem:[%s14120_s14 + $0x1860] sm:%s15265_s10] }
 0x241   : > { %490 = vst [vmem:[%s14124_s17 + $0x3b8] sm:%s15265_s10] %v489_v55  ;;  %v493_v57 = vld [vmem:[%s14120_s14 + $0x1894] sm:%s15265_s10] }
 0x242   : > { %492 = vst [vmem:[%s14124_s17 + $0x3c0] sm:%s15265_s10] %v491_v56  ;;  %v495_v58 = vld [vmem:[%s14120_s14 + $0x18c8] sm:%s15265_s10] }
 0x243   : > { %494 = vst [vmem:[%s14124_s17 + $0x3c8] sm:%s15265_s10] %v493_v57  ;;  %v497_v59 = vld [vmem:[%s14120_s14 + $0x18fc] sm:%s15265_s10] }
 0x244   : > { %496 = vst [vmem:[%s14124_s17 + $0x3d0] sm:%s15265_s10] %v495_v58  ;;  %v499_v60 = vld [vmem:[%s14120_s14 + $0x1930] sm:%s15265_s10] }
 0x245   : > { %498 = vst [vmem:[%s14124_s17 + $0x3d8] sm:%s15265_s10] %v497_v59  ;;  %v501_v61 = vld [vmem:[%s14120_s14 + $0x1964] sm:%s15265_s10] }
 0x246   : > { %500 = vst [vmem:[%s14124_s17 + $0x3e0] sm:%s15265_s10] %v499_v60  ;;  %v503_v62 = vld [vmem:[%s14120_s14 + $0x1998] sm:%s15265_s10] }
 0x247   : > { %502 = vst [vmem:[%s14124_s17 + $0x3e8] sm:%s15265_s10] %v501_v61  ;;  %v505_v63 = vld [vmem:[%s14120_s14 + $0x19cc] sm:%s15265_s10] }
 0x248   : > { %504 = vst [vmem:[%s14124_s17 + $0x3f0] sm:%s15265_s10] %v503_v62 }
 0x249   : > { %506 = vst [vmem:[%s14124_s17 + $0x3f8] sm:%s15265_s10] %v505_v63 }
 0x24a PF: > { %p9039_p11 = scmp.ge.s32.totalorder %s13990_s23, 1  ;;  %p1348_p12 = scmp.lt.s32.totalorder %s13990_s23, 8 }
 0x24c   : > { %p1349_p13 = pnand %p9039_p11, %p1348_p12 }
 0x24d   : > { %s15782_s16 = sand.u32 (!%p1349_p13), 1, %s13974_s19   ;;  %s15785_s11 = sshll.u32 (!%p1349_p13), %s13982_s21, 1 }
 0x24e   : > { %1352 = sbr.rel (%p1349_p13) target bundleno = 2460 (0x99c), region = 88  ;;  %s9040_s14 = sshll.u32 (!%p1349_p13), %s15782_s16, 10 }
 0x24f   : > { %s9041_s17 = sshll.u32 (!%p1349_p13), %s15782_s16, 5  ;;  %p1420_p0 = scmp.lt.s32.totalorder (!%p1349_p13), %s15785_s11, 12 }
 0x250   : > { %s15797_s13 = scalar_lea.vmem (!%p1349_p13), [#allocation3], %s9040_s14  ;;  %s15799_s9 = scalar_lea.vmem (!%p1349_p13), [#allocation4], %s9041_s17 }
 0x251   : > { %p9043_p1 = scmp.ne.s32.totalorder (!%p1349_p13), %s13982_s21, 0 }
 0x253   : > { %s15791_s25 = scalar_select %p1420_p0, %s15785_s11, 12 }
 0x254   : > { %1439 = sbr.rel (%p9043_p1) target bundleno = 2150 (0x866), region = 96 }
 0x259   : > { %v9270_v0 = vld [vmem:[%s21517_s1 + $0x1c0] sm:$0xf]  ;;  %vm6297_vm0 = vcmask 523264  }
 0x25a   : > { %v12866_v1 = vld [vmem:[%s21517_s1 + $0x1dc] sm:$0xf0] }
 0x25b   : > { %v9526_v2 = vld [vmem:[%s21517_s1 + $0x3c0] sm:$0xf]  ;;  %v9271_v3 = vor.u32 %v12866_v1, %v9270_v0 }
 0x25c   : > { %v12930_v4 = vld [vmem:[%s21517_s1 + $0x3dc] sm:$0xf0] }
 0x25d   : > { %v9782_v5 = vld [vmem:[%s21517_s1 + $0x5c0] sm:$0xf]  ;;  %v9527_v7 = vor.u32 %v12930_v4, %v9526_v2  ;;  %6301 = vmatpush.bf16.msra.mxu0 %v9271_v3 }
 0x25e   : > { %v12994_v6 = vld [vmem:[%s21517_s1 + $0x5dc] sm:$0xf0] }
 0x25f   : > { %v9783_v8 = vor.u32 %v12994_v6, %v9782_v5  ;;  %v10038_v9 = vld [vmem:[%s21517_s1 + $0x7c0] sm:$0xf]  ;;  %6315 = vmatpush.bf16.msra.mxu1 %v9527_v7 }
 0x260   : > { %v13058_v10 = vld [vmem:[%s21517_s1 + $0x7dc] sm:$0xf0] }
 0x261   : > { %v9238_v11 = vld [vmem:[%s21517_s1 + $0x180] sm:$0xf]  ;;  %v10039_v12 = vor.u32 %v13058_v10, %v10038_v9  ;;  %6329 = vmatpush.bf16.msra.mxu2 %v9783_v8 }
 0x262   : > { %v12858_v13 = vld [vmem:[%s21517_s1 + $0x19c] sm:$0xf0] }
 0x263   : > { %v9494_v14 = vld [vmem:[%s21517_s1 + $0x380] sm:$0xf]  ;;  %v9239_v16 = vor.u32 %v12858_v13, %v9238_v11  ;;  %6343 = vmatpush.bf16.msra.mxu3 %v10039_v12 }
 0x264   : > { %v12922_v15 = vld [vmem:[%s21517_s1 + $0x39c] sm:$0xf0] }
 0x265   : > { %v9495_v17 = vor.u32 %v12922_v15, %v9494_v14  ;;  %v9750_v18 = vld [vmem:[%s21517_s1 + $0x580] sm:$0xf]  ;;  %6302 = vmatpush.bf16.msra.mxu0 %v9239_v16 }
 0x266   : > { %v12986_v19 = vld [vmem:[%s21517_s1 + $0x59c] sm:$0xf0] }
 0x267   : > { %v10006_v20 = vld [vmem:[%s21517_s1 + $0x780] sm:$0xf]  ;;  %v9751_v21 = vor.u32 %v12986_v19, %v9750_v18  ;;  %6316 = vmatpush.bf16.msra.mxu1 %v9495_v17 }
 0x268   : > { %v13050_v22 = vld [vmem:[%s21517_s1 + $0x79c] sm:$0xf0] }
 0x269   : > { %v9206_v23 = vld [vmem:[%s21517_s1 + $0x140] sm:$0xf]  ;;  %v10007_v25 = vor.u32 %v13050_v22, %v10006_v20  ;;  %6330 = vmatpush.bf16.msra.mxu2 %v9751_v21 }
 0x26a   : > { %v12850_v24 = vld [vmem:[%s21517_s1 + $0x15c] sm:$0xf0] }
 0x26b   : > { %v9462_v26 = vld [vmem:[%s21517_s1 + $0x340] sm:$0xf]  ;;  %v9207_v29 = vor.u32 %v12850_v24, %v9206_v23  ;;  %6344 = vmatpush.bf16.msra.mxu3 %v10007_v25 }
 0x26c   : > { %v12914_v27 = vld [vmem:[%s21517_s1 + $0x35c] sm:$0xf0] }
 0x26d   : > { %v9718_v28 = vld [vmem:[%s21517_s1 + $0x540] sm:$0xf]  ;;  %v9463_v33 = vor.u32 %v12914_v27, %v9462_v26  ;;  %6303 = vmatpush.bf16.msra.mxu0 %v9207_v29 }
 0x26e   : > { %v12978_v30 = vld [vmem:[%s21517_s1 + $0x55c] sm:$0xf0] }
 0x26f   : > { %v9974_v31 = vld [vmem:[%s21517_s1 + $0x740] sm:$0xf]  ;;  %v9719_v34 = vor.u32 %v12978_v30, %v9718_v28  ;;  %6317 = vmatpush.bf16.msra.mxu1 %v9463_v33 }
 0x270   : > { %v13042_v32 = vld [vmem:[%s21517_s1 + $0x75c] sm:$0xf0] }
 0x271   : > { %v9174_v35 = vld [vmem:[%s21517_s1 + $0x100] sm:$0xf]  ;;  %v9975_v38 = vor.u32 %v13042_v32, %v9974_v31  ;;  %6331 = vmatpush.bf16.msra.mxu2 %v9719_v34 }
 0x272   : > { %v12842_v36 = vld [vmem:[%s21517_s1 + $0x11c] sm:$0xf0] }
 0x273   : > { %v9430_v37 = vld [vmem:[%s21517_s1 + $0x300] sm:$0xf]  ;;  %v9175_v44 = vor.u32 %v12842_v36, %v9174_v35  ;;  %6345 = vmatpush.bf16.msra.mxu3 %v9975_v38 }
 0x274   : > { %v12906_v39 = vld [vmem:[%s21517_s1 + $0x31c] sm:$0xf0] }
 0x275   : > { %v9686_v40 = vld [vmem:[%s21517_s1 + $0x500] sm:$0xf]  ;;  %v9431_v45 = vor.u32 %v12906_v39, %v9430_v37  ;;  %6304 = vmatpush.bf16.msra.mxu0 %v9175_v44 }
 0x276   : > { %v12970_v41 = vld [vmem:[%s21517_s1 + $0x51c] sm:$0xf0] }
 0x277   : > { %v9942_v42 = vld [vmem:[%s21517_s1 + $0x700] sm:$0xf]  ;;  %v9687_v46 = vor.u32 %v12970_v41, %v9686_v40  ;;  %6318 = vmatpush.bf16.msra.mxu1 %v9431_v45 }
 0x278   : > { %v13034_v43 = vld [vmem:[%s21517_s1 + $0x71c] sm:$0xf0] }
 0x279   : > { %v9142_v47 = vld [vmem:[%s21517_s1 + $0xc0] sm:$0xf]  ;;  %v9943_v50 = vor.u32 %v13034_v43, %v9942_v42  ;;  %6332 = vmatpush.bf16.msra.mxu2 %v9687_v46 }
 0x27a   : > { %v12834_v48 = vld [vmem:[%s21517_s1 + $0xdc] sm:$0xf0] }
 0x27b   : > { %v9398_v49 = vld [vmem:[%s21517_s1 + $0x2c0] sm:$0xf]  ;;  %v9143_v56 = vor.u32 %v12834_v48, %v9142_v47  ;;  %6346 = vmatpush.bf16.msra.mxu3 %v9943_v50 }
 0x27c   : > { %v12898_v51 = vld [vmem:[%s21517_s1 + $0x2dc] sm:$0xf0] }
 0x27d   : > { %v9654_v52 = vld [vmem:[%s21517_s1 + $0x4c0] sm:$0xf]  ;;  %v9399_v57 = vor.u32 %v12898_v51, %v9398_v49  ;;  %6305 = vmatpush.bf16.msra.mxu0 %v9143_v56 }
 0x27e   : > { %v12962_v53 = vld [vmem:[%s21517_s1 + $0x4dc] sm:$0xf0] }
 0x27f   : > { %v9910_v54 = vld [vmem:[%s21517_s1 + $0x6c0] sm:$0xf]  ;;  %v9655_v58 = vor.u32 %v12962_v53, %v9654_v52  ;;  %6319 = vmatpush.bf16.msra.mxu1 %v9399_v57  ;;  %v1453_v53 = vld [vmem:[%s21516_s0 + $0x68] sm:$0xff] }
 0x280   : > { %v13026_v55 = vld [vmem:[%s21517_s1 + $0x6dc] sm:$0xf0] }
 0x281   : > { %v9110_v59 = vld [vmem:[%s21517_s1 + $0x80] sm:$0xf]  ;;  %v9911_v62 = vor.u32 %v13026_v55, %v9910_v54  ;;  %6333 = vmatpush.bf16.msra.mxu2 %v9655_v58  ;;  %v1442_v54 = vld [vmem:[%s21516_s0 + $0x10] sm:$0xff] }
 0x282   : > { %v12826_v60 = vld [vmem:[%s21517_s1 + $0x9c] sm:$0xf0] }
 0x283   : > { %v9366_v61 = vld [vmem:[%s21517_s1 + $0x280] sm:$0xf]  ;;  %v9111_v4 = vor.u32 %v12826_v60, %v9110_v59  ;;  %6347 = vmatpush.bf16.msra.mxu3 %v9911_v62  ;;  %v1455_v59 = vld [vmem:[%s21516_s0 + $0x78] sm:$0xff] }
 0x284   : > { %v12890_v63 = vld [vmem:[%s21517_s1 + $0x29c] sm:$0xf0] }
 0x285   : > { %v9622_v0 = vld [vmem:[%s21517_s1 + $0x480] sm:$0xf]  ;;  %v9367_v5 = vor.u32 %v12890_v63, %v9366_v61  ;;  %6306 = vmatpush.bf16.msra.mxu0 %v9111_v4 }
 0x286   : > { %v12954_v1 = vld [vmem:[%s21517_s1 + $0x49c] sm:$0xf0] }
 0x287   : > { %v9878_v2 = vld [vmem:[%s21517_s1 + $0x680] sm:$0xf]  ;;  %v9623_v6 = vor.u32 %v12954_v1, %v9622_v0  ;;  %6320 = vmatpush.bf16.msra.mxu1 %v9367_v5  ;;  %v16071_v1 = vpack.c.bf16 %v1455_v59, %v1442_v54 }
 0x288   : > { %v13018_v3 = vld [vmem:[%s21517_s1 + $0x69c] sm:$0xf0] }
 0x289   : > { %v9078_v7 = vld [vmem:[%s21517_s1 + $0x40] sm:$0xf]  ;;  %v9879_v10 = vor.u32 %v13018_v3, %v9878_v2  ;;  %6334 = vmatpush.bf16.msra.mxu2 %v9623_v6  ;;  %v1441_v6 = vld [vmem:[%s21516_s0 + $0x8] sm:$0xff] }
 0x28a   : > { %v12818_v8 = vld [vmem:[%s21517_s1 + $0x5c] sm:$0xf0] }
 0x28b   : > { %v9334_v9 = vld [vmem:[%s21517_s1 + $0x240] sm:$0xf]  ;;  %v9079_v16 = vor.u32 %v12818_v8, %v9078_v7  ;;  %6348 = vmatpush.bf16.msra.mxu3 %v9879_v10  ;;  %v1454_v7 = vld [vmem:[%s21516_s0 + $0x70] sm:$0xff]  ;;  %v1443_v8 = vld [vmem:[%s21516_s0 + $0x18] sm:$0xff] }
 0x28c   : > { %v12882_v11 = vld [vmem:[%s21517_s1 + $0x25c] sm:$0xf0]  ;;  %v16093_v10 = vpack.c.bf16 %v1454_v7, %v1441_v6 }
 0x28d   : > { %v9590_v12 = vld [vmem:[%s21517_s1 + $0x440] sm:$0xf]  ;;  %v9335_v19 = vor.u32 %v12882_v11, %v9334_v9  ;;  %6307 = vmatpush.bf16.msra.mxu0 %v9079_v16 }
 0x28e   : > { %v12946_v13 = vld [vmem:[%s21517_s1 + $0x45c] sm:$0xf0] }
 0x28f   : > { %v9846_v14 = vld [vmem:[%s21517_s1 + $0x640] sm:$0xf]  ;;  %v9591_v20 = vor.u32 %v12946_v13, %v9590_v12  ;;  %6321 = vmatpush.bf16.msra.mxu1 %v9335_v19 }
 0x290   : > { %v13010_v15 = vld [vmem:[%s21517_s1 + $0x65c] sm:$0xf0] }
 0x291   : > { %v9046_v17 = vld [vmem:[%s21517_s1] sm:$0xf]  ;;  %v9847_v24 = vor.u32 %v13010_v15, %v9846_v14  ;;  %6335 = vmatpush.bf16.msra.mxu2 %v9591_v20 }
 0x292   : > { %v12810_v18 = vld [vmem:[%s21517_s1 + $0x1c] sm:$0xf0] }
 0x293   : > { %v9302_v21 = vld [vmem:[%s21517_s1 + $0x200] sm:$0xf]  ;;  %v9047_v31 = vor.u32 %v12810_v18, %v9046_v17  ;;  %6349 = vmatpush.bf16.msra.mxu3 %v9847_v24 }
 0x294   : > { %v12874_v22 = vld [vmem:[%s21517_s1 + $0x21c] sm:$0xf0] }
 0x295   : > { %v9558_v23 = vld [vmem:[%s21517_s1 + $0x400] sm:$0xf]  ;;  %v9303_v35 = vor.u32 %v12874_v22, %v9302_v21  ;;  %6308 = vmatpush.bf16.msra.mxu0 %v9047_v31 }
 0x296   : > { %v12938_v25 = vld [vmem:[%s21517_s1 + $0x41c] sm:$0xf0] }
 0x297   : > { %v9814_v26 = vld [vmem:[%s21517_s1 + $0x600] sm:$0xf]  ;;  %v9559_v36 = vor.u32 %v12938_v25, %v9558_v23  ;;  %6322 = vmatpush.bf16.msra.mxu1 %v9303_v35 }
 0x298   : > { %v13002_v27 = vld [vmem:[%s21517_s1 + $0x61c] sm:$0xf0] }
 0x299   : > { %v10294_v28 = vld [vmem:[%s21517_s1 + $0x9c0] sm:$0xf]  ;;  %v9815_v39 = vor.u32 %v13002_v27, %v9814_v26  ;;  %6336 = vmatpush.bf16.msra.mxu2 %v9559_v36 }
 0x29a   : > { %v13122_v29 = vld [vmem:[%s21517_s1 + $0x9dc] sm:$0xf0]  ;;  %6323 = vmatmul.bf16.vlgmr.msra.gmra.mxu1 %v16093_v10 }
 0x29b   : > { %v10550_v30 = vld [vmem:[%s21517_s1 + $0xbc0] sm:$0xf]  ;;  %v10295_v40 = vor.u32 %v13122_v29, %v10294_v28  ;;  %6350 = vmatpush.bf16.msra.mxu3 %v9815_v39 }
 0x29c   : > { %v13186_v32 = vld [vmem:[%s21517_s1 + $0xbdc] sm:$0xf0]  ;;  %6337 = vmatmul.bf16.vlgmr.msra.gmra.mxu2 %v16071_v1 }
 0x29d   : > { %v10806_v33 = vld [vmem:[%s21517_s1 + $0xdc0] sm:$0xf]  ;;  %v10551_v43 = vor.u32 %v13186_v32, %v10550_v30  ;;  %6357 = vmatpush.bf16.msrb.mxu0 %v10295_v40 }
 0x29e   : > { %v13250_v34 = vld [vmem:[%s21517_s1 + $0xddc] sm:$0xf0] }
 0x29f   : > { %v11062_v37 = vld [vmem:[%s21517_s1 + $0xfc0] sm:$0xf]  ;;  %v10807_v44 = vor.u32 %v13250_v34, %v10806_v33  ;;  %6371 = vmatpush.bf16.msrb.mxu1 %v10551_v43 }
 0x2a0   : > { %v13314_v38 = vld [vmem:[%s21517_s1 + $0xfdc] sm:$0xf0] }
 0x2a1   : > { %v10262_v41 = vld [vmem:[%s21517_s1 + $0x980] sm:$0xf]  ;;  %v11063_v48 = vor.u32 %v13314_v38, %v11062_v37  ;;  %6385 = vmatpush.bf16.msrb.mxu2 %v10807_v44 }
 0x2a2   : > { %v13114_v42 = vld [vmem:[%s21517_s1 + $0x99c] sm:$0xf0] }
 0x2a3   : > { %v10518_v45 = vld [vmem:[%s21517_s1 + $0xb80] sm:$0xf]  ;;  %v10263_v55 = vor.u32 %v13114_v42, %v10262_v41  ;;  %6399 = vmatpush.bf16.msrb.mxu3 %v11063_v48 }
 0x2a4   : > { %v13178_v46 = vld [vmem:[%s21517_s1 + $0xb9c] sm:$0xf0] }
 0x2a5   : > { %v10774_v47 = vld [vmem:[%s21517_s1 + $0xd80] sm:$0xf]  ;;  %v10519_v60 = vor.u32 %v13178_v46, %v10518_v45  ;;  %6358 = vmatpush.bf16.msrb.mxu0 %v10263_v55 }
 0x2a6   : > { %v13242_v49 = vld [vmem:[%s21517_s1 + $0xd9c] sm:$0xf0] }
 0x2a7   : > { %v11030_v50 = vld [vmem:[%s21517_s1 + $0xf80] sm:$0xf]  ;;  %v10775_v61 = vor.u32 %v13242_v49, %v10774_v47  ;;  %6372 = vmatpush.bf16.msrb.mxu1 %v10519_v60 }
 0x2a8   : > { %v13306_v51 = vld [vmem:[%s21517_s1 + $0xf9c] sm:$0xf0] }
 0x2a9   : > { %v1440_v52 = vld [vmem:[%s21516_s0] sm:$0xff]  ;;  %v11031_v2 = vor.u32 %v13306_v51, %v11030_v50  ;;  %6386 = vmatpush.bf16.msrb.mxu2 %v10775_v61 }
 0x2aa   : > { %v10230_v56 = vld [vmem:[%s21517_s1 + $0x940] sm:$0xf]  ;;  %v16057_v58 = vpack.c.bf16 %v1453_v53, %v1440_v52 }
 0x2ab   : > { %v13106_v57 = vld [vmem:[%s21517_s1 + $0x95c] sm:$0xf0]  ;;  %6400 = vmatpush.bf16.msrb.mxu3 %v11031_v2 }
 0x2ac   : > { %v10486_v62 = vld [vmem:[%s21517_s1 + $0xb40] sm:$0xf]  ;;  %6309 = vmatmul.bf16.vlgmr.msra.gmra.mxu0 %v16057_v58  ;;  %v10231_v9 = vor.u32 %v13106_v57, %v10230_v56 }
 0x2ad   : > { %v13170_v63 = vld [vmem:[%s21517_s1 + $0xb5c] sm:$0xf0] }
 0x2ae   : > { %v10742_v0 = vld [vmem:[%s21517_s1 + $0xd40] sm:$0xf]  ;;  %v10487_v12 = vor.u32 %v13170_v63, %v10486_v62  ;;  %6359 = vmatpush.bf16.msrb.mxu0 %v10231_v9 }
 0x2af   : > { %v13234_v3 = vld [vmem:[%s21517_s1 + $0xd5c] sm:$0xf0] }
 0x2b0   : > { %v10998_v4 = vld [vmem:[%s21517_s1 + $0xf40] sm:$0xf]  ;;  %v10743_v13 = vor.u32 %v13234_v3, %v10742_v0  ;;  %6373 = vmatpush.bf16.msrb.mxu1 %v10487_v12 }
 0x2b1   : > { %v13298_v5 = vld [vmem:[%s21517_s1 + $0xf5c] sm:$0xf0] }
 0x2b2   : > { %v1456_v11 = vld [vmem:[%s21516_s0 + $0x80] sm:$0xff]  ;;  %v10999_v18 = vor.u32 %v13298_v5, %v10998_v4  ;;  %6387 = vmatpush.bf16.msrb.mxu2 %v10743_v13 }
 0x2b3   : > { %v10198_v14 = vld [vmem:[%s21517_s1 + $0x900] sm:$0xf]  ;;  %v16107_v17 = vpack.c.bf16 %v1456_v11, %v1443_v8 }
 0x2b4   : > { %v13098_v15 = vld [vmem:[%s21517_s1 + $0x91c] sm:$0xf0]  ;;  %6401 = vmatpush.bf16.msrb.mxu3 %v10999_v18 }
 0x2b5   : > { %v10454_v16 = vld [vmem:[%s21517_s1 + $0xb00] sm:$0xf]  ;;  %6351 = vmatmul.bf16.vlgmr.msra.gmra.mxu3 %v16107_v17  ;;  %v10199_v24 = vor.u32 %v13098_v15, %v10198_v14 }
 0x2b6   : > { %v13162_v19 = vld [vmem:[%s21517_s1 + $0xb1c] sm:$0xf0] }
 0x2b7   : > { %v10710_v20 = vld [vmem:[%s21517_s1 + $0xd00] sm:$0xf]  ;;  %v10455_v25 = vor.u32 %v13162_v19, %v10454_v16  ;;  %6360 = vmatpush.bf16.msrb.mxu0 %v10199_v24 }
 0x2b8   : > { %v13226_v21 = vld [vmem:[%s21517_s1 + $0xd1c] sm:$0xf0] }
 0x2b9   : > { %v10966_v22 = vld [vmem:[%s21517_s1 + $0xf00] sm:$0xf]  ;;  %v10711_v26 = vor.u32 %v13226_v21, %v10710_v20  ;;  %6374 = vmatpush.bf16.msrb.mxu1 %v10455_v25  ;;  %v1446_v25 = vld [vmem:[%s21516_s0 + $0x30] sm:$0xff] }
 0x2ba   : > { %v13290_v23 = vld [vmem:[%s21517_s1 + $0xf1c] sm:$0xf0] }
 0x2bb   : > { %v10166_v27 = vld [vmem:[%s21517_s1 + $0x8c0] sm:$0xf]  ;;  %v10967_v30 = vor.u32 %v13290_v23, %v10966_v22  ;;  %6388 = vmatpush.bf16.msrb.mxu2 %v10711_v26  ;;  %v1457_v22 = vld [vmem:[%s21516_s0 + $0x88] sm:$0xff]  ;;  %v1459_v26 = vld [vmem:[%s21516_s0 + $0x98] sm:$0xff] }
 0x2bc   : > { %v13090_v28 = vld [vmem:[%s21517_s1 + $0x8dc] sm:$0xf0] }
 0x2bd   : > { %v10422_v29 = vld [vmem:[%s21517_s1 + $0xac0] sm:$0xf]  ;;  %v10167_v36 = vor.u32 %v13090_v28, %v10166_v27  ;;  %6402 = vmatpush.bf16.msrb.mxu3 %v10967_v30  ;;  %v1445_v27 = vld [vmem:[%s21516_s0 + $0x28] sm:$0xff]  ;;  %v1458_v30 = vld [vmem:[%s21516_s0 + $0x90] sm:$0xff] }
 0x2be   : > { %v13154_v31 = vld [vmem:[%s21517_s1 + $0xadc] sm:$0xf0] }
 0x2bf   : > { %v10678_v32 = vld [vmem:[%s21517_s1 + $0xcc0] sm:$0xf]  ;;  %v10423_v37 = vor.u32 %v13154_v31, %v10422_v29  ;;  %6361 = vmatpush.bf16.msrb.mxu0 %v10167_v36  ;;  %v1447_v31 = vld [vmem:[%s21516_s0 + $0x38] sm:$0xff] }
 0x2c0   : > { %v13218_v33 = vld [vmem:[%s21517_s1 + $0xcdc] sm:$0xf0] }
 0x2c1   : > { %v10934_v34 = vld [vmem:[%s21517_s1 + $0xec0] sm:$0xf]  ;;  %v10679_v38 = vor.u32 %v13218_v33, %v10678_v32  ;;  %6375 = vmatpush.bf16.msrb.mxu1 %v10423_v37 }
 0x2c2   : > { %v13282_v35 = vld [vmem:[%s21517_s1 + $0xedc] sm:$0xf0] }
 0x2c3   : > { %v10134_v39 = vld [vmem:[%s21517_s1 + $0x880] sm:$0xf]  ;;  %v10935_v42 = vor.u32 %v13282_v35, %v10934_v34  ;;  %6389 = vmatpush.bf16.msrb.mxu2 %v10679_v38 }
 0x2c4   : > { %v13082_v40 = vld [vmem:[%s21517_s1 + $0x89c] sm:$0xf0] }
 0x2c5   : > { %v10390_v41 = vld [vmem:[%s21517_s1 + $0xa80] sm:$0xf]  ;;  %v10135_v48 = vor.u32 %v13082_v40, %v10134_v39  ;;  %6403 = vmatpush.bf16.msrb.mxu3 %v10935_v42 }
 0x2c6   : > { %v13146_v43 = vld [vmem:[%s21517_s1 + $0xa9c] sm:$0xf0] }
 0x2c7   : > { %v10646_v44 = vld [vmem:[%s21517_s1 + $0xc80] sm:$0xf]  ;;  %v10391_v50 = vor.u32 %v13146_v43, %v10390_v41  ;;  %6362 = vmatpush.bf16.msrb.mxu0 %v10135_v48  ;;  %v16290_v43 = vpack.c.bf16 %v1459_v26, %v1446_v25 }
 0x2c8   : > { %v13210_v45 = vld [vmem:[%s21517_s1 + $0xc9c] sm:$0xf0] }
 0x2c9   : > { %v10902_v46 = vld [vmem:[%s21517_s1 + $0xe80] sm:$0xf]  ;;  %v10647_v51 = vor.u32 %v13210_v45, %v10646_v44  ;;  %6376 = vmatpush.bf16.msrb.mxu1 %v10391_v50  ;;  %v16292_v44 = vpack.c.bf16 %v1458_v30, %v1445_v27 }
 0x2ca   : > { %v13274_v47 = vld [vmem:[%s21517_s1 + $0xe9c] sm:$0xf0] }
 0x2cb   : > { %v10102_v49 = vld [vmem:[%s21517_s1 + $0x840] sm:$0xf]  ;;  %v10903_v55 = vor.u32 %v13274_v47, %v10902_v46  ;;  %6390 = vmatpush.bf16.msrb.mxu2 %v10647_v51 }
 0x2cc   : > { %v13074_v52 = vld [vmem:[%s21517_s1 + $0x85c] sm:$0xf0] }
 0x2cd   : > { %v10358_v53 = vld [vmem:[%s21517_s1 + $0xa40] sm:$0xf]  ;;  %v10103_v63 = vor.u32 %v13074_v52, %v10102_v49  ;;  %6404 = vmatpush.bf16.msrb.mxu3 %v10903_v55 }
 0x2ce   : > { %v13138_v54 = vld [vmem:[%s21517_s1 + $0xa5c] sm:$0xf0] }
 0x2cf   : > { %v10614_v56 = vld [vmem:[%s21517_s1 + $0xc40] sm:$0xf]  ;;  %v10359_v5 = vor.u32 %v13138_v54, %v10358_v53  ;;  %6363 = vmatpush.bf16.msrb.mxu0 %v10103_v63 }
 0x2d0   : > { %v13202_v57 = vld [vmem:[%s21517_s1 + $0xc5c] sm:$0xf0] }
 0x2d1   : > { %v10870_v59 = vld [vmem:[%s21517_s1 + $0xe40] sm:$0xf]  ;;  %v10615_v6 = vor.u32 %v13202_v57, %v10614_v56  ;;  %6377 = vmatpush.bf16.msrb.mxu1 %v10359_v5 }
 0x2d2   : > { %v13266_v60 = vld [vmem:[%s21517_s1 + $0xe5c] sm:$0xf0] }
 0x2d3   : > { %v10070_v61 = vld [vmem:[%s21517_s1 + $0x800] sm:$0xf]  ;;  %v10871_v11 = vor.u32 %v13266_v60, %v10870_v59  ;;  %6391 = vmatpush.bf16.msrb.mxu2 %v10615_v6 }
 0x2d4   : > { %v13066_v62 = vld [vmem:[%s21517_s1 + $0x81c] sm:$0xf0] }
 0x2d5   : > { %v10326_v0 = vld [vmem:[%s21517_s1 + $0xa00] sm:$0xf]  ;;  %v10071_v19 = vor.u32 %v13066_v62, %v10070_v61  ;;  %6405 = vmatpush.bf16.msrb.mxu3 %v10871_v11 }
 0x2d6   : > { %v13130_v2 = vld [vmem:[%s21517_s1 + $0xa1c] sm:$0xf0] }
 0x2d7   : > { %v10582_v3 = vld [vmem:[%s21517_s1 + $0xc00] sm:$0xf]  ;;  %v10327_v23 = vor.u32 %v13130_v2, %v10326_v0  ;;  %6364 = vmatpush.bf16.msrb.mxu0 %v10071_v19 }
 0x2d8   : > { %v13194_v4 = vld [vmem:[%s21517_s1 + $0xc1c] sm:$0xf0] }
 0x2d9   : > { %v10838_v7 = vld [vmem:[%s21517_s1 + $0xe00] sm:$0xf]  ;;  %v10583_v24 = vor.u32 %v13194_v4, %v10582_v3  ;;  %6378 = vmatpush.bf16.msrb.mxu1 %v10327_v23 }
 0x2da   : > { %v13258_v8 = vld [vmem:[%s21517_s1 + $0xe1c] sm:$0xf0] }
 0x2db   : > { %v11318_v9 = vld [vmem:[%s21517_s1 + $0x11c0] sm:$0xf]  ;;  %v10839_v28 = vor.u32 %v13258_v8, %v10838_v7  ;;  %6392 = vmatpush.bf16.msrb.mxu2 %v10583_v24 }
 0x2dc   : > { %v13378_v12 = vld [vmem:[%s21517_s1 + $0x11dc] sm:$0xf0]  ;;  %6379 = vmatmul.bf16.vlgmr.msrb.gmra.mxu1 %v16292_v44 }
 0x2dd   : > { %v11574_v13 = vld [vmem:[%s21517_s1 + $0x13c0] sm:$0xf]  ;;  %v11319_v29 = vor.u32 %v13378_v12, %v11318_v9  ;;  %6406 = vmatpush.bf16.msrb.mxu3 %v10839_v28 }
 0x2de   : > { %v13442_v14 = vld [vmem:[%s21517_s1 + $0x13dc] sm:$0xf0]  ;;  %6393 = vmatmul.bf16.vlgmr.msrb.gmra.mxu2 %v16290_v43 }
 0x2df   : > { %v11830_v15 = vld [vmem:[%s21517_s1 + $0x15c0] sm:$0xf]  ;;  %v11575_v33 = vor.u32 %v13442_v14, %v11574_v13  ;;  %6413 = vmatpush.bf16.msra.mxu0 %v11319_v29 }
 0x2e0   : > { %v13506_v16 = vld [vmem:[%s21517_s1 + $0x15dc] sm:$0xf0] }
 0x2e1   : > { %v12086_v18 = vld [vmem:[%s21517_s1 + $0x17c0] sm:$0xf]  ;;  %v11831_v34 = vor.u32 %v13506_v16, %v11830_v15  ;;  %6427 = vmatpush.bf16.msra.mxu1 %v11575_v33 }
 0x2e2   : > { %v13570_v20 = vld [vmem:[%s21517_s1 + $0x17dc] sm:$0xf0] }
 0x2e3   : > { %v1444_v21 = vld [vmem:[%s21516_s0 + $0x20] sm:$0xff]  ;;  %v12087_v38 = vor.u32 %v13570_v20, %v12086_v18  ;;  %6441 = vmatpush.bf16.msra.mxu2 %v11831_v34 }
 0x2e4   : > { %v1460_v32 = vld [vmem:[%s21516_s0 + $0xa0] sm:$0xff]  ;;  %v16279_v39 = vpack.c.bf16 %v1457_v22, %v1444_v21 }
 0x2e5   : > { %v11286_v35 = vld [vmem:[%s21517_s1 + $0x1180] sm:$0xf]  ;;  %v16300_v47 = vpack.c.bf16 %v1460_v32, %v1447_v31  ;;  %6455 = vmatpush.bf16.msra.mxu3 %v12087_v38 }
 0x2e6   : > { %v13370_v36 = vld [vmem:[%s21517_s1 + $0x119c] sm:$0xf0]  ;;  %6365 = vmatmul.bf16.vlgmr.msrb.gmra.mxu0 %v16279_v39 }
 0x2e7   : > { %v11542_v37 = vld [vmem:[%s21517_s1 + $0x1380] sm:$0xf]  ;;  %v11287_v48 = vor.u32 %v13370_v36, %v11286_v35  ;;  %6407 = vmatmul.bf16.vlgmr.msrb.gmra.mxu3 %v16300_v47 }
 0x2e8   : > { %v13434_v40 = vld [vmem:[%s21517_s1 + $0x139c] sm:$0xf0] }
 0x2e9   : > { %v11798_v41 = vld [vmem:[%s21517_s1 + $0x1580] sm:$0xf]  ;;  %v11543_v49 = vor.u32 %v13434_v40, %v11542_v37  ;;  %6414 = vmatpush.bf16.msra.mxu0 %v11287_v48 }
 0x2ea   : > { %v13498_v42 = vld [vmem:[%s21517_s1 + $0x159c] sm:$0xf0] }
 0x2eb   : > { %v12054_v45 = vld [vmem:[%s21517_s1 + $0x1780] sm:$0xf]  ;;  %v11799_v50 = vor.u32 %v13498_v42, %v11798_v41  ;;  %6428 = vmatpush.bf16.msra.mxu1 %v11543_v49 }
 0x2ec   : > { %v13562_v46 = vld [vmem:[%s21517_s1 + $0x179c] sm:$0xf0] }
 0x2ed   : > { %v11254_v51 = vld [vmem:[%s21517_s1 + $0x1140] sm:$0xf]  ;;  %v12055_v54 = vor.u32 %v13562_v46, %v12054_v45  ;;  %6442 = vmatpush.bf16.msra.mxu2 %v11799_v50 }
 0x2ee   : > { %v13362_v52 = vld [vmem:[%s21517_s1 + $0x115c] sm:$0xf0] }
 0x2ef   : > { %v11510_v53 = vld [vmem:[%s21517_s1 + $0x1340] sm:$0xf]  ;;  %v11255_v61 = vor.u32 %v13362_v52, %v11254_v51  ;;  %6456 = vmatpush.bf16.msra.mxu3 %v12055_v54 }
 0x2f0   : > { %v13426_v55 = vld [vmem:[%s21517_s1 + $0x135c] sm:$0xf0] }
 0x2f1   : > { %v11766_v56 = vld [vmem:[%s21517_s1 + $0x1540] sm:$0xf]  ;;  %v11511_v62 = vor.u32 %v13426_v55, %v11510_v53  ;;  %6415 = vmatpush.bf16.msra.mxu0 %v11255_v61 }
 0x2f2   : > { %v13490_v57 = vld [vmem:[%s21517_s1 + $0x155c] sm:$0xf0] }
 0x2f3   : > { %v12022_v59 = vld [vmem:[%s21517_s1 + $0x1740] sm:$0xf]  ;;  %v11767_v63 = vor.u32 %v13490_v57, %v11766_v56  ;;  %6429 = vmatpush.bf16.msra.mxu1 %v11511_v62 }
 0x2f4   : > { %v13554_v60 = vld [vmem:[%s21517_s1 + $0x175c] sm:$0xf0] }
 0x2f5   : > { %v11222_v0 = vld [vmem:[%s21517_s1 + $0x1100] sm:$0xf]  ;;  %v12023_v4 = vor.u32 %v13554_v60, %v12022_v59  ;;  %6443 = vmatpush.bf16.msra.mxu2 %v11767_v63 }
 0x2f6   : > { %v13354_v2 = vld [vmem:[%s21517_s1 + $0x111c] sm:$0xf0] }
 0x2f7   : > { %v11478_v3 = vld [vmem:[%s21517_s1 + $0x1300] sm:$0xf]  ;;  %v11223_v11 = vor.u32 %v13354_v2, %v11222_v0  ;;  %6457 = vmatpush.bf16.msra.mxu3 %v12023_v4  ;;  %v12862_v4 = vld [vmem:[%s21517_s1 + $0x1c4] sm:$0xf] }
 0x2f8   : > { %v13418_v5 = vld [vmem:[%s21517_s1 + $0x131c] sm:$0xf0] }
 0x2f9   : > { %v11734_v6 = vld [vmem:[%s21517_s1 + $0x1500] sm:$0xf]  ;;  %v11479_v12 = vor.u32 %v13418_v5, %v11478_v3  ;;  %6416 = vmatpush.bf16.msra.mxu0 %v11223_v11  ;;  %v9272_v5 = vld [vmem:[%s21517_s1 + $0x1e0] sm:$0xf0] }
 0x2fa   : > { %v13482_v7 = vld [vmem:[%s21517_s1 + $0x151c] sm:$0xf0]  ;;  %v9784_v11 = vld [vmem:[%s21517_s1 + $0x5e0] sm:$0xf0] }
 0x2fb   : > { %v11990_v8 = vld [vmem:[%s21517_s1 + $0x1700] sm:$0xf]  ;;  %v11735_v13 = vor.u32 %v13482_v7, %v11734_v6  ;;  %6430 = vmatpush.bf16.msra.mxu1 %v11479_v12  ;;  %v12926_v6 = vld [vmem:[%s21517_s1 + $0x3c4] sm:$0xf] }
 0x2fc   : > { %v13546_v9 = vld [vmem:[%s21517_s1 + $0x171c] sm:$0xf0]  ;;  %v9528_v7 = vld [vmem:[%s21517_s1 + $0x3e0] sm:$0xf0] }
 0x2fd   : > { %v11190_v14 = vld [vmem:[%s21517_s1 + $0x10c0] sm:$0xf]  ;;  %v11991_v18 = vor.u32 %v13546_v9, %v11990_v8  ;;  %6444 = vmatpush.bf16.msra.mxu2 %v11735_v13  ;;  %v12990_v8 = vld [vmem:[%s21517_s1 + $0x5c4] sm:$0xf]  ;;  %v1461_v13 = vld [vmem:[%s21516_s0 + $0xa8] sm:$0xff] }
 0x2fe   : > { %v13346_v15 = vld [vmem:[%s21517_s1 + $0x10dc] sm:$0xf0] }
 0x2ff   : > { %v11446_v16 = vld [vmem:[%s21517_s1 + $0x12c0] sm:$0xf]  ;;  %v11191_v24 = vor.u32 %v13346_v15, %v11190_v14  ;;  %6458 = vmatpush.bf16.msra.mxu3 %v11991_v18  ;;  %v1463_v18 = vld [vmem:[%s21516_s0 + $0xb8] sm:$0xff] }
 0x300   : > { %v13410_v19 = vld [vmem:[%s21517_s1 + $0x12dc] sm:$0xf0] }
 0x301   : > { %v11702_v20 = vld [vmem:[%s21517_s1 + $0x14c0] sm:$0xf]  ;;  %v11447_v25 = vor.u32 %v13410_v19, %v11446_v16  ;;  %6417 = vmatpush.bf16.msra.mxu0 %v11191_v24  ;;  %v1450_v16 = vld [vmem:[%s21516_s0 + $0x50] sm:$0xff]  ;;  %v1449_v19 = vld [vmem:[%s21516_s0 + $0x48] sm:$0xff] }
 0x302   : > { %v13474_v21 = vld [vmem:[%s21517_s1 + $0x14dc] sm:$0xf0] }
 0x303   : > { %v11958_v22 = vld [vmem:[%s21517_s1 + $0x16c0] sm:$0xf]  ;;  %v11703_v26 = vor.u32 %v13474_v21, %v11702_v20  ;;  %6431 = vmatpush.bf16.msra.mxu1 %v11447_v25  ;;  %v9275_v25 = vor.u32 %v12862_v4, %v9272_v5  ;;  %v12966_v4 = vld [vmem:[%s21517_s1 + $0x504] sm:$0xf] }
 0x304   : > { %v13538_v23 = vld [vmem:[%s21517_s1 + $0x16dc] sm:$0xf0]  ;;  %v9688_v5 = vld [vmem:[%s21517_s1 + $0x520] sm:$0xf0] }
 0x305   : > { %v11158_v27 = vld [vmem:[%s21517_s1 + $0x1080] sm:$0xf]  ;;  %v11959_v30 = vor.u32 %v13538_v23, %v11958_v22  ;;  %6445 = vmatpush.bf16.msra.mxu2 %v11703_v26  ;;  %v1462_v22 = vld [vmem:[%s21516_s0 + $0xb0] sm:$0xff]  ;;  %v1451_v23 = vld [vmem:[%s21516_s0 + $0x58] sm:$0xff]  ;;  %v9531_v26 = vor.u32 %v12926_v6, %v9528_v7 }
 0x306   : > { %v13338_v28 = vld [vmem:[%s21517_s1 + $0x109c] sm:$0xf0]  ;;  %v13054_v6 = vld [vmem:[%s21517_s1 + $0x7c4] sm:$0xf] }
 0x307   : > { %v11414_v29 = vld [vmem:[%s21517_s1 + $0x1280] sm:$0xf]  ;;  %v11159_v36 = vor.u32 %v13338_v28, %v11158_v27  ;;  %6459 = vmatpush.bf16.msra.mxu3 %v11959_v30  ;;  %v9787_v30 = vor.u32 %v12990_v8, %v9784_v11  ;;  %v10040_v7 = vld [vmem:[%s21517_s1 + $0x7e0] sm:$0xf0] }
 0x308   : > { %v13402_v31 = vld [vmem:[%s21517_s1 + $0x129c] sm:$0xf0] }
 0x309   : > { %v11670_v32 = vld [vmem:[%s21517_s1 + $0x1480] sm:$0xf]  ;;  %v11415_v38 = vor.u32 %v13402_v31, %v11414_v29  ;;  %6418 = vmatpush.bf16.msra.mxu0 %v11159_v36  ;;  %v12854_v29 = vld [vmem:[%s21517_s1 + $0x184] sm:$0xf]  ;;  %v16520_v36 = vpack.c.bf16 %v1462_v22, %v1449_v19 }
 0x30a   : > { %v13466_v33 = vld [vmem:[%s21517_s1 + $0x149c] sm:$0xf0]  ;;  %v12958_v19 = vld [vmem:[%s21517_s1 + $0x4c4] sm:$0xf] }
 0x30b   : > { %v11926_v34 = vld [vmem:[%s21517_s1 + $0x1680] sm:$0xf]  ;;  %v11671_v40 = vor.u32 %v13466_v33, %v11670_v32  ;;  %6432 = vmatpush.bf16.msra.mxu1 %v11415_v38  ;;  %v9240_v32 = vld [vmem:[%s21517_s1 + $0x1a0] sm:$0xf0] }
 0x30c   : > { %v13530_v35 = vld [vmem:[%s21517_s1 + $0x169c] sm:$0xf0]  ;;  %v12918_v33 = vld [vmem:[%s21517_s1 + $0x384] sm:$0xf] }
 0x30d   : > { %v11126_v37 = vld [vmem:[%s21517_s1 + $0x1040] sm:$0xf]  ;;  %v11927_v46 = vor.u32 %v13530_v35, %v11926_v34  ;;  %6446 = vmatpush.bf16.msra.mxu2 %v11671_v40  ;;  %v9496_v34 = vld [vmem:[%s21517_s1 + $0x3a0] sm:$0xf0]  ;;  %v16518_v35 = vpack.c.bf16 %v1463_v18, %v1450_v16 }
 0x30e   : > { %v13330_v41 = vld [vmem:[%s21517_s1 + $0x105c] sm:$0xf0]  ;;  %v9752_v38 = vld [vmem:[%s21517_s1 + $0x5a0] sm:$0xf0] }
 0x30f   : > { %v11382_v42 = vld [vmem:[%s21517_s1 + $0x1240] sm:$0xf]  ;;  %v11127_v54 = vor.u32 %v13330_v41, %v11126_v37  ;;  %6460 = vmatpush.bf16.msra.mxu3 %v11927_v46  ;;  %21546 = vst [vmem:[#allocation8_spill] sm:$0xff] %v16518_v35  ;;  %v12982_v37 = vld [vmem:[%s21517_s1 + $0x584] sm:$0xf] }
 0x310   : > { %v13394_v45 = vld [vmem:[%s21517_s1 + $0x125c] sm:$0xf0]  ;;  %v12894_v16 = vld [vmem:[%s21517_s1 + $0x2c4] sm:$0xf] }
 0x311   : > { %v11638_v48 = vld [vmem:[%s21517_s1 + $0x1440] sm:$0xf]  ;;  %v11383_v60 = vor.u32 %v13394_v45, %v11382_v42  ;;  %6419 = vmatpush.bf16.msra.mxu0 %v11127_v54  ;;  %v9243_v42 = vor.u32 %v12854_v29, %v9240_v32  ;;  %v9499_v45 = vor.u32 %v12918_v33, %v9496_v34  ;;  %v12974_v54 = vld [vmem:[%s21517_s1 + $0x544] sm:$0xf] }
 0x312   : > { %v13458_v49 = vld [vmem:[%s21517_s1 + $0x145c] sm:$0xf0]  ;;  %v9400_v18 = vld [vmem:[%s21517_s1 + $0x2e0] sm:$0xf0] }
 0x313   : > { %v11894_v50 = vld [vmem:[%s21517_s1 + $0x1640] sm:$0xf]  ;;  %v11639_v61 = vor.u32 %v13458_v49, %v11638_v48  ;;  %6433 = vmatpush.bf16.msra.mxu1 %v11383_v60  ;;  %v12846_v49 = vld [vmem:[%s21517_s1 + $0x144] sm:$0xf] }
 0x314   : > { %v13522_v51 = vld [vmem:[%s21517_s1 + $0x165c] sm:$0xf0]  ;;  %v10008_v22 = vld [vmem:[%s21517_s1 + $0x7a0] sm:$0xf0] }
 0x315   : > { %v11094_v52 = vld [vmem:[%s21517_s1 + $0x1000] sm:$0xf]  ;;  %v11895_v2 = vor.u32 %v13522_v51, %v11894_v50  ;;  %6447 = vmatpush.bf16.msra.mxu2 %v11639_v61  ;;  %v9755_v50 = vor.u32 %v12982_v37, %v9752_v38  ;;  %v9208_v51 = vld [vmem:[%s21517_s1 + $0x160] sm:$0xf0] }
 0x316   : > { %v13322_v53 = vld [vmem:[%s21517_s1 + $0x101c] sm:$0xf0]  ;;  %v12886_v32 = vld [vmem:[%s21517_s1 + $0x284] sm:$0xf] }
 0x317   : > { %v11350_v55 = vld [vmem:[%s21517_s1 + $0x1200] sm:$0xf]  ;;  %v11095_v9 = vor.u32 %v13322_v53, %v11094_v52  ;;  %6461 = vmatpush.bf16.msra.mxu3 %v11895_v2  ;;  %v12910_v52 = vld [vmem:[%s21517_s1 + $0x344] sm:$0xf] }
 0x318   : > { %v13386_v56 = vld [vmem:[%s21517_s1 + $0x121c] sm:$0xf0]  ;;  %v9464_v53 = vld [vmem:[%s21517_s1 + $0x360] sm:$0xf0] }
 0x319   : > { %v11606_v57 = vld [vmem:[%s21517_s1 + $0x1400] sm:$0xf]  ;;  %v11351_v14 = vor.u32 %v13386_v56, %v11350_v55  ;;  %6420 = vmatpush.bf16.msra.mxu0 %v11095_v9  ;;  %v9720_v55 = vld [vmem:[%s21517_s1 + $0x560] sm:$0xf0]  ;;  %v9467_v60 = vor.u32 %v12910_v52, %v9464_v53 }
 0x31a   : > { %v13450_v59 = vld [vmem:[%s21517_s1 + $0x141c] sm:$0xf0]  ;;  %v12902_v2 = vld [vmem:[%s21517_s1 + $0x304] sm:$0xf] }
 0x31b   : > { %v11862_v62 = vld [vmem:[%s21517_s1 + $0x1600] sm:$0xf]  ;;  %v11607_v15 = vor.u32 %v13450_v59, %v11606_v57  ;;  %6434 = vmatpush.bf16.msra.mxu1 %v11351_v14  ;;  %v9211_v59 = vor.u32 %v12846_v49, %v9208_v51  ;;  %v9691_v14 = vor.u32 %v12966_v4, %v9688_v5  ;;  %v9368_v33 = vld [vmem:[%s21517_s1 + $0x2a0] sm:$0xf0] }
 0x31c   : > { %v13514_v63 = vld [vmem:[%s21517_s1 + $0x161c] sm:$0xf0]  ;;  %v12950_v34 = vld [vmem:[%s21517_s1 + $0x484] sm:$0xf] }
 0x31d   : > { %v12214_v0 = vld [vmem:[%s21517_s1 + $0x18c0] sm:$0xf]  ;;  %v11863_v20 = vor.u32 %v13514_v63, %v11862_v62  ;;  %6448 = vmatpush.bf16.msra.mxu2 %v11607_v15  ;;  %v12838_v62 = vld [vmem:[%s21517_s1 + $0x104] sm:$0xf]  ;;  %v10043_v15 = vor.u32 %v13054_v6, %v10040_v7 }
 0x31e   : > { %v13602_v3 = vld [vmem:[%s21517_s1 + $0x18dc] sm:$0xf0]  ;;  %6435 = vmatmul.bf16.vlgmr.msra.gmra.mxu1 %v16520_v36  ;;  %v9176_v63 = vld [vmem:[%s21517_s1 + $0x120] sm:$0xf0] }
 0x31f   : > { %v1448_v12 = vld [vmem:[%s21516_s0 + $0x40] sm:$0xff]  ;;  %v12215_v21 = vor.u32 %v13602_v3, %v12214_v0  ;;  %6462 = vmatpush.bf16.msra.mxu3 %v11863_v20  ;;  %6483 = vmatpush.bf16.msrb.mxu1 %v9275_v25  ;;  %v9723_v0 = vor.u32 %v12974_v54, %v9720_v55  ;;  %v9179_v9 = vor.u32 %v12838_v62, %v9176_v63 }
 0x320   : > { %v1464_v24 = vld [vmem:[%s21516_s0 + $0xc0] sm:$0xff]  ;;  %v16507_v31 = vpack.c.bf16 %v1461_v13, %v1448_v12  ;;  %6449 = vmatmul.bf16.vlgmr.msra.gmra.mxu2 %v16518_v35 }
 0x321   : > { %v12182_v27 = vld [vmem:[%s21517_s1 + $0x1880] sm:$0xf]  ;;  %6473 = vmatpush.bf16.msrb.mxu0 %v12215_v21  ;;  %v16528_v40 = vpack.c.bf16 %v1464_v24, %v1451_v23  ;;  %6497 = vmatpush.bf16.msrb.mxu2 %v9531_v26  ;;  %v9432_v3 = vld [vmem:[%s21517_s1 + $0x320] sm:$0xf0]  ;;  %v1465_v24 = vld [vmem:[%s21516_s0 + $0xc8] sm:$0xff]  ;;  %v9403_v26 = vor.u32 %v12894_v16, %v9400_v18 }
 0x322   : > { %v13594_v28 = vld [vmem:[%s21517_s1 + $0x189c] sm:$0xf0]  ;;  %6421 = vmatmul.bf16.vlgmr.msra.gmra.mxu0 %v16507_v31  ;;  %v9435_v11 = vor.u32 %v12902_v2, %v9432_v3  ;;  %v12830_v12 = vld [vmem:[%s21517_s1 + $0xc4] sm:$0xf] }
 0x323   : > { %21547 = vst [vmem:[#allocation9_spill] sm:$0xff] %v16528_v40  ;;  %v12183_v41 = vor.u32 %v13594_v28, %v12182_v27  ;;  %v12150_v46 = vld [vmem:[%s21517_s1 + $0x1840] sm:$0xf]  ;;  %6511 = vmatpush.bf16.msrb.mxu3 %v9787_v30  ;;  %6484 = vmatpush.bf16.msrb.mxu1 %v9243_v42  ;;  %v9144_v13 = vld [vmem:[%s21517_s1 + $0xe0] sm:$0xf0] }
 0x324   : > { %v13586_v48 = vld [vmem:[%s21517_s1 + $0x185c] sm:$0xf0]  ;;  %6463 = vmatmul.bf16.vlgmr.msra.gmra.mxu3 %v16528_v40  ;;  %v9656_v20 = vld [vmem:[%s21517_s1 + $0x4e0] sm:$0xf0]  ;;  %v9147_v25 = vor.u32 %v12830_v12, %v9144_v13 }
 0x325   : > { %6474 = vmatpush.bf16.msrb.mxu0 %v12183_v41  ;;  %v12151_v56 = vor.u32 %v13586_v48, %v12150_v46  ;;  %v12118_v57 = vld [vmem:[%s21517_s1 + $0x1800] sm:$0xf]  ;;  %6498 = vmatpush.bf16.msrb.mxu2 %v9499_v45  ;;  %v13046_v21 = vld [vmem:[%s21517_s1 + $0x784] sm:$0xf]  ;;  %v9659_v29 = vor.u32 %v12958_v19, %v9656_v20  ;;  %v9371_v46 = vor.u32 %v12886_v32, %v9368_v33 }
 0x326   : > { %v13578_v61 = vld [vmem:[%s21517_s1 + $0x181c] sm:$0xf0]  ;;  %v12822_v27 = vld [vmem:[%s21517_s1 + $0x84] sm:$0xf]  ;;  %v10011_v30 = vor.u32 %v13046_v21, %v10008_v22 }
 0x327   : > { %6512 = vmatpush.bf16.msrb.mxu3 %v9755_v50  ;;  %v12119_v8 = vor.u32 %v13578_v61, %v12118_v57  ;;  %6485 = vmatpush.bf16.msrb.mxu1 %v9211_v59  ;;  %v1452_v23 = vld [vmem:[%s21516_s0 + $0x60] sm:$0xff] }
 0x328   : > { %v9112_v28 = vld [vmem:[%s21517_s1 + $0xa0] sm:$0xf0]  ;;  %v16633_v37 = vpack.c.bf16 %v1465_v24, %v1452_v23 }
 0x329   : > { %6475 = vmatpush.bf16.msrb.mxu0 %v12151_v56  ;;  %6499 = vmatpush.bf16.msrb.mxu2 %v9467_v60  ;;  %v9624_v38 = vld [vmem:[%s21517_s1 + $0x4a0] sm:$0xf0]  ;;  %v9115_v45 = vor.u32 %v12822_v27, %v9112_v28 }
 0x32a   : > { %21548 = vst [vmem:[#allocation10_spill] sm:$0xff] %v16633_v37  ;;  %v13038_v41 = vld [vmem:[%s21517_s1 + $0x744] sm:$0xf]  ;;  %v9627_v50 = vor.u32 %v12950_v34, %v9624_v38 }
 0x32b   : > { %6513 = vmatpush.bf16.msrb.mxu3 %v9723_v0  ;;  %6486 = vmatpush.bf16.msrb.mxu1 %v9179_v9  ;;  %v9976_v42 = vld [vmem:[%s21517_s1 + $0x760] sm:$0xf0] }
 0x32c   : > { %v12814_v48 = vld [vmem:[%s21517_s1 + $0x44] sm:$0xf]  ;;  %v9979_v51 = vor.u32 %v13038_v41, %v9976_v42 }
 0x32d   : > { %6476 = vmatpush.bf16.msrb.mxu0 %v12119_v8  ;;  %6500 = vmatpush.bf16.msrb.mxu2 %v9435_v11  ;;  %v9080_v49 = vld [vmem:[%s21517_s1 + $0x60] sm:$0xf0] }
 0x32e   : > { %v12878_v52 = vld [vmem:[%s21517_s1 + $0x244] sm:$0xf]  ;;  %v9083_v59 = vor.u32 %v12814_v48, %v9080_v49 }
 0x32f   : > { %6514 = vmatpush.bf16.msrb.mxu3 %v9691_v14  ;;  %6487 = vmatpush.bf16.msrb.mxu1 %v9147_v25  ;;  %v9336_v53 = vld [vmem:[%s21517_s1 + $0x260] sm:$0xf0] }
 0x330   : > { %v12942_v54 = vld [vmem:[%s21517_s1 + $0x444] sm:$0xf]  ;;  %v9339_v60 = vor.u32 %v12878_v52, %v9336_v53 }
 0x331   : > { %6525 = vmatpush.bf16.msra.mxu0 %v10043_v15  ;;  %6501 = vmatpush.bf16.msrb.mxu2 %v9403_v26  ;;  %v9592_v55 = vld [vmem:[%s21517_s1 + $0x460] sm:$0xf0] }
 0x332   : > { %12244 = vmatmul.msk.bf16.vlgmr.msrb.gmra.mxu0 %vm6297_vm0, %v16633_v37  ;;  %v13030_v56 = vld [vmem:[%s21517_s1 + $0x704] sm:$0xf]  ;;  %v9595_v0 = vor.u32 %v12942_v54, %v9592_v55 }
 0x333   : > { %6515 = vmatpush.bf16.msrb.mxu3 %v9659_v29  ;;  %v9944_v57 = vld [vmem:[%s21517_s1 + $0x720] sm:$0xf0]  ;;  %6488 = vmatpush.bf16.msrb.mxu1 %v9115_v45 }
 0x334   : > { %v12806_v61 = vld [vmem:[%s21517_s1 + $0x4] sm:$0xf]  ;;  %v9947_v2 = vor.u32 %v13030_v56, %v9944_v57 }
 0x335   : > { %6526 = vmatpush.bf16.msra.mxu0 %v10011_v30  ;;  %6502 = vmatpush.bf16.msrb.mxu2 %v9371_v46  ;;  %v9048_v62 = vld [vmem:[%s21517_s1 + $0x20] sm:$0xf0] }
 0x336   : > { %v12870_v63 = vld [vmem:[%s21517_s1 + $0x204] sm:$0xf]  ;;  %v9051_v13 = vor.u32 %v12806_v61, %v9048_v62 }
 0x337   : > { %6516 = vmatpush.bf16.msrb.mxu3 %v9627_v50  ;;  %v9304_v3 = vld [vmem:[%s21517_s1 + $0x220] sm:$0xf0]  ;;  %6489 = vmatpush.bf16.msrb.mxu1 %v9083_v59 }
 0x338   : > { %v12934_v4 = vld [vmem:[%s21517_s1 + $0x404] sm:$0xf]  ;;  %v9307_v14 = vor.u32 %v12870_v63, %v9304_v3 }
 0x339   : > { %6527 = vmatpush.bf16.msra.mxu0 %v9979_v51  ;;  %v9560_v5 = vld [vmem:[%s21517_s1 + $0x420] sm:$0xf0]  ;;  %6503 = vmatpush.bf16.msrb.mxu2 %v9339_v60 }
 0x33a   : > { %v13022_v6 = vld [vmem:[%s21517_s1 + $0x6c4] sm:$0xf]  ;;  %v9563_v18 = vor.u32 %v12934_v4, %v9560_v5 }
 0x33b   : > { %v9912_v7 = vld [vmem:[%s21517_s1 + $0x6e0] sm:$0xf0]  ;;  %6517 = vmatpush.bf16.msrb.mxu3 %v9595_v0  ;;  %6490 = vmatpush.bf16.msrb.mxu1 %v9051_v13 }
 0x33c   : > { %v13118_v8 = vld [vmem:[%s21517_s1 + $0x9c4] sm:$0xf]  ;;  %v9915_v19 = vor.u32 %v13022_v6, %v9912_v7 }
 0x33d   : > { %v10296_v9 = vld [vmem:[%s21517_s1 + $0x9e0] sm:$0xf0]  ;;  %6528 = vmatpush.bf16.msra.mxu0 %v9947_v2  ;;  %6504 = vmatpush.bf16.msrb.mxu2 %v9307_v14 }
 0x33e   : > { %v13182_v11 = vld [vmem:[%s21517_s1 + $0xbc4] sm:$0xf]  ;;  %v10299_v20 = vor.u32 %v13118_v8, %v10296_v9  ;;  %6491 = vmatmul.bf16.vlgmr.msrb.gmra.mxu1 %v16057_v58 }
 0x33f   : > { %v10552_v12 = vld [vmem:[%s21517_s1 + $0xbe0] sm:$0xf0]  ;;  %6518 = vmatpush.bf16.msrb.mxu3 %v9563_v18 }
 0x340   : > { %v13246_v15 = vld [vmem:[%s21517_s1 + $0xdc4] sm:$0xf]  ;;  %v10555_v21 = vor.u32 %v13182_v11, %v10552_v12  ;;  %6539 = vmatpush.bf16.msra.mxu1 %v10299_v20  ;;  %6505 = vmatmul.bf16.vlgmr.msrb.gmra.mxu2 %v16093_v10 }
 0x341   : > { %v10808_v16 = vld [vmem:[%s21517_s1 + $0xde0] sm:$0xf0]  ;;  %6529 = vmatpush.bf16.msra.mxu0 %v9915_v19 }
 0x342   : > { %v13014_v22 = vld [vmem:[%s21517_s1 + $0x684] sm:$0xf]  ;;  %v10811_v25 = vor.u32 %v13246_v15, %v10808_v16  ;;  %6553 = vmatpush.bf16.msra.mxu2 %v10555_v21  ;;  %6519 = vmatmul.bf16.vlgmr.msrb.gmra.mxu3 %v16071_v1 }
 0x343   : > { %v9880_v23 = vld [vmem:[%s21517_s1 + $0x6a0] sm:$0xf0] }
 0x344   : > { %v13110_v24 = vld [vmem:[%s21517_s1 + $0x984] sm:$0xf]  ;;  %v9883_v32 = vor.u32 %v13014_v22, %v9880_v23  ;;  %6567 = vmatpush.bf16.msra.mxu3 %v10811_v25 }
 0x345   : > { %v10264_v26 = vld [vmem:[%s21517_s1 + $0x9a0] sm:$0xf0] }
 0x346   : > { %v13174_v27 = vld [vmem:[%s21517_s1 + $0xb84] sm:$0xf]  ;;  %v10267_v33 = vor.u32 %v13110_v24, %v10264_v26  ;;  %6530 = vmatpush.bf16.msra.mxu0 %v9883_v32 }
 0x347   : > { %v10520_v28 = vld [vmem:[%s21517_s1 + $0xba0] sm:$0xf0] }
 0x348   : > { %v13238_v29 = vld [vmem:[%s21517_s1 + $0xd84] sm:$0xf]  ;;  %v10523_v34 = vor.u32 %v13174_v27, %v10520_v28  ;;  %6540 = vmatpush.bf16.msra.mxu1 %v10267_v33 }
 0x349   : > { %v10776_v30 = vld [vmem:[%s21517_s1 + $0xda0] sm:$0xf0] }
 0x34a   : > { %v13006_v38 = vld [vmem:[%s21517_s1 + $0x644] sm:$0xf]  ;;  %v10779_v45 = vor.u32 %v13238_v29, %v10776_v30  ;;  %6554 = vmatpush.bf16.msra.mxu2 %v10523_v34 }
 0x34b   : > { %v9848_v41 = vld [vmem:[%s21517_s1 + $0x660] sm:$0xf0] }
 0x34c   : > { %v13102_v42 = vld [vmem:[%s21517_s1 + $0x944] sm:$0xf]  ;;  %v9851_v52 = vor.u32 %v13006_v38, %v9848_v41  ;;  %6568 = vmatpush.bf16.msra.mxu3 %v10779_v45 }
 0x34d   : > { %v10232_v46 = vld [vmem:[%s21517_s1 + $0x960] sm:$0xf0] }
 0x34e   : > { %v13166_v48 = vld [vmem:[%s21517_s1 + $0xb44] sm:$0xf]  ;;  %v10235_v54 = vor.u32 %v13102_v42, %v10232_v46  ;;  %6531 = vmatpush.bf16.msra.mxu0 %v9851_v52 }
 0x34f   : > { %v10488_v49 = vld [vmem:[%s21517_s1 + $0xb60] sm:$0xf0] }
 0x350   : > { %v13230_v50 = vld [vmem:[%s21517_s1 + $0xd44] sm:$0xf]  ;;  %v10491_v55 = vor.u32 %v13166_v48, %v10488_v49  ;;  %6541 = vmatpush.bf16.msra.mxu1 %v10235_v54 }
 0x351   : > { %v10744_v51 = vld [vmem:[%s21517_s1 + $0xd60] sm:$0xf0] }
 0x352   : > { %v12998_v53 = vld [vmem:[%s21517_s1 + $0x604] sm:$0xf]  ;;  %v10747_v60 = vor.u32 %v13230_v50, %v10744_v51  ;;  %6555 = vmatpush.bf16.msra.mxu2 %v10491_v55 }
 0x353   : > { %v9816_v56 = vld [vmem:[%s21517_s1 + $0x620] sm:$0xf0] }
 0x354   : > { %v13094_v57 = vld [vmem:[%s21517_s1 + $0x904] sm:$0xf]  ;;  %v9819_v4 = vor.u32 %v12998_v53, %v9816_v56  ;;  %6569 = vmatpush.bf16.msra.mxu3 %v10747_v60 }
 0x355   : > { %v10200_v59 = vld [vmem:[%s21517_s1 + $0x920] sm:$0xf0] }
 0x356   : > { %v13158_v61 = vld [vmem:[%s21517_s1 + $0xb04] sm:$0xf]  ;;  %v10203_v5 = vor.u32 %v13094_v57, %v10200_v59  ;;  %6532 = vmatpush.bf16.msra.mxu0 %v9819_v4 }
 0x357   : > { %v10456_v62 = vld [vmem:[%s21517_s1 + $0xb20] sm:$0xf0] }
 0x358   : > { %v13222_v63 = vld [vmem:[%s21517_s1 + $0xd04] sm:$0xf]  ;;  %v10459_v6 = vor.u32 %v13158_v61, %v10456_v62  ;;  %6542 = vmatpush.bf16.msra.mxu1 %v10203_v5 }
 0x359   : > { %v10712_v0 = vld [vmem:[%s21517_s1 + $0xd20] sm:$0xf0]  ;;  %6533 = vmatmul.bf16.vlgmr.msra.gmra.mxu0 %v16107_v17 }
 0x35a   : > { %v13310_v2 = vld [vmem:[%s21517_s1 + $0xfc4] sm:$0xf]  ;;  %v10715_v9 = vor.u32 %v13222_v63, %v10712_v0  ;;  %6556 = vmatpush.bf16.msra.mxu2 %v10459_v6 }
 0x35b   : > { %v11064_v3 = vld [vmem:[%s21517_s1 + $0xfe0] sm:$0xf0] }
 0x35c   : > { %v13086_v7 = vld [vmem:[%s21517_s1 + $0x8c4] sm:$0xf]  ;;  %v11067_v11 = vor.u32 %v13310_v2, %v11064_v3  ;;  %6570 = vmatpush.bf16.msra.mxu3 %v10715_v9 }
 0x35d   : > { %v10168_v8 = vld [vmem:[%s21517_s1 + $0x8e0] sm:$0xf0] }
 0x35e   : > { %v13150_v12 = vld [vmem:[%s21517_s1 + $0xac4] sm:$0xf]  ;;  %v10171_v19 = vor.u32 %v13086_v7, %v10168_v8  ;;  %6581 = vmatpush.bf16.msrb.mxu0 %v11067_v11 }
 0x35f   : > { %v10424_v13 = vld [vmem:[%s21517_s1 + $0xae0] sm:$0xf0] }
 0x360   : > { %v13214_v14 = vld [vmem:[%s21517_s1 + $0xcc4] sm:$0xf]  ;;  %v10427_v20 = vor.u32 %v13150_v12, %v10424_v13  ;;  %6543 = vmatpush.bf16.msra.mxu1 %v10171_v19 }
 0x361   : > { %v10680_v15 = vld [vmem:[%s21517_s1 + $0xce0] sm:$0xf0] }
 0x362   : > { %v13302_v16 = vld [vmem:[%s21517_s1 + $0xf84] sm:$0xf]  ;;  %v10683_v23 = vor.u32 %v13214_v14, %v10680_v15  ;;  %6557 = vmatpush.bf16.msra.mxu2 %v10427_v20 }
 0x363   : > { %v11032_v18 = vld [vmem:[%s21517_s1 + $0xfa0] sm:$0xf0] }
 0x364   : > { %v13078_v21 = vld [vmem:[%s21517_s1 + $0x884] sm:$0xf]  ;;  %v11035_v24 = vor.u32 %v13302_v16, %v11032_v18  ;;  %6571 = vmatpush.bf16.msra.mxu3 %v10683_v23 }
 0x365   : > { %v10136_v22 = vld [vmem:[%s21517_s1 + $0x8a0] sm:$0xf0] }
 0x366   : > { %v13142_v25 = vld [vmem:[%s21517_s1 + $0xa84] sm:$0xf]  ;;  %v10139_v32 = vor.u32 %v13078_v21, %v10136_v22  ;;  %6582 = vmatpush.bf16.msrb.mxu0 %v11035_v24 }
 0x367   : > { %v10392_v26 = vld [vmem:[%s21517_s1 + $0xaa0] sm:$0xf0] }
 0x368   : > { %v13206_v27 = vld [vmem:[%s21517_s1 + $0xc84] sm:$0xf]  ;;  %v10395_v33 = vor.u32 %v13142_v25, %v10392_v26  ;;  %6544 = vmatpush.bf16.msra.mxu1 %v10139_v32 }
 0x369   : > { %v10648_v28 = vld [vmem:[%s21517_s1 + $0xca0] sm:$0xf0] }
 0x36a   : > { %v13294_v29 = vld [vmem:[%s21517_s1 + $0xf44] sm:$0xf]  ;;  %v10651_v41 = vor.u32 %v13206_v27, %v10648_v28  ;;  %6558 = vmatpush.bf16.msra.mxu2 %v10395_v33 }
 0x36b   : > { %v11000_v30 = vld [vmem:[%s21517_s1 + $0xf60] sm:$0xf0] }
 0x36c   : > { %v13070_v34 = vld [vmem:[%s21517_s1 + $0x844] sm:$0xf]  ;;  %v11003_v42 = vor.u32 %v13294_v29, %v11000_v30  ;;  %6572 = vmatpush.bf16.msra.mxu3 %v10651_v41 }
 0x36d   : > { %v10104_v38 = vld [vmem:[%s21517_s1 + $0x860] sm:$0xf0] }
 0x36e   : > { %v13134_v45 = vld [vmem:[%s21517_s1 + $0xa44] sm:$0xf]  ;;  %v10107_v52 = vor.u32 %v13070_v34, %v10104_v38  ;;  %6583 = vmatpush.bf16.msrb.mxu0 %v11003_v42 }
 0x36f   : > { %v10360_v46 = vld [vmem:[%s21517_s1 + $0xa60] sm:$0xf0] }
 0x370   : > { %v13198_v48 = vld [vmem:[%s21517_s1 + $0xc44] sm:$0xf]  ;;  %v10363_v53 = vor.u32 %v13134_v45, %v10360_v46  ;;  %6545 = vmatpush.bf16.msra.mxu1 %v10107_v52 }
 0x371   : > { %v10616_v49 = vld [vmem:[%s21517_s1 + $0xc60] sm:$0xf0] }
 0x372   : > { %v13286_v50 = vld [vmem:[%s21517_s1 + $0xf04] sm:$0xf]  ;;  %v10619_v57 = vor.u32 %v13198_v48, %v10616_v49  ;;  %6559 = vmatpush.bf16.msra.mxu2 %v10363_v53 }
 0x373   : > { %v10968_v51 = vld [vmem:[%s21517_s1 + $0xf20] sm:$0xf0] }
 0x374   : > { %v13062_v54 = vld [vmem:[%s21517_s1 + $0x804] sm:$0xf]  ;;  %v10971_v59 = vor.u32 %v13286_v50, %v10968_v51  ;;  %6573 = vmatpush.bf16.msra.mxu3 %v10619_v57 }
 0x375   : > { %v10072_v55 = vld [vmem:[%s21517_s1 + $0x820] sm:$0xf0] }
 0x376   : > { %v13126_v56 = vld [vmem:[%s21517_s1 + $0xa04] sm:$0xf]  ;;  %v10075_v6 = vor.u32 %v13062_v54, %v10072_v55  ;;  %6584 = vmatpush.bf16.msrb.mxu0 %v10971_v59 }
 0x377   : > { %v10328_v60 = vld [vmem:[%s21517_s1 + $0xa20] sm:$0xf0] }
 0x378   : > { %v13190_v61 = vld [vmem:[%s21517_s1 + $0xc04] sm:$0xf]  ;;  %v10331_v7 = vor.u32 %v13126_v56, %v10328_v60  ;;  %6546 = vmatpush.bf16.msra.mxu1 %v10075_v6 }
 0x379   : > { %v10584_v62 = vld [vmem:[%s21517_s1 + $0xc20] sm:$0xf0] }
 0x37a   : > { %v13278_v63 = vld [vmem:[%s21517_s1 + $0xec4] sm:$0xf]  ;;  %v10587_v11 = vor.u32 %v13190_v61, %v10584_v62  ;;  %6560 = vmatpush.bf16.msra.mxu2 %v10331_v7 }
 0x37b   : > { %v10936_v0 = vld [vmem:[%s21517_s1 + $0xee0] sm:$0xf0]  ;;  %6547 = vmatmul.bf16.vlgmr.msra.gmra.mxu1 %v16279_v39 }
 0x37c   : > { %v13374_v2 = vld [vmem:[%s21517_s1 + $0x11c4] sm:$0xf]  ;;  %v10939_v12 = vor.u32 %v13278_v63, %v10936_v0  ;;  %6574 = vmatpush.bf16.msra.mxu3 %v10587_v11  ;;  %v6310_v63 = vpop.f32.mrf.mxu0 }
 0x37d   : > { %v11320_v3 = vld [vmem:[%s21517_s1 + $0x11e0] sm:$0xf0]  ;;  %6561 = vmatmul.bf16.vlgmr.msra.gmra.mxu2 %v16292_v44 }
 0x37e   : > { %v13438_v4 = vld [vmem:[%s21517_s1 + $0x13c4] sm:$0xf]  ;;  %v11323_v13 = vor.u32 %v13374_v2, %v11320_v3  ;;  %6585 = vmatpush.bf16.msrb.mxu0 %v10939_v12 }
 0x37f   : > { %v11576_v5 = vld [vmem:[%s21517_s1 + $0x13e0] sm:$0xf0]  ;;  %6575 = vmatmul.bf16.vlgmr.msra.gmra.mxu3 %v16290_v43 }
 0x380   : > { %v13502_v8 = vld [vmem:[%s21517_s1 + $0x15c4] sm:$0xf]  ;;  %v11579_v14 = vor.u32 %v13438_v4, %v11576_v5  ;;  %6595 = vmatpush.bf16.msrb.mxu1 %v11323_v13 }
 0x381   : > { %v11832_v9 = vld [vmem:[%s21517_s1 + $0x15e0] sm:$0xf0] }
 0x382   : > { %v13270_v15 = vld [vmem:[%s21517_s1 + $0xe84] sm:$0xf]  ;;  %v11835_v19 = vor.u32 %v13502_v8, %v11832_v9  ;;  %6609 = vmatpush.bf16.msrb.mxu2 %v11579_v14 }
 0x383   : > { %v10904_v16 = vld [vmem:[%s21517_s1 + $0xea0] sm:$0xf0] }
 0x384   : > { %v13366_v18 = vld [vmem:[%s21517_s1 + $0x1184] sm:$0xf]  ;;  %v10907_v25 = vor.u32 %v13270_v15, %v10904_v16  ;;  %6623 = vmatpush.bf16.msrb.mxu3 %v11835_v19  ;;  %v6324_v16 = vpop.f32.mrf.mxu1 }
 0x385   : > { %v11288_v20 = vld [vmem:[%s21517_s1 + $0x11a0] sm:$0xf0] }
 0x386   : > { %v13430_v21 = vld [vmem:[%s21517_s1 + $0x1384] sm:$0xf]  ;;  %v11291_v27 = vor.u32 %v13366_v18, %v11288_v20  ;;  %6586 = vmatpush.bf16.msrb.mxu0 %v10907_v25 }
 0x387   : > { %v11544_v22 = vld [vmem:[%s21517_s1 + $0x13a0] sm:$0xf0] }
 0x388   : > { %v13494_v23 = vld [vmem:[%s21517_s1 + $0x1584] sm:$0xf]  ;;  %v11547_v28 = vor.u32 %v13430_v21, %v11544_v22  ;;  %6596 = vmatpush.bf16.msrb.mxu1 %v11291_v27 }
 0x389   : > { %v11800_v24 = vld [vmem:[%s21517_s1 + $0x15a0] sm:$0xf0] }
 0x38a   : > { %v13262_v26 = vld [vmem:[%s21517_s1 + $0xe44] sm:$0xf]  ;;  %v11803_v33 = vor.u32 %v13494_v23, %v11800_v24  ;;  %6610 = vmatpush.bf16.msrb.mxu2 %v11547_v28  ;;  %v6338_v28 = vpop.f32.mrf.mxu2 }
 0x38b   : > { %v10872_v29 = vld [vmem:[%s21517_s1 + $0xe60] sm:$0xf0] }
 0x38c   : > { %v13358_v30 = vld [vmem:[%s21517_s1 + $0x1144] sm:$0xf]  ;;  %v10875_v46 = vor.u32 %v13262_v26, %v10872_v29  ;;  %6624 = vmatpush.bf16.msrb.mxu3 %v11803_v33 }
 0x38d   : > { %v16944_v32 = vld [vmem:[%s21518_s2] sm:$0xff] }
 0x38e   : > { %v11256_v34 = vld [vmem:[%s21517_s1 + $0x1160] sm:$0xf0]  ;;  %v2281_v49 = vperm.slane %v16944_v32, 0  ;;  %6587 = vmatpush.bf16.msrb.mxu0 %v10875_v46 }
 0x38f   : > { %v13422_v38 = vld [vmem:[%s21517_s1 + $0x1344] sm:$0xf]  ;;  %v11259_v50 = vor.u32 %v13358_v30, %v11256_v34 }
 0x390   : > { %v11512_v41 = vld [vmem:[%s21517_s1 + $0x1360] sm:$0xf0]  ;;  %v6311_v2 = vadd.f32 %v6310_v63, %v2281_v49 }
 0x391   : > { %v13486_v42 = vld [vmem:[%s21517_s1 + $0x1544] sm:$0xf]  ;;  %v11515_v51 = vor.u32 %v13422_v38, %v11512_v41  ;;  %6597 = vmatpush.bf16.msrb.mxu1 %v11259_v50 }
 0x392   : > { %v11768_v45 = vld [vmem:[%s21517_s1 + $0x1560] sm:$0xf0]  ;;  %v6325_v18 = vadd.f32 %v6324_v16, %v6311_v2  ;;  %v12931_v16 = vld [vmem:[%s21517_s1 + $0x3e4] sm:$0xf0] }
 0x393   : > { %v13254_v48 = vld [vmem:[%s21517_s1 + $0xe04] sm:$0xf]  ;;  %v11771_v55 = vor.u32 %v13486_v42, %v11768_v45  ;;  %6611 = vmatpush.bf16.msrb.mxu2 %v11515_v51 }
 0x394   : > { %v10840_v52 = vld [vmem:[%s21517_s1 + $0xe20] sm:$0xf0]  ;;  %v6339_v34 = vadd.f32 %v6338_v28, %v6325_v18  ;;  %v9246_v28 = vld [vmem:[%s21517_s1 + $0x188] sm:$0xf] }
 0x395   : > { %v13350_v53 = vld [vmem:[%s21517_s1 + $0x1104] sm:$0xf]  ;;  %v10843_v0 = vor.u32 %v13254_v48, %v10840_v52  ;;  %6625 = vmatpush.bf16.msrb.mxu3 %v11771_v55 }
 0x396   : > { %v11224_v54 = vld [vmem:[%s21517_s1 + $0x1120] sm:$0xf0] }
 0x397   : > { %v13414_v56 = vld [vmem:[%s21517_s1 + $0x1304] sm:$0xf]  ;;  %v11227_v3 = vor.u32 %v13350_v53, %v11224_v54  ;;  %6588 = vmatpush.bf16.msrb.mxu0 %v10843_v0  ;;  %v6352_v53 = vpop.f32.mrf.mxu3 }
 0x398   : > { %v11480_v57 = vld [vmem:[%s21517_s1 + $0x1320] sm:$0xf0] }
 0x399   : > { %v13478_v59 = vld [vmem:[%s21517_s1 + $0x1504] sm:$0xf]  ;;  %v11483_v4 = vor.u32 %v13414_v56, %v11480_v57  ;;  %6598 = vmatpush.bf16.msrb.mxu1 %v11227_v3  ;;  %v17070_v57 = vadd.f32 %v6352_v53, %v6339_v34  ;;  %v17140_v34 = vpop.f32.mrf.mxu1  ;;  %v12851_v53 = vld [vmem:[%s21517_s1 + $0x164] sm:$0xf0] }
 0x39a   : > { %v11736_v60 = vld [vmem:[%s21517_s1 + $0x1520] sm:$0xf0]  ;;  %6589 = vmatmul.bf16.vlgmr.msrb.gmra.mxu0 %v16300_v47 }
 0x39b   : > { %v13566_v61 = vld [vmem:[%s21517_s1 + $0x17c4] sm:$0xf]  ;;  %v11739_v7 = vor.u32 %v13478_v59, %v11736_v60  ;;  %6612 = vmatpush.bf16.msrb.mxu2 %v11483_v4 }
 0x39c   : > { %v12088_v62 = vld [vmem:[%s21517_s1 + $0x17e0] sm:$0xf0] }
 0x39d   : > { %v13342_v5 = vld [vmem:[%s21517_s1 + $0x10c4] sm:$0xf]  ;;  %v12091_v8 = vor.u32 %v13566_v61, %v12088_v62  ;;  %6626 = vmatpush.bf16.msrb.mxu3 %v11739_v7 }
 0x39e   : > { %v11192_v6 = vld [vmem:[%s21517_s1 + $0x10e0] sm:$0xf0] }
 0x39f   : > { %v13406_v9 = vld [vmem:[%s21517_s1 + $0x12c4] sm:$0xf]  ;;  %v11195_v19 = vor.u32 %v13342_v5, %v11192_v6  ;;  %6637 = vmatpush.bf16.msra.mxu0 %v12091_v8 }
 0x3a0   : > { %v11448_v11 = vld [vmem:[%s21517_s1 + $0x12e0] sm:$0xf0] }
 0x3a1   : > { %v13470_v12 = vld [vmem:[%s21517_s1 + $0x14c4] sm:$0xf]  ;;  %v11451_v20 = vor.u32 %v13406_v9, %v11448_v11  ;;  %6599 = vmatpush.bf16.msrb.mxu1 %v11195_v19  ;;  %v9278_v11 = vld [vmem:[%s21517_s1 + $0x1c8] sm:$0xf] }
 0x3a2   : > { %v11704_v13 = vld [vmem:[%s21517_s1 + $0x14e0] sm:$0xf0] }
 0x3a3   : > { %v13558_v14 = vld [vmem:[%s21517_s1 + $0x1784] sm:$0xf]  ;;  %v11707_v23 = vor.u32 %v13470_v12, %v11704_v13  ;;  %6613 = vmatpush.bf16.msrb.mxu2 %v11451_v20  ;;  %v12867_v12 = vld [vmem:[%s21517_s1 + $0x1e4] sm:$0xf0] }
 0x3a4   : > { %v12056_v15 = vld [vmem:[%s21517_s1 + $0x17a0] sm:$0xf0] }
 0x3a5   : > { %v13334_v21 = vld [vmem:[%s21517_s1 + $0x1084] sm:$0xf]  ;;  %v12059_v24 = vor.u32 %v13558_v14, %v12056_v15  ;;  %6627 = vmatpush.bf16.msrb.mxu3 %v11707_v23  ;;  %v9534_v15 = vld [vmem:[%s21517_s1 + $0x3c8] sm:$0xf] }
 0x3a6   : > { %v11160_v22 = vld [vmem:[%s21517_s1 + $0x10a0] sm:$0xf0] }
 0x3a7   : > { %v13398_v25 = vld [vmem:[%s21517_s1 + $0x1284] sm:$0xf]  ;;  %v11163_v38 = vor.u32 %v13334_v21, %v11160_v22  ;;  %6638 = vmatpush.bf16.msra.mxu0 %v12059_v24  ;;  %v9279_v21 = vor.u32 %v12867_v12, %v9278_v11  ;;  %v17114_v22 = vpop.f32.mrf.mxu0 }
 0x3a8   : > { %v11416_v26 = vld [vmem:[%s21517_s1 + $0x12a0] sm:$0xf0] }
 0x3a9   : > { %v13462_v27 = vld [vmem:[%s21517_s1 + $0x1484] sm:$0xf]  ;;  %v11419_v41 = vor.u32 %v13398_v25, %v11416_v26  ;;  %6600 = vmatpush.bf16.msrb.mxu1 %v11163_v38  ;;  %v9535_v26 = vor.u32 %v12931_v16, %v9534_v15 }
 0x3aa   : > { %v11672_v29 = vld [vmem:[%s21517_s1 + $0x14a0] sm:$0xf0] }
 0x3ab   : > { %v13550_v30 = vld [vmem:[%s21517_s1 + $0x1744] sm:$0xf]  ;;  %v11675_v46 = vor.u32 %v13462_v27, %v11672_v29  ;;  %6614 = vmatpush.bf16.msrb.mxu2 %v11419_v41  ;;  %v12859_v29 = vld [vmem:[%s21517_s1 + $0x1a4] sm:$0xf0] }
 0x3ac   : > { %v12024_v33 = vld [vmem:[%s21517_s1 + $0x1760] sm:$0xf0] }
 0x3ad   : > { %v13326_v42 = vld [vmem:[%s21517_s1 + $0x1044] sm:$0xf]  ;;  %v12027_v48 = vor.u32 %v13550_v30, %v12024_v33  ;;  %6628 = vmatpush.bf16.msrb.mxu3 %v11675_v46  ;;  %v9502_v30 = vld [vmem:[%s21517_s1 + $0x388] sm:$0xf] }
 0x3ae   : > { %v11128_v45 = vld [vmem:[%s21517_s1 + $0x1060] sm:$0xf0]  ;;  %v12923_v33 = vld [vmem:[%s21517_s1 + $0x3a4] sm:$0xf0] }
 0x3af   : > { %v13390_v50 = vld [vmem:[%s21517_s1 + $0x1244] sm:$0xf]  ;;  %v11131_v59 = vor.u32 %v13326_v42, %v11128_v45  ;;  %6639 = vmatpush.bf16.msra.mxu0 %v12027_v48  ;;  %v9247_v42 = vor.u32 %v12859_v29, %v9246_v28  ;;  %v12987_v28 = vld [vmem:[%s21517_s1 + $0x5a4] sm:$0xf0] }
 0x3b0   : > { %v11384_v51 = vld [vmem:[%s21517_s1 + $0x1260] sm:$0xf0]  ;;  %v10014_v29 = vld [vmem:[%s21517_s1 + $0x788] sm:$0xf] }
 0x3b1   : > { %v13454_v52 = vld [vmem:[%s21517_s1 + $0x1444] sm:$0xf]  ;;  %v11387_v60 = vor.u32 %v13390_v50, %v11384_v51  ;;  %6601 = vmatpush.bf16.msrb.mxu1 %v11131_v59  ;;  %v9503_v50 = vor.u32 %v12923_v33, %v9502_v30  ;;  %v13051_v30 = vld [vmem:[%s21517_s1 + $0x7a4] sm:$0xf0] }
 0x3b2   : > { %v11640_v54 = vld [vmem:[%s21517_s1 + $0x1460] sm:$0xf0] }
 0x3b3   : > { %v13542_v55 = vld [vmem:[%s21517_s1 + $0x1704] sm:$0xf]  ;;  %v11643_v0 = vor.u32 %v13454_v52, %v11640_v54  ;;  %6615 = vmatpush.bf16.msrb.mxu2 %v11387_v60  ;;  %v9214_v52 = vld [vmem:[%s21517_s1 + $0x148] sm:$0xf] }
 0x3b4   : > { %v11992_v56 = vld [vmem:[%s21517_s1 + $0x1720] sm:$0xf0]  ;;  %v9470_v54 = vld [vmem:[%s21517_s1 + $0x348] sm:$0xf] }
 0x3b5   : > { %v13318_v61 = vld [vmem:[%s21517_s1 + $0x1004] sm:$0xf]  ;;  %v11995_v2 = vor.u32 %v13542_v55, %v11992_v56  ;;  %6629 = vmatpush.bf16.msrb.mxu3 %v11643_v0  ;;  %v12915_v55 = vld [vmem:[%s21517_s1 + $0x364] sm:$0xf0] }
 0x3b6   : > { %v11096_v62 = vld [vmem:[%s21517_s1 + $0x1020] sm:$0xf0] }
 0x3b7   : > { %v13382_v63 = vld [vmem:[%s21517_s1 + $0x1204] sm:$0xf]  ;;  %v11099_v13 = vor.u32 %v13318_v61, %v11096_v62  ;;  %6640 = vmatpush.bf16.msra.mxu0 %v11995_v2  ;;  %v9215_v61 = vor.u32 %v12851_v53, %v9214_v52  ;;  %v9471_v2 = vor.u32 %v12915_v55, %v9470_v54  ;;  %v12979_v52 = vld [vmem:[%s21517_s1 + $0x564] sm:$0xf0] }
 0x3b8   : > { %v11352_v3 = vld [vmem:[%s21517_s1 + $0x1220] sm:$0xf0]  ;;  %v9982_v53 = vld [vmem:[%s21517_s1 + $0x748] sm:$0xf] }
 0x3b9   : > { %v13446_v4 = vld [vmem:[%s21517_s1 + $0x1404] sm:$0xf]  ;;  %v11355_v14 = vor.u32 %v13382_v63, %v11352_v3  ;;  %6602 = vmatpush.bf16.msrb.mxu1 %v11099_v13  ;;  %v9182_v3 = vld [vmem:[%s21517_s1 + $0x108] sm:$0xf] }
 0x3ba   : > { %v11608_v5 = vld [vmem:[%s21517_s1 + $0x1420] sm:$0xf0]  ;;  %v10046_v13 = vld [vmem:[%s21517_s1 + $0x7c8] sm:$0xf] }
 0x3bb   : > { %v13534_v6 = vld [vmem:[%s21517_s1 + $0x16c4] sm:$0xf]  ;;  %v11611_v18 = vor.u32 %v13446_v4, %v11608_v5  ;;  %6616 = vmatpush.bf16.msrb.mxu2 %v11355_v14  ;;  %v12843_v4 = vld [vmem:[%s21517_s1 + $0x124] sm:$0xf0] }
 0x3bc   : > { %v11960_v7 = vld [vmem:[%s21517_s1 + $0x16e0] sm:$0xf0]  ;;  %6603 = vmatmul.bf16.vlgmr.msrb.gmra.mxu1 %v16507_v31  ;;  %v9438_v5 = vld [vmem:[%s21517_s1 + $0x308] sm:$0xf]  ;;  %v9183_v16 = vor.u32 %v12843_v4, %v9182_v3 }
 0x3bd   : > { %v13598_v8 = vld [vmem:[%s21517_s1 + $0x18c4] sm:$0xf]  ;;  %v11963_v19 = vor.u32 %v13534_v6, %v11960_v7  ;;  %6630 = vmatpush.bf16.msrb.mxu3 %v11611_v18  ;;  %v6366_v6 = vpop.f32.mrf.mxu0  ;;  %v12907_v7 = vld [vmem:[%s21517_s1 + $0x324] sm:$0xf0]  ;;  %v6380_v18 = vpop.f32.mrf.mxu1 }
 0x3be   : > { %v12216_v9 = vld [vmem:[%s21517_s1 + $0x18e0] sm:$0xf0]  ;;  %6617 = vmatmul.bf16.vlgmr.msrb.gmra.mxu2 %v16520_v36  ;;  %v6367_v11 = vadd.f32 %v6366_v6, %v17070_v57  ;;  %v13059_v14 = vld [vmem:[%s21517_s1 + $0x7e4] sm:$0xf0] }
 0x3bf   : > { %v12219_v20 = vor.u32 %v13598_v8, %v12216_v9  ;;  %v13526_v23 = vld [vmem:[%s21517_s1 + $0x1684] sm:$0xf]  ;;  %6641 = vmatpush.bf16.msra.mxu0 %v11963_v19  ;;  %6665 = vmatpush.bf16.msra.mxu2 %v9279_v21  ;;  %v9790_v8 = vld [vmem:[%s21517_s1 + $0x5c8] sm:$0xf]  ;;  %v9439_v19 = vor.u32 %v12907_v7, %v9438_v5 }
 0x3c0   : > { %v11928_v24 = vld [vmem:[%s21517_s1 + $0x16a0] sm:$0xf0]  ;;  %6631 = vmatmul.bf16.vlgmr.msrb.gmra.mxu3 %v16518_v35  ;;  %v12995_v9 = vld [vmem:[%s21517_s1 + $0x5e4] sm:$0xf0] }
 0x3c1   : > { %v13590_v25 = vld [vmem:[%s21517_s1 + $0x1884] sm:$0xf]  ;;  %v11931_v38 = vor.u32 %v13526_v23, %v11928_v24  ;;  %6655 = vmatpush.bf16.msra.mxu1 %v12219_v20  ;;  %6679 = vmatpush.bf16.msra.mxu3 %v9535_v26  ;;  %v17206_v20 = vadd.f32 %v6380_v18, %v6367_v11  ;;  %v9791_v21 = vor.u32 %v12995_v9, %v9790_v8  ;;  %v9150_v57 = vld [vmem:[%s21517_s1 + $0xc8] sm:$0xf] }
 0x3c2   : > { %v12184_v27 = vld [vmem:[%s21517_s1 + $0x18a0] sm:$0xf0]  ;;  %v12835_v23 = vld [vmem:[%s21517_s1 + $0xe4] sm:$0xf0] }
 0x3c3   : > { %v12187_v41 = vor.u32 %v13590_v25, %v12184_v27  ;;  %v13518_v45 = vld [vmem:[%s21517_s1 + $0x1644] sm:$0xf]  ;;  %6642 = vmatpush.bf16.msra.mxu0 %v11931_v38  ;;  %6666 = vmatpush.bf16.msra.mxu2 %v9247_v42  ;;  %v9406_v24 = vld [vmem:[%s21517_s1 + $0x2c8] sm:$0xf]  ;;  %v10047_v25 = vor.u32 %v13059_v14, %v10046_v13  ;;  %v9151_v33 = vor.u32 %v12835_v23, %v9150_v57 }
 0x3c4   : > { %v11896_v46 = vld [vmem:[%s21517_s1 + $0x1660] sm:$0xf0]  ;;  %v12899_v26 = vld [vmem:[%s21517_s1 + $0x2e4] sm:$0xf0] }
 0x3c5   : > { %v13582_v48 = vld [vmem:[%s21517_s1 + $0x1844] sm:$0xf]  ;;  %v11899_v56 = vor.u32 %v13518_v45, %v11896_v46  ;;  %6656 = vmatpush.bf16.msra.mxu1 %v12187_v41  ;;  %6680 = vmatpush.bf16.msra.mxu3 %v9503_v50  ;;  %v9758_v27 = vld [vmem:[%s21517_s1 + $0x588] sm:$0xf]  ;;  %v9407_v38 = vor.u32 %v12899_v26, %v9406_v24 }
 0x3c6   : > { %v12152_v51 = vld [vmem:[%s21517_s1 + $0x1860] sm:$0xf0]  ;;  %v9759_v41 = vor.u32 %v12987_v28, %v9758_v27  ;;  %v9118_v42 = vld [vmem:[%s21517_s1 + $0x88] sm:$0xf] }
 0x3c7   : > { %v13510_v59 = vld [vmem:[%s21517_s1 + $0x1604] sm:$0xf]  ;;  %v12155_v60 = vor.u32 %v13582_v48, %v12152_v51  ;;  %6643 = vmatpush.bf16.msra.mxu0 %v11899_v56  ;;  %6667 = vmatpush.bf16.msra.mxu2 %v9215_v61  ;;  %v12827_v45 = vld [vmem:[%s21517_s1 + $0xa4] sm:$0xf0]  ;;  %v10015_v48 = vor.u32 %v13051_v30, %v10014_v29 }
 0x3c8   : > { %v11864_v62 = vld [vmem:[%s21517_s1 + $0x1620] sm:$0xf0]  ;;  %v9374_v46 = vld [vmem:[%s21517_s1 + $0x288] sm:$0xf]  ;;  %v9119_v55 = vor.u32 %v12827_v45, %v9118_v42 }
 0x3c9   : > { %v13574_v63 = vld [vmem:[%s21517_s1 + $0x1804] sm:$0xf]  ;;  %v11867_v12 = vor.u32 %v13510_v59, %v11864_v62  ;;  %6657 = vmatpush.bf16.msra.mxu1 %v12155_v60  ;;  %6681 = vmatpush.bf16.msra.mxu3 %v9471_v2  ;;  %v12891_v50 = vld [vmem:[%s21517_s1 + $0x2a4] sm:$0xf0] }
 0x3ca   : > { %v12120_v0 = vld [vmem:[%s21517_s1 + $0x1820] sm:$0xf0]  ;;  %v9726_v51 = vld [vmem:[%s21517_s1 + $0x548] sm:$0xf]  ;;  %v9375_v56 = vor.u32 %v12891_v50, %v9374_v46 }
 0x3cb   : > { %v12123_v15 = vor.u32 %v13574_v63, %v12120_v0  ;;  %6644 = vmatpush.bf16.msra.mxu0 %v11867_v12  ;;  %6668 = vmatpush.bf16.msra.mxu2 %v9183_v16  ;;  %v13043_v54 = vld [vmem:[%s21517_s1 + $0x764] sm:$0xf0]  ;;  %v9727_v59 = vor.u32 %v12979_v52, %v9726_v51 }
 0x3cc   : > { %v9086_v60 = vld [vmem:[%s21517_s1 + $0x48] sm:$0xf]  ;;  %v9983_v63 = vor.u32 %v13043_v54, %v9982_v53 }
 0x3cd   : > { %6658 = vmatpush.bf16.msra.mxu1 %v12123_v15  ;;  %6682 = vmatpush.bf16.msra.mxu3 %v9439_v19  ;;  %v12819_v61 = vld [vmem:[%s21517_s1 + $0x64] sm:$0xf0] }
 0x3ce   : > { %6645 = vmatmul.bf16.vlgmr.msra.gmra.mxu0 %v16528_v40  ;;  %v9342_v62 = vld [vmem:[%s21517_s1 + $0x248] sm:$0xf]  ;;  %v9087_v6 = vor.u32 %v12819_v61, %v9086_v60 }
 0x3cf   : > { %6693 = vmatpush.bf16.msrb.mxu0 %v9791_v21  ;;  %6669 = vmatpush.bf16.msra.mxu2 %v9151_v33  ;;  %v12883_v0 = vld [vmem:[%s21517_s1 + $0x264] sm:$0xf0] }
 0x3d0   : > { %v9694_v2 = vld [vmem:[%s21517_s1 + $0x508] sm:$0xf]  ;;  %12245 = vmatmul.msk.bf16.vlgmr.msra.gmra.mxu1 %vm6297_vm0, %v16633_v37  ;;  %v9343_v8 = vor.u32 %v12883_v0, %v9342_v62 }
 0x3d1   : > { %6707 = vmatpush.bf16.msrb.mxu1 %v10047_v25  ;;  %6683 = vmatpush.bf16.msra.mxu3 %v9407_v38  ;;  %v12971_v3 = vld [vmem:[%s21517_s1 + $0x524] sm:$0xf0] }
 0x3d2   : > { %v9950_v4 = vld [vmem:[%s21517_s1 + $0x708] sm:$0xf]  ;;  %v9695_v9 = vor.u32 %v12971_v3, %v9694_v2 }
 0x3d3   : > { %6694 = vmatpush.bf16.msrb.mxu0 %v9759_v41  ;;  %v13035_v5 = vld [vmem:[%s21517_s1 + $0x724] sm:$0xf0]  ;;  %6670 = vmatpush.bf16.msra.mxu2 %v9119_v55 }
 0x3d4   : > { %v9054_v7 = vld [vmem:[%s21517_s1 + $0x8] sm:$0xf]  ;;  %v9951_v14 = vor.u32 %v13035_v5, %v9950_v4 }
 0x3d5   : > { %6708 = vmatpush.bf16.msrb.mxu1 %v10015_v48  ;;  %6684 = vmatpush.bf16.msra.mxu3 %v9375_v56  ;;  %v12811_v11 = vld [vmem:[%s21517_s1 + $0x24] sm:$0xf0] }
 0x3d6   : > { %v9310_v12 = vld [vmem:[%s21517_s1 + $0x208] sm:$0xf]  ;;  %v9055_v23 = vor.u32 %v12811_v11, %v9054_v7 }
 0x3d7   : > { %6695 = vmatpush.bf16.msrb.mxu0 %v9727_v59  ;;  %v12875_v13 = vld [vmem:[%s21517_s1 + $0x224] sm:$0xf0]  ;;  %6671 = vmatpush.bf16.msra.mxu2 %v9087_v6 }
 0x3d8   : > { %v9662_v15 = vld [vmem:[%s21517_s1 + $0x4c8] sm:$0xf]  ;;  %v9311_v26 = vor.u32 %v12875_v13, %v9310_v12 }
 0x3d9   : > { %6709 = vmatpush.bf16.msrb.mxu1 %v9983_v63  ;;  %v12963_v16 = vld [vmem:[%s21517_s1 + $0x4e4] sm:$0xf0]  ;;  %6685 = vmatpush.bf16.msra.mxu3 %v9343_v8 }
 0x3da   : > { %v9918_v18 = vld [vmem:[%s21517_s1 + $0x6c8] sm:$0xf]  ;;  %v9663_v27 = vor.u32 %v12963_v16, %v9662_v15 }
 0x3db   : > { %v13027_v19 = vld [vmem:[%s21517_s1 + $0x6e4] sm:$0xf0]  ;;  %6696 = vmatpush.bf16.msrb.mxu0 %v9695_v9  ;;  %6672 = vmatpush.bf16.msra.mxu2 %v9055_v23 }
 0x3dc   : > { %v10302_v21 = vld [vmem:[%s21517_s1 + $0x9c8] sm:$0xf]  ;;  %v9919_v28 = vor.u32 %v13027_v19, %v9918_v18 }
 0x3dd   : > { %v13123_v57 = vld [vmem:[%s21517_s1 + $0x9e4] sm:$0xf0]  ;;  %6710 = vmatpush.bf16.msrb.mxu1 %v9951_v14  ;;  %6686 = vmatpush.bf16.msra.mxu3 %v9311_v26 }
 0x3de   : > { %v10558_v24 = vld [vmem:[%s21517_s1 + $0xbc8] sm:$0xf]  ;;  %v10303_v29 = vor.u32 %v13123_v57, %v10302_v21  ;;  %6673 = vmatmul.bf16.vlgmr.msra.gmra.mxu2 %v16057_v58 }
 0x3df   : > { %v13187_v25 = vld [vmem:[%s21517_s1 + $0xbe4] sm:$0xf0]  ;;  %6697 = vmatpush.bf16.msrb.mxu0 %v9663_v27 }
 0x3e0   : > { %v9630_v30 = vld [vmem:[%s21517_s1 + $0x488] sm:$0xf]  ;;  %v10559_v41 = vor.u32 %v13187_v25, %v10558_v24  ;;  %6721 = vmatpush.bf16.msrb.mxu2 %v10303_v29  ;;  %6687 = vmatmul.bf16.vlgmr.msra.gmra.mxu3 %v16093_v10 }
 0x3e1   : > { %v12955_v33 = vld [vmem:[%s21517_s1 + $0x4a4] sm:$0xf0]  ;;  %6711 = vmatpush.bf16.msrb.mxu1 %v9919_v28 }
 0x3e2   : > { %v9886_v38 = vld [vmem:[%s21517_s1 + $0x688] sm:$0xf]  ;;  %v9631_v51 = vor.u32 %v12955_v33, %v9630_v30  ;;  %6735 = vmatpush.bf16.msrb.mxu3 %v10559_v41 }
 0x3e3   : > { %v13019_v42 = vld [vmem:[%s21517_s1 + $0x6a4] sm:$0xf0] }
 0x3e4   : > { %v10270_v45 = vld [vmem:[%s21517_s1 + $0x988] sm:$0xf]  ;;  %v9887_v52 = vor.u32 %v13019_v42, %v9886_v38  ;;  %6698 = vmatpush.bf16.msrb.mxu0 %v9631_v51 }
 0x3e5   : > { %v13115_v46 = vld [vmem:[%s21517_s1 + $0x9a4] sm:$0xf0] }
 0x3e6   : > { %v10526_v48 = vld [vmem:[%s21517_s1 + $0xb88] sm:$0xf]  ;;  %v10271_v53 = vor.u32 %v13115_v46, %v10270_v45  ;;  %6712 = vmatpush.bf16.msrb.mxu1 %v9887_v52 }
 0x3e7   : > { %v13179_v50 = vld [vmem:[%s21517_s1 + $0xba4] sm:$0xf0] }
 0x3e8   : > { %v9598_v54 = vld [vmem:[%s21517_s1 + $0x448] sm:$0xf]  ;;  %v10527_v59 = vor.u32 %v13179_v50, %v10526_v48  ;;  %6722 = vmatpush.bf16.msrb.mxu2 %v10271_v53 }
 0x3e9   : > { %v12947_v55 = vld [vmem:[%s21517_s1 + $0x464] sm:$0xf0] }
 0x3ea   : > { %v9854_v56 = vld [vmem:[%s21517_s1 + $0x648] sm:$0xf]  ;;  %v9599_v2 = vor.u32 %v12947_v55, %v9598_v54  ;;  %6736 = vmatpush.bf16.msrb.mxu3 %v10527_v59 }
 0x3eb   : > { %v13011_v60 = vld [vmem:[%s21517_s1 + $0x664] sm:$0xf0] }
 0x3ec   : > { %v10238_v61 = vld [vmem:[%s21517_s1 + $0x948] sm:$0xf]  ;;  %v9855_v4 = vor.u32 %v13011_v60, %v9854_v56  ;;  %6699 = vmatpush.bf16.msrb.mxu0 %v9599_v2 }
 0x3ed   : > { %v13107_v62 = vld [vmem:[%s21517_s1 + $0x964] sm:$0xf0] }
 0x3ee   : > { %v10494_v63 = vld [vmem:[%s21517_s1 + $0xb48] sm:$0xf]  ;;  %v10239_v5 = vor.u32 %v13107_v62, %v10238_v61  ;;  %6713 = vmatpush.bf16.msrb.mxu1 %v9855_v4 }
 0x3ef   : > { %v13171_v0 = vld [vmem:[%s21517_s1 + $0xb64] sm:$0xf0] }
 0x3f0   : > { %v9566_v3 = vld [vmem:[%s21517_s1 + $0x408] sm:$0xf]  ;;  %v10495_v9 = vor.u32 %v13171_v0, %v10494_v63  ;;  %6723 = vmatpush.bf16.msrb.mxu2 %v10239_v5 }
 0x3f1   : > { %v12939_v6 = vld [vmem:[%s21517_s1 + $0x424] sm:$0xf0] }
 0x3f2   : > { %v9822_v7 = vld [vmem:[%s21517_s1 + $0x608] sm:$0xf]  ;;  %v9567_v18 = vor.u32 %v12939_v6, %v9566_v3  ;;  %6737 = vmatpush.bf16.msrb.mxu3 %v10495_v9 }
 0x3f3   : > { %v13003_v8 = vld [vmem:[%s21517_s1 + $0x624] sm:$0xf0] }
 0x3f4   : > { %v10206_v11 = vld [vmem:[%s21517_s1 + $0x908] sm:$0xf]  ;;  %v9823_v57 = vor.u32 %v13003_v8, %v9822_v7  ;;  %6700 = vmatpush.bf16.msrb.mxu0 %v9567_v18  ;;  %v17473_v8 = vpop.f32.mrf.mxu2 }
 0x3f5   : > { %v13099_v12 = vld [vmem:[%s21517_s1 + $0x924] sm:$0xf0] }
 0x3f6   : > { %v10462_v13 = vld [vmem:[%s21517_s1 + $0xb08] sm:$0xf]  ;;  %v10207_v23 = vor.u32 %v13099_v12, %v10206_v11  ;;  %6714 = vmatpush.bf16.msrb.mxu1 %v9823_v57  ;;  %v17481_v12 = vpop.f32.mrf.mxu3 }
 0x3f7   : > { %v13163_v14 = vld [vmem:[%s21517_s1 + $0xb24] sm:$0xf0]  ;;  %6701 = vmatmul.bf16.vlgmr.msrb.gmra.mxu0 %v16071_v1 }
 0x3f8   : > { %v10814_v15 = vld [vmem:[%s21517_s1 + $0xdc8] sm:$0xf]  ;;  %v10463_v24 = vor.u32 %v13163_v14, %v10462_v13  ;;  %6724 = vmatpush.bf16.msrb.mxu2 %v10207_v23 }
 0x3f9   : > { %v13251_v16 = vld [vmem:[%s21517_s1 + $0xde4] sm:$0xf0]  ;;  %6715 = vmatmul.bf16.vlgmr.msrb.gmra.mxu1 %v16107_v17 }
 0x3fa   : > { %v11070_v19 = vld [vmem:[%s21517_s1 + $0xfc8] sm:$0xf]  ;;  %v10815_v25 = vor.u32 %v13251_v16, %v10814_v15  ;;  %6738 = vmatpush.bf16.msrb.mxu3 %v10463_v24 }
 0x3fb   : > { %v13315_v21 = vld [vmem:[%s21517_s1 + $0xfe4] sm:$0xf0] }
 0x3fc   : > { %v10174_v26 = vld [vmem:[%s21517_s1 + $0x8c8] sm:$0xf]  ;;  %v11071_v29 = vor.u32 %v13315_v21, %v11070_v19  ;;  %6749 = vmatpush.bf16.msra.mxu0 %v10815_v25 }
 0x3fd   : > { %v13091_v27 = vld [vmem:[%s21517_s1 + $0x8e4] sm:$0xf0] }
 0x3fe   : > { %v10430_v28 = vld [vmem:[%s21517_s1 + $0xac8] sm:$0xf]  ;;  %v10175_v45 = vor.u32 %v13091_v27, %v10174_v26  ;;  %6763 = vmatpush.bf16.msra.mxu1 %v11071_v29 }
 0x3ff   : > { %v13155_v30 = vld [vmem:[%s21517_s1 + $0xae4] sm:$0xf0] }
 0x400   : > { %v10782_v33 = vld [vmem:[%s21517_s1 + $0xd88] sm:$0xf]  ;;  %v10431_v46 = vor.u32 %v13155_v30, %v10430_v28  ;;  %6725 = vmatpush.bf16.msrb.mxu2 %v10175_v45 }
 0x401   : > { %v13243_v38 = vld [vmem:[%s21517_s1 + $0xda4] sm:$0xf0] }
 0x402   : > { %v11038_v41 = vld [vmem:[%s21517_s1 + $0xf88] sm:$0xf]  ;;  %v10783_v48 = vor.u32 %v13243_v38, %v10782_v33  ;;  %6739 = vmatpush.bf16.msrb.mxu3 %v10431_v46  ;;  %v17519_v38 = vpop.f32.mrf.mxu0 }
 0x403   : > { %v13307_v42 = vld [vmem:[%s21517_s1 + $0xfa4] sm:$0xf0] }
 0x404   : > { %v10142_v50 = vld [vmem:[%s21517_s1 + $0x888] sm:$0xf]  ;;  %v11039_v53 = vor.u32 %v13307_v42, %v11038_v41  ;;  %6750 = vmatpush.bf16.msra.mxu0 %v10783_v48 }
 0x405   : > { %v13083_v51 = vld [vmem:[%s21517_s1 + $0x8a4] sm:$0xf0] }
 0x406   : > { %v10398_v52 = vld [vmem:[%s21517_s1 + $0xa88] sm:$0xf]  ;;  %v10143_v61 = vor.u32 %v13083_v51, %v10142_v50  ;;  %6764 = vmatpush.bf16.msra.mxu1 %v11039_v53 }
 0x407   : > { %v13147_v54 = vld [vmem:[%s21517_s1 + $0xaa4] sm:$0xf0] }
 0x408   : > { %v10750_v55 = vld [vmem:[%s21517_s1 + $0xd48] sm:$0xf]  ;;  %v10399_v62 = vor.u32 %v13147_v54, %v10398_v52  ;;  %6726 = vmatpush.bf16.msrb.mxu2 %v10143_v61 }
 0x409   : > { %v13235_v56 = vld [vmem:[%s21517_s1 + $0xd64] sm:$0xf0] }
 0x40a   : > { %v11006_v59 = vld [vmem:[%s21517_s1 + $0xf48] sm:$0xf]  ;;  %v10751_v63 = vor.u32 %v13235_v56, %v10750_v55  ;;  %6740 = vmatpush.bf16.msrb.mxu3 %v10399_v62  ;;  %v17547_v62 = vpop.f32.mrf.mxu3 }
 0x40b   : > { %v13299_v60 = vld [vmem:[%s21517_s1 + $0xf64] sm:$0xf0] }
 0x40c   : > { %v10110_v0 = vld [vmem:[%s21517_s1 + $0x848] sm:$0xf]  ;;  %v11007_v4 = vor.u32 %v13299_v60, %v11006_v59  ;;  %6751 = vmatpush.bf16.msra.mxu0 %v10751_v63  ;;  %v17545_v60 = vpop.f32.mrf.mxu2 }
 0x40d   : > { %v13075_v2 = vld [vmem:[%s21517_s1 + $0x864] sm:$0xf0] }
 0x40e   : > { %v10366_v3 = vld [vmem:[%s21517_s1 + $0xa48] sm:$0xf]  ;;  %v10111_v13 = vor.u32 %v13075_v2, %v10110_v0  ;;  %6765 = vmatpush.bf16.msra.mxu1 %v11007_v4 }
 0x40f   : > { %v13139_v5 = vld [vmem:[%s21517_s1 + $0xa64] sm:$0xf0] }
 0x410   : > { %v10718_v6 = vld [vmem:[%s21517_s1 + $0xd08] sm:$0xf]  ;;  %v10367_v15 = vor.u32 %v13139_v5, %v10366_v3  ;;  %6727 = vmatpush.bf16.msrb.mxu2 %v10111_v13 }
 0x411   : > { %v13227_v7 = vld [vmem:[%s21517_s1 + $0xd24] sm:$0xf0] }
 0x412   : > { %v10974_v9 = vld [vmem:[%s21517_s1 + $0xf08] sm:$0xf]  ;;  %v10719_v16 = vor.u32 %v13227_v7, %v10718_v6  ;;  %6741 = vmatpush.bf16.msrb.mxu3 %v10367_v15  ;;  %v17577_v15 = vpop.f32.mrf.mxu0 }
 0x413   : > { %v13291_v11 = vld [vmem:[%s21517_s1 + $0xf24] sm:$0xf0] }
 0x414   : > { %v10078_v14 = vld [vmem:[%s21517_s1 + $0x808] sm:$0xf]  ;;  %v10975_v57 = vor.u32 %v13291_v11, %v10974_v9  ;;  %6752 = vmatpush.bf16.msra.mxu0 %v10719_v16  ;;  %v17568_v11 = vpop.f32.mrf.mxu1 }
 0x415   : > { %v13067_v18 = vld [vmem:[%s21517_s1 + $0x824] sm:$0xf0] }
 0x416   : > { %v10334_v19 = vld [vmem:[%s21517_s1 + $0xa08] sm:$0xf]  ;;  %v10079_v29 = vor.u32 %v13067_v18, %v10078_v14  ;;  %6766 = vmatpush.bf16.msra.mxu1 %v10975_v57 }
 0x417   : > { %v13131_v21 = vld [vmem:[%s21517_s1 + $0xa24] sm:$0xf0] }
 0x418   : > { %v10686_v23 = vld [vmem:[%s21517_s1 + $0xcc8] sm:$0xf]  ;;  %v10335_v41 = vor.u32 %v13131_v21, %v10334_v19  ;;  %6728 = vmatpush.bf16.msrb.mxu2 %v10079_v29 }
 0x419   : > { %v13219_v24 = vld [vmem:[%s21517_s1 + $0xce4] sm:$0xf0] }
 0x41a   : > { %v10942_v25 = vld [vmem:[%s21517_s1 + $0xec8] sm:$0xf]  ;;  %v10687_v42 = vor.u32 %v13219_v24, %v10686_v23  ;;  %6742 = vmatpush.bf16.msrb.mxu3 %v10335_v41 }
 0x41b   : > { %v13283_v26 = vld [vmem:[%s21517_s1 + $0xee4] sm:$0xf0]  ;;  %6729 = vmatmul.bf16.vlgmr.msrb.gmra.mxu2 %v16279_v39 }
 0x41c   : > { %v11326_v27 = vld [vmem:[%s21517_s1 + $0x11c8] sm:$0xf]  ;;  %v10943_v45 = vor.u32 %v13283_v26, %v10942_v25  ;;  %6753 = vmatpush.bf16.msra.mxu0 %v10687_v42 }
 0x41d   : > { %v13379_v28 = vld [vmem:[%s21517_s1 + $0x11e4] sm:$0xf0]  ;;  %6743 = vmatmul.bf16.vlgmr.msrb.gmra.mxu3 %v16292_v44 }
 0x41e   : > { %v11582_v30 = vld [vmem:[%s21517_s1 + $0x13c8] sm:$0xf]  ;;  %v11327_v46 = vor.u32 %v13379_v28, %v11326_v27  ;;  %6767 = vmatpush.bf16.msra.mxu1 %v10943_v45 }
 0x41f   : > { %v13443_v33 = vld [vmem:[%s21517_s1 + $0x13e4] sm:$0xf0] }
 0x420   : > { %v10654_v48 = vld [vmem:[%s21517_s1 + $0xc88] sm:$0xf]  ;;  %v11583_v52 = vor.u32 %v13443_v33, %v11582_v30  ;;  %6777 = vmatpush.bf16.msra.mxu2 %v11327_v46 }
 0x421   : > { %v13211_v50 = vld [vmem:[%s21517_s1 + $0xca4] sm:$0xf0] }
 0x422   : > { %v10910_v51 = vld [vmem:[%s21517_s1 + $0xe88] sm:$0xf]  ;;  %v10655_v61 = vor.u32 %v13211_v50, %v10654_v48  ;;  %6791 = vmatpush.bf16.msra.mxu3 %v11583_v52  ;;  %v17615_v50 = vpop.f32.mrf.mxu2 }
 0x423   : > { %v13275_v53 = vld [vmem:[%s21517_s1 + $0xea4] sm:$0xf0] }
 0x424   : > { %v11294_v54 = vld [vmem:[%s21517_s1 + $0x1188] sm:$0xf]  ;;  %v10911_v63 = vor.u32 %v13275_v53, %v10910_v51  ;;  %6754 = vmatpush.bf16.msra.mxu0 %v10655_v61 }
 0x425   : > { %v13371_v55 = vld [vmem:[%s21517_s1 + $0x11a4] sm:$0xf0] }
 0x426   : > { %v11550_v56 = vld [vmem:[%s21517_s1 + $0x1388] sm:$0xf]  ;;  %v11295_v0 = vor.u32 %v13371_v55, %v11294_v54  ;;  %6768 = vmatpush.bf16.msra.mxu1 %v10911_v63 }
 0x427   : > { %v13435_v59 = vld [vmem:[%s21517_s1 + $0x13a4] sm:$0xf0] }
 0x428   : > { %v10622_v2 = vld [vmem:[%s21517_s1 + $0xc48] sm:$0xf]  ;;  %v11551_v5 = vor.u32 %v13435_v59, %v11550_v56  ;;  %6778 = vmatpush.bf16.msra.mxu2 %v11295_v0  ;;  %v17626_v56 = vpop.f32.mrf.mxu3  ;;  %v17628_v59 = vpop.f32.mrf.mxu1 }
 0x429   : > { %v13203_v3 = vld [vmem:[%s21517_s1 + $0xc64] sm:$0xf0] }
 0x42a   : > { %v10878_v4 = vld [vmem:[%s21517_s1 + $0xe48] sm:$0xf]  ;;  %v10623_v16 = vor.u32 %v13203_v3, %v10622_v2  ;;  %6792 = vmatpush.bf16.msra.mxu3 %v11551_v5 }
 0x42b   : > { %v13267_v6 = vld [vmem:[%s21517_s1 + $0xe64] sm:$0xf0] }
 0x42c   : > { %v11262_v7 = vld [vmem:[%s21517_s1 + $0x1148] sm:$0xf]  ;;  %v10879_v19 = vor.u32 %v13267_v6, %v10878_v4  ;;  %6755 = vmatpush.bf16.msra.mxu0 %v10623_v16  ;;  %v17645_v6 = vpop.f32.mrf.mxu0 }
 0x42d   : > { %v13363_v9 = vld [vmem:[%s21517_s1 + $0x1164] sm:$0xf0] }
 0x42e   : > { %v11518_v13 = vld [vmem:[%s21517_s1 + $0x1348] sm:$0xf]  ;;  %v11263_v21 = vor.u32 %v13363_v9, %v11262_v7  ;;  %6769 = vmatpush.bf16.msra.mxu1 %v10879_v19 }
 0x42f   : > { %v13427_v14 = vld [vmem:[%s21517_s1 + $0x1364] sm:$0xf0] }
 0x430   : > { %v10590_v18 = vld [vmem:[%s21517_s1 + $0xc08] sm:$0xf]  ;;  %v11519_v25 = vor.u32 %v13427_v14, %v11518_v13  ;;  %6779 = vmatpush.bf16.msra.mxu2 %v11263_v21 }
 0x431   : > { %v13195_v57 = vld [vmem:[%s21517_s1 + $0xc24] sm:$0xf0] }
 0x432   : > { %v10846_v23 = vld [vmem:[%s21517_s1 + $0xe08] sm:$0xf]  ;;  %v10591_v41 = vor.u32 %v13195_v57, %v10590_v18  ;;  %6793 = vmatpush.bf16.msra.mxu3 %v11519_v25 }
 0x433   : > { %v13259_v24 = vld [vmem:[%s21517_s1 + $0xe24] sm:$0xf0] }
 0x434   : > { %v11230_v26 = vld [vmem:[%s21517_s1 + $0x1108] sm:$0xf]  ;;  %v10847_v46 = vor.u32 %v13259_v24, %v10846_v23  ;;  %6756 = vmatpush.bf16.msra.mxu0 %v10591_v41  ;;  %v17684_v41 = vpop.f32.mrf.mxu3 }
 0x435   : > { %v13355_v27 = vld [vmem:[%s21517_s1 + $0x1124] sm:$0xf0] }
 0x436   : > { %v11486_v28 = vld [vmem:[%s21517_s1 + $0x1308] sm:$0xf]  ;;  %v11231_v48 = vor.u32 %v13355_v27, %v11230_v26  ;;  %6770 = vmatpush.bf16.msra.mxu1 %v10847_v46  ;;  %v17673_v26 = vpop.f32.mrf.mxu2 }
 0x437   : > { %v13419_v29 = vld [vmem:[%s21517_s1 + $0x1324] sm:$0xf0]  ;;  %6757 = vmatmul.bf16.vlgmr.msra.gmra.mxu0 %v16290_v43 }
 0x438   : > { %v11838_v30 = vld [vmem:[%s21517_s1 + $0x15c8] sm:$0xf]  ;;  %v11487_v51 = vor.u32 %v13419_v29, %v11486_v28  ;;  %6780 = vmatpush.bf16.msra.mxu2 %v11231_v48 }
 0x439   : > { %v13507_v33 = vld [vmem:[%s21517_s1 + $0x15e4] sm:$0xf0]  ;;  %6771 = vmatmul.bf16.vlgmr.msra.gmra.mxu1 %v16300_v47 }
 0x43a   : > { %v12094_v42 = vld [vmem:[%s21517_s1 + $0x17c8] sm:$0xf]  ;;  %v11839_v52 = vor.u32 %v13507_v33, %v11838_v30  ;;  %6794 = vmatpush.bf16.msra.mxu3 %v11487_v51 }
 0x43b   : > { %v13571_v45 = vld [vmem:[%s21517_s1 + $0x17e4] sm:$0xf0] }
 0x43c   : > { %v11198_v53 = vld [vmem:[%s21517_s1 + $0x10c8] sm:$0xf]  ;;  %v12095_v61 = vor.u32 %v13571_v45, %v12094_v42  ;;  %6805 = vmatpush.bf16.msrb.mxu0 %v11839_v52 }
 0x43d   : > { %v13347_v54 = vld [vmem:[%s21517_s1 + $0x10e4] sm:$0xf0] }
 0x43e   : > { %v11454_v55 = vld [vmem:[%s21517_s1 + $0x12c8] sm:$0xf]  ;;  %v11199_v5 = vor.u32 %v13347_v54, %v11198_v53  ;;  %6819 = vmatpush.bf16.msrb.mxu1 %v12095_v61  ;;  %v17701_v53 = vpop.f32.mrf.mxu1 }
 0x43f   : > { %v13411_v63 = vld [vmem:[%s21517_s1 + $0x12e4] sm:$0xf0] }
 0x440   : > { %v11806_v0 = vld [vmem:[%s21517_s1 + $0x1588] sm:$0xf]  ;;  %v11455_v7 = vor.u32 %v13411_v63, %v11454_v55  ;;  %6781 = vmatpush.bf16.msra.mxu2 %v11199_v5 }
 0x441   : > { %v13499_v2 = vld [vmem:[%s21517_s1 + $0x15a4] sm:$0xf0] }
 0x442   : > { %v12062_v3 = vld [vmem:[%s21517_s1 + $0x1788] sm:$0xf]  ;;  %v11807_v9 = vor.u32 %v13499_v2, %v11806_v0  ;;  %6795 = vmatpush.bf16.msra.mxu3 %v11455_v7 }
 0x443   : > { %v13563_v4 = vld [vmem:[%s21517_s1 + $0x17a4] sm:$0xf0] }
 0x444   : > { %v11166_v13 = vld [vmem:[%s21517_s1 + $0x1088] sm:$0xf]  ;;  %v12063_v18 = vor.u32 %v13563_v4, %v12062_v3  ;;  %6806 = vmatpush.bf16.msrb.mxu0 %v11807_v9 }
 0x445   : > { %v13339_v14 = vld [vmem:[%s21517_s1 + $0x10a4] sm:$0xf0] }
 0x446   : > { %v11422_v16 = vld [vmem:[%s21517_s1 + $0x1288] sm:$0xf]  ;;  %v11167_v25 = vor.u32 %v13339_v14, %v11166_v13  ;;  %6820 = vmatpush.bf16.msrb.mxu1 %v12063_v18  ;;  %v17724_v13 = vpop.f32.mrf.mxu0 }
 0x447   : > { %v13403_v19 = vld [vmem:[%s21517_s1 + $0x12a4] sm:$0xf0] }
 0x448   : > { %v11774_v21 = vld [vmem:[%s21517_s1 + $0x1548] sm:$0xf]  ;;  %v11423_v27 = vor.u32 %v13403_v19, %v11422_v16  ;;  %6782 = vmatpush.bf16.msra.mxu2 %v11167_v25 }
 0x449   : > { %v13491_v57 = vld [vmem:[%s21517_s1 + $0x1564] sm:$0xf0] }
 0x44a   : > { %v12030_v23 = vld [vmem:[%s21517_s1 + $0x1748] sm:$0xf]  ;;  %v11775_v28 = vor.u32 %v13491_v57, %v11774_v21  ;;  %6796 = vmatpush.bf16.msra.mxu3 %v11423_v27  ;;  %v12863_v21 = vld [vmem:[%s21517_s1 + $0x1cc] sm:$0xf] }
 0x44b   : > { %v13555_v24 = vld [vmem:[%s21517_s1 + $0x1764] sm:$0xf0]  ;;  %v9280_v57 = vld [vmem:[%s21517_s1 + $0x1e8] sm:$0xf0] }
 0x44c   : > { %v11134_v29 = vld [vmem:[%s21517_s1 + $0x1048] sm:$0xf]  ;;  %v12031_v42 = vor.u32 %v13555_v24, %v12030_v23  ;;  %6807 = vmatpush.bf16.msrb.mxu0 %v11775_v28 }
 0x44d   : > { %v13331_v30 = vld [vmem:[%s21517_s1 + $0x1064] sm:$0xf0] }
 0x44e   : > { %v11390_v33 = vld [vmem:[%s21517_s1 + $0x1248] sm:$0xf]  ;;  %v11135_v54 = vor.u32 %v13331_v30, %v11134_v29  ;;  %6821 = vmatpush.bf16.msrb.mxu1 %v12031_v42  ;;  %v9283_v42 = vor.u32 %v12863_v21, %v9280_v57 }
 0x44f   : > { %v13395_v45 = vld [vmem:[%s21517_s1 + $0x1264] sm:$0xf0] }
 0x450   : > { %v11742_v46 = vld [vmem:[%s21517_s1 + $0x1508] sm:$0xf]  ;;  %v11391_v61 = vor.u32 %v13395_v45, %v11390_v33  ;;  %6783 = vmatpush.bf16.msra.mxu2 %v11135_v54  ;;  %v17750_v33 = vpop.f32.mrf.mxu2  ;;  %v12855_v54 = vld [vmem:[%s21517_s1 + $0x18c] sm:$0xf] }
 0x451   : > { %v13483_v48 = vld [vmem:[%s21517_s1 + $0x1524] sm:$0xf0] }
 0x452   : > { %v11998_v51 = vld [vmem:[%s21517_s1 + $0x1708] sm:$0xf]  ;;  %v11743_v63 = vor.u32 %v13483_v48, %v11742_v46  ;;  %6797 = vmatpush.bf16.msra.mxu3 %v11391_v61 }
 0x453   : > { %v13547_v52 = vld [vmem:[%s21517_s1 + $0x1724] sm:$0xf0] }
 0x454   : > { %v11102_v55 = vld [vmem:[%s21517_s1 + $0x1008] sm:$0xf]  ;;  %v11999_v4 = vor.u32 %v13547_v52, %v11998_v51  ;;  %6808 = vmatpush.bf16.msrb.mxu0 %v11743_v63  ;;  %v17761_v51 = vpop.f32.mrf.mxu3  ;;  %v17763_v52 = vpop.f32.mrf.mxu1 }
 0x455   : > { %v13323_v0 = vld [vmem:[%s21517_s1 + $0x1024] sm:$0xf0] }
 0x456   : > { %v11358_v2 = vld [vmem:[%s21517_s1 + $0x1208] sm:$0xf]  ;;  %v11103_v19 = vor.u32 %v13323_v0, %v11102_v55  ;;  %6822 = vmatpush.bf16.msrb.mxu1 %v11999_v4  ;;  %v9248_v55 = vld [vmem:[%s21517_s1 + $0x1a8] sm:$0xf0] }
 0x457   : > { %v13387_v3 = vld [vmem:[%s21517_s1 + $0x1224] sm:$0xf0] }
 0x458   : > { %v11710_v5 = vld [vmem:[%s21517_s1 + $0x14c8] sm:$0xf]  ;;  %v11359_v23 = vor.u32 %v13387_v3, %v11358_v2  ;;  %6784 = vmatpush.bf16.msra.mxu2 %v11103_v19  ;;  %v17797_v19 = vpop.f32.mrf.mxu0 }
 0x459   : > { %v13475_v7 = vld [vmem:[%s21517_s1 + $0x14e4] sm:$0xf0] }
 0x45a   : > { %v11966_v9 = vld [vmem:[%s21517_s1 + $0x16c8] sm:$0xf]  ;;  %v11711_v24 = vor.u32 %v13475_v7, %v11710_v5  ;;  %6798 = vmatpush.bf16.msra.mxu3 %v11359_v23  ;;  %v9251_v5 = vor.u32 %v12855_v54, %v9248_v55  ;;  %v12927_v55 = vld [vmem:[%s21517_s1 + $0x3cc] sm:$0xf] }
 0x45b   : > { %v13539_v14 = vld [vmem:[%s21517_s1 + $0x16e4] sm:$0xf0]  ;;  %6785 = vmatmul.bf16.vlgmr.msra.gmra.mxu2 %v16507_v31 }
 0x45c   : > { %v12222_v16 = vld [vmem:[%s21517_s1 + $0x18c8] sm:$0xf]  ;;  %v11967_v25 = vor.u32 %v13539_v14, %v11966_v9  ;;  %6809 = vmatpush.bf16.msrb.mxu0 %v11711_v24  ;;  %v17823_v54 = vpop.f32.mrf.mxu3 }
 0x45d   : > { %v13603_v18 = vld [vmem:[%s21517_s1 + $0x18e4] sm:$0xf0]  ;;  %6799 = vmatmul.bf16.vlgmr.msra.gmra.mxu3 %v16520_v36 }
 0x45e   : > { %v12223_v27 = vor.u32 %v13603_v18, %v12222_v16  ;;  %v11678_v28 = vld [vmem:[%s21517_s1 + $0x1488] sm:$0xf]  ;;  %6823 = vmatpush.bf16.msrb.mxu1 %v11967_v25  ;;  %6847 = vmatpush.bf16.msrb.mxu3 %v9283_v42  ;;  %v12847_v16 = vld [vmem:[%s21517_s1 + $0x14c] sm:$0xf] }
 0x45f   : > { %v13467_v29 = vld [vmem:[%s21517_s1 + $0x14a4] sm:$0xf0]  ;;  %v9216_v18 = vld [vmem:[%s21517_s1 + $0x168] sm:$0xf0] }
 0x460   : > { %v11934_v30 = vld [vmem:[%s21517_s1 + $0x1688] sm:$0xf]  ;;  %v11679_v61 = vor.u32 %v13467_v29, %v11678_v28  ;;  %6837 = vmatpush.bf16.msrb.mxu2 %v12223_v27  ;;  %v9219_v42 = vor.u32 %v12847_v16, %v9216_v18 }
 0x461   : > { %v13531_v45 = vld [vmem:[%s21517_s1 + $0x16a4] sm:$0xf0] }
 0x462   : > { %v12190_v46 = vld [vmem:[%s21517_s1 + $0x1888] sm:$0xf]  ;;  %v11935_v63 = vor.u32 %v13531_v45, %v11934_v30  ;;  %6810 = vmatpush.bf16.msrb.mxu0 %v11679_v61  ;;  %v6506_v30 = vpop.f32.mrf.mxu2  ;;  %6848 = vmatpush.bf16.msrb.mxu3 %v9251_v5  ;;  %v9536_v61 = vld [vmem:[%s21517_s1 + $0x3e8] sm:$0xf0]  ;;  %v17843_v5 = vpop.f32.mrf.mxu1 }
 0x463   : > { %v13595_v48 = vld [vmem:[%s21517_s1 + $0x18a4] sm:$0xf0] }
 0x464   : > { %v12191_v0 = vor.u32 %v13595_v48, %v12190_v46  ;;  %v11646_v2 = vld [vmem:[%s21517_s1 + $0x1448] sm:$0xf]  ;;  %6824 = vmatpush.bf16.msrb.mxu1 %v11935_v63  ;;  %v12839_v46 = vld [vmem:[%s21517_s1 + $0x10c] sm:$0xf] }
 0x465   : > { %v13459_v3 = vld [vmem:[%s21517_s1 + $0x1464] sm:$0xf0]  ;;  %v9184_v48 = vld [vmem:[%s21517_s1 + $0x128] sm:$0xf0] }
 0x466   : > { %v11902_v4 = vld [vmem:[%s21517_s1 + $0x1648] sm:$0xf]  ;;  %v11647_v21 = vor.u32 %v13459_v3, %v11646_v2  ;;  %6838 = vmatpush.bf16.msrb.mxu2 %v12191_v0  ;;  %v12991_v63 = vld [vmem:[%s21517_s1 + $0x5cc] sm:$0xf]  ;;  %6849 = vmatpush.bf16.msrb.mxu3 %v9219_v42  ;;  %v9187_v18 = vor.u32 %v12839_v46, %v9184_v48  ;;  %v17866_v42 = vpop.f32.mrf.mxu0 }
 0x467   : > { %v13523_v7 = vld [vmem:[%s21517_s1 + $0x1664] sm:$0xf0]  ;;  %v9792_v2 = vld [vmem:[%s21517_s1 + $0x5e8] sm:$0xf0] }
 0x468   : > { %v12158_v9 = vld [vmem:[%s21517_s1 + $0x1848] sm:$0xf]  ;;  %v11903_v24 = vor.u32 %v13523_v7, %v11902_v4  ;;  %6811 = vmatpush.bf16.msrb.mxu0 %v11647_v21  ;;  %v13055_v3 = vld [vmem:[%s21517_s1 + $0x7cc] sm:$0xf]  ;;  %v9539_v21 = vor.u32 %v12927_v55, %v9536_v61 }
 0x469   : > { %v13587_v14 = vld [vmem:[%s21517_s1 + $0x1864] sm:$0xf0]  ;;  %v10048_v4 = vld [vmem:[%s21517_s1 + $0x7e8] sm:$0xf0] }
 0x46a   : > { %v11614_v57 = vld [vmem:[%s21517_s1 + $0x1408] sm:$0xf]  ;;  %v12159_v25 = vor.u32 %v13587_v14, %v12158_v9  ;;  %6825 = vmatpush.bf16.msrb.mxu1 %v11903_v24  ;;  %v17848_v14 = vld [vmem:[%s21518_s2] sm:$0xff]  ;;  %v9795_v24 = vor.u32 %v12991_v63, %v9792_v2  ;;  %v13047_v46 = vld [vmem:[%s21517_s1 + $0x78c] sm:$0xf]  ;;  %6850 = vmatpush.bf16.msrb.mxu3 %v9187_v18  ;;  %v17895_v18 = vpop.f32.mrf.mxu2 }
 0x46b   : > { %v13451_v23 = vld [vmem:[%s21517_s1 + $0x1424] sm:$0xf0]  ;;  %v21523_v16 = vperm.slane %v17848_v14, 1  ;;  %v10016_v48 = vld [vmem:[%s21517_s1 + $0x7a8] sm:$0xf0] }
 0x46c   : > { %v11870_v27 = vld [vmem:[%s21517_s1 + $0x1608] sm:$0xf]  ;;  %v11615_v0 = vor.u32 %v13451_v23, %v11614_v57  ;;  %6839 = vmatpush.bf16.msrb.mxu2 %v12159_v25  ;;  %v12831_v57 = vld [vmem:[%s21517_s1 + $0xcc] sm:$0xf]  ;;  %v10051_v25 = vor.u32 %v13055_v3, %v10048_v4  ;;  %v10019_v4 = vor.u32 %v13047_v46, %v10016_v48  ;;  %v6548_v46 = vpop.f32.mrf.mxu1 }
 0x46d   : > { %v13515_v28 = vld [vmem:[%s21517_s1 + $0x1624] sm:$0xf0]  ;;  %v9152_v23 = vld [vmem:[%s21517_s1 + $0xe8] sm:$0xf0]  ;;  %v6493_v55 = vadd.f32 %v17763_v52, %v21523_v16 }
 0x46e   : > { %v12126_v29 = vld [vmem:[%s21517_s1 + $0x1808] sm:$0xf]  ;;  %v11871_v7 = vor.u32 %v13515_v28, %v11870_v27  ;;  %v12919_v27 = vld [vmem:[%s21517_s1 + $0x38c] sm:$0xf]  ;;  %6812 = vmatpush.bf16.msrb.mxu0 %v11615_v0  ;;  %v9155_v61 = vor.u32 %v12831_v57, %v9152_v23 }
 0x46f   : > { %v13579_v45 = vld [vmem:[%s21517_s1 + $0x1824] sm:$0xf0]  ;;  %v9504_v28 = vld [vmem:[%s21517_s1 + $0x3a8] sm:$0xf0] }
 0x470   : > { %v12127_v9 = vor.u32 %v13579_v45, %v12126_v29  ;;  %v12983_v29 = vld [vmem:[%s21517_s1 + $0x58c] sm:$0xf]  ;;  %6826 = vmatpush.bf16.msrb.mxu1 %v11871_v7  ;;  %v9507_v63 = vor.u32 %v12919_v27, %v9504_v28  ;;  %6851 = vmatpush.bf16.msrb.mxu3 %v9155_v61 }
 0x471   : > { %v9760_v45 = vld [vmem:[%s21517_s1 + $0x5a8] sm:$0xf0]  ;;  %6813 = vmatmul.bf16.vlgmr.msrb.gmra.mxu0 %v16518_v35 }
 0x472   : > { %6840 = vmatpush.bf16.msrb.mxu2 %v12127_v9  ;;  %6861 = vmatpush.bf16.msra.mxu0 %v9539_v21  ;;  %v12823_v0 = vld [vmem:[%s21517_s1 + $0x8c] sm:$0xf]  ;;  %v9763_v3 = vor.u32 %v12983_v29, %v9760_v45 }
 0x473   : > { %v9120_v2 = vld [vmem:[%s21517_s1 + $0xa8] sm:$0xf0]  ;;  %6827 = vmatmul.bf16.vlgmr.msrb.gmra.mxu1 %v16528_v40 }
 0x474   : > { %6875 = vmatpush.bf16.msra.mxu1 %v9795_v24  ;;  %v12911_v52 = vld [vmem:[%s21517_s1 + $0x34c] sm:$0xf]  ;;  %v17908_v24 = vpop.f32.mrf.mxu3  ;;  %v9123_v27 = vor.u32 %v12823_v0, %v9120_v2 }
 0x475   : > { %v9472_v7 = vld [vmem:[%s21517_s1 + $0x368] sm:$0xf0]  ;;  %12246 = vmatmul.msk.bf16.vlgmr.msrb.gmra.mxu2 %vm6297_vm0, %v16633_v37 }
 0x476   : > { %6889 = vmatpush.bf16.msra.mxu2 %v10051_v25  ;;  %v12975_v9 = vld [vmem:[%s21517_s1 + $0x54c] sm:$0xf]  ;;  %v6507_v25 = vadd.f32 %v6506_v30, %v6493_v55  ;;  %6862 = vmatpush.bf16.msra.mxu0 %v9507_v63  ;;  %v9475_v28 = vor.u32 %v12911_v52, %v9472_v7  ;;  %v17940_v52 = vpop.f32.mrf.mxu0 }
 0x477   : > { %v9728_v21 = vld [vmem:[%s21517_s1 + $0x568] sm:$0xf0]  ;;  %6852 = vmatpush.bf16.msrb.mxu3 %v9123_v27 }
 0x478   : > { %v13039_v57 = vld [vmem:[%s21517_s1 + $0x74c] sm:$0xf]  ;;  %6876 = vmatpush.bf16.msra.mxu1 %v9763_v3  ;;  %v9731_v48 = vor.u32 %v12975_v9, %v9728_v21  ;;  %v6313_v3 = vadd.f32 %v17114_v22, %v2281_v49 }
 0x479   : > { %v9984_v23 = vld [vmem:[%s21517_s1 + $0x768] sm:$0xf0] }
 0x47a   : > { %v12815_v29 = vld [vmem:[%s21517_s1 + $0x4c] sm:$0xf]  ;;  %6890 = vmatpush.bf16.msra.mxu2 %v10019_v4  ;;  %v9987_v16 = vor.u32 %v13039_v57, %v9984_v23  ;;  %v6521_v4 = vadd.f32 %v17823_v54, %v6507_v25  ;;  %6863 = vmatpush.bf16.msra.mxu0 %v9475_v28  ;;  %v6327_v28 = vadd.f32 %v17140_v34, %v6313_v3 }
 0x47b   : > { %v9088_v45 = vld [vmem:[%s21517_s1 + $0x68] sm:$0xf0] }
 0x47c   : > { %v12903_v30 = vld [vmem:[%s21517_s1 + $0x30c] sm:$0xf]  ;;  %v9091_v7 = vor.u32 %v12815_v29, %v9088_v45  ;;  %6877 = vmatpush.bf16.msra.mxu1 %v9731_v48  ;;  %v21549_v29 = vperm.slane %v17848_v14, 1  ;;  %v17977_v34 = vpop.f32.mrf.mxu3 }
 0x47d   : > { %v9440_v55 = vld [vmem:[%s21517_s1 + $0x328] sm:$0xf0] }
 0x47e   : > { %v12967_v61 = vld [vmem:[%s21517_s1 + $0x50c] sm:$0xf]  ;;  %v9443_v9 = vor.u32 %v12903_v30, %v9440_v55  ;;  %6891 = vmatpush.bf16.msra.mxu2 %v9987_v16  ;;  %v6495_v45 = vadd.f32 %v17843_v5, %v21549_v29  ;;  %v6535_v55 = vadd.f32 %v17866_v42, %v6521_v4  ;;  %6853 = vmatpush.bf16.msrb.mxu3 %v9091_v7 }
 0x47f   : > { %v9696_v63 = vld [vmem:[%s21517_s1 + $0x528] sm:$0xf0] }
 0x480   : > { %v13031_v0 = vld [vmem:[%s21517_s1 + $0x70c] sm:$0xf]  ;;  %v9699_v32 = vor.u32 %v12967_v61, %v9696_v63  ;;  %v6562_v61 = vpop.f32.mrf.mxu2  ;;  %6864 = vmatpush.bf16.msra.mxu0 %v9443_v9 }
 0x481   : > { %v9952_v2 = vld [vmem:[%s21517_s1 + $0x728] sm:$0xf0] }
 0x482   : > { %v12807_v21 = vld [vmem:[%s21517_s1 + $0xc] sm:$0xf]  ;;  %v9955_v49 = vor.u32 %v13031_v0, %v9952_v2  ;;  %6878 = vmatpush.bf16.msra.mxu1 %v9699_v32  ;;  %v17998_v32 = vpop.f32.mrf.mxu1 }
 0x483   : > { %v9056_v57 = vld [vmem:[%s21517_s1 + $0x28] sm:$0xf0] }
 0x484   : > { %v12895_v22 = vld [vmem:[%s21517_s1 + $0x2cc] sm:$0xf]  ;;  %v9059_v63 = vor.u32 %v12807_v21, %v9056_v57  ;;  %6892 = vmatpush.bf16.msra.mxu2 %v9955_v49  ;;  %v6341_v57 = vadd.f32 %v17473_v8, %v6327_v28 }
 0x485   : > { %v9408_v54 = vld [vmem:[%s21517_s1 + $0x2e8] sm:$0xf0] }
 0x486   : > { %v12959_v23 = vld [vmem:[%s21517_s1 + $0x4cc] sm:$0xf]  ;;  %v9411_v0 = vor.u32 %v12895_v22, %v9408_v54  ;;  %v6509_v54 = vadd.f32 %v17895_v18, %v6495_v45  ;;  %6854 = vmatpush.bf16.msrb.mxu3 %v9059_v63 }
 0x487   : > { %v9664_v25 = vld [vmem:[%s21517_s1 + $0x4e8] sm:$0xf0] }
 0x488   : > { %v13023_v16 = vld [vmem:[%s21517_s1 + $0x6cc] sm:$0xf]  ;;  %v9667_v5 = vor.u32 %v12959_v23, %v9664_v25  ;;  %v6549_v23 = vadd.f32 %v6548_v46, %v6535_v55  ;;  %6865 = vmatpush.bf16.msra.mxu0 %v9411_v0  ;;  %v6590_v46 = vpop.f32.mrf.mxu0 }
 0x489   : > { %v9920_v27 = vld [vmem:[%s21517_s1 + $0x6e8] sm:$0xf0]  ;;  %6855 = vmatmul.bf16.vlgmr.msrb.gmra.mxu3 %v16057_v58 }
 0x48a   : > { %v13119_v48 = vld [vmem:[%s21517_s1 + $0x9cc] sm:$0xf]  ;;  %v9923_v2 = vor.u32 %v13023_v16, %v9920_v27  ;;  %6879 = vmatpush.bf16.msra.mxu1 %v9667_v5  ;;  %v6355_v5 = vadd.f32 %v17481_v12, %v6341_v57  ;;  %v6564_v57 = vpop.f32.mrf.mxu2 }
 0x48b   : > { %v10304_v30 = vld [vmem:[%s21517_s1 + $0x9e8] sm:$0xf0] }
 0x48c   : > { %v12887_v3 = vld [vmem:[%s21517_s1 + $0x28c] sm:$0xf]  ;;  %v10307_v4 = vor.u32 %v13119_v48, %v10304_v30  ;;  %6893 = vmatpush.bf16.msra.mxu2 %v9923_v2  ;;  %v6523_v2 = vadd.f32 %v17908_v24, %v6509_v54  ;;  %v6369_v54 = vadd.f32 %v17519_v38, %v6355_v5 }
 0x48d   : > { %v9376_v29 = vld [vmem:[%s21517_s1 + $0x2a8] sm:$0xf0] }
 0x48e   : > { %v12951_v42 = vld [vmem:[%s21517_s1 + $0x48c] sm:$0xf]  ;;  %v9379_v25 = vor.u32 %v12887_v3, %v9376_v29  ;;  %6903 = vmatpush.bf16.msra.mxu3 %v10307_v4  ;;  %v6563_v3 = vadd.f32 %v6562_v61, %v6549_v23  ;;  %v18061_v23 = vpop.f32.mrf.mxu3 }
 0x48f   : > { %v9632_v7 = vld [vmem:[%s21517_s1 + $0x4a8] sm:$0xf0] }
 0x490   : > { %v13015_v9 = vld [vmem:[%s21517_s1 + $0x68c] sm:$0xf]  ;;  %v9635_v16 = vor.u32 %v12951_v42, %v9632_v7  ;;  %6866 = vmatpush.bf16.msra.mxu0 %v9379_v25  ;;  %v6395_v7 = vadd.f32 %v17545_v60, %v17206_v20  ;;  %v6604_v25 = vpop.f32.mrf.mxu1 }
 0x491   : > { %v9888_v21 = vld [vmem:[%s21517_s1 + $0x6a8] sm:$0xf0] }
 0x492   : > { %v13111_v49 = vld [vmem:[%s21517_s1 + $0x98c] sm:$0xf]  ;;  %v9891_v8 = vor.u32 %v13015_v9, %v9888_v21  ;;  %6880 = vmatpush.bf16.msra.mxu1 %v9635_v16 }
 0x493   : > { %v10272_v22 = vld [vmem:[%s21517_s1 + $0x9a8] sm:$0xf0] }
 0x494   : > { %v12879_v27 = vld [vmem:[%s21517_s1 + $0x24c] sm:$0xf]  ;;  %v10275_v45 = vor.u32 %v13111_v49, %v10272_v22  ;;  %6894 = vmatpush.bf16.msra.mxu2 %v9891_v8 }
 0x495   : > { %v9344_v28 = vld [vmem:[%s21517_s1 + $0x268] sm:$0xf0] }
 0x496   : > { %v12943_v18 = vld [vmem:[%s21517_s1 + $0x44c] sm:$0xf]  ;;  %v9347_v29 = vor.u32 %v12879_v27, %v9344_v28  ;;  %6904 = vmatpush.bf16.msra.mxu3 %v10275_v45  ;;  %v6537_v28 = vadd.f32 %v17940_v52, %v6523_v2 }
 0x497   : > { %v9600_v48 = vld [vmem:[%s21517_s1 + $0x468] sm:$0xf0] }
 0x498   : > { %v13007_v30 = vld [vmem:[%s21517_s1 + $0x64c] sm:$0xf]  ;;  %v9603_v9 = vor.u32 %v12943_v18, %v9600_v48  ;;  %v6577_v18 = vadd.f32 %v17977_v34, %v6563_v3  ;;  %6867 = vmatpush.bf16.msra.mxu0 %v9347_v29  ;;  %v6383_v3 = vadd.f32 %v17568_v11, %v6369_v54  ;;  %v6592_v11 = vpop.f32.mrf.mxu0 }
 0x499   : > { %v9856_v55 = vld [vmem:[%s21517_s1 + $0x668] sm:$0xf0] }
 0x49a   : > { %v13103_v63 = vld [vmem:[%s21517_s1 + $0x94c] sm:$0xf]  ;;  %v9859_v12 = vor.u32 %v13007_v30, %v9856_v55  ;;  %v6409_v55 = vadd.f32 %v17547_v62, %v6395_v7  ;;  %6881 = vmatpush.bf16.msra.mxu1 %v9603_v9 }
 0x49b   : > { %v10240_v0 = vld [vmem:[%s21517_s1 + $0x968] sm:$0xf0] }
 0x49c   : > { %v12871_v42 = vld [vmem:[%s21517_s1 + $0x20c] sm:$0xf]  ;;  %v10243_v49 = vor.u32 %v13103_v63, %v10240_v0  ;;  %6895 = vmatpush.bf16.msra.mxu2 %v9859_v12  ;;  %v6423_v29 = vadd.f32 %v17577_v15, %v6409_v55  ;;  %v6551_v12 = vadd.f32 %v17998_v32, %v6537_v28 }
 0x49d   : > { %v9312_v4 = vld [vmem:[%s21517_s1 + $0x228] sm:$0xf0] }
 0x49e   : > { %v12935_v24 = vld [vmem:[%s21517_s1 + $0x40c] sm:$0xf]  ;;  %v9315_v38 = vor.u32 %v12871_v42, %v9312_v4  ;;  %6905 = vmatpush.bf16.msra.mxu3 %v10243_v49  ;;  %v6397_v49 = vadd.f32 %v17615_v50, %v6383_v3 }
 0x49f   : > { %v9568_v61 = vld [vmem:[%s21517_s1 + $0x428] sm:$0xf0] }
 0x4a0   : > { %v12999_v21 = vld [vmem:[%s21517_s1 + $0x60c] sm:$0xf]  ;;  %v9571_v52 = vor.u32 %v12935_v24, %v9568_v61  ;;  %v6591_v24 = vadd.f32 %v6590_v46, %v6577_v18  ;;  %6868 = vmatpush.bf16.msra.mxu0 %v9315_v38  ;;  %v6565_v46 = vadd.f32 %v6564_v57, %v6551_v12  ;;  %v6606_v57 = vpop.f32.mrf.mxu1  ;;  %v6411_v55 = vadd.f32 %v17626_v56, %v6397_v49 }
 0x4a1   : > { %v9824_v20 = vld [vmem:[%s21517_s1 + $0x628] sm:$0xf0] }
 0x4a2   : > { %v13095_v60 = vld [vmem:[%s21517_s1 + $0x90c] sm:$0xf]  ;;  %v9827_v34 = vor.u32 %v12999_v21, %v9824_v20  ;;  %6882 = vmatpush.bf16.msra.mxu1 %v9571_v52  ;;  %v6605_v20 = vadd.f32 %v6604_v25, %v6591_v24  ;;  %v6632_v25 = vpop.f32.mrf.mxu3  ;;  %v6425_v56 = vadd.f32 %v17645_v6, %v6411_v55 }
 0x4a3   : > { %v10208_v22 = vld [vmem:[%s21517_s1 + $0x928] sm:$0xf0]  ;;  %6869 = vmatmul.bf16.vlgmr.msra.gmra.mxu0 %v16093_v10 }
 0x4a4   : > { %v13183_v16 = vld [vmem:[%s21517_s1 + $0xbcc] sm:$0xf]  ;;  %v10211_v63 = vor.u32 %v13095_v60, %v10208_v22  ;;  %6896 = vmatpush.bf16.msra.mxu2 %v9827_v34  ;;  %v6618_v60 = vpop.f32.mrf.mxu2  ;;  %v6579_v34 = vadd.f32 %v18061_v23, %v6565_v46 }
 0x4a5   : > { %v10560_v8 = vld [vmem:[%s21517_s1 + $0xbe8] sm:$0xf0]  ;;  %6883 = vmatmul.bf16.vlgmr.msra.gmra.mxu1 %v16071_v1 }
 0x4a6   : > { %v13247_v27 = vld [vmem:[%s21517_s1 + $0xdcc] sm:$0xf]  ;;  %v10563_v0 = vor.u32 %v13183_v16, %v10560_v8  ;;  %6906 = vmatpush.bf16.msra.mxu3 %v10211_v63  ;;  %v6437_v8 = vadd.f32 %v17628_v59, %v6423_v29 }
 0x4a7   : > { %v10816_v45 = vld [vmem:[%s21517_s1 + $0xde8] sm:$0xf0]  ;;  %6897 = vmatmul.bf16.vlgmr.msra.gmra.mxu2 %v16107_v17 }
 0x4a8   : > { %v13311_v48 = vld [vmem:[%s21517_s1 + $0xfcc] sm:$0xf]  ;;  %v10819_v62 = vor.u32 %v13247_v27, %v10816_v45  ;;  %6917 = vmatpush.bf16.msrb.mxu0 %v10563_v0  ;;  %v6619_v45 = vadd.f32 %v6618_v60, %v6605_v20  ;;  %v6451_v52 = vadd.f32 %v17673_v26, %v6437_v8  ;;  %v6439_v20 = vadd.f32 %v17701_v53, %v6425_v56 }
 0x4a9   : > { %v11072_v30 = vld [vmem:[%s21517_s1 + $0xfe8] sm:$0xf0] }
 0x4aa   : > { %v13087_v5 = vld [vmem:[%s21517_s1 + $0x8cc] sm:$0xf]  ;;  %v11075_v42 = vor.u32 %v13311_v48, %v11072_v30  ;;  %6931 = vmatpush.bf16.msrb.mxu1 %v10819_v62  ;;  %v6465_v24 = vadd.f32 %v17684_v41, %v6451_v52 }
 0x4ab   : > { %v10176_v2 = vld [vmem:[%s21517_s1 + $0x8e8] sm:$0xf0] }
 0x4ac   : > { %v13175_v4 = vld [vmem:[%s21517_s1 + $0xb8c] sm:$0xf]  ;;  %v10179_v32 = vor.u32 %v13087_v5, %v10176_v2  ;;  %6945 = vmatpush.bf16.msrb.mxu2 %v11075_v42  ;;  %v6593_v42 = vadd.f32 %v6592_v11, %v6579_v34  ;;  %v6479_v8 = vadd.f32 %v17724_v13, %v6465_v24 }
 0x4ad   : > { %v10528_v7 = vld [vmem:[%s21517_s1 + $0xba8] sm:$0xf0] }
 0x4ae   : > { %v13239_v9 = vld [vmem:[%s21517_s1 + $0xd8c] sm:$0xf]  ;;  %v10531_v22 = vor.u32 %v13175_v4, %v10528_v7  ;;  %6907 = vmatpush.bf16.msra.mxu3 %v10179_v32  ;;  %v6633_v4 = vadd.f32 %v6632_v25, %v6619_v45  ;;  %v6646_v7 = vpop.f32.mrf.mxu0  ;;  %v6453_v25 = vadd.f32 %v17750_v33, %v6439_v20 }
 0x4af   : > { %v10784_v15 = vld [vmem:[%s21517_s1 + $0xda8] sm:$0xf0] }
 0x4b0   : > { %v13303_v61 = vld [vmem:[%s21517_s1 + $0xf8c] sm:$0xf]  ;;  %v10787_v50 = vor.u32 %v13239_v9, %v10784_v15  ;;  %6918 = vmatpush.bf16.msrb.mxu0 %v10531_v22  ;;  %v6647_v11 = vadd.f32 %v6646_v7, %v6633_v4 }
 0x4b1   : > { %v11040_v21 = vld [vmem:[%s21517_s1 + $0xfa8] sm:$0xf0] }
 0x4b2   : > { %v13079_v54 = vld [vmem:[%s21517_s1 + $0x88c] sm:$0xf]  ;;  %v11043_v27 = vor.u32 %v13303_v61, %v11040_v21  ;;  %6932 = vmatpush.bf16.msrb.mxu1 %v10787_v50  ;;  %v6607_v61 = vadd.f32 %v6606_v57, %v6593_v42  ;;  %v6620_v21 = vpop.f32.mrf.mxu2 }
 0x4b3   : > { %v10144_v16 = vld [vmem:[%s21517_s1 + $0x8a8] sm:$0xf0] }
 0x4b4   : > { %v13167_v28 = vld [vmem:[%s21517_s1 + $0xb4c] sm:$0xf]  ;;  %v10147_v63 = vor.u32 %v13079_v54, %v10144_v16  ;;  %6946 = vmatpush.bf16.msrb.mxu2 %v11043_v27  ;;  %v6621_v50 = vadd.f32 %v6620_v21, %v6607_v61 }
 0x4b5   : > { %v10496_v18 = vld [vmem:[%s21517_s1 + $0xb68] sm:$0xf0] }
 0x4b6   : > { %v13231_v38 = vld [vmem:[%s21517_s1 + $0xd4c] sm:$0xf]  ;;  %v10499_v0 = vor.u32 %v13167_v28, %v10496_v18  ;;  %6908 = vmatpush.bf16.msra.mxu3 %v10147_v63  ;;  %v6634_v28 = vpop.f32.mrf.mxu3  ;;  %v6660_v18 = vpop.f32.mrf.mxu1 }
 0x4b7   : > { %v10752_v59 = vld [vmem:[%s21517_s1 + $0xd68] sm:$0xf0]  ;;  %v6661_v45 = vadd.f32 %v6660_v18, %v6647_v11 }
 0x4b8   : > { %v13295_v48 = vld [vmem:[%s21517_s1 + $0xf4c] sm:$0xf]  ;;  %v10755_v26 = vor.u32 %v13231_v38, %v10752_v59  ;;  %6919 = vmatpush.bf16.msrb.mxu0 %v10499_v0  ;;  %v7757_v0 = vmax.f32 %v6479_v8, 0.0 }
 0x4b9   : > { %v11008_v30 = vld [vmem:[%s21517_s1 + $0xf68] sm:$0xf0] }
 0x4ba   : > { %v13071_v5 = vld [vmem:[%s21517_s1 + $0x84c] sm:$0xf]  ;;  %v11011_v3 = vor.u32 %v13295_v48, %v11008_v30  ;;  %6933 = vmatpush.bf16.msrb.mxu1 %v10755_v26  ;;  %v6648_v26 = vpop.f32.mrf.mxu0 }
 0x4bb   : > { %v10112_v2 = vld [vmem:[%s21517_s1 + $0x868] sm:$0xf0] }
 0x4bc   : > { %v13159_v23 = vld [vmem:[%s21517_s1 + $0xb0c] sm:$0xf]  ;;  %v10115_v15 = vor.u32 %v13071_v5, %v10112_v2  ;;  %6947 = vmatpush.bf16.msrb.mxu2 %v11011_v3  ;;  %v6635_v5 = vadd.f32 %v6634_v28, %v6621_v50  ;;  %v7758_v2 = vmax.f32 %v6661_v45, 0.0 }
 0x4bd   : > { %v10464_v29 = vld [vmem:[%s21517_s1 + $0xb28] sm:$0xf0] }
 0x4be   : > { %v13223_v62 = vld [vmem:[%s21517_s1 + $0xd0c] sm:$0xf]  ;;  %v10467_v49 = vor.u32 %v13159_v23, %v10464_v29  ;;  %6909 = vmatpush.bf16.msra.mxu3 %v10115_v15  ;;  %v6467_v29 = vadd.f32 %v17761_v51, %v6453_v25  ;;  %v7773_v4 = vpack.c.bf16 %v7758_v2, %v7757_v0  ;;  %v6649_v7 = vadd.f32 %v6648_v26, %v6635_v5 }
 0x4bf   : > { %v10720_v6 = vld [vmem:[%s21517_s1 + $0xd28] sm:$0xf0] }
 0x4c0   : > { %v13287_v9 = vld [vmem:[%s21517_s1 + $0xf0c] sm:$0xf]  ;;  %v10723_v41 = vor.u32 %v13223_v62, %v10720_v6  ;;  %6920 = vmatpush.bf16.msrb.mxu0 %v10467_v49  ;;  %v6481_v11 = vadd.f32 %v17797_v19, %v6467_v29  ;;  %7781 = vst [vmem:[#allocation2] sm:$0xff] %v7773_v4 }
 0x4c1   : > { %v10976_v12 = vld [vmem:[%s21517_s1 + $0xf28] sm:$0xf0] }
 0x4c2   : > { %v13063_v32 = vld [vmem:[%s21517_s1 + $0x80c] sm:$0xf]  ;;  %v10979_v60 = vor.u32 %v13287_v9, %v10976_v12  ;;  %6934 = vmatpush.bf16.msrb.mxu1 %v10723_v41  ;;  %v7765_v25 = vmax.f32 %v6481_v11, 0.0 }
 0x4c3   : > { %v10080_v46 = vld [vmem:[%s21517_s1 + $0x828] sm:$0xf0] }
 0x4c4   : > { %v13151_v22 = vld [vmem:[%s21517_s1 + $0xacc] sm:$0xf]  ;;  %v10083_v59 = vor.u32 %v13063_v32, %v10080_v46  ;;  %6948 = vmatpush.bf16.msrb.mxu2 %v10979_v60  ;;  %v6662_v46 = vpop.f32.mrf.mxu1 }
 0x4c5   : > { %v10432_v54 = vld [vmem:[%s21517_s1 + $0xae8] sm:$0xf0]  ;;  %v6663_v41 = vadd.f32 %v6662_v46, %v6649_v7 }
 0x4c6   : > { %v13215_v16 = vld [vmem:[%s21517_s1 + $0xccc] sm:$0xf]  ;;  %v10435_v48 = vor.u32 %v13151_v22, %v10432_v54  ;;  %6910 = vmatpush.bf16.msra.mxu3 %v10083_v59 }
 0x4c7   : > { %v10688_v53 = vld [vmem:[%s21517_s1 + $0xce8] sm:$0xf0]  ;;  %v7766_v28 = vmax.f32 %v6663_v41, 0.0 }
 0x4c8   : > { %v13279_v27 = vld [vmem:[%s21517_s1 + $0xecc] sm:$0xf]  ;;  %v10691_v33 = vor.u32 %v13215_v16, %v10688_v53  ;;  %6921 = vmatpush.bf16.msrb.mxu0 %v10435_v48 }
 0x4c9   : > { %v10944_v57 = vld [vmem:[%s21517_s1 + $0xee8] sm:$0xf0]  ;;  %6911 = vmatmul.bf16.vlgmr.msra.gmra.mxu3 %v16279_v39 }
 0x4ca   : > { %v13375_v13 = vld [vmem:[%s21517_s1 + $0x11cc] sm:$0xf]  ;;  %v10947_v55 = vor.u32 %v13279_v27, %v10944_v57  ;;  %6935 = vmatpush.bf16.msrb.mxu1 %v10691_v33 }
 0x4cb   : > { %v11328_v38 = vld [vmem:[%s21517_s1 + $0x11e8] sm:$0xf0] }
 0x4cc   : > { %v13143_v30 = vld [vmem:[%s21517_s1 + $0xa8c] sm:$0xf]  ;;  %v11331_v56 = vor.u32 %v13375_v13, %v11328_v38  ;;  %6949 = vmatpush.bf16.msrb.mxu2 %v10947_v55 }
 0x4cd   : > { %v10400_v52 = vld [vmem:[%s21517_s1 + $0xaa8] sm:$0xf0] }
 0x4ce   : > { %v13207_v34 = vld [vmem:[%s21517_s1 + $0xc8c] sm:$0xf]  ;;  %v10403_v6 = vor.u32 %v13143_v30, %v10400_v52  ;;  %6959 = vmatpush.bf16.msrb.mxu3 %v11331_v56  ;;  %v7777_v30 = vpack.c.bf16 %v7766_v28, %v7765_v25 }
 0x4cf   : > { %v10656_v63 = vld [vmem:[%s21517_s1 + $0xca8] sm:$0xf0] }
 0x4d0   : > { %v13271_v3 = vld [vmem:[%s21517_s1 + $0xe8c] sm:$0xf]  ;;  %v10659_v51 = vor.u32 %v13207_v34, %v10656_v63  ;;  %6922 = vmatpush.bf16.msrb.mxu0 %v10403_v6  ;;  %7785 = vst [vmem:[#allocation2 + $0x20] sm:$0xff] %v7777_v30 }
 0x4d1   : > { %v10912_v23 = vld [vmem:[%s21517_s1 + $0xea8] sm:$0xf0] }
 0x4d2   : > { %v13367_v62 = vld [vmem:[%s21517_s1 + $0x118c] sm:$0xf]  ;;  %v10915_v12 = vor.u32 %v13271_v3, %v10912_v23  ;;  %6936 = vmatpush.bf16.msrb.mxu1 %v10659_v51  ;;  %v2283_v3 = vperm.slane %v17848_v14, 2  ;;  %v6674_v51 = vpop.f32.mrf.mxu2 }
 0x4d3   : > { %v11296_v42 = vld [vmem:[%s21517_s1 + $0x11a8] sm:$0xf0] }
 0x4d4   : > { %v13135_v9 = vld [vmem:[%s21517_s1 + $0xa4c] sm:$0xf]  ;;  %v11299_v21 = vor.u32 %v13367_v62, %v11296_v42  ;;  %6950 = vmatpush.bf16.msrb.mxu2 %v10915_v12  ;;  %v6675_v11 = vadd.f32 %v6674_v51, %v2283_v3 }
 0x4d5   : > { %v10368_v24 = vld [vmem:[%s21517_s1 + $0xa68] sm:$0xf0] }
 0x4d6   : > { %v13199_v15 = vld [vmem:[%s21517_s1 + $0xc4c] sm:$0xf]  ;;  %v10371_v60 = vor.u32 %v13135_v9, %v10368_v24  ;;  %6960 = vmatpush.bf16.msrb.mxu3 %v11299_v21 }
 0x4d7   : > { %v10624_v61 = vld [vmem:[%s21517_s1 + $0xc68] sm:$0xf0] }
 0x4d8   : > { %v13263_v49 = vld [vmem:[%s21517_s1 + $0xe4c] sm:$0xf]  ;;  %v10627_v8 = vor.u32 %v13199_v15, %v10624_v61  ;;  %6923 = vmatpush.bf16.msrb.mxu0 %v10371_v60 }
 0x4d9   : > { %v10880_v32 = vld [vmem:[%s21517_s1 + $0xe68] sm:$0xf0] }
 0x4da   : > { %v13359_v20 = vld [vmem:[%s21517_s1 + $0x114c] sm:$0xf]  ;;  %v10883_v50 = vor.u32 %v13263_v49, %v10880_v32  ;;  %6937 = vmatpush.bf16.msrb.mxu1 %v10627_v8 }
 0x4db   : > { %v11264_v19 = vld [vmem:[%s21517_s1 + $0x1168] sm:$0xf0] }
 0x4dc   : > { %v13127_v22 = vld [vmem:[%s21517_s1 + $0xa0c] sm:$0xf]  ;;  %v11267_v18 = vor.u32 %v13359_v20, %v11264_v19  ;;  %6951 = vmatpush.bf16.msrb.mxu2 %v10883_v50  ;;  %v6688_v19 = vpop.f32.mrf.mxu3 }
 0x4dd   : > { %v10336_v54 = vld [vmem:[%s21517_s1 + $0xa28] sm:$0xf0] }
 0x4de   : > { %v13191_v16 = vld [vmem:[%s21517_s1 + $0xc0c] sm:$0xf]  ;;  %v10339_v33 = vor.u32 %v13127_v22, %v10336_v54  ;;  %6961 = vmatpush.bf16.msrb.mxu3 %v11267_v18  ;;  %v6689_v54 = vadd.f32 %v6688_v19, %v6675_v11 }
 0x4df   : > { %v10592_v53 = vld [vmem:[%s21517_s1 + $0xc28] sm:$0xf0] }
 0x4e0   : > { %v13255_v27 = vld [vmem:[%s21517_s1 + $0xe0c] sm:$0xf]  ;;  %v10595_v63 = vor.u32 %v13191_v16, %v10592_v53  ;;  %6924 = vmatpush.bf16.msrb.mxu0 %v10339_v33 }
 0x4e1   : > { %v10848_v57 = vld [vmem:[%s21517_s1 + $0xe28] sm:$0xf0] }
 0x4e2   : > { %v13351_v13 = vld [vmem:[%s21517_s1 + $0x110c] sm:$0xf]  ;;  %v10851_v0 = vor.u32 %v13255_v27, %v10848_v57  ;;  %6938 = vmatpush.bf16.msrb.mxu1 %v10595_v63 }
 0x4e3   : > { %v11232_v38 = vld [vmem:[%s21517_s1 + $0x1128] sm:$0xf0]  ;;  %6925 = vmatmul.bf16.vlgmr.msrb.gmra.mxu0 %v16292_v44 }
 0x4e4   : > { %v13439_v45 = vld [vmem:[%s21517_s1 + $0x13cc] sm:$0xf]  ;;  %v11235_v5 = vor.u32 %v13351_v13, %v11232_v38  ;;  %6952 = vmatpush.bf16.msrb.mxu2 %v10851_v0 }
 0x4e5   : > { %v11584_v59 = vld [vmem:[%s21517_s1 + $0x13e8] sm:$0xf0]  ;;  %6939 = vmatmul.bf16.vlgmr.msrb.gmra.mxu1 %v16290_v43 }
 0x4e6   : > { %v13503_v48 = vld [vmem:[%s21517_s1 + $0x15cc] sm:$0xf]  ;;  %v11587_v2 = vor.u32 %v13439_v45, %v11584_v59  ;;  %6962 = vmatpush.bf16.msrb.mxu3 %v11235_v5  ;;  %v6702_v59 = vpop.f32.mrf.mxu0 }
 0x4e7   : > { %v11840_v55 = vld [vmem:[%s21517_s1 + $0x15e8] sm:$0xf0]  ;;  %6953 = vmatmul.bf16.vlgmr.msrb.gmra.mxu2 %v16300_v47 }
 0x4e8   : > { %v13567_v52 = vld [vmem:[%s21517_s1 + $0x17cc] sm:$0xf]  ;;  %v11843_v23 = vor.u32 %v13503_v48, %v11840_v55  ;;  %6973 = vmatpush.bf16.msra.mxu0 %v11587_v2  ;;  %v6703_v48 = vadd.f32 %v6702_v59, %v6689_v54  ;;  %v18462_v59 = vpop.f32.mrf.mxu3 }
 0x4e9   : > { %v12096_v34 = vld [vmem:[%s21517_s1 + $0x17e8] sm:$0xf0] }
 0x4ea   : > { %v13343_v56 = vld [vmem:[%s21517_s1 + $0x10cc] sm:$0xf]  ;;  %v12099_v29 = vor.u32 %v13567_v52, %v12096_v34  ;;  %6987 = vmatpush.bf16.msra.mxu1 %v11843_v23  ;;  %v6716_v34 = vpop.f32.mrf.mxu1 }
 0x4eb   : > { %v11200_v26 = vld [vmem:[%s21517_s1 + $0x10e8] sm:$0xf0] }
 0x4ec   : > { %v13431_v62 = vld [vmem:[%s21517_s1 + $0x138c] sm:$0xf]  ;;  %v11203_v12 = vor.u32 %v13343_v56, %v11200_v26  ;;  %7001 = vmatpush.bf16.msra.mxu2 %v12099_v29  ;;  %v18388_v26 = vadd.f32 %v6716_v34, %v6703_v48 }
 0x4ed   : > { %v11552_v42 = vld [vmem:[%s21517_s1 + $0x13a8] sm:$0xf0] }
 0x4ee   : > { %v13495_v4 = vld [vmem:[%s21517_s1 + $0x158c] sm:$0xf]  ;;  %v11555_v24 = vor.u32 %v13431_v62, %v11552_v42  ;;  %6963 = vmatpush.bf16.msrb.mxu3 %v11203_v12 }
 0x4ef   : > { %v11808_v7 = vld [vmem:[%s21517_s1 + $0x15a8] sm:$0xf0] }
 0x4f0   : > { %v13559_v6 = vld [vmem:[%s21517_s1 + $0x178c] sm:$0xf]  ;;  %v11811_v21 = vor.u32 %v13495_v4, %v11808_v7  ;;  %6974 = vmatpush.bf16.msra.mxu0 %v11555_v24 }
 0x4f1   : > { %v12064_v9 = vld [vmem:[%s21517_s1 + $0x17a8] sm:$0xf0] }
 0x4f2   : > { %v13335_v15 = vld [vmem:[%s21517_s1 + $0x108c] sm:$0xf]  ;;  %v12067_v49 = vor.u32 %v13559_v6, %v12064_v9  ;;  %6988 = vmatpush.bf16.msra.mxu1 %v11811_v21 }
 0x4f3   : > { %v11168_v61 = vld [vmem:[%s21517_s1 + $0x10a8] sm:$0xf0] }
 0x4f4   : > { %v13423_v32 = vld [vmem:[%s21517_s1 + $0x134c] sm:$0xf]  ;;  %v11171_v16 = vor.u32 %v13335_v15, %v11168_v61  ;;  %7002 = vmatpush.bf16.msra.mxu2 %v12067_v49 }
 0x4f5   : > { %v11520_v46 = vld [vmem:[%s21517_s1 + $0x1368] sm:$0xf0] }
 0x4f6   : > { %v13487_v20 = vld [vmem:[%s21517_s1 + $0x154c] sm:$0xf]  ;;  %v11523_v8 = vor.u32 %v13423_v32, %v11520_v46  ;;  %6964 = vmatpush.bf16.msrb.mxu3 %v11171_v16 }
 0x4f7   : > { %v11776_v41 = vld [vmem:[%s21517_s1 + $0x1568] sm:$0xf0] }
 0x4f8   : > { %v13551_v60 = vld [vmem:[%s21517_s1 + $0x174c] sm:$0xf]  ;;  %v11779_v27 = vor.u32 %v13487_v20, %v11776_v41  ;;  %6975 = vmatpush.bf16.msra.mxu0 %v11523_v8 }
 0x4f9   : > { %v12032_v22 = vld [vmem:[%s21517_s1 + $0x1768] sm:$0xf0] }
 0x4fa   : > { %v13327_v50 = vld [vmem:[%s21517_s1 + $0x104c] sm:$0xf]  ;;  %v12035_v57 = vor.u32 %v13551_v60, %v12032_v22  ;;  %6989 = vmatpush.bf16.msra.mxu1 %v11779_v27 }
 0x4fb   : > { %v11136_v53 = vld [vmem:[%s21517_s1 + $0x1068] sm:$0xf0] }
 0x4fc   : > { %v13415_v25 = vld [vmem:[%s21517_s1 + $0x130c] sm:$0xf]  ;;  %v11139_v30 = vor.u32 %v13327_v50, %v11136_v53  ;;  %7003 = vmatpush.bf16.msra.mxu2 %v12035_v57 }
 0x4fd   : > { %v11488_v28 = vld [vmem:[%s21517_s1 + $0x1328] sm:$0xf0] }
 0x4fe   : > { %v13479_v18 = vld [vmem:[%s21517_s1 + $0x150c] sm:$0xf]  ;;  %v11491_v33 = vor.u32 %v13415_v25, %v11488_v28  ;;  %6965 = vmatpush.bf16.msrb.mxu3 %v11139_v30  ;;  %v18454_v25 = vpop.f32.mrf.mxu2 }
 0x4ff   : > { %v11744_v13 = vld [vmem:[%s21517_s1 + $0x1528] sm:$0xf0] }
 0x500   : > { %v13543_v38 = vld [vmem:[%s21517_s1 + $0x170c] sm:$0xf]  ;;  %v11747_v63 = vor.u32 %v13479_v18, %v11744_v13  ;;  %6976 = vmatpush.bf16.msra.mxu0 %v11491_v33 }
 0x501   : > { %v12000_v45 = vld [vmem:[%s21517_s1 + $0x1728] sm:$0xf0] }
 0x502   : > { %v13319_v55 = vld [vmem:[%s21517_s1 + $0x100c] sm:$0xf]  ;;  %v12003_v0 = vor.u32 %v13543_v38, %v12000_v45  ;;  %6990 = vmatpush.bf16.msra.mxu1 %v11747_v63 }
 0x503   : > { %v11104_v52 = vld [vmem:[%s21517_s1 + $0x1028] sm:$0xf0] }
 0x504   : > { %v13407_v5 = vld [vmem:[%s21517_s1 + $0x12cc] sm:$0xf]  ;;  %v11107_v7 = vor.u32 %v13319_v55, %v11104_v52  ;;  %7004 = vmatpush.bf16.msra.mxu2 %v12003_v0  ;;  %v9286_v0 = vld [vmem:[%s21517_s1 + $0x1d0] sm:$0xf] }
 0x505   : > { %v11456_v2 = vld [vmem:[%s21517_s1 + $0x12e8] sm:$0xf0] }
 0x506   : > { %v13471_v56 = vld [vmem:[%s21517_s1 + $0x14cc] sm:$0xf]  ;;  %v11459_v6 = vor.u32 %v13407_v5, %v11456_v2  ;;  %6966 = vmatpush.bf16.msrb.mxu3 %v11107_v7  ;;  %v12868_v5 = vld [vmem:[%s21517_s1 + $0x1ec] sm:$0xf0] }
 0x507   : > { %v11712_v23 = vld [vmem:[%s21517_s1 + $0x14e8] sm:$0xf0]  ;;  %v9542_v2 = vld [vmem:[%s21517_s1 + $0x3d0] sm:$0xf] }
 0x508   : > { %v13535_v29 = vld [vmem:[%s21517_s1 + $0x16cc] sm:$0xf]  ;;  %v11715_v9 = vor.u32 %v13471_v56, %v11712_v23  ;;  %6977 = vmatpush.bf16.msra.mxu0 %v11459_v6  ;;  %v12932_v23 = vld [vmem:[%s21517_s1 + $0x3ec] sm:$0xf0] }
 0x509   : > { %v11968_v62 = vld [vmem:[%s21517_s1 + $0x16e8] sm:$0xf0]  ;;  %6967 = vmatmul.bf16.vlgmr.msrb.gmra.mxu3 %v16507_v31  ;;  %v10054_v7 = vld [vmem:[%s21517_s1 + $0x7d0] sm:$0xf] }
 0x50a   : > { %v13599_v42 = vld [vmem:[%s21517_s1 + $0x18cc] sm:$0xf]  ;;  %v11971_v51 = vor.u32 %v13535_v29, %v11968_v62  ;;  %6991 = vmatpush.bf16.msra.mxu1 %v11715_v9  ;;  %v9798_v29 = vld [vmem:[%s21517_s1 + $0x5d0] sm:$0xf] }
 0x50b   : > { %v12224_v4 = vld [vmem:[%s21517_s1 + $0x18e8] sm:$0xf0]  ;;  %v12996_v62 = vld [vmem:[%s21517_s1 + $0x5ec] sm:$0xf0] }
 0x50c   : > { %v13399_v12 = vld [vmem:[%s21517_s1 + $0x128c] sm:$0xf]  ;;  %v12227_v61 = vor.u32 %v13599_v42, %v12224_v4  ;;  %7005 = vmatpush.bf16.msra.mxu2 %v11971_v51  ;;  %v13060_v6 = vld [vmem:[%s21517_s1 + $0x7ec] sm:$0xf0]  ;;  %v9287_v51 = vor.u32 %v12868_v5, %v9286_v0 }
 0x50d   : > { %v11424_v24 = vld [vmem:[%s21517_s1 + $0x12a8] sm:$0xf0]  ;;  %v12908_v0 = vld [vmem:[%s21517_s1 + $0x32c] sm:$0xf0] }
 0x50e   : > { %v13463_v15 = vld [vmem:[%s21517_s1 + $0x148c] sm:$0xf]  ;;  %v11427_v20 = vor.u32 %v13399_v12, %v11424_v24  ;;  %7019 = vmatpush.bf16.msra.mxu3 %v12227_v61  ;;  %v9543_v12 = vor.u32 %v12932_v23, %v9542_v2  ;;  %v9799_v24 = vor.u32 %v12996_v62, %v9798_v29  ;;  %v12860_v61 = vld [vmem:[%s21517_s1 + $0x1ac] sm:$0xf0] }
 0x50f   : > { %v11680_v11 = vld [vmem:[%s21517_s1 + $0x14a8] sm:$0xf0]  ;;  %v9702_v5 = vld [vmem:[%s21517_s1 + $0x510] sm:$0xf] }
 0x510   : > { %v13527_v21 = vld [vmem:[%s21517_s1 + $0x168c] sm:$0xf]  ;;  %v11683_v19 = vor.u32 %v13463_v15, %v11680_v11  ;;  %6978 = vmatpush.bf16.msra.mxu0 %v11427_v20  ;;  %v9254_v15 = vld [vmem:[%s21517_s1 + $0x190] sm:$0xf]  ;;  %v6730_v20 = vpop.f32.mrf.mxu2 }
 0x511   : > { %v11936_v49 = vld [vmem:[%s21517_s1 + $0x16a8] sm:$0xf0]  ;;  %v9510_v11 = vld [vmem:[%s21517_s1 + $0x390] sm:$0xf] }
 0x512   : > { %v13591_v32 = vld [vmem:[%s21517_s1 + $0x188c] sm:$0xf]  ;;  %v11939_v41 = vor.u32 %v13527_v21, %v11936_v49  ;;  %6992 = vmatpush.bf16.msra.mxu1 %v11683_v19  ;;  %v10055_v21 = vor.u32 %v13060_v6, %v10054_v7  ;;  %v12924_v49 = vld [vmem:[%s21517_s1 + $0x3ac] sm:$0xf0] }
 0x513   : > { %v12192_v46 = vld [vmem:[%s21517_s1 + $0x18a8] sm:$0xf0]  ;;  %v10022_v19 = vld [vmem:[%s21517_s1 + $0x790] sm:$0xf] }
 0x514   : > { %v13391_v60 = vld [vmem:[%s21517_s1 + $0x124c] sm:$0xf]  ;;  %v12195_v16 = vor.u32 %v13591_v32, %v12192_v46  ;;  %7006 = vmatpush.bf16.msra.mxu2 %v11939_v41  ;;  %v9766_v32 = vld [vmem:[%s21517_s1 + $0x590] sm:$0xf] }
 0x515   : > { %v11392_v22 = vld [vmem:[%s21517_s1 + $0x1268] sm:$0xf0]  ;;  %v12988_v46 = vld [vmem:[%s21517_s1 + $0x5ac] sm:$0xf0] }
 0x516   : > { %v13455_v54 = vld [vmem:[%s21517_s1 + $0x144c] sm:$0xf]  ;;  %v11395_v28 = vor.u32 %v13391_v60, %v11392_v22  ;;  %7020 = vmatpush.bf16.msra.mxu3 %v12195_v16  ;;  %v13052_v41 = vld [vmem:[%s21517_s1 + $0x7ac] sm:$0xf0]  ;;  %v6731_v60 = vadd.f32 %v6730_v20, %v18388_v26  ;;  %v9255_v22 = vor.u32 %v12860_v61, %v9254_v15  ;;  %v9767_v16 = vor.u32 %v12988_v46, %v9766_v32 }
 0x517   : > { %v11648_v8 = vld [vmem:[%s21517_s1 + $0x1468] sm:$0xf0]  ;;  %v10023_v26 = vor.u32 %v13052_v41, %v10022_v19  ;;  %v12972_v2 = vld [vmem:[%s21517_s1 + $0x52c] sm:$0xf0] }
 0x518   : > { %v13519_v50 = vld [vmem:[%s21517_s1 + $0x164c] sm:$0xf]  ;;  %v11651_v38 = vor.u32 %v13455_v54, %v11648_v8  ;;  %6979 = vmatpush.bf16.msra.mxu0 %v11395_v28  ;;  %v9511_v54 = vor.u32 %v12924_v49, %v9510_v11  ;;  %v6744_v8 = vpop.f32.mrf.mxu3  ;;  %v12916_v28 = vld [vmem:[%s21517_s1 + $0x36c] sm:$0xf0] }
 0x519   : > { %v11904_v53 = vld [vmem:[%s21517_s1 + $0x1668] sm:$0xf0]  ;;  %v13036_v23 = vld [vmem:[%s21517_s1 + $0x72c] sm:$0xf0] }
 0x51a   : > { %v13583_v27 = vld [vmem:[%s21517_s1 + $0x184c] sm:$0xf]  ;;  %v11907_v45 = vor.u32 %v13519_v50, %v11904_v53  ;;  %6993 = vmatpush.bf16.msra.mxu1 %v11651_v38  ;;  %v9222_v50 = vld [vmem:[%s21517_s1 + $0x150] sm:$0xf] }
 0x51b   : > { %v12160_v57 = vld [vmem:[%s21517_s1 + $0x1868] sm:$0xf0]  ;;  %v12852_v53 = vld [vmem:[%s21517_s1 + $0x16c] sm:$0xf0] }
 0x51c   : > { %v13383_v18 = vld [vmem:[%s21517_s1 + $0x120c] sm:$0xf]  ;;  %v12163_v55 = vor.u32 %v13583_v27, %v12160_v57  ;;  %7007 = vmatpush.bf16.msra.mxu2 %v11907_v45  ;;  %v9478_v27 = vld [vmem:[%s21517_s1 + $0x350] sm:$0xf]  ;;  %v18541_v57 = vadd.f32 %v6744_v8, %v6731_v60 }
 0x51d   : > { %v11360_v13 = vld [vmem:[%s21517_s1 + $0x1228] sm:$0xf0]  ;;  %v9990_v38 = vld [vmem:[%s21517_s1 + $0x750] sm:$0xf] }
 0x51e   : > { %v13447_v48 = vld [vmem:[%s21517_s1 + $0x140c] sm:$0xf]  ;;  %v11363_v56 = vor.u32 %v13383_v18, %v11360_v13  ;;  %7021 = vmatpush.bf16.msra.mxu3 %v12163_v55  ;;  %v9734_v18 = vld [vmem:[%s21517_s1 + $0x550] sm:$0xf] }
 0x51f   : > { %v11616_v30 = vld [vmem:[%s21517_s1 + $0x1428] sm:$0xf0]  ;;  %v12980_v13 = vld [vmem:[%s21517_s1 + $0x56c] sm:$0xf0] }
 0x520   : > { %v13511_v33 = vld [vmem:[%s21517_s1 + $0x160c] sm:$0xf]  ;;  %v11619_v42 = vor.u32 %v13447_v48, %v11616_v30  ;;  %6980 = vmatpush.bf16.msra.mxu0 %v11363_v56  ;;  %v13044_v45 = vld [vmem:[%s21517_s1 + $0x76c] sm:$0xf0]  ;;  %v9223_v48 = vor.u32 %v12852_v53, %v9222_v50  ;;  %v9479_v30 = vor.u32 %v12916_v28, %v9478_v27 }
 0x521   : > { %v11872_v52 = vld [vmem:[%s21517_s1 + $0x1628] sm:$0xf0]  ;;  %v9190_v55 = vld [vmem:[%s21517_s1 + $0x110] sm:$0xf] }
 0x522   : > { %v13575_v34 = vld [vmem:[%s21517_s1 + $0x180c] sm:$0xf]  ;;  %v11875_v4 = vor.u32 %v13511_v33, %v11872_v52  ;;  %6994 = vmatpush.bf16.msra.mxu1 %v11619_v42  ;;  %v9735_v33 = vor.u32 %v12980_v13, %v9734_v18  ;;  %v12844_v52 = vld [vmem:[%s21517_s1 + $0x12c] sm:$0xf0]  ;;  %v9703_v42 = vor.u32 %v12972_v2, %v9702_v5 }
 0x523   : > { %v12128_v63 = vld [vmem:[%s21517_s1 + $0x1828] sm:$0xf0]  ;;  %6981 = vmatmul.bf16.vlgmr.msra.gmra.mxu0 %v16520_v36  ;;  %v9958_v56 = vld [vmem:[%s21517_s1 + $0x710] sm:$0xf]  ;;  %v9191_v29 = vor.u32 %v12844_v52, %v9190_v55 }
 0x524   : > { %v12131_v9 = vor.u32 %v13575_v34, %v12128_v63  ;;  %7008 = vmatpush.bf16.msra.mxu2 %v11875_v4  ;;  %7029 = vmatpush.bf16.msrb.mxu0 %v9287_v51  ;;  %v9446_v34 = vld [vmem:[%s21517_s1 + $0x310] sm:$0xf]  ;;  %v9991_v63 = vor.u32 %v13044_v45, %v9990_v38 }
 0x525   : > { %6995 = vmatmul.bf16.vlgmr.msra.gmra.mxu1 %v16518_v35  ;;  %v9447_v62 = vor.u32 %v12908_v0, %v9446_v34  ;;  %v9158_v4 = vld [vmem:[%s21517_s1 + $0xd0] sm:$0xf] }
 0x526   : > { %7022 = vmatpush.bf16.msra.mxu3 %v12131_v9  ;;  %7043 = vmatpush.bf16.msrb.mxu1 %v9543_v12  ;;  %v12836_v7 = vld [vmem:[%s21517_s1 + $0xec] sm:$0xf0]  ;;  %v9959_v9 = vor.u32 %v13036_v23, %v9958_v56 }
 0x527   : > { %7009 = vmatmul.bf16.vlgmr.msra.gmra.mxu2 %v16528_v40  ;;  %v9414_v6 = vld [vmem:[%s21517_s1 + $0x2d0] sm:$0xf]  ;;  %v9159_v11 = vor.u32 %v12836_v7, %v9158_v4 }
 0x528   : > { %7057 = vmatpush.bf16.msrb.mxu2 %v9799_v24  ;;  %7030 = vmatpush.bf16.msrb.mxu0 %v9255_v22  ;;  %v12900_v51 = vld [vmem:[%s21517_s1 + $0x2ec] sm:$0xf0] }
 0x529   : > { %12247 = vmatmul.msk.bf16.vlgmr.msra.gmra.mxu3 %vm6297_vm0, %v16633_v37  ;;  %v9670_v12 = vld [vmem:[%s21517_s1 + $0x4d0] sm:$0xf] }
 0x52a   : > { %7071 = vmatpush.bf16.msrb.mxu3 %v10055_v21  ;;  %7044 = vmatpush.bf16.msrb.mxu1 %v9511_v54  ;;  %v12964_v24 = vld [vmem:[%s21517_s1 + $0x4ec] sm:$0xf0]  ;;  %v9415_v21 = vor.u32 %v12900_v51, %v9414_v6 }
 0x52b   : > { %v9926_v15 = vld [vmem:[%s21517_s1 + $0x6d0] sm:$0xf]  ;;  %v9671_v49 = vor.u32 %v12964_v24, %v9670_v12 }
 0x52c   : > { %7058 = vmatpush.bf16.msrb.mxu2 %v9767_v16  ;;  %7031 = vmatpush.bf16.msrb.mxu0 %v9223_v48  ;;  %v13028_v61 = vld [vmem:[%s21517_s1 + $0x6ec] sm:$0xf0] }
 0x52d   : > { %v9126_v32 = vld [vmem:[%s21517_s1 + $0x90] sm:$0xf]  ;;  %v9927_v19 = vor.u32 %v13028_v61, %v9926_v15 }
 0x52e   : > { %7072 = vmatpush.bf16.msrb.mxu3 %v10023_v26  ;;  %7045 = vmatpush.bf16.msrb.mxu1 %v9479_v30  ;;  %v12828_v46 = vld [vmem:[%s21517_s1 + $0xac] sm:$0xf0] }
 0x52f   : > { %v9382_v20 = vld [vmem:[%s21517_s1 + $0x290] sm:$0xf]  ;;  %v9127_v8 = vor.u32 %v12828_v46, %v9126_v32 }
 0x530   : > { %7059 = vmatpush.bf16.msrb.mxu2 %v9735_v33  ;;  %7032 = vmatpush.bf16.msrb.mxu0 %v9191_v29  ;;  %v12892_v41 = vld [vmem:[%s21517_s1 + $0x2ac] sm:$0xf0] }
 0x531   : > { %v9638_v60 = vld [vmem:[%s21517_s1 + $0x490] sm:$0xf]  ;;  %v9383_v50 = vor.u32 %v12892_v41, %v9382_v20 }
 0x532   : > { %7073 = vmatpush.bf16.msrb.mxu3 %v9991_v63  ;;  %7046 = vmatpush.bf16.msrb.mxu1 %v9447_v62  ;;  %v12956_v22 = vld [vmem:[%s21517_s1 + $0x4ac] sm:$0xf0] }
 0x533   : > { %v9894_v54 = vld [vmem:[%s21517_s1 + $0x690] sm:$0xf]  ;;  %v9639_v53 = vor.u32 %v12956_v22, %v9638_v60 }
 0x534   : > { %7060 = vmatpush.bf16.msrb.mxu2 %v9703_v42  ;;  %v13020_v16 = vld [vmem:[%s21517_s1 + $0x6ac] sm:$0xf0]  ;;  %7033 = vmatpush.bf16.msrb.mxu0 %v9159_v11 }
 0x535   : > { %v9094_v27 = vld [vmem:[%s21517_s1 + $0x50] sm:$0xf]  ;;  %v9895_v18 = vor.u32 %v13020_v16, %v9894_v54 }
 0x536   : > { %7074 = vmatpush.bf16.msrb.mxu3 %v9959_v9  ;;  %7047 = vmatpush.bf16.msrb.mxu1 %v9415_v21  ;;  %v12820_v26 = vld [vmem:[%s21517_s1 + $0x6c] sm:$0xf0] }
 0x537   : > { %v9350_v28 = vld [vmem:[%s21517_s1 + $0x250] sm:$0xf]  ;;  %v9095_v33 = vor.u32 %v12820_v26, %v9094_v27 }
 0x538   : > { %7061 = vmatpush.bf16.msrb.mxu2 %v9671_v49  ;;  %v12884_v13 = vld [vmem:[%s21517_s1 + $0x26c] sm:$0xf0]  ;;  %7034 = vmatpush.bf16.msrb.mxu0 %v9127_v8 }
 0x539   : > { %v9606_v38 = vld [vmem:[%s21517_s1 + $0x450] sm:$0xf]  ;;  %v9351_v34 = vor.u32 %v12884_v13, %v9350_v28 }
 0x53a   : > { %7075 = vmatpush.bf16.msrb.mxu3 %v9927_v19  ;;  %v12948_v45 = vld [vmem:[%s21517_s1 + $0x46c] sm:$0xf0]  ;;  %7048 = vmatpush.bf16.msrb.mxu1 %v9383_v50 }
 0x53b   : > { %v9862_v48 = vld [vmem:[%s21517_s1 + $0x650] sm:$0xf]  ;;  %v9607_v63 = vor.u32 %v12948_v45, %v9606_v38 }
 0x53c   : > { %v13012_v30 = vld [vmem:[%s21517_s1 + $0x66c] sm:$0xf0]  ;;  %7062 = vmatpush.bf16.msrb.mxu2 %v9639_v53  ;;  %7035 = vmatpush.bf16.msrb.mxu0 %v9095_v33 }
 0x53d   : > { %v9062_v55 = vld [vmem:[%s21517_s1 + $0x10] sm:$0xf]  ;;  %v9863_v56 = vor.u32 %v13012_v30, %v9862_v48 }
 0x53e   : > { %v12812_v52 = vld [vmem:[%s21517_s1 + $0x2c] sm:$0xf0]  ;;  %7076 = vmatpush.bf16.msrb.mxu3 %v9895_v18  ;;  %7049 = vmatpush.bf16.msrb.mxu1 %v9351_v34 }
 0x53f   : > { %v9318_v0 = vld [vmem:[%s21517_s1 + $0x210] sm:$0xf]  ;;  %v9063_v6 = vor.u32 %v12812_v52, %v9062_v55 }
 0x540   : > { %v12876_v5 = vld [vmem:[%s21517_s1 + $0x22c] sm:$0xf0]  ;;  %7063 = vmatpush.bf16.msrb.mxu2 %v9607_v63 }
 0x541   : > { %v9574_v2 = vld [vmem:[%s21517_s1 + $0x410] sm:$0xf]  ;;  %v9319_v24 = vor.u32 %v12876_v5, %v9318_v0  ;;  %7036 = vmatpush.bf16.msrb.mxu0 %v9063_v6 }
 0x542   : > { %v12940_v23 = vld [vmem:[%s21517_s1 + $0x42c] sm:$0xf0]  ;;  %7077 = vmatpush.bf16.msrb.mxu3 %v9863_v56 }
 0x543   : > { %v9830_v29 = vld [vmem:[%s21517_s1 + $0x610] sm:$0xf]  ;;  %v9575_v15 = vor.u32 %v12940_v23, %v9574_v2  ;;  %7050 = vmatpush.bf16.msrb.mxu1 %v9319_v24 }
 0x544   : > { %v13004_v62 = vld [vmem:[%s21517_s1 + $0x62c] sm:$0xf0]  ;;  %7037 = vmatmul.bf16.vlgmr.msrb.gmra.mxu0 %v16057_v58 }
 0x545   : > { %v10310_v42 = vld [vmem:[%s21517_s1 + $0x9d0] sm:$0xf]  ;;  %v9831_v21 = vor.u32 %v13004_v62, %v9830_v29  ;;  %7064 = vmatpush.bf16.msrb.mxu2 %v9575_v15 }
 0x546   : > { %v13124_v4 = vld [vmem:[%s21517_s1 + $0x9ec] sm:$0xf0]  ;;  %7051 = vmatmul.bf16.vlgmr.msrb.gmra.mxu1 %v16093_v10 }
 0x547   : > { %v10566_v7 = vld [vmem:[%s21517_s1 + $0xbd0] sm:$0xf]  ;;  %v10311_v49 = vor.u32 %v13124_v4, %v10310_v42  ;;  %7078 = vmatpush.bf16.msrb.mxu3 %v9831_v21 }
 0x548   : > { %v13188_v9 = vld [vmem:[%s21517_s1 + $0xbec] sm:$0xf0]  ;;  %7065 = vmatmul.bf16.vlgmr.msrb.gmra.mxu2 %v16071_v1 }
 0x549   : > { %v10822_v51 = vld [vmem:[%s21517_s1 + $0xdd0] sm:$0xf]  ;;  %v10567_v32 = vor.u32 %v13188_v9, %v10566_v7  ;;  %7085 = vmatpush.bf16.msra.mxu0 %v10311_v49 }
 0x54a   : > { %v13252_v12 = vld [vmem:[%s21517_s1 + $0xdec] sm:$0xf0]  ;;  %7079 = vmatmul.bf16.vlgmr.msrb.gmra.mxu3 %v16107_v17 }
 0x54b   : > { %v11078_v61 = vld [vmem:[%s21517_s1 + $0xfd0] sm:$0xf]  ;;  %v10823_v46 = vor.u32 %v13252_v12, %v10822_v51  ;;  %7099 = vmatpush.bf16.msra.mxu1 %v10567_v32 }
 0x54c   : > { %v13316_v11 = vld [vmem:[%s21517_s1 + $0xfec] sm:$0xf0] }
 0x54d   : > { %v10278_v20 = vld [vmem:[%s21517_s1 + $0x990] sm:$0xf]  ;;  %v11079_v60 = vor.u32 %v13316_v11, %v11078_v61  ;;  %7113 = vmatpush.bf16.msra.mxu2 %v10823_v46 }
 0x54e   : > { %v13116_v19 = vld [vmem:[%s21517_s1 + $0x9ac] sm:$0xf0] }
 0x54f   : > { %v10534_v41 = vld [vmem:[%s21517_s1 + $0xb90] sm:$0xf]  ;;  %v10279_v53 = vor.u32 %v13116_v19, %v10278_v20  ;;  %7127 = vmatpush.bf16.msra.mxu3 %v11079_v60  ;;  %v18806_v20 = vpop.f32.mrf.mxu0 }
 0x550   : > { %v13180_v22 = vld [vmem:[%s21517_s1 + $0xbac] sm:$0xf0] }
 0x551   : > { %v10790_v54 = vld [vmem:[%s21517_s1 + $0xd90] sm:$0xf]  ;;  %v10535_v27 = vor.u32 %v13180_v22, %v10534_v41  ;;  %7086 = vmatpush.bf16.msra.mxu0 %v10279_v53 }
 0x552   : > { %v13244_v16 = vld [vmem:[%s21517_s1 + $0xdac] sm:$0xf0] }
 0x553   : > { %v11046_v8 = vld [vmem:[%s21517_s1 + $0xf90] sm:$0xf]  ;;  %v10791_v26 = vor.u32 %v13244_v16, %v10790_v54  ;;  %7100 = vmatpush.bf16.msra.mxu1 %v10535_v27  ;;  %v18817_v16 = vpop.f32.mrf.mxu1 }
 0x554   : > { %v13308_v50 = vld [vmem:[%s21517_s1 + $0xfac] sm:$0xf0] }
 0x555   : > { %v10246_v28 = vld [vmem:[%s21517_s1 + $0x950] sm:$0xf]  ;;  %v11047_v38 = vor.u32 %v13308_v50, %v11046_v8  ;;  %7114 = vmatpush.bf16.msra.mxu2 %v10791_v26 }
 0x556   : > { %v13108_v18 = vld [vmem:[%s21517_s1 + $0x96c] sm:$0xf0] }
 0x557   : > { %v10502_v13 = vld [vmem:[%s21517_s1 + $0xb50] sm:$0xf]  ;;  %v10247_v52 = vor.u32 %v13108_v18, %v10246_v28  ;;  %7128 = vmatpush.bf16.msra.mxu3 %v11047_v38 }
 0x558   : > { %v13172_v45 = vld [vmem:[%s21517_s1 + $0xb6c] sm:$0xf0] }
 0x559   : > { %v10758_v48 = vld [vmem:[%s21517_s1 + $0xd50] sm:$0xf]  ;;  %v10503_v34 = vor.u32 %v13172_v45, %v10502_v13  ;;  %7087 = vmatpush.bf16.msra.mxu0 %v10247_v52 }
 0x55a   : > { %v13236_v30 = vld [vmem:[%s21517_s1 + $0xd6c] sm:$0xf0] }
 0x55b   : > { %v11014_v33 = vld [vmem:[%s21517_s1 + $0xf50] sm:$0xf]  ;;  %v10759_v63 = vor.u32 %v13236_v30, %v10758_v48  ;;  %7101 = vmatpush.bf16.msra.mxu1 %v10503_v34 }
 0x55c   : > { %v13300_v55 = vld [vmem:[%s21517_s1 + $0xf6c] sm:$0xf0] }
 0x55d   : > { %v10214_v0 = vld [vmem:[%s21517_s1 + $0x910] sm:$0xf]  ;;  %v11015_v56 = vor.u32 %v13300_v55, %v11014_v33  ;;  %7115 = vmatpush.bf16.msra.mxu2 %v10759_v63 }
 0x55e   : > { %v13100_v5 = vld [vmem:[%s21517_s1 + $0x92c] sm:$0xf0] }
 0x55f   : > { %v10470_v2 = vld [vmem:[%s21517_s1 + $0xb10] sm:$0xf]  ;;  %v10215_v7 = vor.u32 %v13100_v5, %v10214_v0  ;;  %7129 = vmatpush.bf16.msra.mxu3 %v11015_v56  ;;  %v18858_v5 = vpop.f32.mrf.mxu2 }
 0x560   : > { %v13164_v23 = vld [vmem:[%s21517_s1 + $0xb2c] sm:$0xf0] }
 0x561   : > { %v10726_v29 = vld [vmem:[%s21517_s1 + $0xd10] sm:$0xf]  ;;  %v10471_v6 = vor.u32 %v13164_v23, %v10470_v2  ;;  %7088 = vmatpush.bf16.msra.mxu0 %v10215_v7 }
 0x562   : > { %v13228_v62 = vld [vmem:[%s21517_s1 + $0xd2c] sm:$0xf0] }
 0x563   : > { %v10982_v42 = vld [vmem:[%s21517_s1 + $0xf10] sm:$0xf]  ;;  %v10727_v9 = vor.u32 %v13228_v62, %v10726_v29  ;;  %7102 = vmatpush.bf16.msra.mxu1 %v10471_v6 }
 0x564   : > { %v13292_v4 = vld [vmem:[%s21517_s1 + $0xf2c] sm:$0xf0] }
 0x565   : > { %v10182_v51 = vld [vmem:[%s21517_s1 + $0x8d0] sm:$0xf]  ;;  %v10983_v15 = vor.u32 %v13292_v4, %v10982_v42  ;;  %7116 = vmatpush.bf16.msra.mxu2 %v10727_v9 }
 0x566   : > { %v13092_v12 = vld [vmem:[%s21517_s1 + $0x8ec] sm:$0xf0] }
 0x567   : > { %v10438_v24 = vld [vmem:[%s21517_s1 + $0xad0] sm:$0xf]  ;;  %v10183_v46 = vor.u32 %v13092_v12, %v10182_v51  ;;  %7130 = vmatpush.bf16.msra.mxu3 %v10983_v15 }
 0x568   : > { %v13156_v61 = vld [vmem:[%s21517_s1 + $0xaec] sm:$0xf0] }
 0x569   : > { %v10694_v11 = vld [vmem:[%s21517_s1 + $0xcd0] sm:$0xf]  ;;  %v10439_v19 = vor.u32 %v13156_v61, %v10438_v24  ;;  %7089 = vmatpush.bf16.msra.mxu0 %v10183_v46  ;;  %v18884_v24 = vpop.f32.mrf.mxu0 }
 0x56a   : > { %v13220_v21 = vld [vmem:[%s21517_s1 + $0xcec] sm:$0xf0] }
 0x56b   : > { %v10950_v49 = vld [vmem:[%s21517_s1 + $0xed0] sm:$0xf]  ;;  %v10695_v41 = vor.u32 %v13220_v21, %v10694_v11  ;;  %7103 = vmatpush.bf16.msra.mxu1 %v10439_v19  ;;  %v18895_v21 = vpop.f32.mrf.mxu1 }
 0x56c   : > { %v13284_v32 = vld [vmem:[%s21517_s1 + $0xeec] sm:$0xf0] }
 0x56d   : > { %v10150_v60 = vld [vmem:[%s21517_s1 + $0x890] sm:$0xf]  ;;  %v10951_v8 = vor.u32 %v13284_v32, %v10950_v49  ;;  %7117 = vmatpush.bf16.msra.mxu2 %v10695_v41 }
 0x56e   : > { %v13084_v22 = vld [vmem:[%s21517_s1 + $0x8ac] sm:$0xf0] }
 0x56f   : > { %v10406_v54 = vld [vmem:[%s21517_s1 + $0xa90] sm:$0xf]  ;;  %v10151_v18 = vor.u32 %v13084_v22, %v10150_v60  ;;  %7131 = vmatpush.bf16.msra.mxu3 %v10951_v8  ;;  %v18912_v8 = vpop.f32.mrf.mxu3 }
 0x570   : > { %v13148_v50 = vld [vmem:[%s21517_s1 + $0xaac] sm:$0xf0] }
 0x571   : > { %v10662_v53 = vld [vmem:[%s21517_s1 + $0xc90] sm:$0xf]  ;;  %v10407_v13 = vor.u32 %v13148_v50, %v10406_v54  ;;  %7090 = vmatpush.bf16.msra.mxu0 %v10151_v18 }
 0x572   : > { %v13212_v27 = vld [vmem:[%s21517_s1 + $0xcac] sm:$0xf0] }
 0x573   : > { %v10918_v26 = vld [vmem:[%s21517_s1 + $0xe90] sm:$0xf]  ;;  %v10663_v38 = vor.u32 %v13212_v27, %v10662_v53  ;;  %7104 = vmatpush.bf16.msra.mxu1 %v10407_v13 }
 0x574   : > { %v13276_v28 = vld [vmem:[%s21517_s1 + $0xeac] sm:$0xf0] }
 0x575   : > { %v10118_v45 = vld [vmem:[%s21517_s1 + $0x850] sm:$0xf]  ;;  %v10919_v33 = vor.u32 %v13276_v28, %v10918_v26  ;;  %7118 = vmatpush.bf16.msra.mxu2 %v10663_v38  ;;  %v18923_v38 = vpop.f32.mrf.mxu2 }
 0x576   : > { %v13076_v48 = vld [vmem:[%s21517_s1 + $0x86c] sm:$0xf0] }
 0x577   : > { %v10374_v30 = vld [vmem:[%s21517_s1 + $0xa50] sm:$0xf]  ;;  %v10119_v2 = vor.u32 %v13076_v48, %v10118_v45  ;;  %7132 = vmatpush.bf16.msra.mxu3 %v10919_v33 }
 0x578   : > { %v13140_v55 = vld [vmem:[%s21517_s1 + $0xa6c] sm:$0xf0] }
 0x579   : > { %v10630_v52 = vld [vmem:[%s21517_s1 + $0xc50] sm:$0xf]  ;;  %v10375_v29 = vor.u32 %v13140_v55, %v10374_v30  ;;  %7091 = vmatpush.bf16.msra.mxu0 %v10119_v2 }
 0x57a   : > { %v13204_v34 = vld [vmem:[%s21517_s1 + $0xc6c] sm:$0xf0] }
 0x57b   : > { %v10886_v63 = vld [vmem:[%s21517_s1 + $0xe50] sm:$0xf]  ;;  %v10631_v62 = vor.u32 %v13204_v34, %v10630_v52  ;;  %7105 = vmatpush.bf16.msra.mxu1 %v10375_v29 }
 0x57c   : > { %v13268_v0 = vld [vmem:[%s21517_s1 + $0xe6c] sm:$0xf0] }
 0x57d   : > { %v10086_v56 = vld [vmem:[%s21517_s1 + $0x810] sm:$0xf]  ;;  %v10887_v6 = vor.u32 %v13268_v0, %v10886_v63  ;;  %7119 = vmatpush.bf16.msra.mxu2 %v10631_v62 }
 0x57e   : > { %v13068_v23 = vld [vmem:[%s21517_s1 + $0x82c] sm:$0xf0] }
 0x57f   : > { %v10342_v42 = vld [vmem:[%s21517_s1 + $0xa10] sm:$0xf]  ;;  %v10087_v49 = vor.u32 %v13068_v23, %v10086_v56  ;;  %7133 = vmatpush.bf16.msra.mxu3 %v10887_v6 }
 0x580   : > { %v13132_v4 = vld [vmem:[%s21517_s1 + $0xa2c] sm:$0xf0] }
 0x581   : > { %v10598_v7 = vld [vmem:[%s21517_s1 + $0xc10] sm:$0xf]  ;;  %v10343_v41 = vor.u32 %v13132_v4, %v10342_v42  ;;  %7092 = vmatpush.bf16.msra.mxu0 %v10087_v49 }
 0x582   : > { %v13196_v9 = vld [vmem:[%s21517_s1 + $0xc2c] sm:$0xf0] }
 0x583   : > { %v10854_v51 = vld [vmem:[%s21517_s1 + $0xe10] sm:$0xf]  ;;  %v10599_v60 = vor.u32 %v13196_v9, %v10598_v7  ;;  %7106 = vmatpush.bf16.msra.mxu1 %v10343_v41  ;;  %v18959_v7 = vpop.f32.mrf.mxu0 }
 0x584   : > { %v13260_v12 = vld [vmem:[%s21517_s1 + $0xe2c] sm:$0xf0]  ;;  %7093 = vmatmul.bf16.vlgmr.msra.gmra.mxu0 %v16279_v39 }
 0x585   : > { %v11334_v15 = vld [vmem:[%s21517_s1 + $0x11d0] sm:$0xf]  ;;  %v10855_v50 = vor.u32 %v13260_v12, %v10854_v51  ;;  %7120 = vmatpush.bf16.msra.mxu2 %v10599_v60  ;;  %v18969_v51 = vpop.f32.mrf.mxu1  ;;  %v18971_v12 = vpop.f32.mrf.mxu3 }
 0x586   : > { %v13380_v61 = vld [vmem:[%s21517_s1 + $0x11ec] sm:$0xf0]  ;;  %7107 = vmatmul.bf16.vlgmr.msra.gmra.mxu1 %v16292_v44 }
 0x587   : > { %v11590_v11 = vld [vmem:[%s21517_s1 + $0x13d0] sm:$0xf]  ;;  %v11335_v53 = vor.u32 %v13380_v61, %v11334_v15  ;;  %7134 = vmatpush.bf16.msra.mxu3 %v10855_v50 }
 0x588   : > { %v13444_v32 = vld [vmem:[%s21517_s1 + $0x13ec] sm:$0xf0]  ;;  %7121 = vmatmul.bf16.vlgmr.msra.gmra.mxu2 %v16290_v43 }
 0x589   : > { %v11846_v46 = vld [vmem:[%s21517_s1 + $0x15d0] sm:$0xf]  ;;  %v11591_v27 = vor.u32 %v13444_v32, %v11590_v11  ;;  %7141 = vmatpush.bf16.msrb.mxu0 %v11335_v53  ;;  %v18998_v53 = vpop.f32.mrf.mxu2 }
 0x58a   : > { %v13508_v19 = vld [vmem:[%s21517_s1 + $0x15ec] sm:$0xf0]  ;;  %7135 = vmatmul.bf16.vlgmr.msra.gmra.mxu3 %v16300_v47 }
 0x58b   : > { %v12102_v22 = vld [vmem:[%s21517_s1 + $0x17d0] sm:$0xf]  ;;  %v11847_v26 = vor.u32 %v13508_v19, %v11846_v46  ;;  %7155 = vmatpush.bf16.msrb.mxu1 %v11591_v27 }
 0x58c   : > { %v13572_v54 = vld [vmem:[%s21517_s1 + $0x17ec] sm:$0xf0] }
 0x58d   : > { %v11302_v28 = vld [vmem:[%s21517_s1 + $0x1190] sm:$0xf]  ;;  %v12103_v45 = vor.u32 %v13572_v54, %v12102_v22  ;;  %7169 = vmatpush.bf16.msrb.mxu2 %v11847_v26 }
 0x58e   : > { %v13372_v18 = vld [vmem:[%s21517_s1 + $0x11ac] sm:$0xf0] }
 0x58f   : > { %v11558_v13 = vld [vmem:[%s21517_s1 + $0x1390] sm:$0xf]  ;;  %v11303_v34 = vor.u32 %v13372_v18, %v11302_v28  ;;  %7183 = vmatpush.bf16.msrb.mxu3 %v12103_v45 }
 0x590   : > { %v13436_v48 = vld [vmem:[%s21517_s1 + $0x13ac] sm:$0xf0] }
 0x591   : > { %v11814_v30 = vld [vmem:[%s21517_s1 + $0x1590] sm:$0xf]  ;;  %v11559_v63 = vor.u32 %v13436_v48, %v11558_v13  ;;  %7142 = vmatpush.bf16.msrb.mxu0 %v11303_v34 }
 0x592   : > { %v13500_v33 = vld [vmem:[%s21517_s1 + $0x15ac] sm:$0xf0] }
 0x593   : > { %v12070_v55 = vld [vmem:[%s21517_s1 + $0x1790] sm:$0xf]  ;;  %v11815_v0 = vor.u32 %v13500_v33, %v11814_v30  ;;  %7156 = vmatpush.bf16.msrb.mxu1 %v11559_v63 }
 0x594   : > { %v13564_v52 = vld [vmem:[%s21517_s1 + $0x17ac] sm:$0xf0] }
 0x595   : > { %v11270_v2 = vld [vmem:[%s21517_s1 + $0x1150] sm:$0xf]  ;;  %v12071_v29 = vor.u32 %v13564_v52, %v12070_v55  ;;  %7170 = vmatpush.bf16.msrb.mxu2 %v11815_v0  ;;  %v19018_v52 = vpop.f32.mrf.mxu0  ;;  %v19026_v0 = vpop.f32.mrf.mxu1 }
 0x596   : > { %v13364_v56 = vld [vmem:[%s21517_s1 + $0x116c] sm:$0xf0] }
 0x597   : > { %v11526_v23 = vld [vmem:[%s21517_s1 + $0x1350] sm:$0xf]  ;;  %v11271_v15 = vor.u32 %v13364_v56, %v11270_v2  ;;  %7184 = vmatpush.bf16.msrb.mxu3 %v12071_v29 }
 0x598   : > { %v13428_v62 = vld [vmem:[%s21517_s1 + $0x136c] sm:$0xf0] }
 0x599   : > { %v11782_v42 = vld [vmem:[%s21517_s1 + $0x1550] sm:$0xf]  ;;  %v11527_v61 = vor.u32 %v13428_v62, %v11526_v23  ;;  %7143 = vmatpush.bf16.msrb.mxu0 %v11271_v15 }
 0x59a   : > { %v13492_v4 = vld [vmem:[%s21517_s1 + $0x156c] sm:$0xf0] }
 0x59b   : > { %v12038_v6 = vld [vmem:[%s21517_s1 + $0x1750] sm:$0xf]  ;;  %v11783_v11 = vor.u32 %v13492_v4, %v11782_v42  ;;  %7157 = vmatpush.bf16.msrb.mxu1 %v11527_v61  ;;  %v19037_v4 = vpop.f32.mrf.mxu3 }
 0x59c   : > { %v13556_v9 = vld [vmem:[%s21517_s1 + $0x176c] sm:$0xf0] }
 0x59d   : > { %v11238_v49 = vld [vmem:[%s21517_s1 + $0x1110] sm:$0xf]  ;;  %v12039_v19 = vor.u32 %v13556_v9, %v12038_v6  ;;  %7171 = vmatpush.bf16.msrb.mxu2 %v11783_v11 }
 0x59e   : > { %v13356_v32 = vld [vmem:[%s21517_s1 + $0x112c] sm:$0xf0] }
 0x59f   : > { %v11494_v46 = vld [vmem:[%s21517_s1 + $0x1310] sm:$0xf]  ;;  %v11239_v27 = vor.u32 %v13356_v32, %v11238_v49  ;;  %7185 = vmatpush.bf16.msrb.mxu3 %v12039_v19 }
 0x5a0   : > { %v13420_v41 = vld [vmem:[%s21517_s1 + $0x132c] sm:$0xf0] }
 0x5a1   : > { %v11750_v60 = vld [vmem:[%s21517_s1 + $0x1510] sm:$0xf]  ;;  %v11495_v26 = vor.u32 %v13420_v41, %v11494_v46  ;;  %7144 = vmatpush.bf16.msrb.mxu0 %v11239_v27 }
 0x5a2   : > { %v13484_v22 = vld [vmem:[%s21517_s1 + $0x152c] sm:$0xf0] }
 0x5a3   : > { %v12006_v54 = vld [vmem:[%s21517_s1 + $0x1710] sm:$0xf]  ;;  %v11751_v28 = vor.u32 %v13484_v22, %v11750_v60  ;;  %7158 = vmatpush.bf16.msrb.mxu1 %v11495_v26 }
 0x5a4   : > { %v13548_v50 = vld [vmem:[%s21517_s1 + $0x172c] sm:$0xf0] }
 0x5a5   : > { %v11206_v18 = vld [vmem:[%s21517_s1 + $0x10d0] sm:$0xf]  ;;  %v12007_v48 = vor.u32 %v13548_v50, %v12006_v54  ;;  %7172 = vmatpush.bf16.msrb.mxu2 %v11751_v28  ;;  %v19063_v54 = vpop.f32.mrf.mxu2 }
 0x5a6   : > { %v13348_v13 = vld [vmem:[%s21517_s1 + $0x10ec] sm:$0xf0] }
 0x5a7   : > { %v11462_v45 = vld [vmem:[%s21517_s1 + $0x12d0] sm:$0xf]  ;;  %v11207_v2 = vor.u32 %v13348_v13, %v11206_v18  ;;  %7186 = vmatpush.bf16.msrb.mxu3 %v12007_v48 }
 0x5a8   : > { %v13412_v30 = vld [vmem:[%s21517_s1 + $0x12ec] sm:$0xf0] }
 0x5a9   : > { %v11718_v33 = vld [vmem:[%s21517_s1 + $0x14d0] sm:$0xf]  ;;  %v11463_v56 = vor.u32 %v13412_v30, %v11462_v45  ;;  %7145 = vmatpush.bf16.msrb.mxu0 %v11207_v2 }
 0x5aa   : > { %v13476_v55 = vld [vmem:[%s21517_s1 + $0x14ec] sm:$0xf0] }
 0x5ab   : > { %v11974_v34 = vld [vmem:[%s21517_s1 + $0x16d0] sm:$0xf]  ;;  %v11719_v23 = vor.u32 %v13476_v55, %v11718_v33  ;;  %7159 = vmatpush.bf16.msrb.mxu1 %v11463_v56  ;;  %v19086_v33 = vpop.f32.mrf.mxu0 }
 0x5ac   : > { %v13540_v63 = vld [vmem:[%s21517_s1 + $0x16ec] sm:$0xf0] }
 0x5ad   : > { %v11174_v29 = vld [vmem:[%s21517_s1 + $0x1090] sm:$0xf]  ;;  %v11975_v6 = vor.u32 %v13540_v63, %v11974_v34  ;;  %7173 = vmatpush.bf16.msrb.mxu2 %v11719_v23  ;;  %v19097_v23 = vpop.f32.mrf.mxu1 }
 0x5ae   : > { %v13340_v62 = vld [vmem:[%s21517_s1 + $0x10ac] sm:$0xf0] }
 0x5af   : > { %v11430_v42 = vld [vmem:[%s21517_s1 + $0x1290] sm:$0xf]  ;;  %v11175_v32 = vor.u32 %v13340_v62, %v11174_v29  ;;  %7187 = vmatpush.bf16.msrb.mxu3 %v11975_v6  ;;  %v19099_v29 = vpop.f32.mrf.mxu3 }
 0x5b0   : > { %v13404_v9 = vld [vmem:[%s21517_s1 + $0x12ac] sm:$0xf0] }
 0x5b1   : > { %v11686_v15 = vld [vmem:[%s21517_s1 + $0x1490] sm:$0xf]  ;;  %v11431_v46 = vor.u32 %v13404_v9, %v11430_v42  ;;  %7146 = vmatpush.bf16.msrb.mxu0 %v11175_v32  ;;  %v9288_v32 = vld [vmem:[%s21517_s1 + $0x1f0] sm:$0xf0] }
 0x5b2   : > { %v13468_v61 = vld [vmem:[%s21517_s1 + $0x14ac] sm:$0xf0] }
 0x5b3   : > { %v11942_v11 = vld [vmem:[%s21517_s1 + $0x1690] sm:$0xf]  ;;  %v11687_v19 = vor.u32 %v13468_v61, %v11686_v15  ;;  %7160 = vmatpush.bf16.msrb.mxu1 %v11431_v46  ;;  %v12928_v46 = vld [vmem:[%s21517_s1 + $0x3d4] sm:$0xf] }
 0x5b4   : > { %v13532_v49 = vld [vmem:[%s21517_s1 + $0x16ac] sm:$0xf0] }
 0x5b5   : > { %v11142_v41 = vld [vmem:[%s21517_s1 + $0x1050] sm:$0xf]  ;;  %v11943_v50 = vor.u32 %v13532_v49, %v11942_v11  ;;  %7174 = vmatpush.bf16.msrb.mxu2 %v11687_v19  ;;  %v12864_v11 = vld [vmem:[%s21517_s1 + $0x1d4] sm:$0xf] }
 0x5b6   : > { %v13332_v60 = vld [vmem:[%s21517_s1 + $0x106c] sm:$0xf0]  ;;  %v9544_v19 = vld [vmem:[%s21517_s1 + $0x3f0] sm:$0xf0] }
 0x5b7   : > { %v11398_v22 = vld [vmem:[%s21517_s1 + $0x1250] sm:$0xf]  ;;  %v11143_v45 = vor.u32 %v13332_v60, %v11142_v41  ;;  %7188 = vmatpush.bf16.msrb.mxu3 %v11943_v50  ;;  %v9800_v50 = vld [vmem:[%s21517_s1 + $0x5f0] sm:$0xf0] }
 0x5b8   : > { %v13396_v27 = vld [vmem:[%s21517_s1 + $0x126c] sm:$0xf0] }
 0x5b9   : > { %v11654_v26 = vld [vmem:[%s21517_s1 + $0x1450] sm:$0xf]  ;;  %v11399_v55 = vor.u32 %v13396_v27, %v11398_v22  ;;  %7147 = vmatpush.bf16.msrb.mxu0 %v11143_v45  ;;  %v12992_v22 = vld [vmem:[%s21517_s1 + $0x5d4] sm:$0xf] }
 0x5ba   : > { %v13460_v28 = vld [vmem:[%s21517_s1 + $0x146c] sm:$0xf0] }
 0x5bb   : > { %v11910_v18 = vld [vmem:[%s21517_s1 + $0x1650] sm:$0xf]  ;;  %v11655_v34 = vor.u32 %v13460_v28, %v11654_v26  ;;  %7161 = vmatpush.bf16.msrb.mxu1 %v11399_v55  ;;  %v9291_v28 = vor.u32 %v12864_v11, %v9288_v32  ;;  %v9803_v55 = vor.u32 %v12992_v22, %v9800_v50  ;;  %v12848_v32 = vld [vmem:[%s21517_s1 + $0x154] sm:$0xf]  ;;  %v19188_v50 = vld [vmem:[%s21518_s2] sm:$0xff] }
 0x5bc   : > { %v13524_v13 = vld [vmem:[%s21517_s1 + $0x166c] sm:$0xf0]  ;;  %v9480_v22 = vld [vmem:[%s21517_s1 + $0x370] sm:$0xf0] }
 0x5bd   : > { %v11110_v48 = vld [vmem:[%s21517_s1 + $0x1010] sm:$0xf]  ;;  %v11911_v62 = vor.u32 %v13524_v13, %v11910_v18  ;;  %7175 = vmatpush.bf16.msrb.mxu2 %v11655_v34  ;;  %v9547_v18 = vor.u32 %v12928_v46, %v9544_v19  ;;  %v9256_v34 = vld [vmem:[%s21517_s1 + $0x1b0] sm:$0xf0]  ;;  %v19173_v46 = vpop.f32.mrf.mxu3 }
 0x5be   : > { %v13324_v30 = vld [vmem:[%s21517_s1 + $0x102c] sm:$0xf0] }
 0x5bf   : > { %v11366_v63 = vld [vmem:[%s21517_s1 + $0x1210] sm:$0xf]  ;;  %v11111_v49 = vor.u32 %v13324_v30, %v11110_v48  ;;  %7189 = vmatpush.bf16.msrb.mxu3 %v11911_v62  ;;  %v12856_v48 = vld [vmem:[%s21517_s1 + $0x194] sm:$0xf]  ;;  %v19143_v30 = vpop.f32.mrf.mxu2 }
 0x5c0   : > { %v13388_v2 = vld [vmem:[%s21517_s1 + $0x122c] sm:$0xf0]  ;;  %v12984_v62 = vld [vmem:[%s21517_s1 + $0x594] sm:$0xf] }
 0x5c1   : > { %v11622_v56 = vld [vmem:[%s21517_s1 + $0x1410] sm:$0xf]  ;;  %v11367_v41 = vor.u32 %v13388_v2, %v11366_v63  ;;  %7148 = vmatpush.bf16.msrb.mxu0 %v11111_v49  ;;  %v12920_v63 = vld [vmem:[%s21517_s1 + $0x394] sm:$0xf] }
 0x5c2   : > { %v13452_v42 = vld [vmem:[%s21517_s1 + $0x142c] sm:$0xf0]  ;;  %v9512_v2 = vld [vmem:[%s21517_s1 + $0x3b0] sm:$0xf0] }
 0x5c3   : > { %v11878_v6 = vld [vmem:[%s21517_s1 + $0x1610] sm:$0xf]  ;;  %v11623_v60 = vor.u32 %v13452_v42, %v11622_v56  ;;  %v19154_v56 = vpop.f32.mrf.mxu0  ;;  %7162 = vmatpush.bf16.msrb.mxu1 %v11367_v41  ;;  %v9768_v42 = vld [vmem:[%s21517_s1 + $0x5b0] sm:$0xf0] }
 0x5c4   : > { %v13516_v9 = vld [vmem:[%s21517_s1 + $0x162c] sm:$0xf0]  ;;  %7149 = vmatmul.bf16.vlgmr.msrb.gmra.mxu0 %v16507_v31  ;;  %v9771_v19 = vor.u32 %v12984_v62, %v9768_v42  ;;  %v9224_v41 = vld [vmem:[%s21517_s1 + $0x170] sm:$0xf0] }
 0x5c5   : > { %v12230_v15 = vld [vmem:[%s21517_s1 + $0x18d0] sm:$0xf]  ;;  %v11879_v27 = vor.u32 %v13516_v9, %v11878_v6  ;;  %7176 = vmatpush.bf16.msrb.mxu2 %v11623_v60  ;;  %v19162_v6 = vpop.f32.mrf.mxu1  ;;  %v12912_v60 = vld [vmem:[%s21517_s1 + $0x354] sm:$0xf] }
 0x5c6   : > { %v13604_v61 = vld [vmem:[%s21517_s1 + $0x18ec] sm:$0xf0]  ;;  %7163 = vmatmul.bf16.vlgmr.msrb.gmra.mxu1 %v16520_v36  ;;  %v12904_v42 = vld [vmem:[%s21517_s1 + $0x314] sm:$0xf] }
 0x5c7   : > { %v12231_v26 = vor.u32 %v13604_v61, %v12230_v15  ;;  %v12198_v13 = vld [vmem:[%s21517_s1 + $0x1890] sm:$0xf]  ;;  %7190 = vmatpush.bf16.msrb.mxu3 %v11879_v27  ;;  %7211 = vmatpush.bf16.msra.mxu1 %v9291_v28  ;;  %v9259_v15 = vor.u32 %v12856_v48, %v9256_v34  ;;  %v9515_v61 = vor.u32 %v12920_v63, %v9512_v2  ;;  %v21524_v27 = vperm.slane %v19188_v50, 3  ;;  %v9736_v28 = vld [vmem:[%s21517_s1 + $0x570] sm:$0xf0]  ;;  %v19212_v2 = vpop.f32.mrf.mxu2 }
 0x5c8   : > { %v13596_v45 = vld [vmem:[%s21517_s1 + $0x18ac] sm:$0xf0]  ;;  %7177 = vmatmul.bf16.vlgmr.msrb.gmra.mxu2 %v16518_v35  ;;  %v9483_v48 = vor.u32 %v12912_v60, %v9480_v22  ;;  %v12840_v34 = vld [vmem:[%s21517_s1 + $0x114] sm:$0xf] }
 0x5c9   : > { %7201 = vmatpush.bf16.msra.mxu0 %v12231_v26  ;;  %v12199_v9 = vor.u32 %v13596_v45, %v12198_v13  ;;  %7225 = vmatpush.bf16.msra.mxu2 %v9547_v18  ;;  %v12166_v11 = vld [vmem:[%s21517_s1 + $0x1850] sm:$0xf]  ;;  %v12976_v26 = vld [vmem:[%s21517_s1 + $0x554] sm:$0xf]  ;;  %v9227_v45 = vor.u32 %v12848_v32, %v9224_v41 }
 0x5ca   : > { %v13588_v49 = vld [vmem:[%s21517_s1 + $0x186c] sm:$0xf0]  ;;  %7191 = vmatmul.bf16.vlgmr.msrb.gmra.mxu3 %v16528_v40  ;;  %v9192_v63 = vld [vmem:[%s21517_s1 + $0x130] sm:$0xf0]  ;;  %v9739_v62 = vor.u32 %v12976_v26, %v9736_v28 }
 0x5cb   : > { %7239 = vmatpush.bf16.msra.mxu3 %v9803_v55  ;;  %v12167_v18 = vor.u32 %v13588_v49, %v12166_v11  ;;  %v12134_v13 = vld [vmem:[%s21517_s1 + $0x1810] sm:$0xf]  ;;  %7212 = vmatpush.bf16.msra.mxu1 %v9259_v15  ;;  %v12968_v15 = vld [vmem:[%s21517_s1 + $0x514] sm:$0xf]  ;;  %v19235_v41 = vpop.f32.mrf.mxu0  ;;  %v9195_v60 = vor.u32 %v12840_v34, %v9192_v63 }
 0x5cc   : > { %v13580_v55 = vld [vmem:[%s21517_s1 + $0x182c] sm:$0xf0]  ;;  %v9704_v11 = vld [vmem:[%s21517_s1 + $0x530] sm:$0xf0] }
 0x5cd   : > { %7202 = vmatpush.bf16.msra.mxu0 %v12199_v9  ;;  %7226 = vmatpush.bf16.msra.mxu2 %v9515_v61  ;;  %v9448_v9 = vld [vmem:[%s21517_s1 + $0x330] sm:$0xf0]  ;;  %v6857_v61 = vadd.f32 %v19099_v29, %v21524_v27  ;;  %v19243_v28 = vpop.f32.mrf.mxu1  ;;  %v9707_v27 = vor.u32 %v12968_v15, %v9704_v11 }
 0x5ce   : > { %v13056_v49 = vld [vmem:[%s21517_s1 + $0x7d4] sm:$0xf]  ;;  %v9451_v29 = vor.u32 %v12904_v42, %v9448_v9  ;;  %v6912_v42 = vpop.f32.mrf.mxu3 }
 0x5cf   : > { %7240 = vmatpush.bf16.msra.mxu3 %v9771_v19  ;;  %v10056_v32 = vld [vmem:[%s21517_s1 + $0x7f0] sm:$0xf0]  ;;  %v12135_v19 = vor.u32 %v13580_v55, %v12134_v13  ;;  %7213 = vmatpush.bf16.msra.mxu1 %v9227_v45  ;;  %v6871_v55 = vadd.f32 %v19154_v56, %v6857_v61 }
 0x5d0   : > { %v12832_v22 = vld [vmem:[%s21517_s1 + $0xd4] sm:$0xf] }
 0x5d1   : > { %7203 = vmatpush.bf16.msra.mxu0 %v12167_v18  ;;  %7227 = vmatpush.bf16.msra.mxu2 %v9483_v48  ;;  %v9160_v26 = vld [vmem:[%s21517_s1 + $0xf0] sm:$0xf0]  ;;  %v10059_v18 = vor.u32 %v13056_v49, %v10056_v32 }
 0x5d2   : > { %v12896_v13 = vld [vmem:[%s21517_s1 + $0x2d4] sm:$0xf]  ;;  %v9163_v9 = vor.u32 %v12832_v22, %v9160_v26 }
 0x5d3   : > { %7241 = vmatpush.bf16.msra.mxu3 %v9739_v62  ;;  %v9416_v45 = vld [vmem:[%s21517_s1 + $0x2f0] sm:$0xf0]  ;;  %7214 = vmatpush.bf16.msra.mxu1 %v9195_v60 }
 0x5d4   : > { %v12960_v48 = vld [vmem:[%s21517_s1 + $0x4d4] sm:$0xf]  ;;  %v9419_v15 = vor.u32 %v12896_v13, %v9416_v45  ;;  %v19292_v13 = vpop.f32.mrf.mxu2 }
 0x5d5   : > { %v9672_v34 = vld [vmem:[%s21517_s1 + $0x4f0] sm:$0xf0]  ;;  %7204 = vmatpush.bf16.msra.mxu0 %v12135_v19  ;;  %7228 = vmatpush.bf16.msra.mxu2 %v9451_v29  ;;  %v6885_v29 = vadd.f32 %v19162_v6, %v6871_v55 }
 0x5d6   : > { %v13048_v63 = vld [vmem:[%s21517_s1 + $0x794] sm:$0xf]  ;;  %v9675_v11 = vor.u32 %v12960_v48, %v9672_v34 }
 0x5d7   : > { %v10024_v62 = vld [vmem:[%s21517_s1 + $0x7b0] sm:$0xf0]  ;;  %7242 = vmatpush.bf16.msra.mxu3 %v9707_v27  ;;  %7215 = vmatpush.bf16.msra.mxu1 %v9163_v9  ;;  %v6926_v9 = vpop.f32.mrf.mxu0 }
 0x5d8   : > { %v12824_v56 = vld [vmem:[%s21517_s1 + $0x94] sm:$0xf]  ;;  %v10027_v49 = vor.u32 %v13048_v63, %v10024_v62  ;;  %v6899_v62 = vadd.f32 %v19212_v2, %v6885_v29  ;;  %12248 = vmatmul.msk.bf16.vlgmr.msra.gmra.mxu0 %vm6297_vm0, %v16633_v37  ;;  %v21550_v2 = vperm.slane %v19188_v50, 3 }
 0x5d9   : > { %v9128_v61 = vld [vmem:[%s21517_s1 + $0xb0] sm:$0xf0]  ;;  %7253 = vmatpush.bf16.msrb.mxu0 %v10059_v18  ;;  %v6677_v18 = vadd.f32 %v18454_v25, %v2283_v3  ;;  %7229 = vmatpush.bf16.msra.mxu2 %v9419_v15 }
 0x5da   : > { %v12888_v32 = vld [vmem:[%s21517_s1 + $0x294] sm:$0xf]  ;;  %v9131_v6 = vor.u32 %v12824_v56, %v9128_v61 }
 0x5db   : > { %v9384_v19 = vld [vmem:[%s21517_s1 + $0x2b0] sm:$0xf0]  ;;  %7243 = vmatpush.bf16.msra.mxu3 %v9675_v11  ;;  %v6691_v11 = vadd.f32 %v18462_v59, %v6677_v18 }
 0x5dc   : > { %v12952_v60 = vld [vmem:[%s21517_s1 + $0x494] sm:$0xf]  ;;  %v9387_v45 = vor.u32 %v12888_v32, %v9384_v19  ;;  %v6859_v32 = vadd.f32 %v19173_v46, %v21550_v2  ;;  %7216 = vmatpush.bf16.msra.mxu1 %v9131_v6 }
 0x5dd   : > { %v9640_v27 = vld [vmem:[%s21517_s1 + $0x4b0] sm:$0xf0]  ;;  %7254 = vmatpush.bf16.msrb.mxu0 %v10027_v49  ;;  %v6940_v49 = vpop.f32.mrf.mxu1 }
 0x5de   : > { %v13040_v22 = vld [vmem:[%s21517_s1 + $0x754] sm:$0xf]  ;;  %v9643_v34 = vor.u32 %v12952_v60, %v9640_v27  ;;  %7230 = vmatpush.bf16.msra.mxu2 %v9387_v45 }
 0x5df   : > { %v9992_v26 = vld [vmem:[%s21517_s1 + $0x770] sm:$0xf0] }
 0x5e0   : > { %v12816_v48 = vld [vmem:[%s21517_s1 + $0x54] sm:$0xf]  ;;  %v9995_v14 = vor.u32 %v13040_v22, %v9992_v26  ;;  %v19334_v22 = vpop.f32.mrf.mxu3  ;;  %7244 = vmatpush.bf16.msra.mxu3 %v9643_v34 }
 0x5e1   : > { %v9096_v55 = vld [vmem:[%s21517_s1 + $0x70] sm:$0xf0] }
 0x5e2   : > { %v12880_v3 = vld [vmem:[%s21517_s1 + $0x254] sm:$0xf]  ;;  %v9099_v19 = vor.u32 %v12816_v48, %v9096_v55  ;;  %7255 = vmatpush.bf16.msrb.mxu0 %v9995_v14  ;;  %v6913_v48 = vadd.f32 %v6912_v42, %v6899_v62  ;;  %v6873_v62 = vadd.f32 %v19235_v41, %v6859_v32 }
 0x5e3   : > { %v9352_v25 = vld [vmem:[%s21517_s1 + $0x270] sm:$0xf0] }
 0x5e4   : > { %v12944_v63 = vld [vmem:[%s21517_s1 + $0x454] sm:$0xf]  ;;  %v9355_v60 = vor.u32 %v12880_v3, %v9352_v25  ;;  %v6705_v3 = vadd.f32 %v18806_v20, %v6691_v11  ;;  %7217 = vmatpush.bf16.msra.mxu1 %v9099_v19  ;;  %v6954_v11 = vpop.f32.mrf.mxu2  ;;  %v6927_v40 = vadd.f32 %v6926_v9, %v6913_v48 }
 0x5e5   : > { %v9608_v15 = vld [vmem:[%s21517_s1 + $0x470] sm:$0xf0] }
 0x5e6   : > { %v13032_v56 = vld [vmem:[%s21517_s1 + $0x714] sm:$0xf]  ;;  %v9611_v46 = vor.u32 %v12944_v63, %v9608_v15  ;;  %7231 = vmatpush.bf16.msra.mxu2 %v9355_v60 }
 0x5e7   : > { %v9960_v61 = vld [vmem:[%s21517_s1 + $0x730] sm:$0xf0] }
 0x5e8   : > { %v12808_v29 = vld [vmem:[%s21517_s1 + $0x14] sm:$0xf]  ;;  %v9963_v26 = vor.u32 %v13032_v56, %v9960_v61  ;;  %7245 = vmatpush.bf16.msra.mxu3 %v9611_v46  ;;  %v6968_v48 = vpop.f32.mrf.mxu3 }
 0x5e9   : > { %v9064_v27 = vld [vmem:[%s21517_s1 + $0x30] sm:$0xf0] }
 0x5ea   : > { %v12872_v59 = vld [vmem:[%s21517_s1 + $0x214] sm:$0xf]  ;;  %v9067_v15 = vor.u32 %v12808_v29, %v9064_v27  ;;  %7256 = vmatpush.bf16.msrb.mxu0 %v9963_v26  ;;  %v6719_v29 = vadd.f32 %v18817_v16, %v6705_v3  ;;  %v6759_v27 = vadd.f32 %v18884_v24, %v18541_v57 }
 0x5eb   : > { %v9320_v18 = vld [vmem:[%s21517_s1 + $0x230] sm:$0xf0] }
 0x5ec   : > { %v12936_v6 = vld [vmem:[%s21517_s1 + $0x414] sm:$0xf]  ;;  %v9323_v56 = vor.u32 %v12872_v59, %v9320_v18  ;;  %v6887_v18 = vadd.f32 %v19243_v28, %v6873_v62  ;;  %7218 = vmatpush.bf16.msra.mxu1 %v9067_v15  ;;  %v6733_v24 = vadd.f32 %v18858_v5, %v6719_v29  ;;  %v6956_v29 = vpop.f32.mrf.mxu2 }
 0x5ed   : > { %v9576_v45 = vld [vmem:[%s21517_s1 + $0x430] sm:$0xf0] }
 0x5ee   : > { %v13024_v55 = vld [vmem:[%s21517_s1 + $0x6d4] sm:$0xf]  ;;  %v9579_v2 = vor.u32 %v12936_v6, %v9576_v45  ;;  %v6928_v6 = vpop.f32.mrf.mxu0  ;;  %7232 = vmatpush.bf16.msra.mxu2 %v9323_v56  ;;  %v19400_v45 = vpop.f32.mrf.mxu1  ;;  %v6747_v15 = vadd.f32 %v18912_v8, %v6733_v24 }
 0x5ef   : > { %v9928_v34 = vld [vmem:[%s21517_s1 + $0x6f0] sm:$0xf0]  ;;  %7219 = vmatmul.bf16.vlgmr.msra.gmra.mxu1 %v16057_v58 }
 0x5f0   : > { %v13120_v14 = vld [vmem:[%s21517_s1 + $0x9d4] sm:$0xf]  ;;  %v9931_v37 = vor.u32 %v13024_v55, %v9928_v34  ;;  %7246 = vmatpush.bf16.msra.mxu3 %v9579_v2  ;;  %v6941_v34 = vadd.f32 %v6940_v49, %v6927_v40  ;;  %v6970_v24 = vpop.f32.mrf.mxu3 }
 0x5f1   : > { %v10312_v25 = vld [vmem:[%s21517_s1 + $0x9f0] sm:$0xf0]  ;;  %7233 = vmatmul.bf16.vlgmr.msra.gmra.mxu2 %v16093_v10 }
 0x5f2   : > { %v13184_v42 = vld [vmem:[%s21517_s1 + $0xbd4] sm:$0xf]  ;;  %v10315_v35 = vor.u32 %v13120_v14, %v10312_v25  ;;  %7257 = vmatpush.bf16.msrb.mxu0 %v9931_v37 }
 0x5f3   : > { %v10568_v63 = vld [vmem:[%s21517_s1 + $0xbf0] sm:$0xf0]  ;;  %7247 = vmatmul.bf16.vlgmr.msra.gmra.mxu3 %v16071_v1 }
 0x5f4   : > { %v13248_v20 = vld [vmem:[%s21517_s1 + $0xdd4] sm:$0xf]  ;;  %v10571_v41 = vor.u32 %v13184_v42, %v10568_v63  ;;  %7267 = vmatpush.bf16.msrb.mxu1 %v10315_v35  ;;  %v6773_v42 = vadd.f32 %v18895_v21, %v6759_v27  ;;  %v6901_v63 = vadd.f32 %v19292_v13, %v6887_v18 }
 0x5f5   : > { %v10824_v61 = vld [vmem:[%s21517_s1 + $0xdf0] sm:$0xf0] }
 0x5f6   : > { %v13016_v32 = vld [vmem:[%s21517_s1 + $0x694] sm:$0xf]  ;;  %v10827_v9 = vor.u32 %v13248_v20, %v10824_v61  ;;  %7281 = vmatpush.bf16.msrb.mxu2 %v10571_v41  ;;  %v6787_v56 = vadd.f32 %v18923_v38, %v6773_v42  ;;  %v6915_v2 = vadd.f32 %v19334_v22, %v6901_v63  ;;  %v6955_v41 = vadd.f32 %v6954_v11, %v6941_v34 }
 0x5f7   : > { %v9896_v19 = vld [vmem:[%s21517_s1 + $0x6b0] sm:$0xf0] }
 0x5f8   : > { %v13112_v60 = vld [vmem:[%s21517_s1 + $0x994] sm:$0xf]  ;;  %v9899_v55 = vor.u32 %v13016_v32, %v9896_v19  ;;  %7295 = vmatpush.bf16.msrb.mxu3 %v10827_v9 }
 0x5f9   : > { %v10280_v59 = vld [vmem:[%s21517_s1 + $0x9b0] sm:$0xf0] }
 0x5fa   : > { %v13176_v46 = vld [vmem:[%s21517_s1 + $0xb94] sm:$0xf]  ;;  %v10283_v14 = vor.u32 %v13112_v60, %v10280_v59  ;;  %7258 = vmatpush.bf16.msrb.mxu0 %v9899_v55  ;;  %v6761_v60 = vadd.f32 %v18959_v7, %v6747_v15  ;;  %v6929_v59 = vadd.f32 %v6928_v6, %v6915_v2  ;;  %v6996_v6 = vpop.f32.mrf.mxu1  ;;  %v7010_v2 = vpop.f32.mrf.mxu2 }
 0x5fb   : > { %v10536_v26 = vld [vmem:[%s21517_s1 + $0xbb0] sm:$0xf0] }
 0x5fc   : > { %v13240_v57 = vld [vmem:[%s21517_s1 + $0xd94] sm:$0xf]  ;;  %v10539_v3 = vor.u32 %v13176_v46, %v10536_v26  ;;  %7268 = vmatpush.bf16.msrb.mxu1 %v10283_v14  ;;  %v6969_v46 = vadd.f32 %v6968_v48, %v6955_v41  ;;  %v6982_v26 = vpop.f32.mrf.mxu0 }
 0x5fd   : > { %v10792_v16 = vld [vmem:[%s21517_s1 + $0xdb0] sm:$0xf0] }
 0x5fe   : > { %v13008_v28 = vld [vmem:[%s21517_s1 + $0x654] sm:$0xf]  ;;  %v10795_v40 = vor.u32 %v13240_v57, %v10792_v16  ;;  %7282 = vmatpush.bf16.msrb.mxu2 %v10539_v3  ;;  %v6801_v16 = vadd.f32 %v18971_v12, %v6787_v56  ;;  %v6983_v48 = vadd.f32 %v6982_v26, %v6969_v46 }
 0x5ff   : > { %v9864_v25 = vld [vmem:[%s21517_s1 + $0x670] sm:$0xf0] }
 0x600   : > { %v13104_v5 = vld [vmem:[%s21517_s1 + $0x954] sm:$0xf]  ;;  %v9867_v20 = vor.u32 %v13008_v28, %v9864_v25  ;;  %7296 = vmatpush.bf16.msrb.mxu3 %v10795_v40  ;;  %v6775_v25 = vadd.f32 %v18969_v51, %v6761_v60  ;;  %v6815_v12 = vadd.f32 %v19018_v52, %v6801_v16 }
 0x601   : > { %v10248_v37 = vld [vmem:[%s21517_s1 + $0x970] sm:$0xf0] }
 0x602   : > { %v13168_v35 = vld [vmem:[%s21517_s1 + $0xb54] sm:$0xf]  ;;  %v10251_v61 = vor.u32 %v13104_v5, %v10248_v37  ;;  %7259 = vmatpush.bf16.msrb.mxu0 %v9867_v20 }
 0x603   : > { %v10504_v49 = vld [vmem:[%s21517_s1 + $0xb70] sm:$0xf0] }
 0x604   : > { %v13232_v62 = vld [vmem:[%s21517_s1 + $0xd54] sm:$0xf]  ;;  %v10507_v32 = vor.u32 %v13168_v35, %v10504_v49  ;;  %7269 = vmatpush.bf16.msrb.mxu1 %v10251_v61  ;;  %v6943_v49 = vadd.f32 %v19400_v45, %v6929_v59  ;;  %v6997_v45 = vadd.f32 %v6996_v6, %v6983_v48 }
 0x605   : > { %v10760_v21 = vld [vmem:[%s21517_s1 + $0xd70] sm:$0xf0] }
 0x606   : > { %v13000_v13 = vld [vmem:[%s21517_s1 + $0x614] sm:$0xf]  ;;  %v10763_v22 = vor.u32 %v13232_v62, %v10760_v21  ;;  %7283 = vmatpush.bf16.msrb.mxu2 %v10507_v32  ;;  %v6789_v62 = vadd.f32 %v18998_v53, %v6775_v25  ;;  %v6957_v15 = vadd.f32 %v6956_v29, %v6943_v49  ;;  %v7011_v60 = vadd.f32 %v7010_v2, %v6997_v45 }
 0x607   : > { %v9832_v19 = vld [vmem:[%s21517_s1 + $0x630] sm:$0xf0] }
 0x608   : > { %v13096_v8 = vld [vmem:[%s21517_s1 + $0x914] sm:$0xf]  ;;  %v9835_v55 = vor.u32 %v13000_v13, %v9832_v19  ;;  %7297 = vmatpush.bf16.msrb.mxu3 %v10763_v22  ;;  %v6829_v13 = vadd.f32 %v19026_v0, %v6815_v12  ;;  %v6984_v0 = vpop.f32.mrf.mxu0 }
 0x609   : > { %v10216_v38 = vld [vmem:[%s21517_s1 + $0x930] sm:$0xf0] }
 0x60a   : > { %v13160_v11 = vld [vmem:[%s21517_s1 + $0xb14] sm:$0xf]  ;;  %v10219_v28 = vor.u32 %v13096_v8, %v10216_v38  ;;  %7260 = vmatpush.bf16.msrb.mxu0 %v9835_v55  ;;  %v6971_v38 = vadd.f32 %v6970_v24, %v6957_v15 }
 0x60b   : > { %v10472_v27 = vld [vmem:[%s21517_s1 + $0xb30] sm:$0xf0] }
 0x60c   : > { %v13224_v9 = vld [vmem:[%s21517_s1 + $0xd14] sm:$0xf]  ;;  %v10475_v34 = vor.u32 %v13160_v11, %v10472_v27  ;;  %7270 = vmatpush.bf16.msrb.mxu1 %v10219_v28  ;;  %v6803_v27 = vadd.f32 %v19037_v4, %v6789_v62  ;;  %v6985_v59 = vadd.f32 %v6984_v0, %v6971_v38  ;;  %v6998_v4 = vpop.f32.mrf.mxu1 }
 0x60d   : > { %v10728_v7 = vld [vmem:[%s21517_s1 + $0xd30] sm:$0xf0]  ;;  %7261 = vmatmul.bf16.vlgmr.msrb.gmra.mxu0 %v16107_v17 }
 0x60e   : > { %v13312_v18 = vld [vmem:[%s21517_s1 + $0xfd4] sm:$0xf]  ;;  %v10731_v5 = vor.u32 %v13224_v9, %v10728_v7  ;;  %7284 = vmatpush.bf16.msrb.mxu2 %v10475_v34  ;;  %v6843_v9 = vadd.f32 %v19063_v54, %v6829_v13  ;;  %v6817_v48 = vadd.f32 %v19086_v33, %v6803_v27  ;;  %v6999_v33 = vadd.f32 %v6998_v4, %v6985_v59 }
 0x60f   : > { %v11080_v57 = vld [vmem:[%s21517_s1 + $0xff0] sm:$0xf0] }
 0x610   : > { %v13088_v14 = vld [vmem:[%s21517_s1 + $0x8d4] sm:$0xf]  ;;  %v11083_v37 = vor.u32 %v13312_v18, %v11080_v57  ;;  %7298 = vmatpush.bf16.msrb.mxu3 %v10731_v5  ;;  %v7024_v57 = vpop.f32.mrf.mxu3  ;;  %v7759_v25 = vmax.f32 %v6843_v9, 0.0  ;;  %v6831_v15 = vadd.f32 %v19097_v23, %v6817_v48 }
 0x611   : > { %v10184_v3 = vld [vmem:[%s21517_s1 + $0x8f0] sm:$0xf0]  ;;  %v7025_v28 = vadd.f32 %v7024_v57, %v7011_v60 }
 0x612   : > { %v13152_v42 = vld [vmem:[%s21517_s1 + $0xad4] sm:$0xf]  ;;  %v10187_v21 = vor.u32 %v13088_v14, %v10184_v3  ;;  %7309 = vmatpush.bf16.msra.mxu0 %v11083_v37 }
 0x613   : > { %v10440_v40 = vld [vmem:[%s21517_s1 + $0xaf0] sm:$0xf0]  ;;  %v7760_v5 = vmax.f32 %v7025_v28, 0.0 }
 0x614   : > { %v13216_v35 = vld [vmem:[%s21517_s1 + $0xcd4] sm:$0xf]  ;;  %v10443_v56 = vor.u32 %v13152_v42, %v10440_v40  ;;  %7271 = vmatpush.bf16.msrb.mxu1 %v10187_v21 }
 0x615   : > { %v10696_v51 = vld [vmem:[%s21517_s1 + $0xcf0] sm:$0xf0]  ;;  %v7774_v45 = vpack.c.bf16 %v7760_v5, %v7759_v25 }
 0x616   : > { %v13304_v52 = vld [vmem:[%s21517_s1 + $0xf94] sm:$0xf]  ;;  %v10699_v53 = vor.u32 %v13216_v35, %v10696_v51  ;;  %7285 = vmatpush.bf16.msrb.mxu2 %v10443_v56  ;;  %v7012_v51 = vpop.f32.mrf.mxu2 }
 0x617   : > { %v11048_v63 = vld [vmem:[%s21517_s1 + $0xfb0] sm:$0xf0]  ;;  %v7013_v56 = vadd.f32 %v7012_v51, %v6999_v33  ;;  %7782 = vst [vmem:[#allocation2 + $0x8] sm:$0xff] %v7774_v45 }
 0x618   : > { %v13080_v20 = vld [vmem:[%s21517_s1 + $0x894] sm:$0xf]  ;;  %v11051_v41 = vor.u32 %v13304_v52, %v11048_v63  ;;  %7299 = vmatpush.bf16.msrb.mxu3 %v10699_v53  ;;  %v7026_v60 = vpop.f32.mrf.mxu3 }
 0x619   : > { %v10152_v61 = vld [vmem:[%s21517_s1 + $0x8b0] sm:$0xf0] }
 0x61a   : > { %v13144_v32 = vld [vmem:[%s21517_s1 + $0xa94] sm:$0xf]  ;;  %v10155_v46 = vor.u32 %v13080_v20, %v10152_v61  ;;  %7310 = vmatpush.bf16.msra.mxu0 %v11051_v41  ;;  %v6845_v41 = vadd.f32 %v19143_v30, %v6831_v15 }
 0x61b   : > { %v10408_v19 = vld [vmem:[%s21517_s1 + $0xab0] sm:$0xf0] }
 0x61c   : > { %v13208_v8 = vld [vmem:[%s21517_s1 + $0xc94] sm:$0xf]  ;;  %v10411_v26 = vor.u32 %v13144_v32, %v10408_v19  ;;  %7272 = vmatpush.bf16.msrb.mxu1 %v10155_v46  ;;  %v7767_v57 = vmax.f32 %v6845_v41, 0.0 }
 0x61d   : > { %v10664_v29 = vld [vmem:[%s21517_s1 + $0xcb0] sm:$0xf0] }
 0x61e   : > { %v13296_v22 = vld [vmem:[%s21517_s1 + $0xf54] sm:$0xf]  ;;  %v10667_v16 = vor.u32 %v13208_v8, %v10664_v29  ;;  %7286 = vmatpush.bf16.msrb.mxu2 %v10411_v26 }
 0x61f   : > { %v11016_v11 = vld [vmem:[%s21517_s1 + $0xf70] sm:$0xf0] }
 0x620   : > { %v13072_v7 = vld [vmem:[%s21517_s1 + $0x854] sm:$0xf]  ;;  %v11019_v24 = vor.u32 %v13296_v22, %v11016_v11  ;;  %7300 = vmatpush.bf16.msrb.mxu3 %v10667_v16  ;;  %v7027_v22 = vadd.f32 %v7026_v60, %v7013_v56 }
 0x621   : > { %v10120_v18 = vld [vmem:[%s21517_s1 + $0x870] sm:$0xf0] }
 0x622   : > { %v13136_v54 = vld [vmem:[%s21517_s1 + $0xa54] sm:$0xf]  ;;  %v10123_v37 = vor.u32 %v13072_v7, %v10120_v18  ;;  %7311 = vmatpush.bf16.msra.mxu0 %v11019_v24  ;;  %v7768_v16 = vmax.f32 %v7027_v22, 0.0 }
 0x623   : > { %v10376_v55 = vld [vmem:[%s21517_s1 + $0xa70] sm:$0xf0] }
 0x624   : > { %v13200_v6 = vld [vmem:[%s21517_s1 + $0xc54] sm:$0xf]  ;;  %v10379_v42 = vor.u32 %v13136_v54, %v10376_v55  ;;  %7273 = vmatpush.bf16.msrb.mxu1 %v10123_v37  ;;  %v7778_v55 = vpack.c.bf16 %v7768_v16, %v7767_v57 }
 0x625   : > { %v10632_v34 = vld [vmem:[%s21517_s1 + $0xc70] sm:$0xf0] }
 0x626   : > { %v13288_v14 = vld [vmem:[%s21517_s1 + $0xf14] sm:$0xf]  ;;  %v10635_v49 = vor.u32 %v13200_v6, %v10632_v34  ;;  %7287 = vmatpush.bf16.msrb.mxu2 %v10379_v42  ;;  %7786 = vst [vmem:[#allocation2 + $0x28] sm:$0xff] %v7778_v55  ;;  %v7066_v55 = vpop.f32.mrf.mxu2 }
 0x627   : > { %v10984_v3 = vld [vmem:[%s21517_s1 + $0xf30] sm:$0xf0] }
 0x628   : > { %v13064_v12 = vld [vmem:[%s21517_s1 + $0x814] sm:$0xf]  ;;  %v10987_v52 = vor.u32 %v13288_v14, %v10984_v3  ;;  %7301 = vmatpush.bf16.msrb.mxu3 %v10635_v49 }
 0x629   : > { %v10088_v40 = vld [vmem:[%s21517_s1 + $0x830] sm:$0xf0] }
 0x62a   : > { %v13128_v35 = vld [vmem:[%s21517_s1 + $0xa14] sm:$0xf]  ;;  %v10091_v32 = vor.u32 %v13064_v12, %v10088_v40  ;;  %7312 = vmatpush.bf16.msra.mxu0 %v10987_v52 }
 0x62b   : > { %v10344_v63 = vld [vmem:[%s21517_s1 + $0xa30] sm:$0xf0] }
 0x62c   : > { %v13192_v62 = vld [vmem:[%s21517_s1 + $0xc14] sm:$0xf]  ;;  %v10347_v19 = vor.u32 %v13128_v35, %v10344_v63  ;;  %7274 = vmatpush.bf16.msrb.mxu1 %v10091_v32  ;;  %v2285_v35 = vperm.slane %v19188_v50, 4  ;;  %v9486_v50 = vld [vmem:[%s21517_s1 + $0x358] sm:$0xf] }
 0x62d   : > { %v10600_v21 = vld [vmem:[%s21517_s1 + $0xc30] sm:$0xf0] }
 0x62e   : > { %v13280_v20 = vld [vmem:[%s21517_s1 + $0xed4] sm:$0xf]  ;;  %v10603_v0 = vor.u32 %v13192_v62, %v10600_v21  ;;  %7288 = vmatpush.bf16.msrb.mxu2 %v10347_v19 }
 0x62f   : > { %v10952_v61 = vld [vmem:[%s21517_s1 + $0xef0] sm:$0xf0]  ;;  %7275 = vmatmul.bf16.vlgmr.msrb.gmra.mxu1 %v16279_v39 }
 0x630   : > { %v13376_v13 = vld [vmem:[%s21517_s1 + $0x11d4] sm:$0xf]  ;;  %v10955_v29 = vor.u32 %v13280_v20, %v10952_v61  ;;  %7302 = vmatpush.bf16.msrb.mxu3 %v10603_v0 }
 0x631   : > { %v11336_v53 = vld [vmem:[%s21517_s1 + $0x11f0] sm:$0xf0]  ;;  %7289 = vmatmul.bf16.vlgmr.msrb.gmra.mxu2 %v16292_v44 }
 0x632   : > { %v13440_v23 = vld [vmem:[%s21517_s1 + $0x13d4] sm:$0xf]  ;;  %v11339_v30 = vor.u32 %v13376_v13, %v11336_v53  ;;  %7313 = vmatpush.bf16.msra.mxu0 %v10955_v29  ;;  %v7038_v53 = vpop.f32.mrf.mxu0 }
 0x633   : > { %v11592_v2 = vld [vmem:[%s21517_s1 + $0x13f0] sm:$0xf0]  ;;  %7303 = vmatmul.bf16.vlgmr.msrb.gmra.mxu3 %v16290_v43 }
 0x634   : > { %v13504_v8 = vld [vmem:[%s21517_s1 + $0x15d4] sm:$0xf]  ;;  %v11595_v11 = vor.u32 %v13440_v23, %v11592_v2  ;;  %7323 = vmatpush.bf16.msra.mxu1 %v11339_v30  ;;  %v7039_v2 = vadd.f32 %v7038_v53, %v2285_v35 }
 0x635   : > { %v11848_v38 = vld [vmem:[%s21517_s1 + $0x15f0] sm:$0xf0] }
 0x636   : > { %v13272_v27 = vld [vmem:[%s21517_s1 + $0xe94] sm:$0xf]  ;;  %v11851_v46 = vor.u32 %v13504_v8, %v11848_v38  ;;  %7337 = vmatpush.bf16.msra.mxu2 %v11595_v11  ;;  %v7052_v38 = vpop.f32.mrf.mxu1 }
 0x637   : > { %v10920_v9 = vld [vmem:[%s21517_s1 + $0xeb0] sm:$0xf0]  ;;  %v7053_v11 = vadd.f32 %v7052_v38, %v7039_v2  ;;  %v9294_v38 = vld [vmem:[%s21517_s1 + $0x1d8] sm:$0xf] }
 0x638   : > { %v13368_v59 = vld [vmem:[%s21517_s1 + $0x1194] sm:$0xf]  ;;  %v10923_v54 = vor.u32 %v13272_v27, %v10920_v9  ;;  %7351 = vmatpush.bf16.msra.mxu3 %v11851_v46 }
 0x639   : > { %v11304_v26 = vld [vmem:[%s21517_s1 + $0x11b0] sm:$0xf0] }
 0x63a   : > { %v13432_v7 = vld [vmem:[%s21517_s1 + $0x1394] sm:$0xf]  ;;  %v11307_v6 = vor.u32 %v13368_v59, %v11304_v26  ;;  %7314 = vmatpush.bf16.msra.mxu0 %v10923_v54 }
 0x63b   : > { %v11560_v18 = vld [vmem:[%s21517_s1 + $0x13b0] sm:$0xf0] }
 0x63c   : > { %v13496_v4 = vld [vmem:[%s21517_s1 + $0x1594] sm:$0xf]  ;;  %v11563_v48 = vor.u32 %v13432_v7, %v11560_v18  ;;  %7324 = vmatpush.bf16.msra.mxu1 %v11307_v6 }
 0x63d   : > { %v11816_v24 = vld [vmem:[%s21517_s1 + $0x15b0] sm:$0xf0] }
 0x63e   : > { %v13264_v28 = vld [vmem:[%s21517_s1 + $0xe54] sm:$0xf]  ;;  %v11819_v3 = vor.u32 %v13496_v4, %v11816_v24  ;;  %7338 = vmatpush.bf16.msra.mxu2 %v11563_v48 }
 0x63f   : > { %v10888_v34 = vld [vmem:[%s21517_s1 + $0xe70] sm:$0xf0] }
 0x640   : > { %v13360_v14 = vld [vmem:[%s21517_s1 + $0x1154] sm:$0xf]  ;;  %v10891_v42 = vor.u32 %v13264_v28, %v10888_v34  ;;  %7352 = vmatpush.bf16.msra.mxu3 %v11819_v3  ;;  %v7067_v34 = vadd.f32 %v7066_v55, %v7053_v11  ;;  %v9518_v55 = vld [vmem:[%s21517_s1 + $0x398] sm:$0xf] }
 0x641   : > { %v11272_v25 = vld [vmem:[%s21517_s1 + $0x1170] sm:$0xf0] }
 0x642   : > { %v13424_v12 = vld [vmem:[%s21517_s1 + $0x1354] sm:$0xf]  ;;  %v11275_v49 = vor.u32 %v13360_v14, %v11272_v25  ;;  %7315 = vmatpush.bf16.msra.mxu0 %v10891_v42  ;;  %v7080_v14 = vpop.f32.mrf.mxu3 }
 0x643   : > { %v11528_v5 = vld [vmem:[%s21517_s1 + $0x1370] sm:$0xf0] }
 0x644   : > { %v13488_v33 = vld [vmem:[%s21517_s1 + $0x1554] sm:$0xf]  ;;  %v11531_v51 = vor.u32 %v13424_v12, %v11528_v5  ;;  %7325 = vmatpush.bf16.msra.mxu1 %v11275_v49 }
 0x645   : > { %v11784_v37 = vld [vmem:[%s21517_s1 + $0x1570] sm:$0xf0] }
 0x646   : > { %v13256_v40 = vld [vmem:[%s21517_s1 + $0xe14] sm:$0xf]  ;;  %v11787_v21 = vor.u32 %v13488_v33, %v11784_v37  ;;  %7339 = vmatpush.bf16.msra.mxu2 %v11531_v51  ;;  %v19730_v33 = vadd.f32 %v7080_v14, %v7067_v34 }
 0x647   : > { %v10856_v52 = vld [vmem:[%s21517_s1 + $0xe30] sm:$0xf0] }
 0x648   : > { %v13352_v63 = vld [vmem:[%s21517_s1 + $0x1114] sm:$0xf]  ;;  %v10859_v23 = vor.u32 %v13256_v40, %v10856_v52  ;;  %7353 = vmatpush.bf16.msra.mxu3 %v11787_v21 }
 0x649   : > { %v11240_v62 = vld [vmem:[%s21517_s1 + $0x1130] sm:$0xf0] }
 0x64a   : > { %v13416_v15 = vld [vmem:[%s21517_s1 + $0x1314] sm:$0xf]  ;;  %v11243_v41 = vor.u32 %v13352_v63, %v11240_v62  ;;  %7316 = vmatpush.bf16.msra.mxu0 %v10859_v23 }
 0x64b   : > { %v11496_v45 = vld [vmem:[%s21517_s1 + $0x1330] sm:$0xf0] }
 0x64c   : > { %v13480_v56 = vld [vmem:[%s21517_s1 + $0x1514] sm:$0xf]  ;;  %v11499_v32 = vor.u32 %v13416_v15, %v11496_v45  ;;  %7326 = vmatpush.bf16.msra.mxu1 %v11243_v41 }
 0x64d   : > { %v11752_v20 = vld [vmem:[%s21517_s1 + $0x1530] sm:$0xf0]  ;;  %7317 = vmatmul.bf16.vlgmr.msra.gmra.mxu0 %v16300_v47 }
 0x64e   : > { %v13568_v61 = vld [vmem:[%s21517_s1 + $0x17d4] sm:$0xf]  ;;  %v11755_v60 = vor.u32 %v13480_v56, %v11752_v20  ;;  %7340 = vmatpush.bf16.msra.mxu2 %v11499_v32 }
 0x64f   : > { %v12104_v13 = vld [vmem:[%s21517_s1 + $0x17f0] sm:$0xf0] }
 0x650   : > { %v13344_v19 = vld [vmem:[%s21517_s1 + $0x10d4] sm:$0xf]  ;;  %v12107_v0 = vor.u32 %v13568_v61, %v12104_v13  ;;  %7354 = vmatpush.bf16.msra.mxu3 %v11755_v60  ;;  %v12869_v60 = vld [vmem:[%s21517_s1 + $0x1f4] sm:$0xf0] }
 0x651   : > { %v11208_v8 = vld [vmem:[%s21517_s1 + $0x10f0] sm:$0xf0] }
 0x652   : > { %v13408_v29 = vld [vmem:[%s21517_s1 + $0x12d4] sm:$0xf]  ;;  %v11211_v46 = vor.u32 %v13344_v19, %v11208_v8  ;;  %7365 = vmatpush.bf16.msrb.mxu0 %v12107_v0 }
 0x653   : > { %v11464_v22 = vld [vmem:[%s21517_s1 + $0x12f0] sm:$0xf0] }
 0x654   : > { %v13472_v30 = vld [vmem:[%s21517_s1 + $0x14d4] sm:$0xf]  ;;  %v11467_v26 = vor.u32 %v13408_v29, %v11464_v22  ;;  %7327 = vmatpush.bf16.msra.mxu1 %v11211_v46  ;;  %v9550_v22 = vld [vmem:[%s21517_s1 + $0x3d8] sm:$0xf]  ;;  %v7040_v46 = vpop.f32.mrf.mxu0 }
 0x655   : > { %v11720_v27 = vld [vmem:[%s21517_s1 + $0x14f0] sm:$0xf0] }
 0x656   : > { %v13560_v9 = vld [vmem:[%s21517_s1 + $0x1794] sm:$0xf]  ;;  %v11723_v57 = vor.u32 %v13472_v30, %v11720_v27  ;;  %7341 = vmatpush.bf16.msra.mxu2 %v11467_v26  ;;  %v12933_v30 = vld [vmem:[%s21517_s1 + $0x3f4] sm:$0xf0] }
 0x657   : > { %v12072_v59 = vld [vmem:[%s21517_s1 + $0x17b0] sm:$0xf0] }
 0x658   : > { %v13336_v7 = vld [vmem:[%s21517_s1 + $0x1094] sm:$0xf]  ;;  %v12075_v16 = vor.u32 %v13560_v9, %v12072_v59  ;;  %7355 = vmatpush.bf16.msra.mxu3 %v11723_v57  ;;  %v9295_v59 = vor.u32 %v12869_v60, %v9294_v38  ;;  %v9551_v57 = vor.u32 %v12933_v30, %v9550_v22  ;;  %v10062_v60 = vld [vmem:[%s21517_s1 + $0x7d8] sm:$0xf] }
 0x659   : > { %v11176_v18 = vld [vmem:[%s21517_s1 + $0x10b0] sm:$0xf0] }
 0x65a   : > { %v13400_v4 = vld [vmem:[%s21517_s1 + $0x1294] sm:$0xf]  ;;  %v11179_v3 = vor.u32 %v13336_v7, %v11176_v18  ;;  %7366 = vmatpush.bf16.msrb.mxu0 %v12075_v16 }
 0x65b   : > { %v11432_v24 = vld [vmem:[%s21517_s1 + $0x12b0] sm:$0xf0] }
 0x65c   : > { %v13464_v54 = vld [vmem:[%s21517_s1 + $0x1494] sm:$0xf]  ;;  %v11435_v25 = vor.u32 %v13400_v4, %v11432_v24  ;;  %7328 = vmatpush.bf16.msra.mxu1 %v11179_v3  ;;  %v9262_v4 = vld [vmem:[%s21517_s1 + $0x198] sm:$0xf] }
 0x65d   : > { %v11688_v6 = vld [vmem:[%s21517_s1 + $0x14b0] sm:$0xf0]  ;;  %v12861_v24 = vld [vmem:[%s21517_s1 + $0x1b4] sm:$0xf0] }
 0x65e   : > { %v13552_v48 = vld [vmem:[%s21517_s1 + $0x1754] sm:$0xf]  ;;  %v11691_v37 = vor.u32 %v13464_v54, %v11688_v6  ;;  %7342 = vmatpush.bf16.msra.mxu2 %v11435_v25  ;;  %v7054_v54 = vpop.f32.mrf.mxu1  ;;  %v12925_v6 = vld [vmem:[%s21517_s1 + $0x3b4] sm:$0xf0]  ;;  %v9263_v34 = vor.u32 %v12861_v24, %v9262_v4 }
 0x65f   : > { %v12040_v28 = vld [vmem:[%s21517_s1 + $0x1770] sm:$0xf0]  ;;  %v10030_v4 = vld [vmem:[%s21517_s1 + $0x798] sm:$0xf] }
 0x660   : > { %v13328_v12 = vld [vmem:[%s21517_s1 + $0x1054] sm:$0xf]  ;;  %v12043_v42 = vor.u32 %v13552_v48, %v12040_v28  ;;  %7356 = vmatpush.bf16.msra.mxu3 %v11691_v37  ;;  %v13053_v24 = vld [vmem:[%s21517_s1 + $0x7b4] sm:$0xf0] }
 0x661   : > { %v11144_v5 = vld [vmem:[%s21517_s1 + $0x1070] sm:$0xf0] }
 0x662   : > { %v13392_v40 = vld [vmem:[%s21517_s1 + $0x1254] sm:$0xf]  ;;  %v11147_v21 = vor.u32 %v13328_v12, %v11144_v5  ;;  %7367 = vmatpush.bf16.msrb.mxu0 %v12043_v42  ;;  %v7041_v12 = vadd.f32 %v7040_v46, %v2285_v35  ;;  %v9519_v5 = vor.u32 %v12925_v6, %v9518_v55  ;;  %v9230_v42 = vld [vmem:[%s21517_s1 + $0x158] sm:$0xf] }
 0x663   : > { %v11400_v49 = vld [vmem:[%s21517_s1 + $0x1270] sm:$0xf0]  ;;  %v12917_v35 = vld [vmem:[%s21517_s1 + $0x374] sm:$0xf0] }
 0x664   : > { %v13456_v51 = vld [vmem:[%s21517_s1 + $0x1454] sm:$0xf]  ;;  %v11403_v15 = vor.u32 %v13392_v40, %v11400_v49  ;;  %7329 = vmatpush.bf16.msra.mxu1 %v11147_v21  ;;  %v12853_v40 = vld [vmem:[%s21517_s1 + $0x174] sm:$0xf0]  ;;  %v21551_v49 = vld [vmem:[#allocation8_spill] sm:$0xff] }
 0x665   : > { %v11656_v52 = vld [vmem:[%s21517_s1 + $0x1470] sm:$0xf0]  ;;  %v12837_v46 = vld [vmem:[%s21517_s1 + $0xf4] sm:$0xf0] }
 0x666   : > { %v13544_v63 = vld [vmem:[%s21517_s1 + $0x1714] sm:$0xf]  ;;  %v11659_v61 = vor.u32 %v13456_v51, %v11656_v52  ;;  %7343 = vmatpush.bf16.msra.mxu2 %v11403_v15  ;;  %v7108_v38 = vpop.f32.mrf.mxu1 }
 0x667   : > { %v12008_v62 = vld [vmem:[%s21517_s1 + $0x1730] sm:$0xf0] }
 0x668   : > { %v13320_v45 = vld [vmem:[%s21517_s1 + $0x1014] sm:$0xf]  ;;  %v12011_v13 = vor.u32 %v13544_v63, %v12008_v62  ;;  %7357 = vmatpush.bf16.msra.mxu3 %v11659_v61  ;;  %v9231_v62 = vor.u32 %v12853_v40, %v9230_v42  ;;  %v9198_v61 = vld [vmem:[%s21517_s1 + $0x118] sm:$0xf] }
 0x669   : > { %v11112_v56 = vld [vmem:[%s21517_s1 + $0x1030] sm:$0xf0]  ;;  %v9742_v42 = vld [vmem:[%s21517_s1 + $0x558] sm:$0xf] }
 0x66a   : > { %v13384_v20 = vld [vmem:[%s21517_s1 + $0x1214] sm:$0xf]  ;;  %v11115_v0 = vor.u32 %v13320_v45, %v11112_v56  ;;  %7368 = vmatpush.bf16.msrb.mxu0 %v12011_v13  ;;  %v7055_v56 = vadd.f32 %v7054_v54, %v7041_v12  ;;  %v12845_v13 = vld [vmem:[%s21517_s1 + $0x134] sm:$0xf0]  ;;  %v7082_v54 = vpop.f32.mrf.mxu3  ;;  %v10031_v12 = vor.u32 %v13053_v24, %v10030_v4 }
 0x66b   : > { %v11368_v53 = vld [vmem:[%s21517_s1 + $0x1230] sm:$0xf0]  ;;  %v9199_v30 = vor.u32 %v12845_v13, %v9198_v61  ;;  %v12981_v40 = vld [vmem:[%s21517_s1 + $0x574] sm:$0xf0] }
 0x66c   : > { %v13448_v23 = vld [vmem:[%s21517_s1 + $0x1414] sm:$0xf]  ;;  %v11371_v29 = vor.u32 %v13384_v20, %v11368_v53  ;;  %7330 = vmatpush.bf16.msra.mxu1 %v11115_v0  ;;  %v9487_v20 = vor.u32 %v12917_v35, %v9486_v50  ;;  %v9454_v53 = vld [vmem:[%s21517_s1 + $0x318] sm:$0xf] }
 0x66d   : > { %v11624_v2 = vld [vmem:[%s21517_s1 + $0x1430] sm:$0xf0]  ;;  %v13061_v0 = vld [vmem:[%s21517_s1 + $0x7f4] sm:$0xf0] }
 0x66e   : > { %v13536_v41 = vld [vmem:[%s21517_s1 + $0x16d4] sm:$0xf]  ;;  %v11627_v11 = vor.u32 %v13448_v23, %v11624_v2  ;;  %7344 = vmatpush.bf16.msra.mxu2 %v11371_v29  ;;  %v7094_v23 = vpop.f32.mrf.mxu0  ;;  %v12909_v2 = vld [vmem:[%s21517_s1 + $0x334] sm:$0xf0]  ;;  %v7068_v29 = vpop.f32.mrf.mxu2 }
 0x66f   : > { %v11976_v32 = vld [vmem:[%s21517_s1 + $0x16f0] sm:$0xf0]  ;;  %7331 = vmatmul.bf16.vlgmr.msra.gmra.mxu1 %v16507_v31  ;;  %v7110_v35 = vpop.f32.mrf.mxu1  ;;  %v12885_v13 = vld [vmem:[%s21517_s1 + $0x274] sm:$0xf0] }
 0x670   : > { %v13600_v19 = vld [vmem:[%s21517_s1 + $0x18d4] sm:$0xf]  ;;  %v11979_v27 = vor.u32 %v13536_v41, %v11976_v32  ;;  %7358 = vmatpush.bf16.msra.mxu3 %v11627_v11  ;;  %v9806_v41 = vld [vmem:[%s21517_s1 + $0x5d8] sm:$0xf]  ;;  %v7069_v11 = vadd.f32 %v7068_v29, %v7055_v56 }
 0x671   : > { %v12232_v8 = vld [vmem:[%s21517_s1 + $0x18f0] sm:$0xf0]  ;;  %7345 = vmatmul.bf16.vlgmr.msra.gmra.mxu2 %v16520_v36  ;;  %v12997_v32 = vld [vmem:[%s21517_s1 + $0x5f4] sm:$0xf0] }
 0x672   : > { %v12235_v9 = vor.u32 %v13600_v19, %v12232_v8  ;;  %v13528_v26 = vld [vmem:[%s21517_s1 + $0x1694] sm:$0xf]  ;;  %7369 = vmatpush.bf16.msrb.mxu0 %v11979_v27  ;;  %7393 = vmatpush.bf16.msrb.mxu2 %v9295_v59  ;;  %v7095_v19 = vadd.f32 %v7094_v23, %v19730_v33  ;;  %v9455_v27 = vor.u32 %v12909_v2, %v9454_v53  ;;  %v9166_v59 = vld [vmem:[%s21517_s1 + $0xd8] sm:$0xf] }
 0x673   : > { %v11944_v7 = vld [vmem:[%s21517_s1 + $0x16b0] sm:$0xf0]  ;;  %7359 = vmatmul.bf16.vlgmr.msra.gmra.mxu3 %v21551_v49  ;;  %v9807_v33 = vor.u32 %v12997_v32, %v9806_v41  ;;  %v9167_v55 = vor.u32 %v12837_v46, %v9166_v59  ;;  %v7083_v6 = vadd.f32 %v7082_v54, %v7069_v11  ;;  %v12821_v56 = vld [vmem:[%s21517_s1 + $0x74] sm:$0xf0] }
 0x674   : > { %v13592_v18 = vld [vmem:[%s21517_s1 + $0x1894] sm:$0xf]  ;;  %v11947_v48 = vor.u32 %v13528_v26, %v11944_v7  ;;  %7383 = vmatpush.bf16.msrb.mxu1 %v12235_v9  ;;  %7407 = vmatpush.bf16.msrb.mxu3 %v9551_v57  ;;  %v19882_v9 = vadd.f32 %v7108_v38, %v7095_v19  ;;  %v9422_v26 = vld [vmem:[%s21517_s1 + $0x2d8] sm:$0xf]  ;;  %v10063_v7 = vor.u32 %v13061_v0, %v10062_v60 }
 0x675   : > { %v12200_v16 = vld [vmem:[%s21517_s1 + $0x18b0] sm:$0xf0]  ;;  %v9774_v57 = vld [vmem:[%s21517_s1 + $0x598] sm:$0xf] }
 0x676   : > { %v12203_v28 = vor.u32 %v13592_v18, %v12200_v16  ;;  %v13520_v14 = vld [vmem:[%s21517_s1 + $0x1654] sm:$0xf]  ;;  %7370 = vmatpush.bf16.msrb.mxu0 %v11947_v48  ;;  %7394 = vmatpush.bf16.msrb.mxu2 %v9263_v34  ;;  %v12901_v18 = vld [vmem:[%s21517_s1 + $0x2f4] sm:$0xf0] }
 0x677   : > { %v11912_v3 = vld [vmem:[%s21517_s1 + $0x1670] sm:$0xf0]  ;;  %v12989_v16 = vld [vmem:[%s21517_s1 + $0x5b4] sm:$0xf0]  ;;  %v9423_v48 = vor.u32 %v12901_v18, %v9422_v26 }
 0x678   : > { %v13584_v25 = vld [vmem:[%s21517_s1 + $0x1854] sm:$0xf]  ;;  %v11915_v51 = vor.u32 %v13520_v14, %v11912_v3  ;;  %7384 = vmatpush.bf16.msrb.mxu1 %v12203_v28  ;;  %7408 = vmatpush.bf16.msrb.mxu3 %v9519_v5  ;;  %v9775_v28 = vor.u32 %v12989_v16, %v9774_v57  ;;  %v9134_v34 = vld [vmem:[%s21517_s1 + $0x98] sm:$0xf]  ;;  %v7096_v5 = vpop.f32.mrf.mxu0 }
 0x679   : > { %v12168_v37 = vld [vmem:[%s21517_s1 + $0x1870] sm:$0xf0]  ;;  %v12829_v14 = vld [vmem:[%s21517_s1 + $0xb4] sm:$0xf0]  ;;  %v7097_v50 = vadd.f32 %v7096_v5, %v7083_v6 }
 0x67a   : > { %v13512_v52 = vld [vmem:[%s21517_s1 + $0x1614] sm:$0xf]  ;;  %v12171_v63 = vor.u32 %v13584_v25, %v12168_v37  ;;  %7371 = vmatpush.bf16.msrb.mxu0 %v11915_v51  ;;  %7395 = vmatpush.bf16.msrb.mxu2 %v9231_v62  ;;  %v9390_v3 = vld [vmem:[%s21517_s1 + $0x298] sm:$0xf]  ;;  %v21552_v25 = vld [vmem:[#allocation9_spill] sm:$0xff] }
 0x67b   : > { %v11880_v21 = vld [vmem:[%s21517_s1 + $0x1630] sm:$0xf0]  ;;  %v12893_v37 = vld [vmem:[%s21517_s1 + $0x2b4] sm:$0xf0] }
 0x67c   : > { %v13576_v15 = vld [vmem:[%s21517_s1 + $0x1814] sm:$0xf]  ;;  %v11883_v8 = vor.u32 %v13512_v52, %v11880_v21  ;;  %7385 = vmatpush.bf16.msrb.mxu1 %v12171_v63  ;;  %7409 = vmatpush.bf16.msrb.mxu3 %v9487_v20  ;;  %v9998_v51 = vld [vmem:[%s21517_s1 + $0x758] sm:$0xf]  ;;  %v9135_v63 = vor.u32 %v12829_v14, %v9134_v34  ;;  %v9391_v62 = vor.u32 %v12893_v37, %v9390_v3 }
 0x67d   : > { %v12136_v45 = vld [vmem:[%s21517_s1 + $0x1830] sm:$0xf0]  ;;  %v13045_v52 = vld [vmem:[%s21517_s1 + $0x774] sm:$0xf0]  ;;  %v19933_v21 = vadd.f32 %v7110_v35, %v7097_v50 }
 0x67e   : > { %v12139_v22 = vor.u32 %v13576_v15, %v12136_v45  ;;  %7372 = vmatpush.bf16.msrb.mxu0 %v11883_v8  ;;  %7396 = vmatpush.bf16.msrb.mxu2 %v9199_v30  ;;  %v9743_v15 = vor.u32 %v12981_v40, %v9742_v42  ;;  %v9102_v45 = vld [vmem:[%s21517_s1 + $0x58] sm:$0xf]  ;;  %v9999_v61 = vor.u32 %v13045_v52, %v9998_v51  ;;  %v21553_v2 = vld [vmem:[#allocation10_spill] sm:$0xff] }
 0x67f   : > { %v9358_v20 = vld [vmem:[%s21517_s1 + $0x258] sm:$0xf]  ;;  %v9103_v19 = vor.u32 %v12821_v56, %v9102_v45 }
 0x680   : > { %7386 = vmatpush.bf16.msrb.mxu1 %v12139_v22  ;;  %7410 = vmatpush.bf16.msrb.mxu3 %v9455_v27  ;;  %v9710_v53 = vld [vmem:[%s21517_s1 + $0x518] sm:$0xf]  ;;  %v9359_v38 = vor.u32 %v12885_v13, %v9358_v20 }
 0x681   : > { %7373 = vmatmul.bf16.vlgmr.msrb.gmra.mxu0 %v21552_v25  ;;  %v12973_v23 = vld [vmem:[%s21517_s1 + $0x534] sm:$0xf0] }
 0x682   : > { %7421 = vmatpush.bf16.msra.mxu0 %v9807_v33  ;;  %7397 = vmatpush.bf16.msrb.mxu2 %v9167_v55  ;;  %v9966_v41 = vld [vmem:[%s21517_s1 + $0x718] sm:$0xf]  ;;  %v9711_v60 = vor.u32 %v12973_v23, %v9710_v53 }
 0x683   : > { %12249 = vmatmul.msk.bf16.vlgmr.msrb.gmra.mxu1 %vm6297_vm0, %v21553_v2  ;;  %v13037_v32 = vld [vmem:[%s21517_s1 + $0x734] sm:$0xf0] }
 0x684   : > { %7435 = vmatpush.bf16.msra.mxu1 %v10063_v7  ;;  %7411 = vmatpush.bf16.msrb.mxu3 %v9423_v48  ;;  %v9070_v8 = vld [vmem:[%s21517_s1 + $0x18] sm:$0xf]  ;;  %v9967_v30 = vor.u32 %v13037_v32, %v9966_v41 }
 0x685   : > { %v12813_v0 = vld [vmem:[%s21517_s1 + $0x34] sm:$0xf0] }
 0x686   : > { %7422 = vmatpush.bf16.msra.mxu0 %v9775_v28  ;;  %7398 = vmatpush.bf16.msrb.mxu2 %v9135_v63  ;;  %v9326_v29 = vld [vmem:[%s21517_s1 + $0x218] sm:$0xf]  ;;  %v9071_v7 = vor.u32 %v12813_v0, %v9070_v8 }
 0x687   : > { %v12877_v22 = vld [vmem:[%s21517_s1 + $0x234] sm:$0xf0] }
 0x688   : > { %7436 = vmatpush.bf16.msra.mxu1 %v10031_v12  ;;  %7412 = vmatpush.bf16.msrb.mxu3 %v9391_v62  ;;  %v9678_v11 = vld [vmem:[%s21517_s1 + $0x4d8] sm:$0xf]  ;;  %v9327_v16 = vor.u32 %v12877_v22, %v9326_v29 }
 0x689   : > { %v12965_v27 = vld [vmem:[%s21517_s1 + $0x4f4] sm:$0xf0] }
 0x68a   : > { %7423 = vmatpush.bf16.msra.mxu0 %v9743_v15  ;;  %v9934_v33 = vld [vmem:[%s21517_s1 + $0x6d8] sm:$0xf]  ;;  %7399 = vmatpush.bf16.msrb.mxu2 %v9103_v19  ;;  %v9679_v4 = vor.u32 %v12965_v27, %v9678_v11 }
 0x68b   : > { %v13029_v59 = vld [vmem:[%s21517_s1 + $0x6f4] sm:$0xf0] }
 0x68c   : > { %7437 = vmatpush.bf16.msra.mxu1 %v9999_v61  ;;  %v10318_v46 = vld [vmem:[%s21517_s1 + $0x9d8] sm:$0xf]  ;;  %7413 = vmatpush.bf16.msrb.mxu3 %v9359_v38  ;;  %v9935_v24 = vor.u32 %v13029_v59, %v9934_v33 }
 0x68d   : > { %v13125_v26 = vld [vmem:[%s21517_s1 + $0x9f4] sm:$0xf0] }
 0x68e   : > { %v10574_v18 = vld [vmem:[%s21517_s1 + $0xbd8] sm:$0xf]  ;;  %7424 = vmatpush.bf16.msra.mxu0 %v9711_v60  ;;  %v10319_v54 = vor.u32 %v13125_v26, %v10318_v46  ;;  %7400 = vmatpush.bf16.msrb.mxu2 %v9071_v7 }
 0x68f   : > { %v13189_v57 = vld [vmem:[%s21517_s1 + $0xbf4] sm:$0xf0] }
 0x690   : > { %7438 = vmatpush.bf16.msra.mxu1 %v9967_v30  ;;  %v9646_v55 = vld [vmem:[%s21517_s1 + $0x498] sm:$0xf]  ;;  %v10575_v28 = vor.u32 %v13189_v57, %v10574_v18  ;;  %7414 = vmatpush.bf16.msrb.mxu3 %v9327_v16 }
 0x691   : > { %v12957_v6 = vld [vmem:[%s21517_s1 + $0x4b4] sm:$0xf0]  ;;  %7401 = vmatmul.bf16.vlgmr.msrb.gmra.mxu2 %v16057_v58 }
 0x692   : > { %v9902_v48 = vld [vmem:[%s21517_s1 + $0x698] sm:$0xf]  ;;  %7425 = vmatpush.bf16.msra.mxu0 %v9679_v4  ;;  %v9647_v37 = vor.u32 %v12957_v6, %v9646_v55  ;;  %7449 = vmatpush.bf16.msra.mxu2 %v10319_v54 }
 0x693   : > { %v13021_v34 = vld [vmem:[%s21517_s1 + $0x6b4] sm:$0xf0]  ;;  %7415 = vmatmul.bf16.vlgmr.msrb.gmra.mxu3 %v16093_v10 }
 0x694   : > { %v10286_v14 = vld [vmem:[%s21517_s1 + $0x998] sm:$0xf]  ;;  %7439 = vmatpush.bf16.msra.mxu1 %v9935_v24  ;;  %v9903_v42 = vor.u32 %v13021_v34, %v9902_v48  ;;  %7463 = vmatpush.bf16.msra.mxu3 %v10575_v28 }
 0x695   : > { %v13117_v3 = vld [vmem:[%s21517_s1 + $0x9b4] sm:$0xf0] }
 0x696   : > { %v10542_v12 = vld [vmem:[%s21517_s1 + $0xb98] sm:$0xf]  ;;  %v10287_v40 = vor.u32 %v13117_v3, %v10286_v14  ;;  %7426 = vmatpush.bf16.msra.mxu0 %v9647_v37 }
 0x697   : > { %v13181_v5 = vld [vmem:[%s21517_s1 + $0xbb4] sm:$0xf0] }
 0x698   : > { %v9614_v50 = vld [vmem:[%s21517_s1 + $0x458] sm:$0xf]  ;;  %v10543_v52 = vor.u32 %v13181_v5, %v10542_v12  ;;  %7440 = vmatpush.bf16.msra.mxu1 %v9903_v42  ;;  %7450 = vmatpush.bf16.msra.mxu2 %v10287_v40 }
 0x699   : > { %v12949_v35 = vld [vmem:[%s21517_s1 + $0x474] sm:$0xf0] }
 0x69a   : > { %v9870_v51 = vld [vmem:[%s21517_s1 + $0x658] sm:$0xf]  ;;  %v9615_v20 = vor.u32 %v12949_v35, %v9614_v50  ;;  %7464 = vmatpush.bf16.msra.mxu3 %v10543_v52 }
 0x69b   : > { %v13013_v63 = vld [vmem:[%s21517_s1 + $0x674] sm:$0xf0] }
 0x69c   : > { %v10254_v62 = vld [vmem:[%s21517_s1 + $0x958] sm:$0xf]  ;;  %v9871_v13 = vor.u32 %v13013_v63, %v9870_v51  ;;  %7427 = vmatpush.bf16.msra.mxu0 %v9615_v20 }
 0x69d   : > { %v13109_v15 = vld [vmem:[%s21517_s1 + $0x974] sm:$0xf0] }
 0x69e   : > { %v10510_v45 = vld [vmem:[%s21517_s1 + $0xb58] sm:$0xf]  ;;  %v10255_v53 = vor.u32 %v13109_v15, %v10254_v62  ;;  %7441 = vmatpush.bf16.msra.mxu1 %v9871_v13 }
 0x69f   : > { %v13173_v56 = vld [vmem:[%s21517_s1 + $0xb74] sm:$0xf0] }
 0x6a0   : > { %v9582_v61 = vld [vmem:[%s21517_s1 + $0x418] sm:$0xf]  ;;  %v10511_v19 = vor.u32 %v13173_v56, %v10510_v45  ;;  %7451 = vmatpush.bf16.msra.mxu2 %v10255_v53 }
 0x6a1   : > { %v12941_v23 = vld [vmem:[%s21517_s1 + $0x434] sm:$0xf0] }
 0x6a2   : > { %v9838_v41 = vld [vmem:[%s21517_s1 + $0x618] sm:$0xf]  ;;  %v9583_v30 = vor.u32 %v12941_v23, %v9582_v61  ;;  %7465 = vmatpush.bf16.msra.mxu3 %v10511_v19 }
 0x6a3   : > { %v13005_v32 = vld [vmem:[%s21517_s1 + $0x634] sm:$0xf0] }
 0x6a4   : > { %v10222_v8 = vld [vmem:[%s21517_s1 + $0x918] sm:$0xf]  ;;  %v9839_v33 = vor.u32 %v13005_v32, %v9838_v41  ;;  %7428 = vmatpush.bf16.msra.mxu0 %v9583_v30 }
 0x6a5   : > { %v13101_v38 = vld [vmem:[%s21517_s1 + $0x934] sm:$0xf0] }
 0x6a6   : > { %v10478_v60 = vld [vmem:[%s21517_s1 + $0xb18] sm:$0xf]  ;;  %v10223_v59 = vor.u32 %v13101_v38, %v10222_v8  ;;  %7442 = vmatpush.bf16.msra.mxu1 %v9839_v33 }
 0x6a7   : > { %v13165_v0 = vld [vmem:[%s21517_s1 + $0xb34] sm:$0xf0]  ;;  %7429 = vmatmul.bf16.vlgmr.msra.gmra.mxu0 %v16071_v1 }
 0x6a8   : > { %v10830_v29 = vld [vmem:[%s21517_s1 + $0xdd8] sm:$0xf]  ;;  %v10479_v46 = vor.u32 %v13165_v0, %v10478_v60  ;;  %7452 = vmatpush.bf16.msra.mxu2 %v10223_v59 }
 0x6a9   : > { %v13253_v22 = vld [vmem:[%s21517_s1 + $0xdf4] sm:$0xf0]  ;;  %7443 = vmatmul.bf16.vlgmr.msra.gmra.mxu1 %v16107_v17 }
 0x6aa   : > { %v11086_v11 = vld [vmem:[%s21517_s1 + $0xfd8] sm:$0xf]  ;;  %v10831_v26 = vor.u32 %v13253_v22, %v10830_v29  ;;  %7466 = vmatpush.bf16.msra.mxu3 %v10479_v46 }
 0x6ab   : > { %v13317_v27 = vld [vmem:[%s21517_s1 + $0xff4] sm:$0xf0] }
 0x6ac   : > { %v10190_v7 = vld [vmem:[%s21517_s1 + $0x8d8] sm:$0xf]  ;;  %v11087_v16 = vor.u32 %v13317_v27, %v11086_v11  ;;  %7477 = vmatpush.bf16.msrb.mxu0 %v10831_v26 }
 0x6ad   : > { %v13093_v18 = vld [vmem:[%s21517_s1 + $0x8f4] sm:$0xf0] }
 0x6ae   : > { %v10446_v57 = vld [vmem:[%s21517_s1 + $0xad8] sm:$0xf]  ;;  %v10191_v48 = vor.u32 %v13093_v18, %v10190_v7  ;;  %7491 = vmatpush.bf16.msrb.mxu1 %v11087_v16 }
 0x6af   : > { %v13157_v4 = vld [vmem:[%s21517_s1 + $0xaf4] sm:$0xf0] }
 0x6b0   : > { %v10798_v24 = vld [vmem:[%s21517_s1 + $0xd98] sm:$0xf]  ;;  %v10447_v28 = vor.u32 %v13157_v4, %v10446_v57  ;;  %7453 = vmatpush.bf16.msra.mxu2 %v10191_v48 }
 0x6b1   : > { %v13245_v54 = vld [vmem:[%s21517_s1 + $0xdb4] sm:$0xf0] }
 0x6b2   : > { %v11054_v55 = vld [vmem:[%s21517_s1 + $0xf98] sm:$0xf]  ;;  %v10799_v34 = vor.u32 %v13245_v54, %v10798_v24  ;;  %7467 = vmatpush.bf16.msra.mxu3 %v10447_v28 }
 0x6b3   : > { %v13309_v6 = vld [vmem:[%s21517_s1 + $0xfb4] sm:$0xf0] }
 0x6b4   : > { %v10158_v14 = vld [vmem:[%s21517_s1 + $0x898] sm:$0xf]  ;;  %v11055_v5 = vor.u32 %v13309_v6, %v11054_v55  ;;  %7478 = vmatpush.bf16.msrb.mxu0 %v10799_v34 }
 0x6b5   : > { %v13085_v3 = vld [vmem:[%s21517_s1 + $0x8b4] sm:$0xf0] }
 0x6b6   : > { %v10414_v12 = vld [vmem:[%s21517_s1 + $0xa98] sm:$0xf]  ;;  %v10159_v51 = vor.u32 %v13085_v3, %v10158_v14  ;;  %7492 = vmatpush.bf16.msrb.mxu1 %v11055_v5 }
 0x6b7   : > { %v13149_v37 = vld [vmem:[%s21517_s1 + $0xab4] sm:$0xf0] }
 0x6b8   : > { %v10766_v42 = vld [vmem:[%s21517_s1 + $0xd58] sm:$0xf]  ;;  %v10415_v52 = vor.u32 %v13149_v37, %v10414_v12  ;;  %7454 = vmatpush.bf16.msra.mxu2 %v10159_v51  ;;  %v20217_v12 = vpop.f32.mrf.mxu2  ;;  %v20219_v37 = vpop.f32.mrf.mxu3 }
 0x6b9   : > { %v13237_v40 = vld [vmem:[%s21517_s1 + $0xd74] sm:$0xf0] }
 0x6ba   : > { %v11022_v50 = vld [vmem:[%s21517_s1 + $0xf58] sm:$0xf]  ;;  %v10767_v63 = vor.u32 %v13237_v40, %v10766_v42  ;;  %7468 = vmatpush.bf16.msra.mxu3 %v10415_v52 }
 0x6bb   : > { %v13301_v35 = vld [vmem:[%s21517_s1 + $0xf74] sm:$0xf0] }
 0x6bc   : > { %v10126_v62 = vld [vmem:[%s21517_s1 + $0x858] sm:$0xf]  ;;  %v11023_v56 = vor.u32 %v13301_v35, %v11022_v50  ;;  %7479 = vmatpush.bf16.msrb.mxu0 %v10767_v63 }
 0x6bd   : > { %v13077_v15 = vld [vmem:[%s21517_s1 + $0x874] sm:$0xf0] }
 0x6be   : > { %v10382_v45 = vld [vmem:[%s21517_s1 + $0xa58] sm:$0xf]  ;;  %v10127_v41 = vor.u32 %v13077_v15, %v10126_v62  ;;  %7493 = vmatpush.bf16.msrb.mxu1 %v11023_v56 }
 0x6bf   : > { %v13141_v20 = vld [vmem:[%s21517_s1 + $0xa74] sm:$0xf0] }
 0x6c0   : > { %v10734_v61 = vld [vmem:[%s21517_s1 + $0xd18] sm:$0xf]  ;;  %v10383_v19 = vor.u32 %v13141_v20, %v10382_v45  ;;  %7455 = vmatpush.bf16.msra.mxu2 %v10127_v41  ;;  %v20247_v20 = vpop.f32.mrf.mxu0 }
 0x6c1   : > { %v13229_v13 = vld [vmem:[%s21517_s1 + $0xd34] sm:$0xf0] }
 0x6c2   : > { %v10990_v53 = vld [vmem:[%s21517_s1 + $0xf18] sm:$0xf]  ;;  %v10735_v8 = vor.u32 %v13229_v13, %v10734_v61  ;;  %7469 = vmatpush.bf16.msra.mxu3 %v10383_v19 }
 0x6c3   : > { %v13293_v23 = vld [vmem:[%s21517_s1 + $0xf34] sm:$0xf0] }
 0x6c4   : > { %v10094_v32 = vld [vmem:[%s21517_s1 + $0x818] sm:$0xf]  ;;  %v10991_v29 = vor.u32 %v13293_v23, %v10990_v53  ;;  %7480 = vmatpush.bf16.msrb.mxu0 %v10735_v8 }
 0x6c5   : > { %v13069_v38 = vld [vmem:[%s21517_s1 + $0x834] sm:$0xf0] }
 0x6c6   : > { %v10350_v60 = vld [vmem:[%s21517_s1 + $0xa18] sm:$0xf]  ;;  %v10095_v46 = vor.u32 %v13069_v38, %v10094_v32  ;;  %7494 = vmatpush.bf16.msrb.mxu1 %v10991_v29 }
 0x6c7   : > { %v13133_v0 = vld [vmem:[%s21517_s1 + $0xa34] sm:$0xf0] }
 0x6c8   : > { %v10702_v22 = vld [vmem:[%s21517_s1 + $0xcd8] sm:$0xf]  ;;  %v10351_v18 = vor.u32 %v13133_v0, %v10350_v60  ;;  %7456 = vmatpush.bf16.msra.mxu2 %v10095_v46 }
 0x6c9   : > { %v13221_v30 = vld [vmem:[%s21517_s1 + $0xcf4] sm:$0xf0] }
 0x6ca   : > { %v10958_v11 = vld [vmem:[%s21517_s1 + $0xed8] sm:$0xf]  ;;  %v10703_v57 = vor.u32 %v13221_v30, %v10702_v22  ;;  %7470 = vmatpush.bf16.msra.mxu3 %v10351_v18 }
 0x6cb   : > { %v13285_v27 = vld [vmem:[%s21517_s1 + $0xef4] sm:$0xf0]  ;;  %7457 = vmatmul.bf16.vlgmr.msra.gmra.mxu2 %v16279_v39 }
 0x6cc   : > { %v11342_v33 = vld [vmem:[%s21517_s1 + $0x11d8] sm:$0xf]  ;;  %v10959_v16 = vor.u32 %v13285_v27, %v10958_v11  ;;  %7481 = vmatpush.bf16.msrb.mxu0 %v10703_v57 }
 0x6cd   : > { %v13381_v59 = vld [vmem:[%s21517_s1 + $0x11f4] sm:$0xf0]  ;;  %7471 = vmatmul.bf16.vlgmr.msra.gmra.mxu3 %v16292_v44 }
 0x6ce   : > { %v11598_v26 = vld [vmem:[%s21517_s1 + $0x13d8] sm:$0xf]  ;;  %v11343_v4 = vor.u32 %v13381_v59, %v11342_v33  ;;  %7495 = vmatpush.bf16.msrb.mxu1 %v10959_v16 }
 0x6cf   : > { %v13445_v7 = vld [vmem:[%s21517_s1 + $0x13f4] sm:$0xf0] }
 0x6d0   : > { %v10670_v24 = vld [vmem:[%s21517_s1 + $0xc98] sm:$0xf]  ;;  %v11599_v6 = vor.u32 %v13445_v7, %v11598_v26  ;;  %7505 = vmatpush.bf16.msrb.mxu2 %v11343_v4  ;;  %v20285_v26 = vpop.f32.mrf.mxu2 }
 0x6d1   : > { %v13213_v54 = vld [vmem:[%s21517_s1 + $0xcb4] sm:$0xf0] }
 0x6d2   : > { %v10926_v55 = vld [vmem:[%s21517_s1 + $0xe98] sm:$0xf]  ;;  %v10671_v5 = vor.u32 %v13213_v54, %v10670_v24  ;;  %7519 = vmatpush.bf16.msrb.mxu3 %v11599_v6  ;;  %v20296_v24 = vpop.f32.mrf.mxu3  ;;  %v20298_v54 = vpop.f32.mrf.mxu1 }
 0x6d3   : > { %v13277_v48 = vld [vmem:[%s21517_s1 + $0xeb4] sm:$0xf0] }
 0x6d4   : > { %v11310_v28 = vld [vmem:[%s21517_s1 + $0x1198] sm:$0xf]  ;;  %v10927_v42 = vor.u32 %v13277_v48, %v10926_v55  ;;  %7482 = vmatpush.bf16.msrb.mxu0 %v10671_v5  ;;  %v20315_v5 = vpop.f32.mrf.mxu0 }
 0x6d5   : > { %v13373_v34 = vld [vmem:[%s21517_s1 + $0x11b4] sm:$0xf0] }
 0x6d6   : > { %v11566_v14 = vld [vmem:[%s21517_s1 + $0x1398] sm:$0xf]  ;;  %v11311_v40 = vor.u32 %v13373_v34, %v11310_v28  ;;  %7496 = vmatpush.bf16.msrb.mxu1 %v10927_v42 }
 0x6d7   : > { %v13437_v3 = vld [vmem:[%s21517_s1 + $0x13b4] sm:$0xf0] }
 0x6d8   : > { %v10638_v50 = vld [vmem:[%s21517_s1 + $0xc58] sm:$0xf]  ;;  %v11567_v52 = vor.u32 %v13437_v3, %v11566_v14  ;;  %7506 = vmatpush.bf16.msrb.mxu2 %v11311_v40 }
 0x6d9   : > { %v13205_v35 = vld [vmem:[%s21517_s1 + $0xc74] sm:$0xf0] }
 0x6da   : > { %v10894_v51 = vld [vmem:[%s21517_s1 + $0xe58] sm:$0xf]  ;;  %v10639_v61 = vor.u32 %v13205_v35, %v10638_v50  ;;  %7520 = vmatpush.bf16.msrb.mxu3 %v11567_v52 }
 0x6db   : > { %v13269_v63 = vld [vmem:[%s21517_s1 + $0xe74] sm:$0xf0] }
 0x6dc   : > { %v11278_v62 = vld [vmem:[%s21517_s1 + $0x1158] sm:$0xf]  ;;  %v10895_v53 = vor.u32 %v13269_v63, %v10894_v51  ;;  %7483 = vmatpush.bf16.msrb.mxu0 %v10639_v61 }
 0x6dd   : > { %v13365_v15 = vld [vmem:[%s21517_s1 + $0x1174] sm:$0xf0] }
 0x6de   : > { %v11534_v45 = vld [vmem:[%s21517_s1 + $0x1358] sm:$0xf]  ;;  %v11279_v23 = vor.u32 %v13365_v15, %v11278_v62  ;;  %7497 = vmatpush.bf16.msrb.mxu1 %v10895_v53 }
 0x6df   : > { %v13429_v56 = vld [vmem:[%s21517_s1 + $0x1374] sm:$0xf0] }
 0x6e0   : > { %v10606_v13 = vld [vmem:[%s21517_s1 + $0xc18] sm:$0xf]  ;;  %v11535_v8 = vor.u32 %v13429_v56, %v11534_v45  ;;  %7507 = vmatpush.bf16.msrb.mxu2 %v11279_v23 }
 0x6e1   : > { %v13197_v41 = vld [vmem:[%s21517_s1 + $0xc34] sm:$0xf0] }
 0x6e2   : > { %v10862_v32 = vld [vmem:[%s21517_s1 + $0xe18] sm:$0xf]  ;;  %v10607_v11 = vor.u32 %v13197_v41, %v10606_v13  ;;  %7521 = vmatpush.bf16.msrb.mxu3 %v11535_v8  ;;  %v20343_v13 = vpop.f32.mrf.mxu2  ;;  %v20354_v8 = vpop.f32.mrf.mxu3 }
 0x6e3   : > { %v13261_v19 = vld [vmem:[%s21517_s1 + $0xe34] sm:$0xf0] }
 0x6e4   : > { %v11246_v38 = vld [vmem:[%s21517_s1 + $0x1118] sm:$0xf]  ;;  %v10863_v59 = vor.u32 %v13261_v19, %v10862_v32  ;;  %7484 = vmatpush.bf16.msrb.mxu0 %v10607_v11  ;;  %v20371_v11 = vpop.f32.mrf.mxu1 }
 0x6e5   : > { %v13357_v60 = vld [vmem:[%s21517_s1 + $0x1134] sm:$0xf0] }
 0x6e6   : > { %v11502_v0 = vld [vmem:[%s21517_s1 + $0x1318] sm:$0xf]  ;;  %v11247_v46 = vor.u32 %v13357_v60, %v11246_v38  ;;  %7498 = vmatpush.bf16.msrb.mxu1 %v10863_v59 }
 0x6e7   : > { %v13421_v29 = vld [vmem:[%s21517_s1 + $0x1334] sm:$0xf0]  ;;  %7485 = vmatmul.bf16.vlgmr.msrb.gmra.mxu0 %v16290_v43 }
 0x6e8   : > { %v11854_v22 = vld [vmem:[%s21517_s1 + $0x15d8] sm:$0xf]  ;;  %v11503_v7 = vor.u32 %v13421_v29, %v11502_v0  ;;  %7508 = vmatpush.bf16.msrb.mxu2 %v11247_v46 }
 0x6e9   : > { %v13509_v30 = vld [vmem:[%s21517_s1 + $0x15f4] sm:$0xf0]  ;;  %7499 = vmatmul.bf16.vlgmr.msrb.gmra.mxu1 %v16300_v47 }
 0x6ea   : > { %v12110_v27 = vld [vmem:[%s21517_s1 + $0x17d8] sm:$0xf]  ;;  %v11855_v18 = vor.u32 %v13509_v30, %v11854_v22  ;;  %7522 = vmatpush.bf16.msrb.mxu3 %v11503_v7 }
 0x6eb   : > { %v13573_v33 = vld [vmem:[%s21517_s1 + $0x17f4] sm:$0xf0] }
 0x6ec   : > { %v11214_v57 = vld [vmem:[%s21517_s1 + $0x10d8] sm:$0xf]  ;;  %v12111_v55 = vor.u32 %v13573_v33, %v12110_v27  ;;  %7533 = vmatpush.bf16.msra.mxu0 %v11855_v18 }
 0x6ed   : > { %v13349_v16 = vld [vmem:[%s21517_s1 + $0x10f4] sm:$0xf0] }
 0x6ee   : > { %v11470_v4 = vld [vmem:[%s21517_s1 + $0x12d8] sm:$0xf]  ;;  %v11215_v3 = vor.u32 %v13349_v16, %v11214_v57  ;;  %7547 = vmatpush.bf16.msra.mxu1 %v12111_v55 }
 0x6ef   : > { %v13413_v6 = vld [vmem:[%s21517_s1 + $0x12f4] sm:$0xf0] }
 0x6f0   : > { %v11822_v48 = vld [vmem:[%s21517_s1 + $0x1598] sm:$0xf]  ;;  %v11471_v42 = vor.u32 %v13413_v6, %v11470_v4  ;;  %7509 = vmatpush.bf16.msrb.mxu2 %v11215_v3 }
 0x6f1   : > { %v13501_v28 = vld [vmem:[%s21517_s1 + $0x15b4] sm:$0xf0] }
 0x6f2   : > { %v12078_v34 = vld [vmem:[%s21517_s1 + $0x1798] sm:$0xf]  ;;  %v11823_v40 = vor.u32 %v13501_v28, %v11822_v48  ;;  %7523 = vmatpush.bf16.msrb.mxu3 %v11471_v42  ;;  %v20394_v48 = vpop.f32.mrf.mxu0  ;;  %v12865_v42 = vld [vmem:[%s21517_s1 + $0x1dc] sm:$0xf] }
 0x6f3   : > { %v13565_v14 = vld [vmem:[%s21517_s1 + $0x17b4] sm:$0xf0] }
 0x6f4   : > { %v11182_v50 = vld [vmem:[%s21517_s1 + $0x1098] sm:$0xf]  ;;  %v12079_v52 = vor.u32 %v13565_v14, %v12078_v34  ;;  %7534 = vmatpush.bf16.msra.mxu0 %v11823_v40  ;;  %v9296_v40 = vld [vmem:[%s21517_s1 + $0x1f8] sm:$0xf0] }
 0x6f5   : > { %v13341_v35 = vld [vmem:[%s21517_s1 + $0x10b4] sm:$0xf0] }
 0x6f6   : > { %v11438_v51 = vld [vmem:[%s21517_s1 + $0x1298] sm:$0xf]  ;;  %v11183_v61 = vor.u32 %v13341_v35, %v11182_v50  ;;  %7548 = vmatpush.bf16.msra.mxu1 %v12079_v52 }
 0x6f7   : > { %v13405_v63 = vld [vmem:[%s21517_s1 + $0x12b4] sm:$0xf0] }
 0x6f8   : > { %v11790_v62 = vld [vmem:[%s21517_s1 + $0x1558] sm:$0xf]  ;;  %v11439_v53 = vor.u32 %v13405_v63, %v11438_v51  ;;  %7510 = vmatpush.bf16.msrb.mxu2 %v11183_v61 }
 0x6f9   : > { %v13493_v15 = vld [vmem:[%s21517_s1 + $0x1574] sm:$0xf0] }
 0x6fa   : > { %v12046_v45 = vld [vmem:[%s21517_s1 + $0x1758] sm:$0xf]  ;;  %v11791_v23 = vor.u32 %v13493_v15, %v11790_v62  ;;  %7524 = vmatpush.bf16.msrb.mxu3 %v11439_v53 }
 0x6fb   : > { %v13557_v56 = vld [vmem:[%s21517_s1 + $0x1774] sm:$0xf0] }
 0x6fc   : > { %v11150_v41 = vld [vmem:[%s21517_s1 + $0x1058] sm:$0xf]  ;;  %v12047_v38 = vor.u32 %v13557_v56, %v12046_v45  ;;  %7535 = vmatpush.bf16.msra.mxu0 %v11791_v23  ;;  %v20420_v45 = vpop.f32.mrf.mxu2  ;;  %v9299_v56 = vor.u32 %v12865_v42, %v9296_v40 }
 0x6fd   : > { %v13333_v32 = vld [vmem:[%s21517_s1 + $0x1074] sm:$0xf0] }
 0x6fe   : > { %v11406_v19 = vld [vmem:[%s21517_s1 + $0x1258] sm:$0xf]  ;;  %v11151_v27 = vor.u32 %v13333_v32, %v11150_v41  ;;  %7549 = vmatpush.bf16.msra.mxu1 %v12047_v38  ;;  %v20431_v41 = vpop.f32.mrf.mxu3  ;;  %v20433_v32 = vpop.f32.mrf.mxu1  ;;  %v9264_v38 = vld [vmem:[%s21517_s1 + $0x1b8] sm:$0xf0] }
 0x6ff   : > { %v13397_v60 = vld [vmem:[%s21517_s1 + $0x1274] sm:$0xf0] }
 0x700   : > { %v11758_v0 = vld [vmem:[%s21517_s1 + $0x1518] sm:$0xf]  ;;  %v11407_v59 = vor.u32 %v13397_v60, %v11406_v19  ;;  %7511 = vmatpush.bf16.msrb.mxu2 %v11151_v27  ;;  %v12857_v19 = vld [vmem:[%s21517_s1 + $0x19c] sm:$0xf] }
 0x701   : > { %v13485_v29 = vld [vmem:[%s21517_s1 + $0x1534] sm:$0xf0] }
 0x702   : > { %v12014_v22 = vld [vmem:[%s21517_s1 + $0x1718] sm:$0xf]  ;;  %v11759_v46 = vor.u32 %v13485_v29, %v11758_v0  ;;  %7525 = vmatpush.bf16.msrb.mxu3 %v11407_v59 }
 0x703   : > { %v13549_v30 = vld [vmem:[%s21517_s1 + $0x1734] sm:$0xf0] }
 0x704   : > { %v11118_v33 = vld [vmem:[%s21517_s1 + $0x1018] sm:$0xf]  ;;  %v12015_v16 = vor.u32 %v13549_v30, %v12014_v22  ;;  %7536 = vmatpush.bf16.msra.mxu0 %v11759_v46  ;;  %v7234_v40 = vpop.f32.mrf.mxu2 }
 0x705   : > { %v13325_v7 = vld [vmem:[%s21517_s1 + $0x1034] sm:$0xf0] }
 0x706   : > { %v11374_v18 = vld [vmem:[%s21517_s1 + $0x1218] sm:$0xf]  ;;  %v11119_v3 = vor.u32 %v13325_v7, %v11118_v33  ;;  %7550 = vmatpush.bf16.msra.mxu1 %v12015_v16  ;;  %v9267_v33 = vor.u32 %v12857_v19, %v9264_v38  ;;  %v20467_v16 = vpop.f32.mrf.mxu0  ;;  %v10064_v19 = vld [vmem:[%s21517_s1 + $0x7f8] sm:$0xf0]  ;;  %v20513_v38 = vpop.f32.mrf.mxu1 }
 0x707   : > { %v13389_v57 = vld [vmem:[%s21517_s1 + $0x1234] sm:$0xf0] }
 0x708   : > { %v11726_v4 = vld [vmem:[%s21517_s1 + $0x14d8] sm:$0xf]  ;;  %v11375_v50 = vor.u32 %v13389_v57, %v11374_v18  ;;  %7512 = vmatpush.bf16.msrb.mxu2 %v11119_v3  ;;  %v12849_v18 = vld [vmem:[%s21517_s1 + $0x15c] sm:$0xf] }
 0x709   : > { %v13477_v55 = vld [vmem:[%s21517_s1 + $0x14f4] sm:$0xf0]  ;;  %v9232_v57 = vld [vmem:[%s21517_s1 + $0x178] sm:$0xf0] }
 0x70a   : > { %v11982_v6 = vld [vmem:[%s21517_s1 + $0x16d8] sm:$0xf]  ;;  %v11727_v35 = vor.u32 %v13477_v55, %v11726_v4  ;;  %7526 = vmatpush.bf16.msrb.mxu3 %v11375_v50  ;;  %v9235_v50 = vor.u32 %v12849_v18, %v9232_v57  ;;  %v12921_v18 = vld [vmem:[%s21517_s1 + $0x39c] sm:$0xf] }
 0x70b   : > { %v13541_v28 = vld [vmem:[%s21517_s1 + $0x16f4] sm:$0xf0]  ;;  %7513 = vmatmul.bf16.vlgmr.msrb.gmra.mxu2 %v16507_v31  ;;  %v9520_v57 = vld [vmem:[%s21517_s1 + $0x3b8] sm:$0xf0] }
 0x70c   : > { %v12238_v34 = vld [vmem:[%s21517_s1 + $0x18d8] sm:$0xf]  ;;  %v11983_v51 = vor.u32 %v13541_v28, %v11982_v6  ;;  %7537 = vmatpush.bf16.msra.mxu0 %v11727_v35 }
 0x70d   : > { %v13605_v14 = vld [vmem:[%s21517_s1 + $0x18f4] sm:$0xf0]  ;;  %7527 = vmatmul.bf16.vlgmr.msrb.gmra.mxu3 %v16520_v36 }
 0x70e   : > { %v12239_v52 = vor.u32 %v13605_v14, %v12238_v34  ;;  %v11694_v63 = vld [vmem:[%s21517_s1 + $0x1498] sm:$0xf]  ;;  %7551 = vmatpush.bf16.msra.mxu1 %v11983_v51  ;;  %7575 = vmatpush.bf16.msra.mxu3 %v9299_v56  ;;  %v12841_v51 = vld [vmem:[%s21517_s1 + $0x11c] sm:$0xf] }
 0x70f   : > { %v13469_v62 = vld [vmem:[%s21517_s1 + $0x14b4] sm:$0xf0]  ;;  %v12993_v56 = vld [vmem:[%s21517_s1 + $0x5dc] sm:$0xf] }
 0x710   : > { %v11950_v15 = vld [vmem:[%s21517_s1 + $0x1698] sm:$0xf]  ;;  %v11695_v60 = vor.u32 %v13469_v62, %v11694_v63  ;;  %7565 = vmatpush.bf16.msra.mxu2 %v12239_v52  ;;  %v9200_v52 = vld [vmem:[%s21517_s1 + $0x138] sm:$0xf0]  ;;  %v20493_v63 = vpop.f32.mrf.mxu3 }
 0x711   : > { %v13533_v61 = vld [vmem:[%s21517_s1 + $0x16b4] sm:$0xf0]  ;;  %v12929_v62 = vld [vmem:[%s21517_s1 + $0x3dc] sm:$0xf] }
 0x712   : > { %v12206_v53 = vld [vmem:[%s21517_s1 + $0x1898] sm:$0xf]  ;;  %v11951_v0 = vor.u32 %v13533_v61, %v11950_v15  ;;  %7538 = vmatpush.bf16.msra.mxu0 %v11695_v60  ;;  %7576 = vmatpush.bf16.msra.mxu3 %v9267_v33  ;;  %v9552_v15 = vld [vmem:[%s21517_s1 + $0x3f8] sm:$0xf0] }
 0x713   : > { %v13597_v23 = vld [vmem:[%s21517_s1 + $0x18b4] sm:$0xf0]  ;;  %v12833_v33 = vld [vmem:[%s21517_s1 + $0xdc] sm:$0xf] }
 0x714   : > { %v12207_v29 = vor.u32 %v13597_v23, %v12206_v53  ;;  %v11662_v22 = vld [vmem:[%s21517_s1 + $0x1458] sm:$0xf]  ;;  %7552 = vmatpush.bf16.msra.mxu1 %v11951_v0  ;;  %v9808_v53 = vld [vmem:[%s21517_s1 + $0x5f8] sm:$0xf0] }
 0x715   : > { %v13461_v30 = vld [vmem:[%s21517_s1 + $0x1474] sm:$0xf0]  ;;  %v13057_v23 = vld [vmem:[%s21517_s1 + $0x7dc] sm:$0xf] }
 0x716   : > { %v11918_v27 = vld [vmem:[%s21517_s1 + $0x1658] sm:$0xf]  ;;  %v11663_v4 = vor.u32 %v13461_v30, %v11662_v22  ;;  %7566 = vmatpush.bf16.msra.mxu2 %v12207_v29  ;;  %v20518_v29 = vld [vmem:[%s21518_s2] sm:$0xff]  ;;  %7577 = vmatpush.bf16.msra.mxu3 %v9235_v50  ;;  %v9203_v30 = vor.u32 %v12841_v51, %v9200_v52  ;;  %v12825_v50 = vld [vmem:[%s21517_s1 + $0x9c] sm:$0xf] }
 0x717   : > { %v13525_v59 = vld [vmem:[%s21517_s1 + $0x1674] sm:$0xf0]  ;;  %v2286_v22 = vperm.slane %v20518_v29, 5 }
 0x718   : > { %v12174_v46 = vld [vmem:[%s21517_s1 + $0x1858] sm:$0xf]  ;;  %v11919_v28 = vor.u32 %v13525_v59, %v11918_v27  ;;  %7539 = vmatpush.bf16.msra.mxu0 %v11663_v4  ;;  %v9555_v27 = vor.u32 %v12929_v62, %v9552_v15  ;;  %v9168_v59 = vld [vmem:[%s21517_s1 + $0xf8] sm:$0xf0] }
 0x719   : > { %v13589_v7 = vld [vmem:[%s21517_s1 + $0x1874] sm:$0xf0]  ;;  %v12985_v4 = vld [vmem:[%s21517_s1 + $0x59c] sm:$0xf] }
 0x71a   : > { %v11630_v55 = vld [vmem:[%s21517_s1 + $0x1418] sm:$0xf]  ;;  %v12175_v34 = vor.u32 %v13589_v7, %v12174_v46  ;;  %7553 = vmatpush.bf16.msra.mxu1 %v11919_v28  ;;  %v9811_v46 = vor.u32 %v12993_v56, %v9808_v53  ;;  %v10067_v7 = vor.u32 %v13057_v23, %v10064_v19  ;;  %v13049_v28 = vld [vmem:[%s21517_s1 + $0x79c] sm:$0xf]  ;;  %7578 = vmatpush.bf16.msra.mxu3 %v9203_v30  ;;  %v20565_v56 = vpop.f32.mrf.mxu2  ;;  %v20578_v19 = vpop.f32.mrf.mxu3 }
 0x71b   : > { %v13453_v6 = vld [vmem:[%s21517_s1 + $0x1434] sm:$0xf0]  ;;  %v9488_v62 = vld [vmem:[%s21517_s1 + $0x378] sm:$0xf0] }
 0x71c   : > { %v11886_v14 = vld [vmem:[%s21517_s1 + $0x1618] sm:$0xf]  ;;  %v11631_v61 = vor.u32 %v13453_v6, %v11630_v55  ;;  %7567 = vmatpush.bf16.msra.mxu2 %v12175_v34  ;;  %v20536_v55 = vpop.f32.mrf.mxu0  ;;  %v9776_v6 = vld [vmem:[%s21517_s1 + $0x5b8] sm:$0xf0] }
 0x71d   : > { %v13517_v3 = vld [vmem:[%s21517_s1 + $0x1634] sm:$0xf0]  ;;  %v10032_v34 = vld [vmem:[%s21517_s1 + $0x7b8] sm:$0xf0]  ;;  %v9779_v51 = vor.u32 %v12985_v4, %v9776_v6 }
 0x71e   : > { %v12142_v42 = vld [vmem:[%s21517_s1 + $0x1818] sm:$0xf]  ;;  %v11887_v60 = vor.u32 %v13517_v3, %v11886_v14  ;;  %7540 = vmatpush.bf16.msra.mxu0 %v11631_v61  ;;  %v7221_v14 = vadd.f32 %v20433_v32, %v2286_v22  ;;  %v9171_v3 = vor.u32 %v12833_v33, %v9168_v59  ;;  %v10035_v52 = vor.u32 %v13049_v28, %v10032_v34  ;;  %v12913_v32 = vld [vmem:[%s21517_s1 + $0x35c] sm:$0xf]  ;;  %v7276_v59 = vpop.f32.mrf.mxu1 }
 0x71f   : > { %v13581_v35 = vld [vmem:[%s21517_s1 + $0x1834] sm:$0xf0]  ;;  %v12977_v15 = vld [vmem:[%s21517_s1 + $0x55c] sm:$0xf]  ;;  %v9491_v30 = vor.u32 %v12913_v32, %v9488_v62 }
 0x720   : > { %v12143_v0 = vor.u32 %v13581_v35, %v12142_v42  ;;  %7554 = vmatpush.bf16.msra.mxu1 %v11887_v60  ;;  %v9523_v42 = vor.u32 %v12921_v18, %v9520_v57  ;;  %v9136_v35 = vld [vmem:[%s21517_s1 + $0xb8] sm:$0xf0]  ;;  %v7235_v60 = vadd.f32 %v7234_v40, %v7221_v14  ;;  %7579 = vmatpush.bf16.msra.mxu3 %v9171_v3 }
 0x721   : > { %7541 = vmatmul.bf16.vlgmr.msra.gmra.mxu0 %v21551_v49  ;;  %v9744_v61 = vld [vmem:[%s21517_s1 + $0x578] sm:$0xf0] }
 0x722   : > { %7568 = vmatpush.bf16.msra.mxu2 %v12143_v0  ;;  %7589 = vmatpush.bf16.msrb.mxu0 %v9555_v27  ;;  %v13041_v53 = vld [vmem:[%s21517_s1 + $0x75c] sm:$0xf]  ;;  %v9139_v0 = vor.u32 %v12825_v50, %v9136_v35  ;;  %v7249_v34 = vadd.f32 %v20493_v63, %v7235_v60 }
 0x723   : > { %7555 = vmatmul.bf16.vlgmr.msra.gmra.mxu1 %v21552_v25  ;;  %v10000_v23 = vld [vmem:[%s21517_s1 + $0x778] sm:$0xf0] }
 0x724   : > { %7603 = vmatpush.bf16.msrb.mxu1 %v9811_v46  ;;  %v12817_v27 = vld [vmem:[%s21517_s1 + $0x5c] sm:$0xf]  ;;  %v9747_v46 = vor.u32 %v12977_v15, %v9744_v61  ;;  %v20607_v14 = vpop.f32.mrf.mxu0  ;;  %7580 = vmatpush.bf16.msra.mxu3 %v9139_v0 }
 0x725   : > { %v9104_v33 = vld [vmem:[%s21517_s1 + $0x78] sm:$0xf0]  ;;  %12250 = vmatmul.msk.bf16.vlgmr.msra.gmra.mxu2 %vm6297_vm0, %v21553_v2 }
 0x726   : > { %7617 = vmatpush.bf16.msrb.mxu2 %v10067_v7  ;;  %7590 = vmatpush.bf16.msrb.mxu0 %v9523_v42  ;;  %v10003_v7 = vor.u32 %v13041_v53, %v10000_v23  ;;  %v12905_v40 = vld [vmem:[%s21517_s1 + $0x31c] sm:$0xf]  ;;  %v9107_v3 = vor.u32 %v12817_v27, %v9104_v33  ;;  %v7223_v23 = vadd.f32 %v20513_v38, %v2286_v22  ;;  %v7290_v27 = vpop.f32.mrf.mxu2 }
 0x727   : > { %v9456_v18 = vld [vmem:[%s21517_s1 + $0x338] sm:$0xf0] }
 0x728   : > { %7604 = vmatpush.bf16.msrb.mxu1 %v9779_v51  ;;  %v12969_v57 = vld [vmem:[%s21517_s1 + $0x51c] sm:$0xf]  ;;  %v9459_v42 = vor.u32 %v12905_v40, %v9456_v18  ;;  %7581 = vmatpush.bf16.msra.mxu3 %v9107_v3 }
 0x729   : > { %v9712_v4 = vld [vmem:[%s21517_s1 + $0x538] sm:$0xf0] }
 0x72a   : > { %7618 = vmatpush.bf16.msrb.mxu2 %v10035_v52  ;;  %v13033_v6 = vld [vmem:[%s21517_s1 + $0x71c] sm:$0xf]  ;;  %7591 = vmatpush.bf16.msrb.mxu0 %v9491_v30  ;;  %v9715_v51 = vor.u32 %v12969_v57, %v9712_v4  ;;  %v7263_v30 = vadd.f32 %v20536_v55, %v7249_v34  ;;  %v20661_v34 = vpop.f32.mrf.mxu1 }
 0x72b   : > { %v9968_v28 = vld [vmem:[%s21517_s1 + $0x738] sm:$0xf0] }
 0x72c   : > { %v12809_v50 = vld [vmem:[%s21517_s1 + $0x1c] sm:$0xf]  ;;  %7605 = vmatpush.bf16.msrb.mxu1 %v9747_v46  ;;  %v9971_v52 = vor.u32 %v13033_v6, %v9968_v28 }
 0x72d   : > { %v9072_v35 = vld [vmem:[%s21517_s1 + $0x38] sm:$0xf0] }
 0x72e   : > { %7619 = vmatpush.bf16.msrb.mxu2 %v10003_v7  ;;  %v12897_v63 = vld [vmem:[%s21517_s1 + $0x2dc] sm:$0xf]  ;;  %7592 = vmatpush.bf16.msrb.mxu0 %v9459_v42  ;;  %v9075_v33 = vor.u32 %v12809_v50, %v9072_v35  ;;  %v7304_v7 = vpop.f32.mrf.mxu3  ;;  %v7237_v50 = vadd.f32 %v20565_v56, %v7223_v23  ;;  %v7277_v35 = vadd.f32 %v7276_v59, %v7263_v30  ;;  %v7318_v59 = vpop.f32.mrf.mxu0 }
 0x72f   : > { %v9424_v32 = vld [vmem:[%s21517_s1 + $0x2f8] sm:$0xf0] }
 0x730   : > { %v12961_v62 = vld [vmem:[%s21517_s1 + $0x4dc] sm:$0xf]  ;;  %v9427_v46 = vor.u32 %v12897_v63, %v9424_v32  ;;  %7606 = vmatpush.bf16.msrb.mxu1 %v9715_v51  ;;  %7582 = vmatpush.bf16.msra.mxu3 %v9075_v33  ;;  %v7251_v30 = vadd.f32 %v20578_v19, %v7237_v50  ;;  %v7291_v33 = vadd.f32 %v7290_v27, %v7277_v35 }
 0x731   : > { %v9680_v15 = vld [vmem:[%s21517_s1 + $0x4f8] sm:$0xf0] }
 0x732   : > { %v13025_v61 = vld [vmem:[%s21517_s1 + $0x6dc] sm:$0xf]  ;;  %7620 = vmatpush.bf16.msrb.mxu2 %v9971_v52  ;;  %v9683_v40 = vor.u32 %v12961_v62, %v9680_v15  ;;  %7593 = vmatpush.bf16.msrb.mxu0 %v9427_v46 }
 0x733   : > { %v9936_v53 = vld [vmem:[%s21517_s1 + $0x6f8] sm:$0xf0]  ;;  %7583 = vmatmul.bf16.vlgmr.msra.gmra.mxu3 %v16057_v58 }
 0x734   : > { %v13121_v60 = vld [vmem:[%s21517_s1 + $0x9dc] sm:$0xf]  ;;  %v9939_v38 = vor.u32 %v13025_v61, %v9936_v53  ;;  %7607 = vmatpush.bf16.msrb.mxu1 %v9683_v40 }
 0x735   : > { %v10320_v0 = vld [vmem:[%s21517_s1 + $0x9f8] sm:$0xf0] }
 0x736   : > { %v12889_v22 = vld [vmem:[%s21517_s1 + $0x29c] sm:$0xf]  ;;  %v10323_v57 = vor.u32 %v13121_v60, %v10320_v0  ;;  %7621 = vmatpush.bf16.msrb.mxu2 %v9939_v38 }
 0x737   : > { %v9392_v18 = vld [vmem:[%s21517_s1 + $0x2b8] sm:$0xf0] }
 0x738   : > { %v12953_v55 = vld [vmem:[%s21517_s1 + $0x49c] sm:$0xf]  ;;  %v9395_v51 = vor.u32 %v12889_v22, %v9392_v18  ;;  %7631 = vmatpush.bf16.msrb.mxu3 %v10323_v57  ;;  %v7123_v22 = vadd.f32 %v20217_v12, %v19882_v9  ;;  %v7292_v57 = vpop.f32.mrf.mxu2 }
 0x739   : > { %v9648_v4 = vld [vmem:[%s21517_s1 + $0x4b8] sm:$0xf0] }
 0x73a   : > { %v13017_v6 = vld [vmem:[%s21517_s1 + $0x69c] sm:$0xf]  ;;  %v9651_v52 = vor.u32 %v12953_v55, %v9648_v4  ;;  %7594 = vmatpush.bf16.msrb.mxu0 %v9395_v51  ;;  %v7265_v51 = vadd.f32 %v20607_v14, %v7251_v30 }
 0x73b   : > { %v9904_v28 = vld [vmem:[%s21517_s1 + $0x6b8] sm:$0xf0] }
 0x73c   : > { %v13113_v3 = vld [vmem:[%s21517_s1 + $0x99c] sm:$0xf]  ;;  %v9907_v63 = vor.u32 %v13017_v6, %v9904_v28  ;;  %7608 = vmatpush.bf16.msrb.mxu1 %v9651_v52  ;;  %v20722_v28 = vpop.f32.mrf.mxu3  ;;  %v7305_v52 = vadd.f32 %v7304_v7, %v7291_v33 }
 0x73d   : > { %v10288_v42 = vld [vmem:[%s21517_s1 + $0x9b8] sm:$0xf0] }
 0x73e   : > { %v12881_v32 = vld [vmem:[%s21517_s1 + $0x25c] sm:$0xf]  ;;  %v10291_v15 = vor.u32 %v13113_v3, %v10288_v42  ;;  %7622 = vmatpush.bf16.msrb.mxu2 %v9907_v63  ;;  %v7332_v3 = vpop.f32.mrf.mxu1 }
 0x73f   : > { %v9360_v62 = vld [vmem:[%s21517_s1 + $0x278] sm:$0xf0] }
 0x740   : > { %v12945_v56 = vld [vmem:[%s21517_s1 + $0x45c] sm:$0xf]  ;;  %v9363_v46 = vor.u32 %v12881_v32, %v9360_v62  ;;  %7632 = vmatpush.bf16.msrb.mxu3 %v10291_v15  ;;  %v7137_v15 = vadd.f32 %v20219_v37, %v7123_v22  ;;  %v7319_v22 = vadd.f32 %v7318_v59, %v7305_v52 }
 0x741   : > { %v9616_v61 = vld [vmem:[%s21517_s1 + $0x478] sm:$0xf0] }
 0x742   : > { %v13009_v53 = vld [vmem:[%s21517_s1 + $0x65c] sm:$0xf]  ;;  %v9619_v18 = vor.u32 %v12945_v56, %v9616_v61  ;;  %7595 = vmatpush.bf16.msrb.mxu0 %v9363_v46 }
 0x743   : > { %v9872_v23 = vld [vmem:[%s21517_s1 + $0x678] sm:$0xf0] }
 0x744   : > { %v13105_v60 = vld [vmem:[%s21517_s1 + $0x95c] sm:$0xf]  ;;  %v9875_v58 = vor.u32 %v13009_v53, %v9872_v23  ;;  %7609 = vmatpush.bf16.msrb.mxu1 %v9619_v18  ;;  %v7320_v18 = vpop.f32.mrf.mxu0 }
 0x745   : > { %v10256_v0 = vld [vmem:[%s21517_s1 + $0x978] sm:$0xf0] }
 0x746   : > { %v12873_v40 = vld [vmem:[%s21517_s1 + $0x21c] sm:$0xf]  ;;  %v10259_v4 = vor.u32 %v13105_v60, %v10256_v0  ;;  %7623 = vmatpush.bf16.msrb.mxu2 %v9875_v58  ;;  %v7151_v0 = vadd.f32 %v20247_v20, %v7137_v15 }
 0x747   : > { %v9328_v38 = vld [vmem:[%s21517_s1 + $0x238] sm:$0xf0] }
 0x748   : > { %v12937_v19 = vld [vmem:[%s21517_s1 + $0x41c] sm:$0xf]  ;;  %v9331_v63 = vor.u32 %v12873_v40, %v9328_v38  ;;  %7633 = vmatpush.bf16.msrb.mxu3 %v10259_v4  ;;  %v7279_v38 = vadd.f32 %v20661_v34, %v7265_v51  ;;  %v7346_v4 = vpop.f32.mrf.mxu2 }
 0x749   : > { %v9584_v27 = vld [vmem:[%s21517_s1 + $0x438] sm:$0xf0] }
 0x74a   : > { %v13001_v55 = vld [vmem:[%s21517_s1 + $0x61c] sm:$0xf]  ;;  %v9587_v14 = vor.u32 %v12937_v19, %v9584_v27  ;;  %7596 = vmatpush.bf16.msrb.mxu0 %v9331_v63  ;;  %v7125_v27 = vadd.f32 %v20285_v26, %v19933_v21  ;;  %v7293_v59 = vadd.f32 %v7292_v57, %v7279_v38  ;;  %v7334_v57 = vpop.f32.mrf.mxu1 }
 0x74b   : > { %v9840_v9 = vld [vmem:[%s21517_s1 + $0x638] sm:$0xf0] }
 0x74c   : > { %v13097_v12 = vld [vmem:[%s21517_s1 + $0x91c] sm:$0xf]  ;;  %v9843_v7 = vor.u32 %v13001_v55, %v9840_v9  ;;  %7610 = vmatpush.bf16.msrb.mxu1 %v9587_v14  ;;  %v7333_v55 = vadd.f32 %v7332_v3, %v7319_v22  ;;  %v7360_v3 = vpop.f32.mrf.mxu3  ;;  %v7307_v15 = vadd.f32 %v20722_v28, %v7293_v59 }
 0x74d   : > { %v10224_v6 = vld [vmem:[%s21517_s1 + $0x938] sm:$0xf0]  ;;  %7597 = vmatmul.bf16.vlgmr.msrb.gmra.mxu0 %v16093_v10 }
 0x74e   : > { %v13185_v42 = vld [vmem:[%s21517_s1 + $0xbdc] sm:$0xf]  ;;  %v10227_v61 = vor.u32 %v13097_v12, %v10224_v6  ;;  %7624 = vmatpush.bf16.msrb.mxu2 %v9843_v7  ;;  %v7347_v52 = vadd.f32 %v7346_v4, %v7333_v55 }
 0x74f   : > { %v10576_v50 = vld [vmem:[%s21517_s1 + $0xbf8] sm:$0xf0]  ;;  %7611 = vmatmul.bf16.vlgmr.msrb.gmra.mxu1 %v16071_v1 }
 0x750   : > { %v13249_v35 = vld [vmem:[%s21517_s1 + $0xddc] sm:$0xf]  ;;  %v10579_v53 = vor.u32 %v13185_v42, %v10576_v50  ;;  %7634 = vmatpush.bf16.msrb.mxu3 %v10227_v61  ;;  %v7165_v42 = vadd.f32 %v20298_v54, %v7151_v0  ;;  %v7374_v0 = vpop.f32.mrf.mxu0  ;;  %v7348_v22 = vpop.f32.mrf.mxu2 }
 0x751   : > { %v10832_v32 = vld [vmem:[%s21517_s1 + $0xdf8] sm:$0xf0]  ;;  %7625 = vmatmul.bf16.vlgmr.msrb.gmra.mxu2 %v16107_v17 }
 0x752   : > { %v13313_v62 = vld [vmem:[%s21517_s1 + $0xfdc] sm:$0xf]  ;;  %v10835_v30 = vor.u32 %v13249_v35, %v10832_v32  ;;  %7645 = vmatpush.bf16.msra.mxu0 %v10579_v53 }
 0x753   : > { %v11088_v56 = vld [vmem:[%s21517_s1 + $0xff8] sm:$0xf0] }
 0x754   : > { %v13089_v23 = vld [vmem:[%s21517_s1 + $0x8dc] sm:$0xf]  ;;  %v11091_v33 = vor.u32 %v13313_v62, %v11088_v56  ;;  %7659 = vmatpush.bf16.msra.mxu1 %v10835_v30  ;;  %v7139_v62 = vadd.f32 %v20296_v24, %v7125_v27  ;;  %v7179_v56 = vadd.f32 %v20343_v13, %v7165_v42 }
 0x755   : > { %v10192_v60 = vld [vmem:[%s21517_s1 + $0x8f8] sm:$0xf0] }
 0x756   : > { %v13177_v37 = vld [vmem:[%s21517_s1 + $0xb9c] sm:$0xf]  ;;  %v10195_v34 = vor.u32 %v13089_v23, %v10192_v60  ;;  %7673 = vmatpush.bf16.msra.mxu2 %v11091_v33  ;;  %v7153_v17 = vadd.f32 %v20315_v5, %v7139_v62  ;;  %v7321_v23 = vadd.f32 %v7320_v18, %v7307_v15  ;;  %v7361_v60 = vadd.f32 %v7360_v3, %v7347_v52 }
 0x757   : > { %v10544_v46 = vld [vmem:[%s21517_s1 + $0xbb8] sm:$0xf0] }
 0x758   : > { %v13241_v40 = vld [vmem:[%s21517_s1 + $0xd9c] sm:$0xf]  ;;  %v10547_v9 = vor.u32 %v13177_v37, %v10544_v46  ;;  %7635 = vmatpush.bf16.msrb.mxu3 %v10195_v34  ;;  %v7193_v37 = vadd.f32 %v20354_v8, %v7179_v56  ;;  %v7375_v38 = vadd.f32 %v7374_v0, %v7361_v60 }
 0x759   : > { %v10800_v20 = vld [vmem:[%s21517_s1 + $0xdb8] sm:$0xf0] }
 0x75a   : > { %v13305_v58 = vld [vmem:[%s21517_s1 + $0xf9c] sm:$0xf]  ;;  %v10803_v21 = vor.u32 %v13241_v40, %v10800_v20  ;;  %7646 = vmatpush.bf16.msra.mxu0 %v10547_v9  ;;  %v7335_v40 = vadd.f32 %v7334_v57, %v7321_v23  ;;  %v7207_v4 = vadd.f32 %v20394_v48, %v7193_v37 }
 0x75b   : > { %v11056_v19 = vld [vmem:[%s21517_s1 + $0xfb8] sm:$0xf0] }
 0x75c   : > { %v13081_v12 = vld [vmem:[%s21517_s1 + $0x89c] sm:$0xf]  ;;  %v11059_v26 = vor.u32 %v13305_v58, %v11056_v19  ;;  %7660 = vmatpush.bf16.msra.mxu1 %v10803_v21  ;;  %v7167_v19 = vadd.f32 %v20371_v11, %v7153_v17  ;;  %v7349_v9 = vadd.f32 %v7348_v22, %v7335_v40  ;;  %v7362_v21 = vpop.f32.mrf.mxu3  ;;  %v7761_v62 = vmax.f32 %v7207_v4, 0.0 }
 0x75d   : > { %v10160_v6 = vld [vmem:[%s21517_s1 + $0x8b8] sm:$0xf0] }
 0x75e   : > { %v13169_v50 = vld [vmem:[%s21517_s1 + $0xb5c] sm:$0xf]  ;;  %v10163_v14 = vor.u32 %v13081_v12, %v10160_v6  ;;  %7674 = vmatpush.bf16.msra.mxu2 %v11059_v26  ;;  %v7181_v42 = vadd.f32 %v20420_v45, %v7167_v19  ;;  %v7388_v26 = vpop.f32.mrf.mxu1  ;;  %v7363_v56 = vadd.f32 %v7362_v21, %v7349_v9 }
 0x75f   : > { %v10512_v35 = vld [vmem:[%s21517_s1 + $0xb78] sm:$0xf0]  ;;  %v7389_v3 = vadd.f32 %v7388_v26, %v7375_v38 }
 0x760   : > { %v13233_v51 = vld [vmem:[%s21517_s1 + $0xd5c] sm:$0xf]  ;;  %v10515_v7 = vor.u32 %v13169_v50, %v10512_v35  ;;  %7636 = vmatpush.bf16.msrb.mxu3 %v10163_v14  ;;  %v7195_v17 = vadd.f32 %v20431_v41, %v7181_v42 }
 0x761   : > { %v10768_v54 = vld [vmem:[%s21517_s1 + $0xd78] sm:$0xf0]  ;;  %v7762_v15 = vmax.f32 %v7389_v3, 0.0 }
 0x762   : > { %v13297_v63 = vld [vmem:[%s21517_s1 + $0xf5c] sm:$0xf]  ;;  %v10771_v24 = vor.u32 %v13233_v51, %v10768_v54  ;;  %7647 = vmatpush.bf16.msra.mxu0 %v10515_v7  ;;  %v7376_v7 = vpop.f32.mrf.mxu0 }
 0x763   : > { %v11024_v32 = vld [vmem:[%s21517_s1 + $0xf78] sm:$0xf0] }
 0x764   : > { %v13073_v61 = vld [vmem:[%s21517_s1 + $0x85c] sm:$0xf]  ;;  %v11027_v1 = vor.u32 %v13297_v63, %v11024_v32  ;;  %7661 = vmatpush.bf16.msra.mxu1 %v10771_v24 }
 0x765   : > { %v10128_v10 = vld [vmem:[%s21517_s1 + $0x878] sm:$0xf0] }
 0x766   : > { %v13161_v13 = vld [vmem:[%s21517_s1 + $0xb1c] sm:$0xf]  ;;  %v10131_v46 = vor.u32 %v13073_v61, %v10128_v10  ;;  %7675 = vmatpush.bf16.msra.mxu2 %v11027_v1  ;;  %v7390_v38 = vpop.f32.mrf.mxu1 }
 0x767   : > { %v10480_v28 = vld [vmem:[%s21517_s1 + $0xb38] sm:$0xf0] }
 0x768   : > { %v13225_v53 = vld [vmem:[%s21517_s1 + $0xd1c] sm:$0xf]  ;;  %v10483_v18 = vor.u32 %v13161_v13, %v10480_v28  ;;  %7637 = vmatpush.bf16.msrb.mxu3 %v10131_v46  ;;  %v7775_v13 = vpack.c.bf16 %v7762_v15, %v7761_v62  ;;  %v7377_v28 = vadd.f32 %v7376_v7, %v7363_v56  ;;  %v2287_v62 = vperm.slane %v20518_v29, 6 }
 0x769   : > { %v10736_v5 = vld [vmem:[%s21517_s1 + $0xd38] sm:$0xf0] }
 0x76a   : > { %v13289_v30 = vld [vmem:[%s21517_s1 + $0xf1c] sm:$0xf]  ;;  %v10739_v8 = vor.u32 %v13225_v53, %v10736_v5  ;;  %7648 = vmatpush.bf16.msra.mxu0 %v10483_v18  ;;  %7783 = vst [vmem:[#allocation2 + $0x10] sm:$0xff] %v7775_v13  ;;  %v7391_v18 = vadd.f32 %v7390_v38, %v7377_v28 }
 0x76b   : > { %v10992_v33 = vld [vmem:[%s21517_s1 + $0xf38] sm:$0xf0] }
 0x76c   : > { %v13065_v20 = vld [vmem:[%s21517_s1 + $0x81c] sm:$0xf]  ;;  %v10995_v27 = vor.u32 %v13289_v30, %v10992_v33  ;;  %7662 = vmatpush.bf16.msra.mxu1 %v10739_v8  ;;  %v7209_v33 = vadd.f32 %v20467_v16, %v7195_v17  ;;  %v7770_v9 = vmax.f32 %v7391_v18, 0.0 }
 0x76d   : > { %v10096_v58 = vld [vmem:[%s21517_s1 + $0x838] sm:$0xf0] }
 0x76e   : > { %v13153_v34 = vld [vmem:[%s21517_s1 + $0xadc] sm:$0xf]  ;;  %v10099_v50 = vor.u32 %v13065_v20, %v10096_v58  ;;  %7676 = vmatpush.bf16.msra.mxu2 %v10995_v27  ;;  %v7769_v4 = vmax.f32 %v7209_v33, 0.0 }
 0x76f   : > { %v10448_v59 = vld [vmem:[%s21517_s1 + $0xaf8] sm:$0xf0] }
 0x770   : > { %v13217_v55 = vld [vmem:[%s21517_s1 + $0xcdc] sm:$0xf]  ;;  %v10451_v35 = vor.u32 %v13153_v34, %v10448_v59  ;;  %7638 = vmatpush.bf16.msrb.mxu3 %v10099_v50 }
 0x771   : > { %v10704_v11 = vld [vmem:[%s21517_s1 + $0xcf8] sm:$0xf0] }
 0x772   : > { %v13281_v12 = vld [vmem:[%s21517_s1 + $0xedc] sm:$0xf]  ;;  %v10707_v45 = vor.u32 %v13217_v55, %v10704_v11  ;;  %7649 = vmatpush.bf16.msra.mxu0 %v10451_v35 }
 0x773   : > { %v10960_v6 = vld [vmem:[%s21517_s1 + $0xef8] sm:$0xf0]  ;;  %7639 = vmatmul.bf16.vlgmr.msrb.gmra.mxu3 %v16279_v39 }
 0x774   : > { %v13377_v48 = vld [vmem:[%s21517_s1 + $0x11dc] sm:$0xf]  ;;  %v10963_v52 = vor.u32 %v13281_v12, %v10960_v6  ;;  %7663 = vmatpush.bf16.msra.mxu1 %v10707_v45 }
 0x775   : > { %v11344_v57 = vld [vmem:[%s21517_s1 + $0x11f8] sm:$0xf0] }
 0x776   : > { %v13145_v51 = vld [vmem:[%s21517_s1 + $0xa9c] sm:$0xf]  ;;  %v11347_v14 = vor.u32 %v13377_v48, %v11344_v57  ;;  %7677 = vmatpush.bf16.msra.mxu2 %v10963_v52  ;;  %v7779_v48 = vpack.c.bf16 %v7770_v9, %v7769_v4  ;;  %v7444_v4 = vpop.f32.mrf.mxu1 }
 0x777   : > { %v10416_v54 = vld [vmem:[%s21517_s1 + $0xab8] sm:$0xf0] }
 0x778   : > { %v13209_v63 = vld [vmem:[%s21517_s1 + $0xc9c] sm:$0xf]  ;;  %v10419_v53 = vor.u32 %v13145_v51, %v10416_v54  ;;  %7687 = vmatpush.bf16.msra.mxu3 %v11347_v14  ;;  %7787 = vst [vmem:[#allocation2 + $0x30] sm:$0xff] %v7779_v48 }
 0x779   : > { %v10672_v32 = vld [vmem:[%s21517_s1 + $0xcb8] sm:$0xf0] }
 0x77a   : > { %v13273_v61 = vld [vmem:[%s21517_s1 + $0xe9c] sm:$0xf]  ;;  %v10675_v41 = vor.u32 %v13209_v63, %v10672_v32  ;;  %7650 = vmatpush.bf16.msra.mxu0 %v10419_v53 }
 0x77b   : > { %v10928_v10 = vld [vmem:[%s21517_s1 + $0xeb8] sm:$0xf0] }
 0x77c   : > { %v13369_v24 = vld [vmem:[%s21517_s1 + $0x119c] sm:$0xf]  ;;  %v10931_v60 = vor.u32 %v13273_v61, %v10928_v10  ;;  %7664 = vmatpush.bf16.msra.mxu1 %v10675_v41  ;;  %v7416_v41 = vpop.f32.mrf.mxu3 }
 0x77d   : > { %v11312_v1 = vld [vmem:[%s21517_s1 + $0x11b8] sm:$0xf0] }
 0x77e   : > { %v13137_v23 = vld [vmem:[%s21517_s1 + $0xa5c] sm:$0xf]  ;;  %v11315_v37 = vor.u32 %v13369_v24, %v11312_v1  ;;  %7678 = vmatpush.bf16.msra.mxu2 %v10931_v60  ;;  %v7402_v24 = vpop.f32.mrf.mxu2 }
 0x77f   : > { %v10384_v0 = vld [vmem:[%s21517_s1 + $0xa78] sm:$0xf0] }
 0x780   : > { %v13201_v5 = vld [vmem:[%s21517_s1 + $0xc5c] sm:$0xf]  ;;  %v10387_v20 = vor.u32 %v13137_v23, %v10384_v0  ;;  %7688 = vmatpush.bf16.msra.mxu3 %v11315_v37  ;;  %v7403_v23 = vadd.f32 %v7402_v24, %v2287_v62 }
 0x781   : > { %v10640_v30 = vld [vmem:[%s21517_s1 + $0xc78] sm:$0xf0] }
 0x782   : > { %v13265_v46 = vld [vmem:[%s21517_s1 + $0xe5c] sm:$0xf]  ;;  %v10643_v8 = vor.u32 %v13201_v5, %v10640_v30  ;;  %7651 = vmatpush.bf16.msra.mxu0 %v10387_v20  ;;  %v7417_v38 = vadd.f32 %v7416_v41, %v7403_v23  ;;  %v7446_v41 = vpop.f32.mrf.mxu1 }
 0x783   : > { %v10896_v40 = vld [vmem:[%s21517_s1 + $0xe78] sm:$0xf0] }
 0x784   : > { %v13361_v22 = vld [vmem:[%s21517_s1 + $0x115c] sm:$0xf]  ;;  %v10899_v27 = vor.u32 %v13265_v46, %v10896_v40  ;;  %7665 = vmatpush.bf16.msra.mxu1 %v10643_v8 }
 0x785   : > { %v11280_v16 = vld [vmem:[%s21517_s1 + $0x1178] sm:$0xf0] }
 0x786   : > { %v13129_v58 = vld [vmem:[%s21517_s1 + $0xa1c] sm:$0xf]  ;;  %v11283_v11 = vor.u32 %v13361_v22, %v11280_v16  ;;  %7679 = vmatpush.bf16.msra.mxu2 %v10899_v27 }
 0x787   : > { %v10352_v39 = vld [vmem:[%s21517_s1 + $0xa38] sm:$0xf0] }
 0x788   : > { %v13193_v19 = vld [vmem:[%s21517_s1 + $0xc1c] sm:$0xf]  ;;  %v10355_v57 = vor.u32 %v13129_v58, %v10352_v39  ;;  %7689 = vmatpush.bf16.msra.mxu3 %v11283_v11 }
 0x789   : > { %v10608_v34 = vld [vmem:[%s21517_s1 + $0xc38] sm:$0xf0] }
 0x78a   : > { %v13257_v59 = vld [vmem:[%s21517_s1 + $0xe1c] sm:$0xf]  ;;  %v10611_v51 = vor.u32 %v13193_v19, %v10608_v34  ;;  %7652 = vmatpush.bf16.msra.mxu0 %v10355_v57  ;;  %v7430_v34 = vpop.f32.mrf.mxu0 }
 0x78b   : > { %v10864_v55 = vld [vmem:[%s21517_s1 + $0xe38] sm:$0xf0] }
 0x78c   : > { %v13353_v12 = vld [vmem:[%s21517_s1 + $0x111c] sm:$0xf]  ;;  %v10867_v45 = vor.u32 %v13257_v59, %v10864_v55  ;;  %7666 = vmatpush.bf16.msra.mxu1 %v10611_v51  ;;  %v7431_v59 = vadd.f32 %v7430_v34, %v7417_v38  ;;  %v7404_v55 = vpop.f32.mrf.mxu2 }
 0x78d   : > { %v11248_v6 = vld [vmem:[%s21517_s1 + $0x1138] sm:$0xf0]  ;;  %7653 = vmatmul.bf16.vlgmr.msra.gmra.mxu0 %v16292_v44 }
 0x78e   : > { %v13441_v42 = vld [vmem:[%s21517_s1 + $0x13dc] sm:$0xf]  ;;  %v11251_v52 = vor.u32 %v13353_v12, %v11248_v6  ;;  %7680 = vmatpush.bf16.msra.mxu2 %v10867_v45 }
 0x78f   : > { %v11600_v21 = vld [vmem:[%s21517_s1 + $0x13f8] sm:$0xf0]  ;;  %7667 = vmatmul.bf16.vlgmr.msra.gmra.mxu1 %v16290_v43 }
 0x790   : > { %v13505_v26 = vld [vmem:[%s21517_s1 + $0x15dc] sm:$0xf]  ;;  %v11603_v54 = vor.u32 %v13441_v42, %v11600_v21  ;;  %7690 = vmatpush.bf16.msra.mxu3 %v11251_v52  ;;  %v7405_v42 = vadd.f32 %v7404_v55, %v2287_v62 }
 0x791   : > { %v11856_v3 = vld [vmem:[%s21517_s1 + $0x15f8] sm:$0xf0]  ;;  %7681 = vmatmul.bf16.vlgmr.msra.gmra.mxu2 %v16300_v47 }
 0x792   : > { %v13569_v50 = vld [vmem:[%s21517_s1 + $0x17dc] sm:$0xf]  ;;  %v11859_v56 = vor.u32 %v13505_v26, %v11856_v3  ;;  %7701 = vmatpush.bf16.msrb.mxu0 %v11603_v54 }
 0x793   : > { %v12112_v35 = vld [vmem:[%s21517_s1 + $0x17f8] sm:$0xf0] }
 0x794   : > { %v13345_v63 = vld [vmem:[%s21517_s1 + $0x10dc] sm:$0xf]  ;;  %v12115_v15 = vor.u32 %v13569_v50, %v12112_v35  ;;  %7715 = vmatpush.bf16.msrb.mxu1 %v11859_v56  ;;  %v21046_v50 = vadd.f32 %v7444_v4, %v7431_v59  ;;  %v7418_v35 = vpop.f32.mrf.mxu3 }
 0x795   : > { %v11216_v32 = vld [vmem:[%s21517_s1 + $0x10f8] sm:$0xf0]  ;;  %v7419_v54 = vadd.f32 %v7418_v35, %v7405_v42 }
 0x796   : > { %v13433_v14 = vld [vmem:[%s21517_s1 + $0x139c] sm:$0xf]  ;;  %v11219_v1 = vor.u32 %v13345_v63, %v11216_v32  ;;  %7729 = vmatpush.bf16.msrb.mxu2 %v12115_v15 }
 0x797   : > { %v11568_v7 = vld [vmem:[%s21517_s1 + $0x13b8] sm:$0xf0] }
 0x798   : > { %v13497_v61 = vld [vmem:[%s21517_s1 + $0x159c] sm:$0xf]  ;;  %v11571_v13 = vor.u32 %v13433_v14, %v11568_v7  ;;  %7691 = vmatpush.bf16.msra.mxu3 %v11219_v1 }
 0x799   : > { %v11824_v10 = vld [vmem:[%s21517_s1 + $0x15b8] sm:$0xf0] }
 0x79a   : > { %v13561_v29 = vld [vmem:[%s21517_s1 + $0x179c] sm:$0xf]  ;;  %v11827_v60 = vor.u32 %v13497_v61, %v11824_v10  ;;  %7702 = vmatpush.bf16.msrb.mxu0 %v11571_v13  ;;  %v7432_v13 = vpop.f32.mrf.mxu0 }
 0x79b   : > { %v12080_v17 = vld [vmem:[%s21517_s1 + $0x17b8] sm:$0xf0]  ;;  %v7433_v23 = vadd.f32 %v7432_v13, %v7419_v54 }
 0x79c   : > { %v13337_v28 = vld [vmem:[%s21517_s1 + $0x109c] sm:$0xf]  ;;  %v12083_v0 = vor.u32 %v13561_v29, %v12080_v17  ;;  %7716 = vmatpush.bf16.msrb.mxu1 %v11827_v60 }
 0x79d   : > { %v11184_v53 = vld [vmem:[%s21517_s1 + $0x10b8] sm:$0xf0] }
 0x79e   : > { %v13425_v5 = vld [vmem:[%s21517_s1 + $0x135c] sm:$0xf]  ;;  %v11187_v44 = vor.u32 %v13337_v28, %v11184_v53  ;;  %7730 = vmatpush.bf16.msrb.mxu2 %v12083_v0 }
 0x79f   : > { %v11536_v30 = vld [vmem:[%s21517_s1 + $0x1378] sm:$0xf0] }
 0x7a0   : > { %v13489_v33 = vld [vmem:[%s21517_s1 + $0x155c] sm:$0xf]  ;;  %v11539_v22 = vor.u32 %v13425_v5, %v11536_v30  ;;  %7692 = vmatpush.bf16.msra.mxu3 %v11187_v44 }
 0x7a1   : > { %v11792_v37 = vld [vmem:[%s21517_s1 + $0x1578] sm:$0xf0] }
 0x7a2   : > { %v13553_v46 = vld [vmem:[%s21517_s1 + $0x175c] sm:$0xf]  ;;  %v11795_v18 = vor.u32 %v13489_v33, %v11792_v37  ;;  %7703 = vmatpush.bf16.msrb.mxu0 %v11539_v22 }
 0x7a3   : > { %v12048_v40 = vld [vmem:[%s21517_s1 + $0x1778] sm:$0xf0] }
 0x7a4   : > { %v13329_v47 = vld [vmem:[%s21517_s1 + $0x105c] sm:$0xf]  ;;  %v12051_v20 = vor.u32 %v13553_v46, %v12048_v40  ;;  %7717 = vmatpush.bf16.msrb.mxu1 %v11795_v18  ;;  %v7447_v46 = vadd.f32 %v7446_v41, %v7433_v23 }
 0x7a5   : > { %v11152_v16 = vld [vmem:[%s21517_s1 + $0x1078] sm:$0xf0] }
 0x7a6   : > { %v13417_v43 = vld [vmem:[%s21517_s1 + $0x131c] sm:$0xf]  ;;  %v11155_v9 = vor.u32 %v13329_v47, %v11152_v16  ;;  %7731 = vmatpush.bf16.msrb.mxu2 %v12051_v20 }
 0x7a7   : > { %v11504_v58 = vld [vmem:[%s21517_s1 + $0x1338] sm:$0xf0] }
 0x7a8   : > { %v13481_v39 = vld [vmem:[%s21517_s1 + $0x151c] sm:$0xf]  ;;  %v11507_v11 = vor.u32 %v13417_v43, %v11504_v58  ;;  %7693 = vmatpush.bf16.msra.mxu3 %v11155_v9 }
 0x7a9   : > { %v11760_v19 = vld [vmem:[%s21517_s1 + $0x1538] sm:$0xf0] }
 0x7aa   : > { %v13545_v8 = vld [vmem:[%s21517_s1 + $0x171c] sm:$0xf]  ;;  %v11763_v21 = vor.u32 %v13481_v39, %v11760_v19  ;;  %7704 = vmatpush.bf16.msrb.mxu0 %v11507_v11 }
 0x7ab   : > { %v12016_v27 = vld [vmem:[%s21517_s1 + $0x1738] sm:$0xf0] }
 0x7ac   : > { %v13321_v12 = vld [vmem:[%s21517_s1 + $0x101c] sm:$0xf]  ;;  %v12019_v26 = vor.u32 %v13545_v8, %v12016_v27  ;;  %7718 = vmatpush.bf16.msrb.mxu1 %v11763_v21  ;;  %v7472_v21 = vpop.f32.mrf.mxu3 }
 0x7ad   : > { %v11120_v6 = vld [vmem:[%s21517_s1 + $0x1038] sm:$0xf0] }
 0x7ae   : > { %v13409_v48 = vld [vmem:[%s21517_s1 + $0x12dc] sm:$0xf]  ;;  %v11123_v62 = vor.u32 %v13321_v12, %v11120_v6  ;;  %7732 = vmatpush.bf16.msrb.mxu2 %v12019_v26  ;;  %v7458_v6 = vpop.f32.mrf.mxu2 }
 0x7af   : > { %v11472_v57 = vld [vmem:[%s21517_s1 + $0x12f8] sm:$0xf0]  ;;  %v7459_v42 = vadd.f32 %v7458_v6, %v21046_v50 }
 0x7b0   : > { %v13473_v3 = vld [vmem:[%s21517_s1 + $0x14dc] sm:$0xf]  ;;  %v11475_v56 = vor.u32 %v13409_v48, %v11472_v57  ;;  %7694 = vmatpush.bf16.msra.mxu3 %v11123_v62 }
 0x7b1   : > { %v11728_v51 = vld [vmem:[%s21517_s1 + $0x14f8] sm:$0xf0]  ;;  %v7473_v26 = vadd.f32 %v7472_v21, %v7459_v42 }
 0x7b2   : > { %v13537_v45 = vld [vmem:[%s21517_s1 + $0x16dc] sm:$0xf]  ;;  %v11731_v15 = vor.u32 %v13473_v3, %v11728_v51  ;;  %7705 = vmatpush.bf16.msrb.mxu0 %v11475_v56  ;;  %v7486_v51 = vpop.f32.mrf.mxu0 }
 0x7b3   : > { %v11984_v52 = vld [vmem:[%s21517_s1 + $0x16f8] sm:$0xf0]  ;;  %7695 = vmatmul.bf16.vlgmr.msra.gmra.mxu3 %v16507_v31 }
 0x7b4   : > { %v13601_v63 = vld [vmem:[%s21517_s1 + $0x18dc] sm:$0xf]  ;;  %v11987_v14 = vor.u32 %v13537_v45, %v11984_v52  ;;  %7719 = vmatpush.bf16.msrb.mxu1 %v11731_v15  ;;  %v7474_v3 = vpop.f32.mrf.mxu3  ;;  %v7500_v45 = vpop.f32.mrf.mxu1 }
 0x7b5   : > { %v12240_v32 = vld [vmem:[%s21517_s1 + $0x18f8] sm:$0xf0] }
 0x7b6   : > { %v13401_v7 = vld [vmem:[%s21517_s1 + $0x129c] sm:$0xf]  ;;  %v12243_v29 = vor.u32 %v13601_v63, %v12240_v32  ;;  %7733 = vmatpush.bf16.msrb.mxu2 %v11987_v14  ;;  %v7460_v48 = vpop.f32.mrf.mxu2 }
 0x7b7   : > { %v11440_v61 = vld [vmem:[%s21517_s1 + $0x12b8] sm:$0xf0]  ;;  %v7461_v57 = vadd.f32 %v7460_v48, %v7447_v46 }
 0x7b8   : > { %v13465_v10 = vld [vmem:[%s21517_s1 + $0x149c] sm:$0xf]  ;;  %v11443_v60 = vor.u32 %v13401_v7, %v11440_v61  ;;  %7747 = vmatpush.bf16.msrb.mxu3 %v12243_v29  ;;  %v13868_v29 = vld [vmem:[%s21518_s2] sm:$0xff] }
 0x7b9   : > { %v11696_v17 = vld [vmem:[%s21517_s1 + $0x14b8] sm:$0xf0]  ;;  %v7475_v35 = vadd.f32 %v7474_v3, %v7461_v57 }
 0x7ba   : > { %v13529_v24 = vld [vmem:[%s21517_s1 + $0x169c] sm:$0xf]  ;;  %v11699_v0 = vor.u32 %v13465_v10, %v11696_v17  ;;  %7706 = vmatpush.bf16.msrb.mxu0 %v11443_v60  ;;  %v7488_v54 = vpop.f32.mrf.mxu0  ;;  %v2288_v17 = vperm.slane %v13868_v29, 7 }
 0x7bb   : > { %v11952_v1 = vld [vmem:[%s21517_s1 + $0x16b8] sm:$0xf0] }
 0x7bc   : > { %v13593_v28 = vld [vmem:[%s21517_s1 + $0x189c] sm:$0xf]  ;;  %v11955_v5 = vor.u32 %v13529_v24, %v11952_v1  ;;  %7720 = vmatpush.bf16.msrb.mxu1 %v11699_v0  ;;  %v7528_v50 = vpop.f32.mrf.mxu3  ;;  %v7502_v63 = vpop.f32.mrf.mxu1 }
 0x7bd   : > { %v12208_v53 = vld [vmem:[%s21517_s1 + $0x18b8] sm:$0xf0] }
 0x7be   : > { %v13393_v30 = vld [vmem:[%s21517_s1 + $0x125c] sm:$0xf]  ;;  %v12211_v40 = vor.u32 %v13593_v28, %v12208_v53  ;;  %7734 = vmatpush.bf16.msrb.mxu2 %v11955_v5  ;;  %v7514_v52 = vpop.f32.mrf.mxu2 }
 0x7bf   : > { %v11408_v33 = vld [vmem:[%s21517_s1 + $0x1278] sm:$0xf0] }
 0x7c0   : > { %v13457_v37 = vld [vmem:[%s21517_s1 + $0x145c] sm:$0xf]  ;;  %v11411_v18 = vor.u32 %v13393_v30, %v11408_v33  ;;  %7748 = vmatpush.bf16.msrb.mxu3 %v12211_v40 }
 0x7c1   : > { %v11664_v38 = vld [vmem:[%s21517_s1 + $0x1478] sm:$0xf0] }
 0x7c2   : > { %v13521_v44 = vld [vmem:[%s21517_s1 + $0x165c] sm:$0xf]  ;;  %v11667_v20 = vor.u32 %v13457_v37, %v11664_v38  ;;  %7707 = vmatpush.bf16.msrb.mxu0 %v11411_v18 }
 0x7c3   : > { %v11920_v22 = vld [vmem:[%s21517_s1 + $0x1678] sm:$0xf0] }
 0x7c4   : > { %v13585_v47 = vld [vmem:[%s21517_s1 + $0x185c] sm:$0xf]  ;;  %v11923_v43 = vor.u32 %v13521_v44, %v11920_v22  ;;  %7721 = vmatpush.bf16.msrb.mxu1 %v11667_v20  ;;  %v7556_v62 = vpop.f32.mrf.mxu1  ;;  %v7487_v44 = vadd.f32 %v7486_v51, %v7473_v26 }
 0x7c5   : > { %v12176_v16 = vld [vmem:[%s21517_s1 + $0x1878] sm:$0xf0] }
 0x7c6   : > { %v13385_v58 = vld [vmem:[%s21517_s1 + $0x121c] sm:$0xf]  ;;  %v12179_v19 = vor.u32 %v13585_v47, %v12176_v16  ;;  %7735 = vmatpush.bf16.msrb.mxu2 %v11923_v43  ;;  %v7516_v32 = vpop.f32.mrf.mxu2  ;;  %v7501_v20 = vadd.f32 %v7500_v45, %v7487_v44 }
 0x7c7   : > { %v11376_v31 = vld [vmem:[%s21517_s1 + $0x1238] sm:$0xf0] }
 0x7c8   : > { %v13449_v39 = vld [vmem:[%s21517_s1 + $0x141c] sm:$0xf]  ;;  %v11379_v4 = vor.u32 %v13385_v58, %v11376_v31  ;;  %7749 = vmatpush.bf16.msrb.mxu3 %v12179_v19 }
 0x7c9   : > { %v11632_v8 = vld [vmem:[%s21517_s1 + $0x1438] sm:$0xf0] }
 0x7ca   : > { %v13513_v27 = vld [vmem:[%s21517_s1 + $0x161c] sm:$0xf]  ;;  %v11635_v9 = vor.u32 %v13449_v39, %v11632_v8  ;;  %7708 = vmatpush.bf16.msrb.mxu0 %v11379_v4  ;;  %v7515_v39 = vadd.f32 %v7514_v52, %v7501_v20 }
 0x7cb   : > { %v11888_v34 = vld [vmem:[%s21517_s1 + $0x1638] sm:$0xf0] }
 0x7cc   : > { %v13577_v59 = vld [vmem:[%s21517_s1 + $0x181c] sm:$0xf]  ;;  %v11891_v11 = vor.u32 %v13513_v27, %v11888_v34  ;;  %7722 = vmatpush.bf16.msrb.mxu1 %v11635_v9  ;;  %v21142_v14 = vpop.f32.mrf.mxu1  ;;  %v7489_v27 = vadd.f32 %v7488_v54, %v7475_v35  ;;  %v7529_v9 = vadd.f32 %v7528_v50, %v7515_v39 }
 0x7cd   : > { %v12144_v55 = vld [vmem:[%s21517_s1 + $0x1838] sm:$0xf0]  ;;  %7709 = vmatmul.bf16.vlgmr.msrb.gmra.mxu0 %v16520_v36  ;;  %v7542_v36 = vpop.f32.mrf.mxu0 }
 0x7ce   : > { %v12147_v12 = vor.u32 %v13577_v59, %v12144_v55  ;;  %7736 = vmatpush.bf16.msrb.mxu2 %v11891_v11  ;;  %v7570_v56 = vpop.f32.mrf.mxu2  ;;  %v7503_v6 = vadd.f32 %v7502_v63, %v7489_v27  ;;  %v7543_v42 = vadd.f32 %v7542_v36, %v7529_v9 }
 0x7cf   : > { %7723 = vmatmul.bf16.vlgmr.msrb.gmra.mxu1 %v21551_v49  ;;  %v7530_v49 = vpop.f32.mrf.mxu3 }
 0x7d0   : > { %7750 = vmatpush.bf16.msrb.mxu3 %v12147_v12  ;;  %v7517_v48 = vadd.f32 %v7516_v32, %v7503_v6  ;;  %v7557_v51 = vadd.f32 %v7556_v62, %v7543_v42 }
 0x7d1   : > { %7737 = vmatmul.bf16.vlgmr.msrb.gmra.mxu2 %v21552_v25 }
 0x7d2   : > { %v7531_v35 = vadd.f32 %v7530_v49, %v7517_v48  ;;  %v7571_v54 = vadd.f32 %v7570_v56, %v7557_v51 }
 0x7d3   : > { %12251 = vmatmul.msk.bf16.vlgmr.msrb.gmra.mxu3 %vm6297_vm0, %v21553_v2 }
 0x7d4   : > { %v7612_v61 = vpop.f32.mrf.mxu1 }
 0x7d5   : > { %v7544_v25 = vpop.f32.mrf.mxu0 }
 0x7d6   : > { %v21144_v7 = vpop.f32.mrf.mxu2  ;;  %v7545_v29 = vadd.f32 %v7544_v25, %v7531_v35 }
 0x7d7   : > { %v7584_v15 = vpop.f32.mrf.mxu3 }
 0x7d8   : > { %v7585_v1 = vadd.f32 %v7584_v15, %v2288_v17 }
 0x7dc   : > { %v7614_v28 = vpop.f32.mrf.mxu1 }
 0x7dd   : > { %v7598_v2 = vpop.f32.mrf.mxu0 }
 0x7de   : > { %v7626_v24 = vpop.f32.mrf.mxu2  ;;  %v7599_v53 = vadd.f32 %v7598_v2, %v7585_v1  ;;  %v7559_v1 = vadd.f32 %v21142_v14, %v7545_v29 }
 0x7df   : > { %v7586_v10 = vpop.f32.mrf.mxu3 }
 0x7e0   : > { %v7613_v41 = vadd.f32 %v7612_v61, %v7599_v53  ;;  %v7587_v5 = vadd.f32 %v7586_v10, %v2288_v17  ;;  %v7763_v17 = vmax.f32 %v7571_v54, 0.0  ;;  %v7573_v62 = vadd.f32 %v21144_v7, %v7559_v1 }
 0x7e2   : > { %v7627_v30 = vadd.f32 %v7626_v24, %v7613_v41  ;;  %v7771_v49 = vmax.f32 %v7573_v62, 0.0 }
 0x7e5   : > { %v7600_v13 = vpop.f32.mrf.mxu0 }
 0x7e6   : > { %v7628_v60 = vpop.f32.mrf.mxu2  ;;  %v7601_v46 = vadd.f32 %v7600_v13, %v7587_v5 }
 0x7e8   : > { %v7615_v22 = vadd.f32 %v7614_v28, %v7601_v46 }
 0x7ea   : > { %v7629_v58 = vadd.f32 %v7628_v60, %v7615_v22 }
 0x7f6   : > { %v7640_v23 = vpop.f32.mrf.mxu3 }
 0x7f7   : > { %v7641_v40 = vadd.f32 %v7640_v23, %v7627_v30 }
 0x7fe   : > { %v7642_v37 = vpop.f32.mrf.mxu3 }
 0x7ff   : > { %v7643_v19 = vadd.f32 %v7642_v37, %v7629_v58 }
 0x80a   : > { %v7654_v0 = vpop.f32.mrf.mxu0 }
 0x80b   : > { %v7655_v47 = vadd.f32 %v7654_v0, %v7641_v40 }
 0x80c   : > { %v7668_v33 = vpop.f32.mrf.mxu1 }
 0x80d   : > { %v7669_v31 = vadd.f32 %v7668_v33, %v7655_v47 }
 0x812   : > { %v7656_v16 = vpop.f32.mrf.mxu0 }
 0x813   : > { %v7657_v59 = vadd.f32 %v7656_v16, %v7643_v19 }
 0x814   : > { %v7682_v38 = vpop.f32.mrf.mxu2  ;;  %v7670_v43 = vpop.f32.mrf.mxu1 }
 0x815   : > { %v7683_v8 = vadd.f32 %v7682_v38, %v7669_v31  ;;  %v7671_v26 = vadd.f32 %v7670_v43, %v7657_v59 }
 0x81c   : > { %v7684_v34 = vpop.f32.mrf.mxu2 }
 0x81d   : > { %v7685_v57 = vadd.f32 %v7684_v34, %v7671_v26 }
 0x836   : > { %v7696_v18 = vpop.f32.mrf.mxu3 }
 0x837   : > { %v7697_v55 = vadd.f32 %v7696_v18, %v7683_v8 }
 0x83e   : > { %v7698_v12 = vpop.f32.mrf.mxu3 }
 0x83f   : > { %v7699_v52 = vadd.f32 %v7698_v12, %v7685_v57 }
 0x84a   : > { %v7710_v4 = vpop.f32.mrf.mxu0 }
 0x84b   : > { %v7711_v11 = vadd.f32 %v7710_v4, %v7697_v55 }
 0x84c   : > { %v7724_v21 = vpop.f32.mrf.mxu1 }
 0x84d   : > { %v7725_v3 = vadd.f32 %v7724_v21, %v7711_v11 }
 0x852   : > { %v7712_v2 = vpop.f32.mrf.mxu0 }
 0x853   : > { %v7713_v61 = vadd.f32 %v7712_v2, %v7699_v52 }
 0x854   : > { %v7738_v45 = vpop.f32.mrf.mxu2  ;;  %v7726_v24 = vpop.f32.mrf.mxu1 }
 0x855   : > { %v7739_v15 = vadd.f32 %v7738_v45, %v7725_v3  ;;  %v7727_v36 = vadd.f32 %v7726_v24, %v7713_v61 }
 0x856   : > { %v7752_v10 = vpop.f32.mrf.mxu3 }
 0x857   : > { %v7753_v50 = vadd.f32 %v7752_v10, %v7739_v15 }
 0x859   : > { %v7764_v63 = vmax.f32 %v7753_v50, 0.0 }
 0x85b   : > { %v7776_v32 = vpack.c.bf16 %v7764_v63, %v7763_v17 }
 0x85c   : > { %v7740_v13 = vpop.f32.mrf.mxu2 }
 0x85d   : > { %v7741_v28 = vadd.f32 %v7740_v13, %v7727_v36  ;;  %7784 = vst [vmem:[#allocation2 + $0x18] sm:$0xff] %v7776_v32 }
 0x85e   : > { %v7754_v53 = vpop.f32.mrf.mxu3 }
 0x85f   : > { %v7755_v23 = vadd.f32 %v7754_v53, %v7741_v28 }
 0x861   : > { %v7772_v56 = vmax.f32 %v7755_v23, 0.0 }
 0x863   : > { %v7780_v41 = vpack.c.bf16 %v7772_v56, %v7771_v49 }
 0x865   : > { %7788 = vst [vmem:[#allocation2 + $0x38] sm:$0xff] %v7780_v41 }
 0x866 PF: > { %v12342_v25 = vld [vmem:[%s15797_s13 + $0x70] sm:$0xf]  ;;  %v13629_v14 = vld [vmem:[%s15797_s13 + $0x74] sm:$0xf0]  ;;  %v12334_v38 = vld [vmem:[%s15797_s13 + $0x60] sm:$0xf]  ;;  %s21554_s12 = scalar_lea.vmem %s21520_s4, %s15791_s25 }
 0x867   : > { %v12406_v7 = vld [vmem:[%s15797_s13 + $0xf0] sm:$0xf]  ;;  %v12343_v60 = vor.u32 %v13629_v14, %v12342_v25  ;;  %v13645_v0 = vld [vmem:[%s15797_s13 + $0xf4] sm:$0xf0]  ;;  %v13627_v22 = vld [vmem:[%s15797_s13 + $0x64] sm:$0xf0] }
 0x868   : > { %v12470_v5 = vld [vmem:[%s15797_s13 + $0x170] sm:$0xf]  ;;  %v13661_v30 = vld [vmem:[%s15797_s13 + $0x174] sm:$0xf0]  ;;  %v12407_v33 = vor.u32 %v13645_v0, %v12406_v7  ;;  %v12398_v47 = vld [vmem:[%s15797_s13 + $0xe0] sm:$0xf]  ;;  %v12335_v18 = vor.u32 %v13627_v22, %v12334_v38 }
 0x869   : > { %v12471_v37 = vor.u32 %v13661_v30, %v12470_v5  ;;  %v12534_v46 = vld [vmem:[%s15797_s13 + $0x1f0] sm:$0xf]  ;;  %v13677_v40 = vld [vmem:[%s15797_s13 + $0x1f4] sm:$0xf0]  ;;  %8611 = vmatpush.bf16.msra.mxu0 %v12343_v60  ;;  %v13643_v16 = vld [vmem:[%s15797_s13 + $0xe4] sm:$0xf0] }
 0x86a   : > { %v12535_v44 = vor.u32 %v13677_v40, %v12534_v46  ;;  %8625 = vmatpush.bf16.msra.mxu1 %v12407_v33  ;;  %v12399_v20 = vor.u32 %v13643_v16, %v12398_v47  ;;  %v12462_v43 = vld [vmem:[%s15797_s13 + $0x160] sm:$0xf]  ;;  %v13659_v58 = vld [vmem:[%s15797_s13 + $0x164] sm:$0xf0]  ;;  %v12326_v8 = vld [vmem:[%s15797_s13 + $0x50] sm:$0xf] }
 0x86b   : > { %8639 = vmatpush.bf16.msra.mxu2 %v12471_v37  ;;  %v12526_v31 = vld [vmem:[%s15797_s13 + $0x1e0] sm:$0xf]  ;;  %v12463_v39 = vor.u32 %v13659_v58, %v12462_v43  ;;  %v13675_v19 = vld [vmem:[%s15797_s13 + $0x1e4] sm:$0xf0]  ;;  %v13625_v27 = vld [vmem:[%s15797_s13 + $0x54] sm:$0xf0] }
 0x86c   : > { %8653 = vmatpush.bf16.msra.mxu3 %v12535_v44  ;;  %v12527_v34 = vor.u32 %v13675_v19, %v12526_v31  ;;  %v12390_v59 = vld [vmem:[%s15797_s13 + $0xd0] sm:$0xf]  ;;  %v13641_v55 = vld [vmem:[%s15797_s13 + $0xd4] sm:$0xf0]  ;;  %v12327_v9 = vor.u32 %v13625_v27, %v12326_v8  ;;  %v12318_v26 = vld [vmem:[%s15797_s13 + $0x40] sm:$0xf] }
 0x86d   : > { %v12454_v4 = vld [vmem:[%s15797_s13 + $0x150] sm:$0xf]  ;;  %8612 = vmatpush.bf16.msra.mxu0 %v12335_v18  ;;  %v13657_v11 = vld [vmem:[%s15797_s13 + $0x154] sm:$0xf0]  ;;  %v12391_v42 = vor.u32 %v13641_v55, %v12390_v59  ;;  %v13623_v48 = vld [vmem:[%s15797_s13 + $0x44] sm:$0xf0] }
 0x86e   : > { %v12518_v12 = vld [vmem:[%s15797_s13 + $0x1d0] sm:$0xf]  ;;  %v13673_v6 = vld [vmem:[%s15797_s13 + $0x1d4] sm:$0xf0]  ;;  %8626 = vmatpush.bf16.msra.mxu1 %v12399_v20  ;;  %v12455_v21 = vor.u32 %v13657_v11, %v12454_v4  ;;  %v12382_v57 = vld [vmem:[%s15797_s13 + $0xc0] sm:$0xf]  ;;  %v12319_v35 = vor.u32 %v13623_v48, %v12318_v26 }
 0x86f   : > { %8640 = vmatpush.bf16.msra.mxu2 %v12463_v39  ;;  %v12519_v3 = vor.u32 %v13673_v6, %v12518_v12  ;;  %v13639_v51 = vld [vmem:[%s15797_s13 + $0xc4] sm:$0xf0]  ;;  %v12446_v45 = vld [vmem:[%s15797_s13 + $0x140] sm:$0xf]  ;;  %v12310_v10 = vld [vmem:[%s15797_s13 + $0x30] sm:$0xf] }
 0x870   : > { %8654 = vmatpush.bf16.msra.mxu3 %v12527_v34  ;;  %v13655_v52 = vld [vmem:[%s15797_s13 + $0x144] sm:$0xf0]  ;;  %v12510_v15 = vld [vmem:[%s15797_s13 + $0x1c0] sm:$0xf]  ;;  %v12383_v54 = vor.u32 %v13639_v51, %v12382_v57  ;;  %v13621_v29 = vld [vmem:[%s15797_s13 + $0x34] sm:$0xf0] }
 0x871   : > { %v13671_v2 = vld [vmem:[%s15797_s13 + $0x1c4] sm:$0xf0]  ;;  %8613 = vmatpush.bf16.msra.mxu0 %v12327_v9  ;;  %v12447_v61 = vor.u32 %v13655_v52, %v12446_v45  ;;  %v12374_v50 = vld [vmem:[%s15797_s13 + $0xb0] sm:$0xf]  ;;  %v13637_v24 = vld [vmem:[%s15797_s13 + $0xb4] sm:$0xf0]  ;;  %v12311_v13 = vor.u32 %v13621_v29, %v12310_v10 }
 0x872   : > { %8627 = vmatpush.bf16.msra.mxu1 %v12391_v42  ;;  %v12511_v17 = vor.u32 %v13671_v2, %v12510_v15  ;;  %v12438_v63 = vld [vmem:[%s15797_s13 + $0x130] sm:$0xf]  ;;  %v13653_v36 = vld [vmem:[%s15797_s13 + $0x134] sm:$0xf0]  ;;  %v12375_v28 = vor.u32 %v13637_v24, %v12374_v50  ;;  %v12302_v53 = vld [vmem:[%s15797_s13 + $0x20] sm:$0xf] }
 0x873   : > { %8641 = vmatpush.bf16.msra.mxu2 %v12455_v21  ;;  %v12502_v1 = vld [vmem:[%s15797_s13 + $0x1b0] sm:$0xf]  ;;  %v13669_v32 = vld [vmem:[%s15797_s13 + $0x1b4] sm:$0xf0]  ;;  %v12439_v62 = vor.u32 %v13653_v36, %v12438_v63  ;;  %v13619_v23 = vld [vmem:[%s15797_s13 + $0x24] sm:$0xf0] }
 0x874   : > { %8655 = vmatpush.bf16.msra.mxu3 %v12519_v3  ;;  %v12366_v49 = vld [vmem:[%s15797_s13 + $0xa0] sm:$0xf]  ;;  %v12503_v56 = vor.u32 %v13669_v32, %v12502_v1  ;;  %v13635_v41 = vld [vmem:[%s15797_s13 + $0xa4] sm:$0xf0]  ;;  %v12303_v0 = vor.u32 %v13619_v23, %v12302_v53  ;;  %v12294_v33 = vld [vmem:[%s15797_s13 + $0x10] sm:$0xf] }
 0x875   : > { %8614 = vmatpush.bf16.msra.mxu0 %v12319_v35  ;;  %v12430_v25 = vld [vmem:[%s15797_s13 + $0x120] sm:$0xf]  ;;  %v13651_v14 = vld [vmem:[%s15797_s13 + $0x124] sm:$0xf0]  ;;  %v12367_v5 = vor.u32 %v13635_v41, %v12366_v49  ;;  %v13617_v37 = vld [vmem:[%s15797_s13 + $0x14] sm:$0xf0] }
 0x876   : > { %8628 = vmatpush.bf16.msra.mxu1 %v12383_v54  ;;  %v12494_v7 = vld [vmem:[%s15797_s13 + $0x1a0] sm:$0xf]  ;;  %v13667_v60 = vld [vmem:[%s15797_s13 + $0x1a4] sm:$0xf0]  ;;  %v12431_v30 = vor.u32 %v13651_v14, %v12430_v25  ;;  %v12358_v46 = vld [vmem:[%s15797_s13 + $0x90] sm:$0xf]  ;;  %v12295_v18 = vor.u32 %v13617_v37, %v12294_v33 }
 0x877   : > { %8642 = vmatpush.bf16.msra.mxu2 %v12447_v61  ;;  %v12495_v40 = vor.u32 %v13667_v60, %v12494_v7  ;;  %v13633_v38 = vld [vmem:[%s15797_s13 + $0x94] sm:$0xf0]  ;;  %v12422_v44 = vld [vmem:[%s15797_s13 + $0x110] sm:$0xf]  ;;  %v12286_v20 = vld [vmem:[%s15797_s13] sm:$0xf] }
 0x878   : > { %8656 = vmatpush.bf16.msra.mxu3 %v12511_v17  ;;  %v13649_v22 = vld [vmem:[%s15797_s13 + $0x114] sm:$0xf0]  ;;  %v12486_v47 = vld [vmem:[%s15797_s13 + $0x190] sm:$0xf]  ;;  %v13615_v43 = vld [vmem:[%s15797_s13 + $0x4] sm:$0xf0]  ;;  %v12359_v58 = vor.u32 %v13633_v38, %v12358_v46 }
 0x879   : > { %8615 = vmatpush.bf16.msra.mxu0 %v12311_v13  ;;  %v13665_v16 = vld [vmem:[%s15797_s13 + $0x194] sm:$0xf0]  ;;  %v12423_v31 = vor.u32 %v13649_v22, %v12422_v44  ;;  %v12350_v39 = vld [vmem:[%s15797_s13 + $0x80] sm:$0xf]  ;;  %v13631_v19 = vld [vmem:[%s15797_s13 + $0x84] sm:$0xf0]  ;;  %v12287_v12 = vor.u32 %v13615_v43, %v12286_v20 }
 0x87a   : > { %8629 = vmatpush.bf16.msra.mxu1 %v12375_v28  ;;  %v12414_v8 = vld [vmem:[%s15797_s13 + $0x100] sm:$0xf]  ;;  %v12487_v27 = vor.u32 %v13665_v16, %v12486_v47  ;;  %v13647_v34 = vld [vmem:[%s15797_s13 + $0x104] sm:$0xf0]  ;;  %v12598_v4 = vld [vmem:[%s15797_s13 + $0x270] sm:$0xf]  ;;  %v12351_v26 = vor.u32 %v13631_v19, %v12350_v39 }
 0x87b   : > { %8643 = vmatpush.bf16.msra.mxu2 %v12439_v62  ;;  %v12478_v59 = vld [vmem:[%s15797_s13 + $0x180] sm:$0xf]  ;;  %v13663_v55 = vld [vmem:[%s15797_s13 + $0x184] sm:$0xf0]  ;;  %v13693_v9 = vld [vmem:[%s15797_s13 + $0x274] sm:$0xf0]  ;;  %v12415_v48 = vor.u32 %v13647_v34, %v12414_v8 }
 0x87c   : > { %8657 = vmatpush.bf16.msra.mxu3 %v12503_v56  ;;  %v12662_v11 = vld [vmem:[%s15797_s13 + $0x2f0] sm:$0xf]  ;;  %v13709_v6 = vld [vmem:[%s15797_s13 + $0x2f4] sm:$0xf0]  ;;  %v12479_v51 = vor.u32 %v13663_v55, %v12478_v59  ;;  %v12599_v45 = vor.u32 %v13693_v9, %v12598_v4  ;;  %v12590_v52 = vld [vmem:[%s15797_s13 + $0x260] sm:$0xf] }
 0x87d   : > { %8616 = vmatpush.bf16.msra.mxu0 %v12303_v0  ;;  %v12726_v42 = vld [vmem:[%s15797_s13 + $0x370] sm:$0xf]  ;;  %v13725_v21 = vld [vmem:[%s15797_s13 + $0x374] sm:$0xf0]  ;;  %v13691_v15 = vld [vmem:[%s15797_s13 + $0x264] sm:$0xf0]  ;;  %v12663_v2 = vor.u32 %v13709_v6, %v12662_v11 }
 0x87e   : > { %8630 = vmatpush.bf16.msra.mxu1 %v12367_v5  ;;  %v12790_v57 = vld [vmem:[%s15797_s13 + $0x3f0] sm:$0xf]  ;;  %v13741_v3 = vld [vmem:[%s15797_s13 + $0x3f4] sm:$0xf0]  ;;  %v12727_v35 = vor.u32 %v13725_v21, %v12726_v42  ;;  %v12654_v54 = vld [vmem:[%s15797_s13 + $0x2e0] sm:$0xf]  ;;  %v12591_v32 = vor.u32 %v13691_v15, %v12590_v52 }
 0x87f   : > { %8644 = vmatpush.bf16.msra.mxu2 %v12431_v30  ;;  %v13707_v61 = vld [vmem:[%s15797_s13 + $0x2e4] sm:$0xf0]  ;;  %v12718_v10 = vld [vmem:[%s15797_s13 + $0x360] sm:$0xf]  ;;  %v12791_v29 = vor.u32 %v13741_v3, %v12790_v57  ;;  %v12582_v13 = vld [vmem:[%s15797_s13 + $0x250] sm:$0xf] }
 0x880   : > { %8658 = vmatpush.bf16.msra.mxu3 %v12495_v40  ;;  %v13723_v50 = vld [vmem:[%s15797_s13 + $0x364] sm:$0xf0]  ;;  %v12782_v17 = vld [vmem:[%s15797_s13 + $0x3e0] sm:$0xf]  ;;  %v13689_v28 = vld [vmem:[%s15797_s13 + $0x254] sm:$0xf0]  ;;  %v12655_v23 = vor.u32 %v13707_v61, %v12654_v54 }
 0x881   : > { %8617 = vmatpush.bf16.msra.mxu0 %v12295_v18  ;;  %v13739_v24 = vld [vmem:[%s15797_s13 + $0x3e4] sm:$0xf0]  ;;  %v12254_v63 = vld [vmem:[#allocation2] sm:$0xf]  ;;  %v12719_v49 = vor.u32 %v13723_v50, %v12718_v10  ;;  %v12646_v56 = vld [vmem:[%s15797_s13 + $0x2d0] sm:$0xf]  ;;  %v12583_v46 = vor.u32 %v13689_v28, %v12582_v13 }
 0x882   : > { %8631 = vmatpush.bf16.msra.mxu1 %v12359_v58  ;;  %v13610_v36 = vld [vmem:[#allocation2 + $0x1c] sm:$0xf0]  ;;  %v12262_v1 = vld [vmem:[#allocation2 + $0x8] sm:$0xf]  ;;  %v13705_v41 = vld [vmem:[%s15797_s13 + $0x2d4] sm:$0xf0]  ;;  %v12783_v7 = vor.u32 %v13739_v24, %v12782_v17 }
 0x883   : > { %8645 = vmatpush.bf16.msra.mxu2 %v12423_v31  ;;  %v21233_v62 = vor.u32 %v13610_v36, %v12254_v63  ;;  %v13611_v53 = vld [vmem:[#allocation2 + $0x24] sm:$0xf0]  ;;  %v12710_v25 = vld [vmem:[%s15797_s13 + $0x350] sm:$0xf]  ;;  %v13721_v60 = vld [vmem:[%s15797_s13 + $0x354] sm:$0xf0]  ;;  %v12647_v44 = vor.u32 %v13705_v41, %v12646_v56 }
 0x884   : > { %8659 = vmatpush.bf16.msra.mxu3 %v12487_v27  ;;  %v21238_v14 = vor.u32 %v13611_v53, %v12262_v1  ;;  %v12774_v0 = vld [vmem:[%s15797_s13 + $0x3d0] sm:$0xf]  ;;  %v13737_v5 = vld [vmem:[%s15797_s13 + $0x3d4] sm:$0xf0]  ;;  %v13606_v30 = vld [vmem:[#allocation2 + $0x4] sm:$0xf]  ;;  %v12711_v22 = vor.u32 %v13721_v60, %v12710_v25 }
 0x885   : > { %8618 = vmatpush.bf16.msra.mxu0 %v12287_v12  ;;  %v12256_v33 = vld [vmem:[#allocation2 + $0x20] sm:$0xf0]  ;;  %v13607_v37 = vld [vmem:[#allocation2 + $0xc] sm:$0xf]  ;;  %v12574_v47 = vld [vmem:[%s15797_s13 + $0x240] sm:$0xf]  ;;  %v12775_v43 = vor.u32 %v13737_v5, %v12774_v0 }
 0x886   : > { %8632 = vmatpush.bf16.msra.mxu1 %v12351_v26  ;;  %v21245_v40 = vor.u32 %v13606_v30, %v12256_v33  ;;  %v12264_v38 = vld [vmem:[#allocation2 + $0x28] sm:$0xf0]  ;;  %v13687_v16 = vld [vmem:[%s15797_s13 + $0x244] sm:$0xf0]  ;;  %v12638_v18 = vld [vmem:[%s15797_s13 + $0x2c0] sm:$0xf] }
 0x887   : > { %8646 = vmatpush.bf16.msra.mxu2 %v12415_v48  ;;  %v21250_v20 = vor.u32 %v13607_v37, %v12264_v38  ;;  %v13703_v58 = vld [vmem:[%s15797_s13 + $0x2c4] sm:$0xf0]  ;;  %v12702_v31 = vld [vmem:[%s15797_s13 + $0x340] sm:$0xf]  ;;  %v12575_v27 = vor.u32 %v13687_v16, %v12574_v47  ;;  %v12566_v55 = vld [vmem:[%s15797_s13 + $0x230] sm:$0xf] }
 0x888   : > { %8660 = vmatpush.bf16.msra.mxu3 %v12479_v51  ;;  %8619 = vmatmul.bf16.vlgmr.msra.gmra.mxu0 %v21233_v62  ;;  %v13719_v39 = vld [vmem:[%s15797_s13 + $0x344] sm:$0xf0]  ;;  %v12766_v19 = vld [vmem:[%s15797_s13 + $0x3c0] sm:$0xf]  ;;  %v12639_v34 = vor.u32 %v13703_v58, %v12638_v18  ;;  %v13685_v4 = vld [vmem:[%s15797_s13 + $0x234] sm:$0xf0] }
 0x889   : > { %8667 = vmatpush.bf16.msrb.mxu0 %v12599_v45  ;;  %8633 = vmatmul.bf16.vlgmr.msra.gmra.mxu1 %v21245_v40  ;;  %v13735_v8 = vld [vmem:[%s15797_s13 + $0x3c4] sm:$0xf0]  ;;  %v12703_v59 = vor.u32 %v13719_v39, %v12702_v31  ;;  %v12630_v9 = vld [vmem:[%s15797_s13 + $0x2b0] sm:$0xf]  ;;  %v13701_v12 = vld [vmem:[%s15797_s13 + $0x2b4] sm:$0xf0]  ;;  %v12567_v48 = vor.u32 %v13685_v4, %v12566_v55 }
 0x88a   : > { %8681 = vmatpush.bf16.msrb.mxu1 %v12663_v2  ;;  %8647 = vmatmul.bf16.vlgmr.msra.gmra.mxu2 %v21238_v14  ;;  %v12767_v11 = vor.u32 %v13735_v8, %v12766_v19  ;;  %v12694_v6 = vld [vmem:[%s15797_s13 + $0x330] sm:$0xf]  ;;  %v13717_v42 = vld [vmem:[%s15797_s13 + $0x334] sm:$0xf0]  ;;  %v12631_v57 = vor.u32 %v13701_v12, %v12630_v9  ;;  %v12558_v51 = vld [vmem:[%s15797_s13 + $0x220] sm:$0xf] }
 0x88b   : > { %8695 = vmatpush.bf16.msrb.mxu2 %v12727_v35  ;;  %8661 = vmatmul.bf16.vlgmr.msra.gmra.mxu3 %v21250_v20  ;;  %v12758_v21 = vld [vmem:[%s15797_s13 + $0x3b0] sm:$0xf]  ;;  %v13733_v26 = vld [vmem:[%s15797_s13 + $0x3b4] sm:$0xf0]  ;;  %v12695_v3 = vor.u32 %v13717_v42, %v12694_v6  ;;  %v13683_v45 = vld [vmem:[%s15797_s13 + $0x224] sm:$0xf0] }
 0x88c   : > { %8709 = vmatpush.bf16.msrb.mxu3 %v12791_v29  ;;  %v12622_v52 = vld [vmem:[%s15797_s13 + $0x2a0] sm:$0xf]  ;;  %v12759_v15 = vor.u32 %v13733_v26, %v12758_v21  ;;  %v13699_v2 = vld [vmem:[%s15797_s13 + $0x2a4] sm:$0xf0]  ;;  %v12559_v29 = vor.u32 %v13683_v45, %v12558_v51  ;;  %v12550_v50 = vld [vmem:[%s15797_s13 + $0x210] sm:$0xf] }
 0x88d   : > { %8668 = vmatpush.bf16.msrb.mxu0 %v12591_v32  ;;  %v12686_v35 = vld [vmem:[%s15797_s13 + $0x320] sm:$0xf]  ;;  %v13715_v54 = vld [vmem:[%s15797_s13 + $0x324] sm:$0xf0]  ;;  %v12623_v17 = vor.u32 %v13699_v2, %v12622_v52  ;;  %v13681_v63 = vld [vmem:[%s15797_s13 + $0x214] sm:$0xf0] }
 0x88e   : > { %8682 = vmatpush.bf16.msrb.mxu1 %v12655_v23  ;;  %v12750_v61 = vld [vmem:[%s15797_s13 + $0x3a0] sm:$0xf]  ;;  %v13731_v10 = vld [vmem:[%s15797_s13 + $0x3a4] sm:$0xf0]  ;;  %v12687_v24 = vor.u32 %v13715_v54, %v12686_v35  ;;  %v12614_v36 = vld [vmem:[%s15797_s13 + $0x290] sm:$0xf]  ;;  %v12551_v41 = vor.u32 %v13681_v63, %v12550_v50 }
 0x88f   : > { %8696 = vmatpush.bf16.msrb.mxu2 %v12719_v49  ;;  %v13697_v1 = vld [vmem:[%s15797_s13 + $0x294] sm:$0xf0]  ;;  %v12751_v32 = vor.u32 %v13731_v10, %v12750_v61  ;;  %v12678_v13 = vld [vmem:[%s15797_s13 + $0x310] sm:$0xf]  ;;  %v12542_v49 = vld [vmem:[%s15797_s13 + $0x200] sm:$0xf] }
 0x890   : > { %8710 = vmatpush.bf16.msrb.mxu3 %v12783_v7  ;;  %v13713_v28 = vld [vmem:[%s15797_s13 + $0x314] sm:$0xf0]  ;;  %v12742_v53 = vld [vmem:[%s15797_s13 + $0x390] sm:$0xf]  ;;  %v13679_v56 = vld [vmem:[%s15797_s13 + $0x204] sm:$0xf0]  ;;  %v12615_v5 = vor.u32 %v13697_v1, %v12614_v36 }
 0x891   : > { %8669 = vmatpush.bf16.msrb.mxu0 %v12583_v46  ;;  %v13729_v23 = vld [vmem:[%s15797_s13 + $0x394] sm:$0xf0]  ;;  %v12606_v25 = vld [vmem:[%s15797_s13 + $0x280] sm:$0xf]  ;;  %v13695_v7 = vld [vmem:[%s15797_s13 + $0x284] sm:$0xf0]  ;;  %v12679_v30 = vor.u32 %v13713_v28, %v12678_v13  ;;  %v12543_v58 = vor.u32 %v13679_v56, %v12542_v49 }
 0x892   : > { %8683 = vmatpush.bf16.msrb.mxu1 %v12647_v44  ;;  %v12670_v60 = vld [vmem:[%s15797_s13 + $0x300] sm:$0xf]  ;;  %v13711_v0 = vld [vmem:[%s15797_s13 + $0x304] sm:$0xf0]  ;;  %v13628_v46 = vld [vmem:[%s15797_s13 + $0x74] sm:$0xf]  ;;  %v12743_v38 = vor.u32 %v13729_v23, %v12742_v53  ;;  %v12607_v8 = vor.u32 %v13695_v7, %v12606_v25 }
 0x893   : > { %8697 = vmatpush.bf16.msrb.mxu2 %v12711_v22  ;;  %v12734_v33 = vld [vmem:[%s15797_s13 + $0x380] sm:$0xf]  ;;  %v13727_v37 = vld [vmem:[%s15797_s13 + $0x384] sm:$0xf0]  ;;  %v12344_v44 = vld [vmem:[%s15797_s13 + $0x78] sm:$0xf0] }
 0x894   : > { %8711 = vmatpush.bf16.msrb.mxu3 %v12775_v43  ;;  %v13644_v22 = vld [vmem:[%s15797_s13 + $0xf4] sm:$0xf]  ;;  %v12408_v47 = vld [vmem:[%s15797_s13 + $0xf8] sm:$0xf0]  ;;  %v12270_v39 = vld [vmem:[#allocation2 + $0x10] sm:$0xf]  ;;  %v12735_v4 = vor.u32 %v13727_v37, %v12734_v33  ;;  %v12347_v9 = vor.u32 %v13628_v46, %v12344_v44 }
 0x895   : > { %8670 = vmatpush.bf16.msrb.mxu0 %v12575_v27  ;;  %v13660_v16 = vld [vmem:[%s15797_s13 + $0x174] sm:$0xf]  ;;  %v12472_v18 = vld [vmem:[%s15797_s13 + $0x178] sm:$0xf0]  ;;  %v13612_v19 = vld [vmem:[#allocation2 + $0x2c] sm:$0xf0]  ;;  %v12671_v27 = vor.u32 %v13711_v0, %v12670_v60  ;;  %v12411_v42 = vor.u32 %v13644_v22, %v12408_v47 }
 0x896   : > { %8684 = vmatpush.bf16.msrb.mxu1 %v12639_v34  ;;  %v13676_v43 = vld [vmem:[%s15797_s13 + $0x1f4] sm:$0xf]  ;;  %v12536_v31 = vld [vmem:[%s15797_s13 + $0x1f8] sm:$0xf0]  ;;  %v12278_v34 = vld [vmem:[#allocation2 + $0x18] sm:$0xf]  ;;  %v12475_v21 = vor.u32 %v13660_v16, %v12472_v18  ;;  %v21302_v51 = vor.u32 %v13612_v19, %v12270_v39 }
 0x897   : > { %8698 = vmatpush.bf16.msrb.mxu2 %v12703_v59  ;;  %v13613_v59 = vld [vmem:[#allocation2 + $0x34] sm:$0xf0]  ;;  %v13608_v55 = vld [vmem:[#allocation2 + $0x14] sm:$0xf]  ;;  %v13609_v12 = vld [vmem:[#allocation2 + $0x1c] sm:$0xf] }
 0x898   : > { %8712 = vmatpush.bf16.msrb.mxu3 %v12767_v11  ;;  %v12272_v11 = vld [vmem:[#allocation2 + $0x30] sm:$0xf0]  ;;  %v12280_v6 = vld [vmem:[#allocation2 + $0x38] sm:$0xf0]  ;;  %v13626_v26 = vld [vmem:[%s15797_s13 + $0x64] sm:$0xf]  ;;  %v21307_v2 = vor.u32 %v13613_v59, %v12278_v34 }
 0x899   : > { %8671 = vmatpush.bf16.msrb.mxu0 %v12567_v48  ;;  %v12336_v48 = vld [vmem:[%s15797_s13 + $0x68] sm:$0xf0]  ;;  %v13658_v52 = vld [vmem:[%s15797_s13 + $0x164] sm:$0xf]  ;;  %v21309_v35 = vor.u32 %v13608_v55, %v12272_v11  ;;  %v21313_v10 = vor.u32 %v13609_v12, %v12280_v6  ;;  %v12328_v63 = vld [vmem:[%s15797_s13 + $0x58] sm:$0xf0] }
 0x89a   : > { %8685 = vmatpush.bf16.msrb.mxu1 %v12631_v57  ;;  %v13642_v57 = vld [vmem:[%s15797_s13 + $0xe4] sm:$0xf]  ;;  %v12400_v45 = vld [vmem:[%s15797_s13 + $0xe8] sm:$0xf0]  ;;  %v13640_v36 = vld [vmem:[%s15797_s13 + $0xd4] sm:$0xf] }
 0x89b   : > { %8699 = vmatpush.bf16.msrb.mxu2 %v12695_v3  ;;  %v12539_v3 = vor.u32 %v13676_v43, %v12536_v31  ;;  %v13674_v54 = vld [vmem:[%s15797_s13 + $0x1e4] sm:$0xf]  ;;  %v12528_v61 = vld [vmem:[%s15797_s13 + $0x1e8] sm:$0xf0]  ;;  %v12403_v50 = vor.u32 %v13642_v57, %v12400_v45  ;;  %v13656_v13 = vld [vmem:[%s15797_s13 + $0x154] sm:$0xf] }
 0x89c   : > { %8713 = vmatpush.bf16.msrb.mxu3 %v12759_v15  ;;  %v12464_v15 = vld [vmem:[%s15797_s13 + $0x168] sm:$0xf0]  ;;  %v12531_v1 = vor.u32 %v13674_v54, %v12528_v61  ;;  %v12456_v28 = vld [vmem:[%s15797_s13 + $0x158] sm:$0xf0]  ;;  %v13672_v53 = vld [vmem:[%s15797_s13 + $0x1d4] sm:$0xf] }
 0x89d   : > { %8672 = vmatpush.bf16.msrb.mxu0 %v12559_v29  ;;  %v12339_v29 = vor.u32 %v13626_v26, %v12336_v48  ;;  %v12520_v23 = vld [vmem:[%s15797_s13 + $0x1d8] sm:$0xf0]  ;;  %v13622_v25 = vld [vmem:[%s15797_s13 + $0x44] sm:$0xf]  ;;  %v12320_v7 = vld [vmem:[%s15797_s13 + $0x48] sm:$0xf0] }
 0x89e   : > { %8686 = vmatpush.bf16.msrb.mxu1 %v12623_v17  ;;  %v12467_v17 = vor.u32 %v13658_v52, %v12464_v15  ;;  %v13638_v60 = vld [vmem:[%s15797_s13 + $0xc4] sm:$0xf]  ;;  %v12523_v0 = vor.u32 %v13672_v53, %v12520_v23  ;;  %v12448_v33 = vld [vmem:[%s15797_s13 + $0x148] sm:$0xf0]  ;;  %v13620_v47 = vld [vmem:[%s15797_s13 + $0x34] sm:$0xf] }
 0x89f   : > { %8700 = vmatpush.bf16.msrb.mxu2 %v12687_v24  ;;  %v13624_v24 = vld [vmem:[%s15797_s13 + $0x54] sm:$0xf]  ;;  %v13670_v37 = vld [vmem:[%s15797_s13 + $0x1c4] sm:$0xf]  ;;  %v12512_v46 = vld [vmem:[%s15797_s13 + $0x1c8] sm:$0xf0] }
 0x8a0   : > { %8714 = vmatpush.bf16.msrb.mxu3 %v12751_v32  ;;  %v12392_v32 = vld [vmem:[%s15797_s13 + $0xd8] sm:$0xf0]  ;;  %v12331_v49 = vor.u32 %v13624_v24, %v12328_v63  ;;  %v13636_v18 = vld [vmem:[%s15797_s13 + $0xb4] sm:$0xf]  ;;  %v12515_v43 = vor.u32 %v13670_v37, %v12512_v46  ;;  %v13618_v55 = vld [vmem:[%s15797_s13 + $0x24] sm:$0xf] }
 0x8a1   : > { %8673 = vmatpush.bf16.msrb.mxu0 %v12551_v41  ;;  %v12395_v56 = vor.u32 %v13640_v36, %v12392_v32  ;;  %v12459_v41 = vor.u32 %v13656_v13, %v12456_v28  ;;  %v12312_v16 = vld [vmem:[%s15797_s13 + $0x38] sm:$0xf0]  ;;  %v13652_v31 = vld [vmem:[%s15797_s13 + $0x134] sm:$0xf]  ;;  %v12368_v12 = vld [vmem:[%s15797_s13 + $0xa8] sm:$0xf0] }
 0x8a2   : > { %8687 = vmatpush.bf16.msrb.mxu1 %v12615_v5  ;;  %v12384_v5 = vld [vmem:[%s15797_s13 + $0xc8] sm:$0xf0]  ;;  %v12440_v39 = vld [vmem:[%s15797_s13 + $0x138] sm:$0xf0]  ;;  %v13668_v19 = vld [vmem:[%s15797_s13 + $0x1b4] sm:$0xf] }
 0x8a3   : > { %8701 = vmatpush.bf16.msrb.mxu2 %v12679_v30  ;;  %v13654_v30 = vld [vmem:[%s15797_s13 + $0x144] sm:$0xf]  ;;  %v12387_v44 = vor.u32 %v13638_v60, %v12384_v5  ;;  %v12443_v59 = vor.u32 %v13652_v31, %v12440_v39  ;;  %v12496_v26 = vld [vmem:[%s15797_s13 + $0x1a8] sm:$0xf0]  ;;  %v13616_v45 = vld [vmem:[%s15797_s13 + $0x14] sm:$0xf] }
 0x8a4   : > { %8715 = vmatpush.bf16.msrb.mxu3 %v12743_v38  ;;  %v12323_v38 = vor.u32 %v13622_v25, %v12320_v7  ;;  %v12451_v22 = vor.u32 %v13654_v30, %v12448_v33  ;;  %v13650_v6 = vld [vmem:[%s15797_s13 + $0x124] sm:$0xf]  ;;  %v12296_v52 = vld [vmem:[%s15797_s13 + $0x18] sm:$0xf0]  ;;  %v13632_v15 = vld [vmem:[%s15797_s13 + $0x94] sm:$0xf] }
 0x8a5   : > { %8674 = vmatpush.bf16.msrb.mxu0 %v12543_v58  ;;  %v12376_v58 = vld [vmem:[%s15797_s13 + $0xb8] sm:$0xf0]  ;;  %v12299_v63 = vor.u32 %v13616_v45, %v12296_v52  ;;  %v13614_v36 = vld [vmem:[%s15797_s13 + $0x4] sm:$0xf]  ;;  %v12352_v53 = vld [vmem:[%s15797_s13 + $0x88] sm:$0xf0] }
 0x8a6   : > { %8688 = vmatpush.bf16.msrb.mxu1 %v12607_v8  ;;  %v12504_v8 = vld [vmem:[%s15797_s13 + $0x1b8] sm:$0xf0]  ;;  %v12379_v34 = vor.u32 %v13636_v18, %v12376_v58  ;;  %v13630_v28 = vld [vmem:[%s15797_s13 + $0x84] sm:$0xf]  ;;  %v12480_v25 = vld [vmem:[%s15797_s13 + $0x188] sm:$0xf0] }
 0x8a7   : > { %8702 = vmatpush.bf16.msrb.mxu2 %v12671_v27  ;;  %v12315_v27 = vor.u32 %v13620_v47, %v12312_v16  ;;  %v12507_v11 = vor.u32 %v13668_v19, %v12504_v8  ;;  %v12360_v61 = vld [vmem:[%s15797_s13 + $0x98] sm:$0xf0]  ;;  %v13646_v23 = vld [vmem:[%s15797_s13 + $0x104] sm:$0xf]  ;;  %v13692_v7 = vld [vmem:[%s15797_s13 + $0x274] sm:$0xf]  ;;  %v12355_v46 = vor.u32 %v13630_v28, %v12352_v53 }
 0x8a8   : > { %8716 = vmatpush.bf16.msrb.mxu3 %v12735_v4  ;;  %8675 = vmatmul.bf16.vlgmr.msrb.gmra.mxu0 %v21302_v51  ;;  %v12304_v4 = vld [vmem:[%s15797_s13 + $0x28] sm:$0xf0]  ;;  %v12488_v24 = vld [vmem:[%s15797_s13 + $0x198] sm:$0xf0]  ;;  %v12363_v32 = vor.u32 %v13632_v15, %v12360_v61  ;;  %v13724_v33 = vld [vmem:[%s15797_s13 + $0x374] sm:$0xf] }
 0x8a9   : > { %8723 = vmatpush.bf16.msra.mxu0 %v12347_v9  ;;  %8689 = vmatmul.bf16.vlgmr.msrb.gmra.mxu1 %v21309_v35  ;;  %v13634_v9 = vld [vmem:[%s15797_s13 + $0xa4] sm:$0xf]  ;;  %v12307_v48 = vor.u32 %v13618_v55, %v12304_v4  ;;  %v12600_v60 = vld [vmem:[%s15797_s13 + $0x278] sm:$0xf0]  ;;  %v12592_v31 = vld [vmem:[%s15797_s13 + $0x268] sm:$0xf0] }
 0x8aa   : > { %8737 = vmatpush.bf16.msra.mxu1 %v12411_v42  ;;  %8703 = vmatmul.bf16.vlgmr.msrb.gmra.mxu2 %v21307_v2  ;;  %v12432_v42 = vld [vmem:[%s15797_s13 + $0x128] sm:$0xf0]  ;;  %v12371_v57 = vor.u32 %v13634_v9, %v12368_v12  ;;  %v12664_v30 = vld [vmem:[%s15797_s13 + $0x2f8] sm:$0xf0]  ;;  %v12603_v16 = vor.u32 %v13692_v7, %v12600_v60  ;;  %v13690_v58 = vld [vmem:[%s15797_s13 + $0x264] sm:$0xf] }
 0x8ab   : > { %8751 = vmatpush.bf16.msra.mxu2 %v12475_v21  ;;  %8717 = vmatmul.bf16.vlgmr.msrb.gmra.mxu3 %v21313_v10  ;;  %v13666_v21 = vld [vmem:[%s15797_s13 + $0x1a4] sm:$0xf]  ;;  %v12728_v37 = vld [vmem:[%s15797_s13 + $0x378] sm:$0xf0]  ;;  %v12656_v8 = vld [vmem:[%s15797_s13 + $0x2e8] sm:$0xf0]  ;;  %v12595_v4 = vor.u32 %v13690_v58, %v12592_v31 }
 0x8ac   : > { %8765 = vmatpush.bf16.msra.mxu3 %v12539_v3  ;;  %v12435_v3 = vor.u32 %v13650_v6, %v12432_v42  ;;  %v12499_v54 = vor.u32 %v13666_v21, %v12496_v26  ;;  %v13706_v39 = vld [vmem:[%s15797_s13 + $0x2e4] sm:$0xf]  ;;  %v12784_v55 = vld [vmem:[%s15797_s13 + $0x3e8] sm:$0xf0]  ;;  %v13688_v12 = vld [vmem:[%s15797_s13 + $0x254] sm:$0xf] }
 0x8ad   : > { %8724 = vmatpush.bf16.msra.mxu0 %v12339_v29  ;;  %v13648_v29 = vld [vmem:[%s15797_s13 + $0x114] sm:$0xf]  ;;  %v12659_v9 = vor.u32 %v13706_v39, %v12656_v8  ;;  %v12584_v6 = vld [vmem:[%s15797_s13 + $0x258] sm:$0xf0]  ;;  %v12576_v61 = vld [vmem:[%s15797_s13 + $0x248] sm:$0xf0] }
 0x8ae   : > { %8738 = vmatpush.bf16.msra.mxu1 %v12403_v50  ;;  %v12424_v50 = vld [vmem:[%s15797_s13 + $0x118] sm:$0xf0]  ;;  %v13704_v42 = vld [vmem:[%s15797_s13 + $0x2d4] sm:$0xf]  ;;  %v12587_v52 = vor.u32 %v13688_v12, %v12584_v6  ;;  %v13678_v12 = vld [vmem:[%s15797_s13 + $0x204] sm:$0xf] }
 0x8af   : > { %8752 = vmatpush.bf16.msra.mxu2 %v12467_v17  ;;  %v13664_v17 = vld [vmem:[%s15797_s13 + $0x194] sm:$0xf]  ;;  %v12427_v13 = vor.u32 %v13648_v29, %v12424_v50  ;;  %v12648_v26 = vld [vmem:[%s15797_s13 + $0x2d8] sm:$0xf0]  ;;  %v13702_v29 = vld [vmem:[%s15797_s13 + $0x2c4] sm:$0xf] }
 0x8b0   : > { %8766 = vmatpush.bf16.msra.mxu3 %v12531_v1  ;;  %v12288_v1 = vld [vmem:[%s15797_s13 + $0x8] sm:$0xf0]  ;;  %v12776_v45 = vld [vmem:[%s15797_s13 + $0x3d8] sm:$0xf0]  ;;  %v13700_v28 = vld [vmem:[%s15797_s13 + $0x2b4] sm:$0xf] }
 0x8b1   : > { %8725 = vmatpush.bf16.msra.mxu0 %v12331_v49  ;;  %v12491_v49 = vor.u32 %v13664_v17, %v12488_v24  ;;  %v12291_v5 = vor.u32 %v13614_v36, %v12288_v1  ;;  %v12640_v50 = vld [vmem:[%s15797_s13 + $0x2c8] sm:$0xf0]  ;;  %v13734_v24 = vld [vmem:[%s15797_s13 + $0x3c4] sm:$0xf]  ;;  %v13680_v58 = vld [vmem:[%s15797_s13 + $0x214] sm:$0xf] }
 0x8b2   : > { %8739 = vmatpush.bf16.msra.mxu1 %v12395_v56  ;;  %v12416_v56 = vld [vmem:[%s15797_s13 + $0x108] sm:$0xf0]  ;;  %v12643_v36 = vor.u32 %v13702_v29, %v12640_v50  ;;  %v12552_v31 = vld [vmem:[%s15797_s13 + $0x218] sm:$0xf0]  ;;  %v13696_v39 = vld [vmem:[%s15797_s13 + $0x294] sm:$0xf] }
 0x8b3   : > { %8753 = vmatpush.bf16.msra.mxu2 %v12459_v41  ;;  %v13662_v41 = vld [vmem:[%s15797_s13 + $0x184] sm:$0xf]  ;;  %v12704_v17 = vld [vmem:[%s15797_s13 + $0x348] sm:$0xf0]  ;;  %v12616_v8 = vld [vmem:[%s15797_s13 + $0x298] sm:$0xf0] }
 0x8b4   : > { %8767 = vmatpush.bf16.msra.mxu3 %v12523_v0  ;;  %v13708_v0 = vld [vmem:[%s15797_s13 + $0x2f4] sm:$0xf]  ;;  %v12483_v47 = vor.u32 %v13662_v41, %v12480_v25  ;;  %v12760_v25 = vld [vmem:[%s15797_s13 + $0x3b8] sm:$0xf0]  ;;  %v12544_v6 = vld [vmem:[%s15797_s13 + $0x208] sm:$0xf0] }
 0x8b5   : > { %8726 = vmatpush.bf16.msra.mxu0 %v12323_v38  ;;  %v12419_v38 = vor.u32 %v13646_v23, %v12416_v56  ;;  %v12667_v18 = vor.u32 %v13708_v0, %v12664_v30  ;;  %v12632_v23 = vld [vmem:[%s15797_s13 + $0x2b8] sm:$0xf0]  ;;  %v13732_v41 = vld [vmem:[%s15797_s13 + $0x3b4] sm:$0xf]  ;;  %v12560_v30 = vld [vmem:[%s15797_s13 + $0x228] sm:$0xf0] }
 0x8b6   : > { %8740 = vmatpush.bf16.msra.mxu1 %v12387_v44  ;;  %v13740_v44 = vld [vmem:[%s15797_s13 + $0x3f4] sm:$0xf]  ;;  %v12696_v56 = vld [vmem:[%s15797_s13 + $0x338] sm:$0xf0]  ;;  %v12635_v60 = vor.u32 %v13700_v28, %v12632_v23  ;;  %s8844_s25 = scalar_lea.sflag [#allocation5], %s15782_s16  ;;  %s8855_s29 = ssub.s32 (%p14098_p5), 13, %s15785_s11 }
 0x8b7   : > { %8754 = vmatpush.bf16.msra.mxu2 %v12451_v22  ;;  %v12792_v22 = vld [vmem:[%s15797_s13 + $0x3f8] sm:$0xf0]  ;;  %p8856_p2 = scmp.lt.s32.totalorder (%p14098_p5), %s8855_s29, 2 }
 0x8b8   : > { %8768 = vmatpush.bf16.msra.mxu3 %v12515_v43  ;;  %v12731_v43 = vor.u32 %v13724_v33, %v12728_v37  ;;  %v12795_v19 = vor.u32 %v13740_v44, %v12792_v22  ;;  %v13698_v33 = vld [vmem:[%s15797_s13 + $0x2a4] sm:$0xf]  ;;  %v12763_v37 = vor.u32 %v13732_v41, %v12760_v25  ;;  %v12688_v44 = vld [vmem:[%s15797_s13 + $0x328] sm:$0xf0] }
 0x8b9   : > { %8727 = vmatpush.bf16.msra.mxu0 %v12315_v27  ;;  %v13722_v27 = vld [vmem:[%s15797_s13 + $0x364] sm:$0xf] }
 0x8ba   : > { %8741 = vmatpush.bf16.msra.mxu1 %v12379_v34  ;;  %v12720_v34 = vld [vmem:[%s15797_s13 + $0x368] sm:$0xf0]  ;;  %v13730_v22 = vld [vmem:[%s15797_s13 + $0x3a4] sm:$0xf] }
 0x8bb   : > { %8755 = vmatpush.bf16.msra.mxu2 %v12443_v59  ;;  %v13738_v59 = vld [vmem:[%s15797_s13 + $0x3e4] sm:$0xf] }
 0x8bc   : > { %8769 = vmatpush.bf16.msra.mxu3 %v12507_v11  ;;  %v12723_v11 = vor.u32 %v13722_v27, %v12720_v34  ;;  %v12787_v21 = vor.u32 %v13738_v59, %v12784_v55  ;;  %v13712_v27 = vld [vmem:[%s15797_s13 + $0x314] sm:$0xf]  ;;  %v12680_v34 = vld [vmem:[%s15797_s13 + $0x318] sm:$0xf0] }
 0x8bd   : > { %8728 = vmatpush.bf16.msra.mxu0 %v12307_v48  ;;  %v13720_v48 = vld [vmem:[%s15797_s13 + $0x354] sm:$0xf]  ;;  %v12744_v55 = vld [vmem:[%s15797_s13 + $0x398] sm:$0xf0] }
 0x8be   : > { %8742 = vmatpush.bf16.msra.mxu1 %v12371_v57  ;;  %v12712_v57 = vld [vmem:[%s15797_s13 + $0x358] sm:$0xf0]  ;;  %v13728_v59 = vld [vmem:[%s15797_s13 + $0x394] sm:$0xf] }
 0x8bf   : > { %8756 = vmatpush.bf16.msra.mxu2 %v12435_v3  ;;  %v13736_v3 = vld [vmem:[%s15797_s13 + $0x3d4] sm:$0xf]  ;;  %v12715_v15 = vor.u32 %v13720_v48, %v12712_v57  ;;  %v13710_v48 = vld [vmem:[%s15797_s13 + $0x304] sm:$0xf]  ;;  %v12672_v57 = vld [vmem:[%s15797_s13 + $0x308] sm:$0xf0] }
 0x8c0   : > { %8770 = vmatpush.bf16.msra.mxu3 %v12499_v54  ;;  %v13686_v54 = vld [vmem:[%s15797_s13 + $0x244] sm:$0xf] }
 0x8c1   : > { %8729 = vmatpush.bf16.msra.mxu0 %v12299_v63  ;;  %v12579_v63 = vor.u32 %v13686_v54, %v12576_v61  ;;  %v7925_v61 = vld [vmem:[%s21554_s12] sm:$0x3] }
 0x8c2   : > { %8743 = vmatpush.bf16.msra.mxu1 %v12363_v32  ;;  %v13684_v32 = vld [vmem:[%s15797_s13 + $0x234] sm:$0xf] }
 0x8c3   : > { %8757 = vmatpush.bf16.msra.mxu2 %v12427_v13  ;;  %v12568_v13 = vld [vmem:[%s15797_s13 + $0x238] sm:$0xf0] }
 0x8c4   : > { %8771 = vmatpush.bf16.msra.mxu3 %v12491_v49  ;;  %v13716_v49 = vld [vmem:[%s15797_s13 + $0x334] sm:$0xf]  ;;  %v12571_v7 = vor.u32 %v13684_v32, %v12568_v13 }
 0x8c5   : > { %8730 = vmatpush.bf16.msra.mxu0 %v12291_v5  ;;  %v12699_v0 = vor.u32 %v13716_v49, %v12696_v56  ;;  %v13682_v5 = vld [vmem:[%s15797_s13 + $0x224] sm:$0xf] }
 0x8c6   : > { %8744 = vmatpush.bf16.msra.mxu1 %v12355_v46  ;;  %v12624_v46 = vld [vmem:[%s15797_s13 + $0x2a8] sm:$0xf0] }
 0x8c7   : > { %8758 = vmatpush.bf16.msra.mxu2 %v12419_v38  ;;  %v13714_v38 = vld [vmem:[%s15797_s13 + $0x324] sm:$0xf] }
 0x8c8   : > { %8772 = vmatpush.bf16.msra.mxu3 %v12483_v47  ;;  %8731 = vmatmul.bf16.vlgmr.msra.gmra.mxu0 %v21233_v62  ;;  %v12779_v62 = vor.u32 %v13736_v3, %v12776_v45  ;;  %v12752_v47 = vld [vmem:[%s15797_s13 + $0x3a8] sm:$0xf0]  ;;  %v13726_v3 = vld [vmem:[%s15797_s13 + $0x384] sm:$0xf] }
 0x8c9   : > { %8779 = vmatpush.bf16.msrb.mxu0 %v12603_v16  ;;  %8745 = vmatmul.bf16.vlgmr.msra.gmra.mxu1 %v21245_v40  ;;  %v12768_v40 = vld [vmem:[%s15797_s13 + $0x3c8] sm:$0xf0]  ;;  %v12563_v16 = vor.u32 %v13682_v5, %v12560_v30 }
 0x8ca   : > { %8793 = vmatpush.bf16.msrb.mxu1 %v12667_v18  ;;  %8759 = vmatmul.bf16.vlgmr.msra.gmra.mxu2 %v21238_v14  ;;  %v12651_v14 = vor.u32 %v13704_v42, %v12648_v26  ;;  %v12771_v53 = vor.u32 %v13734_v24, %v12768_v40  ;;  %v12627_v18 = vor.u32 %v13698_v33, %v12624_v46  ;;  %v13694_v42 = vld [vmem:[%s15797_s13 + $0x284] sm:$0xf]  ;;  %v12608_v26 = vld [vmem:[%s15797_s13 + $0x288] sm:$0xf0] }
 0x8cb   : > { %8807 = vmatpush.bf16.msrb.mxu2 %v12731_v43  ;;  %8773 = vmatmul.bf16.vlgmr.msra.gmra.mxu3 %v21250_v20  ;;  %v13718_v20 = vld [vmem:[%s15797_s13 + $0x344] sm:$0xf]  ;;  %v12691_v43 = vor.u32 %v13714_v38, %v12688_v44  ;;  %v12736_v45 = vld [vmem:[%s15797_s13 + $0x388] sm:$0xf0] }
 0x8cc   : > { %8821 = vmatpush.bf16.msrb.mxu3 %v12795_v19  ;;  %v12707_v1 = vor.u32 %v13718_v20, %v12704_v17  ;;  %v12755_v19 = vor.u32 %v13730_v22, %v12752_v47  ;;  %v12739_v54 = vor.u32 %v13726_v3, %v12736_v45 }
 0x8cd   : > { %8780 = vmatpush.bf16.msrb.mxu0 %v12595_v4  ;;  %v12555_v4 = vor.u32 %v13680_v58, %v12552_v31 }
 0x8ce   : > { %8794 = vmatpush.bf16.msrb.mxu1 %v12659_v9  ;;  %v12619_v9 = vor.u32 %v13696_v39, %v12616_v8 }
 0x8cf   : > { %8808 = vmatpush.bf16.msrb.mxu2 %v12723_v11  ;;  %v12683_v11 = vor.u32 %v13712_v27, %v12680_v34 }
 0x8d0   : > { %8822 = vmatpush.bf16.msrb.mxu3 %v12787_v21  ;;  %v12747_v21 = vor.u32 %v13728_v59, %v12744_v55 }
 0x8d1   : > { %8781 = vmatpush.bf16.msrb.mxu0 %v12587_v52  ;;  %v12547_v52 = vor.u32 %v13678_v12, %v12544_v6 }
 0x8d2   : > { %8795 = vmatpush.bf16.msrb.mxu1 %v12651_v14  ;;  %v12611_v14 = vor.u32 %v13694_v42, %v12608_v26 }
 0x8d3   : > { %8809 = vmatpush.bf16.msrb.mxu2 %v12715_v15  ;;  %v12675_v15 = vor.u32 %v13710_v48, %v12672_v57 }
 0x8d4   : > { %8823 = vmatpush.bf16.msrb.mxu3 %v12779_v62  ;;  %v7927_v62 = vperm.slane %v7925_v61, 0 }
 0x8d5   : > { %8782 = vmatpush.bf16.msrb.mxu0 %v12579_v63 }
 0x8d6   : > { %8796 = vmatpush.bf16.msrb.mxu1 %v12643_v36 }
 0x8d7   : > { %8810 = vmatpush.bf16.msrb.mxu2 %v12707_v1 }
 0x8d8   : > { %8824 = vmatpush.bf16.msrb.mxu3 %v12771_v53 }
 0x8d9   : > { %8783 = vmatpush.bf16.msrb.mxu0 %v12571_v7 }
 0x8da   : > { %8797 = vmatpush.bf16.msrb.mxu1 %v12635_v60 }
 0x8db   : > { %8811 = vmatpush.bf16.msrb.mxu2 %v12699_v0 }
 0x8dc   : > { %8825 = vmatpush.bf16.msrb.mxu3 %v12763_v37 }
 0x8dd   : > { %8784 = vmatpush.bf16.msrb.mxu0 %v12563_v16 }
 0x8de   : > { %8798 = vmatpush.bf16.msrb.mxu1 %v12627_v18  ;;  %v7928_v18 = vperm.slane %v7925_v61, 1 }
 0x8df   : > { %8812 = vmatpush.bf16.msrb.mxu2 %v12691_v43 }
 0x8e0   : > { %8826 = vmatpush.bf16.msrb.mxu3 %v12755_v19 }
 0x8e1   : > { %8785 = vmatpush.bf16.msrb.mxu0 %v12555_v4 }
 0x8e2   : > { %8799 = vmatpush.bf16.msrb.mxu1 %v12619_v9 }
 0x8e3   : > { %8813 = vmatpush.bf16.msrb.mxu2 %v12683_v11 }
 0x8e4   : > { %8827 = vmatpush.bf16.msrb.mxu3 %v12747_v21 }
 0x8e5   : > { %8786 = vmatpush.bf16.msrb.mxu0 %v12547_v52 }
 0x8e6   : > { %8800 = vmatpush.bf16.msrb.mxu1 %v12611_v14 }
 0x8e7   : > { %8814 = vmatpush.bf16.msrb.mxu2 %v12675_v15 }
 0x8e8   : > { %8828 = vmatpush.bf16.msrb.mxu3 %v12739_v54  ;;  %8787 = vmatmul.bf16.vlgmr.msrb.gmra.mxu0 %v21302_v51 }
 0x8e9   : > { %8801 = vmatmul.bf16.vlgmr.msrb.gmra.mxu1 %v21309_v35 }
 0x8ea   : > { %8815 = vmatmul.bf16.vlgmr.msrb.gmra.mxu2 %v21307_v2 }
 0x8eb   : > { %8829 = vmatmul.bf16.vlgmr.msrb.gmra.mxu3 %v21313_v10 }
 0x905   : > { %v8620_v29 = vpop.f32.mrf.mxu0 }
 0x906   : > { %v8634_v50 = vpop.f32.mrf.mxu1  ;;  %v8621_v20 = vadd.f32 %v8620_v29, %v7927_v62 }
 0x908   : > { %v8635_v40 = vadd.f32 %v8634_v50, %v8621_v20 }
 0x90d   : > { %v8648_v17 = vpop.f32.mrf.mxu2  ;;  %v8622_v63 = vpop.f32.mrf.mxu0 }
 0x90e   : > { %v8662_v24 = vpop.f32.mrf.mxu3  ;;  %v8636_v51 = vpop.f32.mrf.mxu1  ;;  %v8649_v36 = vadd.f32 %v8648_v17, %v8635_v40  ;;  %v8623_v35 = vadd.f32 %v8622_v63, %v7927_v62 }
 0x910   : > { %v8663_v1 = vadd.f32 %v8662_v24, %v8649_v36  ;;  %v8637_v32 = vadd.f32 %v8636_v51, %v8623_v35 }
 0x915   : > { %v8650_v2 = vpop.f32.mrf.mxu2 }
 0x916   : > { %v8664_v10 = vpop.f32.mrf.mxu3  ;;  %v8651_v23 = vadd.f32 %v8650_v2, %v8637_v32 }
 0x918   : > { %v8665_v56 = vadd.f32 %v8664_v10, %v8651_v23 }
 0x925   : > { %v8676_v13 = vpop.f32.mrf.mxu0 }
 0x926   : > { %v8677_v28 = vadd.f32 %v8676_v13, %v8663_v1  ;;  %v8690_v53 = vpop.f32.mrf.mxu1 }
 0x928   : > { %v8691_v49 = vadd.f32 %v8690_v53, %v8677_v28 }
 0x92d   : > { %v8704_v41 = vpop.f32.mrf.mxu2  ;;  %v8678_v7 = vpop.f32.mrf.mxu0 }
 0x92e   : > { %v8705_v25 = vadd.f32 %v8704_v41, %v8691_v49  ;;  %v8718_v60 = vpop.f32.mrf.mxu3  ;;  %v8679_v0 = vadd.f32 %v8678_v7, %v8665_v56  ;;  %v8692_v30 = vpop.f32.mrf.mxu1 }
 0x930   : > { %v8719_v5 = vadd.f32 %v8718_v60, %v8705_v25  ;;  %v8693_v37 = vadd.f32 %v8692_v30, %v8679_v0 }
 0x932   : > { %v8835_v33 = vmax.f32 %v8719_v5, 0.0 }
 0x934   : > { %8839 = vst [vmem:[%s15799_s9] sm:$0xff] %v8835_v33 }
 0x935   : > { %v8706_v46 = vpop.f32.mrf.mxu2 }
 0x936   : > { %v8707_v38 = vadd.f32 %v8706_v46, %v8693_v37  ;;  %v8720_v44 = vpop.f32.mrf.mxu3 }
 0x938   : > { %v8721_v22 = vadd.f32 %v8720_v44, %v8707_v38 }
 0x93a   : > { %v8837_v47 = vmax.f32 %v8721_v22, 0.0 }
 0x93c   : > { %8841 = vst [vmem:[%s15799_s9 + $0x10] sm:$0xff] %v8837_v47 }
 0x945   : > { %v8732_v16 = vpop.f32.mrf.mxu0 }
 0x946   : > { %v8746_v43 = vpop.f32.mrf.mxu1  ;;  %v8733_v58 = vadd.f32 %v8732_v16, %v7928_v18 }
 0x948   : > { %v8747_v19 = vadd.f32 %v8746_v43, %v8733_v58 }
 0x94d   : > { %v8760_v31 = vpop.f32.mrf.mxu2  ;;  %v8734_v8 = vpop.f32.mrf.mxu0 }
 0x94e   : > { %v8774_v39 = vpop.f32.mrf.mxu3  ;;  %v8748_v27 = vpop.f32.mrf.mxu1  ;;  %v8761_v34 = vadd.f32 %v8760_v31, %v8747_v19  ;;  %v8735_v59 = vadd.f32 %v8734_v8, %v7928_v18 }
 0x950   : > { %v8775_v4 = vadd.f32 %v8774_v39, %v8761_v34  ;;  %v8749_v9 = vadd.f32 %v8748_v27, %v8735_v59 }
 0x955   : > { %v8762_v55 = vpop.f32.mrf.mxu2 }
 0x956   : > { %v8776_v11 = vpop.f32.mrf.mxu3  ;;  %v8763_v21 = vadd.f32 %v8762_v55, %v8749_v9 }
 0x958   : > { %v8777_v57 = vadd.f32 %v8776_v11, %v8763_v21 }
 0x965   : > { %v8788_v12 = vpop.f32.mrf.mxu0 }
 0x966   : > { %v8789_v6 = vadd.f32 %v8788_v12, %v8775_v4  ;;  %v8802_v42 = vpop.f32.mrf.mxu1 }
 0x968   : > { %v8803_v26 = vadd.f32 %v8802_v42, %v8789_v6 }
 0x96d   : > { %v8816_v48 = vpop.f32.mrf.mxu2  ;;  %v8790_v52 = vpop.f32.mrf.mxu0 }
 0x96e   : > { %v8817_v3 = vadd.f32 %v8816_v48, %v8803_v26  ;;  %v8830_v45 = vpop.f32.mrf.mxu3  ;;  %v8791_v15 = vadd.f32 %v8790_v52, %v8777_v57  ;;  %v8804_v61 = vpop.f32.mrf.mxu1 }
 0x970   : > { %v8831_v14 = vadd.f32 %v8830_v45, %v8817_v3  ;;  %v8805_v29 = vadd.f32 %v8804_v61, %v8791_v15 }
 0x972   : > { %v8836_v54 = vmax.f32 %v8831_v14, 0.0 }
 0x974   : > { %8840 = vst [vmem:[%s15799_s9 + $0x8] sm:$0xff] %v8836_v54 }
 0x975   : > { %v8818_v62 = vpop.f32.mrf.mxu2 }
 0x976   : > { %v8819_v50 = vadd.f32 %v8818_v62, %v8805_v29  ;;  %v8832_v20 = vpop.f32.mrf.mxu3 }
 0x978   : > { %v8833_v17 = vadd.f32 %v8832_v20, %v8819_v50  ;;  %8850 = sbr.rel (!%p14098_p5) target bundleno = 2460 (0x99c), region = 100 }
 0x97a   : > { %v8838_v24 = vmax.f32 %v8833_v17, 0.0 }
 0x97c   : > { %8842 = vst [vmem:[%s15799_s9 + $0x18] sm:$0xff] %v8838_v24 }
 0x97d   : > { %s21570_s29 = smov (!%p8856_p2, %s8855_s29), 2 }
 0x97e   : > { %s21455_s8 = sshll.u32 %s21570_s29, 3 }
 0x97f   : > { %s8859_s7 = ssub.s32 32, %s21455_s8 }
 0x980   : > { %s8860_s24 = sshll.u32 %s8859_s7, 4 }
 0x981   : > { %8861 = vsyncadd %s8844_s25, %s8860_s24  ;;  %p12799_p5 = scmp.ne.s32.totalorder %s21455_s8, 0  ;;  %s13742_s28 = sshll.u32 %s13982_s21, 4 }
 0x982   : > { %s8866_s15 = scalar_lea.hbm %s21521_s5, %s13742_s28  ;;  %s8869_s10 = sshll.u32 %s15799_s9, 4  ;;  %s21466_s10 = int_to_ptr.vmem [resolvable:$true] %s8869_s10 }
 0x983   : > { %s8871_s14 = sshll.u32 %s8866_s15, 4  ;;  %s12802_s26 = sshll.u32 %s21570_s29, 7  ;;  %s21468_s14 = int_to_ptr.hbm [resolvable:$true] %s8871_s14 }
 0x984   : > { %s13869_s27 = sshra.s32 %s21466_s10, 4  ;;  %s13871_s13 = sshrl.u32 %s12802_s26, 4  ;;  %s13870_s27 = int_to_ptr.vmem [resolvable:$true] %s13869_s27 }
 0x985   : > { %s13876_s17 = scalar_lea.vmem %s13870_s27, %s13871_s13  ;;  %s14026_s21 = smov [#allocation4]  }
 0x986   : > { %p13877_p3 = scmp.ne.s32.totalorder %s13870_s27, %s13876_s17  ;;  %s13880_s12 = scalar_lea.vmem %s14026_s21, 64 }
 0x987   : > { %p13882_p7 = scmp.lt.s32.totalorder %s13880_s12, %s13876_s17 }
 0x988   : > { %p13878_p4 = pnand %p13877_p3, %p12799_p5 }
 0x98a   : > { %p13879_p6 = pneg %p13878_p4 }
 0x98c   : > { %p13884_p8 = pnand %p13882_p7, %p13879_p6 }
 0x98e   : > { %13887 = shalt.err (!%p13884_p8)
}
 0x98f   : > { %s13888_s9 = sshra.s32 %s21468_s14, 4  ;;  %s13899_s11 = scalar_lea.hbm %s21521_s5, 104  ;;  %s13889_s9 = int_to_ptr.hbm [resolvable:$true] %s13888_s9 }
 0x990   : > { %s13895_s7 = scalar_lea.hbm %s13889_s9, %s13871_s13  ;;  %p13900_p13 = scmp.lt.s32.totalorder %s13889_s9, %s21521_s5 }
 0x991   : > { %p13896_p10 = scmp.ne.s32.totalorder %s13889_s9, %s13895_s7  ;;  %p13901_p0 = scmp.lt.s32.totalorder %s13899_s11, %s13895_s7 }
 0x993   : > { %p13897_p11 = pnand %p13896_p10, %p12799_p5  ;;  %p13902_p1 = por %p13901_p0, %p13900_p13 }
 0x995   : > { %p13898_p12 = pneg %p13897_p11 }
 0x997   : > { %p13903_p2 = pnand %p13902_p1, %p13898_p12 }
 0x999   : > { %13906 = shalt.err (!%p13903_p2)
}
 0x99a   : > { %s14027_s27 = smov 256   ;;  %s14028_s13 = smov 1664  }
 0x99b   : > { %8877 = dma.vmem_to_hbm [thread:$0]  (%p12799_p5), %s21466_s10, %s12802_s26, %s21468_s14, %s8844_s25, %s14027_s27, %s14028_s13, %s21455_s8  }
 0x99c PF: > { %p13748_p3 = scmp.ge.s32.totalorder %s13990_s23, 2  ;;  %s8886_s17 = sand.u32 1, %s13970_s18  }
 0x99d   : > { %s8887_s21 = scalar_lea.sflag [#allocation5], %s8886_s17 }
 0x99e   : > { %p13745_p4 = pnand %p13748_p3, %p14109_p9 }
 0x9a0   : > { %p13746_p6 = pneg %p13745_p4 }
 0x9a2   : > { %13965 = dma.done.wait (%p13746_p6), %s8887_s21, 512  }
 0x9a3   : > { %13967 = vsyncadd (%p13746_p6), %s8887_s21, 4294966784  ;;  %s18_s23 = sadd.s32 1, %s13990_s23   ;;  %s21555_s16 = sld [smem:[#allocation7_spill]] }
 0x9a4   : > { %p15_p7 = scmp.ge.s32.totalorder %s18_s23, 9   ;;  %s21556_s18 = smov %s13974_s19 }
 0x9a5   : > { %s21557_s19 = smov %s13978_s20  ;;  %s21558_s20 = smov %s14107_s30 }
 0x9a6   : > { %s21559_s21 = smov %s13986_s22  ;;  %17 = sbr.rel (!%p15_p7) target bundleno = 6 (0x6), region = 174 }
 0x9a9   : > { %s21560_s22 = smov %s21555_s16 }
 0x9ab   :  { %8893 = vsyncpa [#allocation5], 1 }
 0x9ac   :  { %8895 = vsyncpa [#allocation5 + $0x1], 1 }

</bundles_post_ra>
